<compile_context>
chip_gen: v7x
topology: tpu7x:2x2x1
jax: 0.10.0
libtpu: 0.0.40
codegen_flags: <defaults>
</compile_context>

<pallas_src>
import functools

import jax
import jax.numpy as jnp
from jax import lax
from jax.experimental import pallas as pl
from jax.experimental.pallas import tpu as pltpu


_SUBLANE = 8
_TILE_M_MAX = 128                 # row-tile cap; working set stays far below VMEM limits
_VMEM_LIMIT = 32 * 1024 * 1024    # explicit scoped-VMEM ceiling; safe on v7x (64 MiB phys)
_BN_EPS = 1e-5


def _pick_tile_m(m):
    """Largest row tile <= _TILE_M_MAX that evenly divides m (multiple of 8 sublanes)."""
    if m <= _TILE_M_MAX:
        return m
    for t in range(_TILE_M_MAX, 0, -_SUBLANE):
        if m % t == 0:
            return t
    return m


def _cparams(sem):
    return pltpu.CompilerParams(dimension_semantics=sem,
                                vmem_limit_bytes=_VMEM_LIMIT)


# ---------------------------------------------------------------------------
# Pallas kernels
# ---------------------------------------------------------------------------
def _matmul_bias_kernel(x_ref, w_ref, b_ref, o_ref):
    # o = x @ w + b ; bf16 operands, f32 accumulation on the MXU.
    y = jnp.dot(x_ref[...], w_ref[...], preferred_element_type=jnp.float32)
    o_ref[...] = (y + b_ref[...]).astype(o_ref.dtype)


def _matmul_bias_stats_kernel(x_ref, w_ref, b_ref, o_ref, stats_ref):
    # o = x @ w + b ; additionally accumulate per-column [sum; sum_sq] across the
    # M-tile grid axis (cross-tile BatchNorm statistics).
    y = jnp.dot(x_ref[...], w_ref[...], preferred_element_type=jnp.float32)
    y = y + b_ref[...]
    o_ref[...] = y.astype(o_ref.dtype)

    @pl.when(pl.program_id(0) == 0)
    def _init():
        stats_ref[...] = jnp.zeros_like(stats_ref)

    stats_ref[...] += jnp.concatenate(
        [jnp.sum(y, axis=0, keepdims=True),
         jnp.sum(y * y, axis=0, keepdims=True)], axis=0)


def _col_stats_kernel(x_ref, stats_ref):
    # Per-column [sum; sum_sq] accumulated across the M-tile grid axis.
    @pl.when(pl.program_id(0) == 0)
    def _init():
        stats_ref[...] = jnp.zeros_like(stats_ref)

    x = x_ref[...].astype(jnp.float32)
    stats_ref[...] += jnp.concatenate(
        [jnp.sum(x, axis=0, keepdims=True),
         jnp.sum(x * x, axis=0, keepdims=True)], axis=0)


def _scale_shift_act_kernel(x_ref, scale_ref, shift_ref, o_ref, *, act):
    # o = act(x * scale + shift); all epilogue math in f32 (VPU/EUP).
    y = x_ref[...].astype(jnp.float32) * scale_ref[...] + shift_ref[...]
    if act == "relu":
        y = jnp.maximum(y, 0.0)
    elif act == "sigmoid":
        y = 1.0 / (1.0 + jnp.exp(-y))
    o_ref[...] = y.astype(o_ref.dtype)


# ---------------------------------------------------------------------------
# pallas_call wrappers
# ---------------------------------------------------------------------------
def matmul_bias(x, w, b, *, with_stats=False, out_dtype=jnp.float32):
    """o = x @ w + b, tiled over rows (M).  Optionally also returns per-column
    [sum; sum_of_squares] accumulated across row tiles (for BatchNorm)."""
    m, k = x.shape
    k2, c = w.shape
    assert k == k2, (x.shape, w.shape)
    tm = _pick_tile_m(m)
    grid = (m // tm,)

    xb = x.astype(jnp.bfloat16)             # MXU operands in bf16
    wb = w.astype(jnp.bfloat16)
    b2 = b.reshape(1, c).astype(jnp.float32)

    in_specs = [
        pl.BlockSpec((tm, k), lambda i: (i, 0)),     # streamed row tiles
        pl.BlockSpec((k, c), lambda i: (0, 0)),      # full-K weights, resident
        pl.BlockSpec((1, c), lambda i: (0, 0)),      # bias, loaded once
    ]
    flops = 2 * m * k * c
    bytes_accessed = xb.size * 2 + wb.size * 2 + 4 * c + m * c * 4

    if with_stats:
        out_shape = (jax.ShapeDtypeStruct((m, c), out_dtype),
                     jax.ShapeDtypeStruct((2, c), jnp.float32))
        out_specs = (pl.BlockSpec((tm, c), lambda i: (i, 0)),
                     pl.BlockSpec((2, c), lambda i: (0, 0)))   # cross-tile accumulator
        kernel = _matmul_bias_stats_kernel
        sem = ("arbitrary",)       # accumulator carries a cross-tile dependency
        bytes_accessed += 2 * c * 4
    else:
        out_shape = jax.ShapeDtypeStruct((m, c), out_dtype)
        out_specs = pl.BlockSpec((tm, c), lambda i: (i, 0))
        kernel = _matmul_bias_kernel
        sem = ("parallel",)        # independent row tiles (megacore on v7x)

    return pl.pallas_call(
        kernel,
        out_shape=out_shape,
        grid=grid,
        in_specs=in_specs,
        out_specs=out_specs,
        compiler_params=_cparams(sem),
        cost_estimate=pl.CostEstimate(flops=flops, transcendentals=0,
                                      bytes_accessed=bytes_accessed),
    )(xb, wb, b2)


def col_stats(x):
    """Per-column [sum; sum_of_squares] of a 2-D array, tiled over rows."""
    m, c = x.shape
    tm = _pick_tile_m(m)
    return pl.pallas_call(
        _col_stats_kernel,
        out_shape=jax.ShapeDtypeStruct((2, c), jnp.float32),
        grid=(m // tm,),
        in_specs=[pl.BlockSpec((tm, c), lambda i: (i, 0))],
        out_specs=pl.BlockSpec((2, c), lambda i: (0, 0)),
        compiler_params=_cparams(("arbitrary",)),
        cost_estimate=pl.CostEstimate(flops=3 * m * c, transcendentals=0,
                                      bytes_accessed=x.size * x.dtype.itemsize + 2 * c * 4),
    )(x)


def scale_shift_act(x, scale, shift, *, act, out_dtype=jnp.float32):
    """o = act(x * scale + shift), tiled over rows; scale/shift are per-column."""
    m, c = x.shape
    tm = _pick_tile_m(m)
    kernel = functools.partial(_scale_shift_act_kernel, act=act)
    trans = m * c if act == "sigmoid" else 0
    return pl.pallas_call(
        kernel,
        out_shape=jax.ShapeDtypeStruct((m, c), out_dtype),
        grid=(m // tm,),
        in_specs=[pl.BlockSpec((tm, c), lambda i: (i, 0)),
                  pl.BlockSpec((1, c), lambda i: (0, 0)),     # loaded once
                  pl.BlockSpec((1, c), lambda i: (0, 0))],    # loaded once
        out_specs=pl.BlockSpec((tm, c), lambda i: (i, 0)),
        compiler_params=_cparams(("parallel",)),
        cost_estimate=pl.CostEstimate(flops=2 * m * c, transcendentals=trans,
                                      bytes_accessed=x.size * x.dtype.itemsize + m * c * 4),
    )(x, scale.reshape(1, c).astype(jnp.float32), shift.reshape(1, c).astype(jnp.float32))


# ---------------------------------------------------------------------------
# Glue
# ---------------------------------------------------------------------------
def _bn_scale_shift(stats, count, gamma, beta, eps=_BN_EPS):
    """Fold training-mode BatchNorm (biased variance) into per-channel scale/shift."""
    mean = stats[0] / count
    var = jnp.maximum(stats[1] / count - mean * mean, 0.0)
    scale = gamma * lax.rsqrt(var + eps)
    shift = beta - mean * scale
    return scale, shift


def _overlap_add_s2k4p1(p, n, hi, wi, cout):
    """ConvTranspose2d(k=4, s=2, p=1) overlap-add from the per-pixel patch matmul.

    p: [n*hi*wi, 16*cout] with columns ordered (ky, kx, co).
    Returns NHWC output [n, 2*hi, 2*wi, cout]."""
    p = p.reshape(n, hi, wi, 2, 2, 2, 2, cout)         # (n, i, j, qy, ry, qx, rx, c); ky=2qy+ry
    acc = jnp.zeros((n, hi + 1, wi + 1, 2, 2, cout), p.dtype)
    for qy in range(2):
        for qx in range(2):
            contrib = p[:, :, :, qy, :, qx, :, :]      # (n, i, j, ry, rx, c)
            contrib = jnp.pad(contrib,
                              ((0, 0), (qy, 1 - qy), (qx, 1 - qx), (0, 0), (0, 0), (0, 0)))
            acc = acc + contrib
    # acc[n, m, l, ry, rx, c] -> out_pad[n, 2m+ry, 2l+rx, c]; crop the p=1 border.
    out_pad = acc.transpose(0, 1, 3, 2, 4, 5).reshape(n, 2 * (hi + 1), 2 * (wi + 1), cout)
    return out_pad[:, 1:-1, 1:-1, :]


# ---------------------------------------------------------------------------
# Parameters
# ---------------------------------------------------------------------------
def init_params(key, z_dim, height, width, pix):
    """Synthetic init mimicking utils.initialize_weights (weights ~ N(0, 0.02))."""
    h4, w4 = height // 4, width // 4
    c2 = 128 * h4 * w4
    ks = jax.random.split(key, 12)
    nrm = lambda k, shape, s=0.02: s * jax.random.normal(k, shape, jnp.float32)
    return {
        "fc1_w": nrm(ks[0], (1024, z_dim)),         # torch nn.Linear: [out, in]
        "fc1_b": nrm(ks[1], (1024,)),
        "bn1_g": 1.0 + nrm(ks[2], (1024,)),
        "bn1_b": nrm(ks[3], (1024,)),
        "fc2_w": nrm(ks[4], (c2, 1024)),
        "fc2_b": nrm(ks[5], (c2,)),
        "bn2_g": 1.0 + nrm(ks[6], (c2,)),
        "bn2_b": nrm(ks[7], (c2,)),
        "dc1_w": nrm(ks[8], (128, 64, 4, 4)),       # torch ConvTranspose2d: [Cin, Cout, kh, kw]
        "dc1_b": nrm(ks[9], (64,)),
        "bn3_g": 1.0 + nrm(ks[10], (64,)),
        "bn3_b": jnp.zeros((64,), jnp.float32),
        "dc2_w": nrm(ks[11], (64, pix, 4, 4)),
        "dc2_b": jnp.full((pix,), 0.1, jnp.float32),
    }


def prepare_params(p, height, width):
    """Layout plumbing (done once, wrapper side): transpose Linear weights to
    [in, out], permute fc2 output features from (c, h, w) to (h, w, c) so the NHWC
    pixel reshape is free, and flatten deconv weights to [Cin, kh*kw*Cout]."""
    h4, w4 = height // 4, width // 4
    c2 = 128 * h4 * w4
    perm = jnp.arange(c2).reshape(128, h4, w4).transpose(1, 2, 0).reshape(-1)
    cin2, pix = p["dc2_w"].shape[0], p["dc2_w"].shape[1]
    return {
        "fc1_w": p["fc1_w"].T,
        "fc1_b": p["fc1_b"],
        "bn1_g": p["bn1_g"], "bn1_b": p["bn1_b"],
        "fc2_w": p["fc2_w"].T[:, perm],
        "fc2_b": p["fc2_b"][perm],
        "bn2_g": p["bn2_g"][perm], "bn2_b": p["bn2_b"][perm],
        # [Cin, Cout, kh, kw] -> [Cin, kh*kw*Cout], columns ordered (ky, kx, co)
        "dc1_w": p["dc1_w"].transpose(0, 2, 3, 1).reshape(128, 16 * 64),
        # dc1_b is intentionally absent: a per-channel bias cancels exactly inside
        # the training-mode BatchNorm that follows.
        "bn3_g": p["bn3_g"], "bn3_b": p["bn3_b"],
        "dc2_w": p["dc2_w"].transpose(0, 2, 3, 1).reshape(cin2, 16 * pix),
        "dc2_b": p["dc2_b"],
    }


# ---------------------------------------------------------------------------
# Generator forward (Pallas path)
# ---------------------------------------------------------------------------
def generator_forward(z, params, *, height, width):
    n = z.shape[0]
    h4, w4 = height // 4, width // 4
    h2s, w2s = 2 * h4, 2 * w4
    pix = params["dc2_w"].shape[1] // 16

    # ---- fc1: Linear(z_dim, 1024) + BatchNorm1d + ReLU -------------------------
    y1, s1 = matmul_bias(z, params["fc1_w"], params["fc1_b"], with_stats=True)
    sc1, sh1 = _bn_scale_shift(s1, n, params["bn1_g"], params["bn1_b"])
    h1 = scale_shift_act(y1, sc1, sh1, act="relu")

    # ---- fc2: Linear(1024, 128*h4*w4) + BatchNorm1d + ReLU ---------------------
    y2, s2 = matmul_bias(h1, params["fc2_w"], params["fc2_b"], with_stats=True)
    sc2, sh2 = _bn_scale_shift(s2, n, params["bn2_g"], params["bn2_b"])
    h2 = scale_shift_act(y2, sc2, sh2, act="relu")
    x_pix = h2.reshape(n * h4 * w4, 128)                 # free reshape: columns are (h, w, c)

    # ---- deconv1: ConvTranspose2d(128, 64, 4, 2, 1) + BatchNorm2d + ReLU -------
    p1 = matmul_bias(x_pix, params["dc1_w"],
                     jnp.zeros((params["dc1_w"].shape[1],), jnp.float32))
    y3 = _overlap_add_s2k4p1(p1, n, h4, w4, 64)          # [N, 8, 8, 64] NHWC
    y3v = y3.reshape(n * h2s, w2s * 64)                  # lane-dense [N*H, W*C] view
    s3 = col_stats(y3v).reshape(2, w2s, 64).sum(axis=1)  # per-(w,c) -> per-channel
    sc3, sh3 = _bn_scale_shift(s3, n * h2s * w2s, params["bn3_g"], params["bn3_b"])
    h3 = scale_shift_act(y3v, jnp.tile(sc3, w2s), jnp.tile(sh3, w2s), act="relu")

    # ---- deconv2: ConvTranspose2d(64, pix, 4, 2, 1) + bias + Sigmoid -----------
    x_pix2 = h3.reshape(n * h2s * w2s, 64)
    p2 = matmul_bias(x_pix2, params["dc2_w"],
                     jnp.zeros((params["dc2_w"].shape[1],), jnp.float32))
    y4 = _overlap_add_s2k4p1(p2, n, h2s, w2s, pix)       # [N, H, W, pix] NHWC
    y4v = y4.reshape(n, height * width * pix)            # lane-dense [N, H*W*pix]
    out = scale_shift_act(y4v,
                          jnp.ones((height * width * pix,), jnp.float32),
                          jnp.tile(params["dc2_b"], height * width),
                          act="sigmoid")
    return out.reshape(n, height, width, pix).transpose(0, 3, 1, 2)   # -> NCHW


# ---------------------------------------------------------------------------
# Pure-JAX reference (lax conv / dot) for correctness checking
# ---------------------------------------------------------------------------
def generator_reference(z, p, *, height, width, matmul_dtype=jnp.float32):
    def dot(a, b):
        return jnp.dot(a.astype(matmul_dtype), b.astype(matmul_dtype),
                       preferred_element_type=jnp.float32)

    def bn(y, gamma, beta, axes):
        mean = jnp.mean(y, axis=axes, keepdims=True)
        var = jnp.mean((y - mean) ** 2, axis=axes, keepdims=True)
        return gamma * ((y - mean) * lax.rsqrt(var + _BN_EPS)) + beta

    def deconv(x, w, b):
        kh = w.shape[2]
        wc = jnp.flip(w, (2, 3)).transpose(1, 0, 2, 3)   # -> [Cout, Cin, kh, kw]
        dn = lax.conv_dimension_numbers(x.shape, wc.shape, ("NCHW", "OIHW", "NCHW"))
        pad = kh - 1 - 1
        out = lax.conv_general_dilated(
            x.astype(matmul_dtype), wc.astype(matmul_dtype), (1, 1),
            [(pad, pad), (pad, pad)], lhs_dilation=(2, 2),
            dimension_numbers=dn, preferred_element_type=jnp.float32)
        return out + b.reshape(1, -1, 1, 1)

    n = z.shape[0]
    h4, w4 = height // 4, width // 4
    x = dot(z, p["fc1_w"].T) + p["fc1_b"]
    x = jax.nn.relu(bn(x, p["bn1_g"], p["bn1_b"], axes=(0,)))
    x = dot(x, p["fc2_w"].T) + p["fc2_b"]
    x = jax.nn.relu(bn(x, p["bn2_g"], p["bn2_b"], axes=(0,)))
    x = x.reshape(n, 128, h4, w4)
    x = deconv(x, p["dc1_w"], p["dc1_b"])
    x = jax.nn.relu(bn(x, p["bn3_g"].reshape(1, -1, 1, 1),
                       p["bn3_b"].reshape(1, -1, 1, 1), axes=(0, 2, 3)))
    x = deconv(x, p["dc2_w"], p["dc2_b"])
    return jax.nn.sigmoid(x)


if __name__ == "__main__":
    key = jax.random.PRNGKey(0)
    kz, kp = jax.random.split(key)

    # Small MNIST-like Generator: batch 32 (big enough to exercise multi-tile grids
    # and the cross-tile BatchNorm accumulator), z_dim 64, 16x16 output, 1 channel.
    batch, z_dim, height, width, pix = 32, 64, 16, 16, 1

    z = jax.random.normal(kz, (batch, z_dim), jnp.float32)
    torch_params = init_params(kp, z_dim, height, width, pix)
    kernel_params = prepare_params(torch_params, height, width)

    fwd = jax.jit(functools.partial(generator_forward, height=height, width=width))
    out = jax.block_until_ready(fwd(z, kernel_params))
    assert out.shape == (batch, pix, height, width), out.shape

    # Reference with matched matmul operand precision (bf16 operands, f32 accumulate).
    ref = jax.block_until_ready(
        generator_reference(z, torch_params, height=height, width=width,
                            matmul_dtype=jnp.bfloat16))
    err = float(jnp.max(jnp.abs(out - ref)))
    assert jnp.allclose(out, ref, rtol=5e-3, atol=5e-3), f"max abs diff vs bf16 ref = {err}"

    # Loose sanity check against the all-f32 reference (bf16 operand quantisation only).
    ref32 = jax.block_until_ready(
        generator_reference(z, torch_params, height=height, width=width,
                            matmul_dtype=jnp.float32))
    err32 = float(jnp.max(jnp.abs(out - ref32)))
    assert jnp.allclose(out, ref32, rtol=2e-2, atol=2e-2), f"max abs diff vs f32 ref = {err32}"

    print("KERNEL_OK")
</pallas_src>

<mosaic_0001>
module attributes {stable_mosaic.version = 11 : i64} {
  func.func @_matmul_bias_stats_kernel(%arg0: i32, %arg1: memref<32x64xbf16, #tpu.memory_space<vmem>>, %arg2: memref<64x1024xbf16, #tpu.memory_space<vmem>>, %arg3: memref<1x1024xf32, #tpu.memory_space<vmem>>, %arg4: memref<32x1024xf32, #tpu.memory_space<vmem>>, %arg5: memref<2x1024xf32, #tpu.memory_space<vmem>>) attributes {dimension_semantics = [#tpu.dimension_semantics<arbitrary>], iteration_bounds = array<i64: 1>, scalar_prefetch = 0 : i64, scratch_operands = 0 : i64, tpu.core_type = #tpu.core_type<tc>, window_params = [{transform_indices = @transform_0, window_bounds = array<i64: 32, 64>}, {pipeline_mode = #tpu.pipeline_mode<synchronous>, transform_indices = @transform_1, window_bounds = array<i64: 64, 1024>}, {pipeline_mode = #tpu.pipeline_mode<synchronous>, transform_indices = @transform_2, window_bounds = array<i64: 1, 1024>}, {transform_indices = @transform_3, window_bounds = array<i64: 32, 1024>}, {pipeline_mode = #tpu.pipeline_mode<synchronous>, transform_indices = @transform_4, window_bounds = array<i64: 2, 1024>}]} {
    %c0 = arith.constant 0 : index
    %c0_0 = arith.constant 0 : index
    %0 = vector.load %arg1[%c0, %c0_0] : memref<32x64xbf16, #tpu.memory_space<vmem>>, vector<32x64xbf16>
    %c0_1 = arith.constant 0 : index
    %c0_2 = arith.constant 0 : index
    %1 = vector.load %arg2[%c0_1, %c0_2] : memref<64x1024xbf16, #tpu.memory_space<vmem>>, vector<64x1024xbf16>
    %cst = arith.constant dense<0.000000e+00> : vector<32x1024xf32>
    %2 = tpu.matmul %0, %1, %cst {dimension_numbers = #tpu.dot_dimension_numbers<[1], [0], [0], [1], [0, 0, 1, 1], [], []>} : vector<32x64xbf16>, vector<64x1024xbf16>, vector<32x1024xf32> -> vector<32x1024xf32>
    %c0_3 = arith.constant 0 : index
    %c0_4 = arith.constant 0 : index
    %3 = vector.load %arg3[%c0_3, %c0_4] : memref<1x1024xf32, #tpu.memory_space<vmem>>, vector<1x1024xf32>
    %4 = vector.broadcast %3 : vector<1x1024xf32> to vector<32x1024xf32>
    %5 = arith.addf %2, %4 : vector<32x1024xf32>
    %c0_5 = arith.constant 0 : index
    %c0_6 = arith.constant 0 : index
    %6 = vector.load %arg4[%c0_5, %c0_6] : memref<32x1024xf32, #tpu.memory_space<vmem>>, vector<32x1024xf32>
    tpu.vector_store %arg4[%c0_5, %c0_6], %5 {strides = array<i32>} : memref<32x1024xf32, #tpu.memory_space<vmem>>, vector<32x1024xf32>,
    %c0_i32 = arith.constant 0 : i32
    %7 = arith.cmpi eq, %arg0, %c0_i32 : i32
    %8 = arith.extui %7 : i1 to i32
    %c0_i32_7 = arith.constant 0 : i32
    %9 = arith.cmpi ne, %8, %c0_i32_7 : i32
    scf.if %9 {
      %cst_14 = arith.constant 0.000000e+00 : f32
      %19 = vector.broadcast %cst_14 : f32 to vector<2x1024xf32>
      %c0_15 = arith.constant 0 : index
      %c0_16 = arith.constant 0 : index
      %20 = vector.load %arg5[%c0_15, %c0_16] : memref<2x1024xf32, #tpu.memory_space<vmem>>, vector<2x1024xf32>
      tpu.vector_store %arg5[%c0_15, %c0_16], %19 {strides = array<i32>} : memref<2x1024xf32, #tpu.memory_space<vmem>>, vector<2x1024xf32>,
    } else {
    }
    %c0_8 = arith.constant 0 : index
    %c0_9 = arith.constant 0 : index
    %10 = vector.load %arg5[%c0_8, %c0_9] : memref<2x1024xf32, #tpu.memory_space<vmem>>, vector<2x1024xf32>
    %cst_10 = arith.constant dense<0.000000e+00> : vector<1024xf32>
    %11 = vector.multi_reduction <add>, %5, %cst_10 [0] : vector<32x1024xf32> to vector<1024xf32>
    %12 = vector.shape_cast %11 : vector<1024xf32> to vector<1x1024xf32>
    %13 = arith.mulf %5, %5 : vector<32x1024xf32>
    %cst_11 = arith.constant dense<0.000000e+00> : vector<1024xf32>
    %14 = vector.multi_reduction <add>, %13, %cst_11 [0] : vector<32x1024xf32> to vector<1024xf32>
    %15 = vector.shape_cast %14 : vector<1024xf32> to vector<1x1024xf32>
    %16 = tpu.concatenate %12, %15 in 0 : vector<1x1024xf32>, vector<1x1024xf32> -> vector<2x1024xf32>
    %17 = arith.addf %10, %16 : vector<2x1024xf32>
    %c0_12 = arith.constant 0 : index
    %c0_13 = arith.constant 0 : index
    %18 = vector.load %arg5[%c0_12, %c0_13] : memref<2x1024xf32, #tpu.memory_space<vmem>>, vector<2x1024xf32>
    tpu.vector_store %arg5[%c0_12, %c0_13], %17 {strides = array<i32>} : memref<2x1024xf32, #tpu.memory_space<vmem>>, vector<2x1024xf32>,
    return
  }
  func.func @transform_0(%arg0: i32) -> (i32, i32) {
    %c0_i32 = arith.constant 0 : i32
    %c0_i32_0 = arith.constant 0 : i32
    return %arg0, %c0_i32 : i32, i32
  }
  func.func @transform_1(%arg0: i32) -> (i32, i32) {
    %c0_i32 = arith.constant 0 : i32
    %c0_i32_0 = arith.constant 0 : i32
    %c0_i32_1 = arith.constant 0 : i32
    return %c0_i32, %c0_i32_0 : i32, i32
  }
  func.func @transform_2(%arg0: i32) -> (i32, i32) {
    %c0_i32 = arith.constant 0 : i32
    %c0_i32_0 = arith.constant 0 : i32
    %c0_i32_1 = arith.constant 0 : i32
    return %c0_i32, %c0_i32_0 : i32, i32
  }
  func.func @transform_3(%arg0: i32) -> (i32, i32) {
    %c0_i32 = arith.constant 0 : i32
    %c0_i32_0 = arith.constant 0 : i32
    return %arg0, %c0_i32 : i32, i32
  }
  func.func @transform_4(%arg0: i32) -> (i32, i32) {
    %c0_i32 = arith.constant 0 : i32
    %c0_i32_0 = arith.constant 0 : i32
    %c0_i32_1 = arith.constant 0 : i32
    return %c0_i32, %c0_i32_0 : i32, i32
  }
}

module attributes {stable_mosaic.version = 11 : i64} {
  func.func @_scale_shift_act_kernel(%arg0: i32, %arg1: memref<32x1024xf32, #tpu.memory_space<vmem>>, %arg2: memref<1x1024xf32, #tpu.memory_space<vmem>>, %arg3: memref<1x1024xf32, #tpu.memory_space<vmem>>, %arg4: memref<32x1024xf32, #tpu.memory_space<vmem>>) attributes {dimension_semantics = [#tpu.dimension_semantics<parallel>], iteration_bounds = array<i64: 1>, scalar_prefetch = 0 : i64, scratch_operands = 0 : i64, tpu.core_type = #tpu.core_type<tc>, window_params = [{transform_indices = @transform_0, window_bounds = array<i64: 32, 1024>}, {pipeline_mode = #tpu.pipeline_mode<synchronous>, transform_indices = @transform_1, window_bounds = array<i64: 1, 1024>}, {pipeline_mode = #tpu.pipeline_mode<synchronous>, transform_indices = @transform_2, window_bounds = array<i64: 1, 1024>}, {transform_indices = @transform_3, window_bounds = array<i64: 32, 1024>}]} {
    %c0 = arith.constant 0 : index
    %c0_0 = arith.constant 0 : index
    %0 = vector.load %arg1[%c0, %c0_0] : memref<32x1024xf32, #tpu.memory_space<vmem>>, vector<32x1024xf32>
    %c0_1 = arith.constant 0 : index
    %c0_2 = arith.constant 0 : index
    %1 = vector.load %arg2[%c0_1, %c0_2] : memref<1x1024xf32, #tpu.memory_space<vmem>>, vector<1x1024xf32>
    %2 = vector.broadcast %1 : vector<1x1024xf32> to vector<32x1024xf32>
    %3 = arith.mulf %0, %2 : vector<32x1024xf32>
    %c0_3 = arith.constant 0 : index
    %c0_4 = arith.constant 0 : index
    %4 = vector.load %arg3[%c0_3, %c0_4] : memref<1x1024xf32, #tpu.memory_space<vmem>>, vector<1x1024xf32>
    %5 = vector.broadcast %4 : vector<1x1024xf32> to vector<32x1024xf32>
    %6 = arith.addf %3, %5 : vector<32x1024xf32>
    %cst = arith.constant 0.000000e+00 : f32
    %7 = vector.broadcast %cst : f32 to vector<32x1024xf32>
    %8 = arith.maximumf %6, %7 : vector<32x1024xf32>
    %c0_5 = arith.constant 0 : index
    %c0_6 = arith.constant 0 : index
    %9 = vector.load %arg4[%c0_5, %c0_6] : memref<32x1024xf32, #tpu.memory_space<vmem>>, vector<32x1024xf32>
    tpu.vector_store %arg4[%c0_5, %c0_6], %8 {strides = array<i32>} : memref<32x1024xf32, #tpu.memory_space<vmem>>, vector<32x1024xf32>,
    return
  }
  func.func @transform_0(%arg0: i32) -> (i32, i32) {
    %c0_i32 = arith.constant 0 : i32
    %c0_i32_0 = arith.constant 0 : i32
    return %arg0, %c0_i32 : i32, i32
  }
  func.func @transform_1(%arg0: i32) -> (i32, i32) {
    %c0_i32 = arith.constant 0 : i32
    %c0_i32_0 = arith.constant 0 : i32
    %c0_i32_1 = arith.constant 0 : i32
    return %c0_i32, %c0_i32_0 : i32, i32
  }
  func.func @transform_2(%arg0: i32) -> (i32, i32) {
    %c0_i32 = arith.constant 0 : i32
    %c0_i32_0 = arith.constant 0 : i32
    %c0_i32_1 = arith.constant 0 : i32
    return %c0_i32, %c0_i32_0 : i32, i32
  }
  func.func @transform_3(%arg0: i32) -> (i32, i32) {
    %c0_i32 = arith.constant 0 : i32
    %c0_i32_0 = arith.constant 0 : i32
    return %arg0, %c0_i32 : i32, i32
  }
}

module attributes {stable_mosaic.version = 11 : i64} {
  func.func @_matmul_bias_stats_kernel(%arg0: i32, %arg1: memref<32x1024xbf16, #tpu.memory_space<vmem>>, %arg2: memref<1024x2048xbf16, #tpu.memory_space<vmem>>, %arg3: memref<1x2048xf32, #tpu.memory_space<vmem>>, %arg4: memref<32x2048xf32, #tpu.memory_space<vmem>>, %arg5: memref<2x2048xf32, #tpu.memory_space<vmem>>) attributes {dimension_semantics = [#tpu.dimension_semantics<arbitrary>], iteration_bounds = array<i64: 1>, scalar_prefetch = 0 : i64, scratch_operands = 0 : i64, tpu.core_type = #tpu.core_type<tc>, window_params = [{transform_indices = @transform_0, window_bounds = array<i64: 32, 1024>}, {pipeline_mode = #tpu.pipeline_mode<synchronous>, transform_indices = @transform_1, window_bounds = array<i64: 1024, 2048>}, {pipeline_mode = #tpu.pipeline_mode<synchronous>, transform_indices = @transform_2, window_bounds = array<i64: 1, 2048>}, {transform_indices = @transform_3, window_bounds = array<i64: 32, 2048>}, {pipeline_mode = #tpu.pipeline_mode<synchronous>, transform_indices = @transform_4, window_bounds = array<i64: 2, 2048>}]} {
    %c0 = arith.constant 0 : index
    %c0_0 = arith.constant 0 : index
    %0 = vector.load %arg1[%c0, %c0_0] : memref<32x1024xbf16, #tpu.memory_space<vmem>>, vector<32x1024xbf16>
    %c0_1 = arith.constant 0 : index
    %c0_2 = arith.constant 0 : index
    %1 = vector.load %arg2[%c0_1, %c0_2] : memref<1024x2048xbf16, #tpu.memory_space<vmem>>, vector<1024x2048xbf16>
    %cst = arith.constant dense<0.000000e+00> : vector<32x2048xf32>
    %2 = tpu.matmul %0, %1, %cst {dimension_numbers = #tpu.dot_dimension_numbers<[1], [0], [0], [1], [0, 0, 1, 1], [], []>} : vector<32x1024xbf16>, vector<1024x2048xbf16>, vector<32x2048xf32> -> vector<32x2048xf32>
    %c0_3 = arith.constant 0 : index
    %c0_4 = arith.constant 0 : index
    %3 = vector.load %arg3[%c0_3, %c0_4] : memref<1x2048xf32, #tpu.memory_space<vmem>>, vector<1x2048xf32>
    %4 = vector.broadcast %3 : vector<1x2048xf32> to vector<32x2048xf32>
    %5 = arith.addf %2, %4 : vector<32x2048xf32>
    %c0_5 = arith.constant 0 : index
    %c0_6 = arith.constant 0 : index
    %6 = vector.load %arg4[%c0_5, %c0_6] : memref<32x2048xf32, #tpu.memory_space<vmem>>, vector<32x2048xf32>
    tpu.vector_store %arg4[%c0_5, %c0_6], %5 {strides = array<i32>} : memref<32x2048xf32, #tpu.memory_space<vmem>>, vector<32x2048xf32>,
    %c0_i32 = arith.constant 0 : i32
    %7 = arith.cmpi eq, %arg0, %c0_i32 : i32
    %8 = arith.extui %7 : i1 to i32
    %c0_i32_7 = arith.constant 0 : i32
    %9 = arith.cmpi ne, %8, %c0_i32_7 : i32
    scf.if %9 {
      %cst_14 = arith.constant 0.000000e+00 : f32
      %19 = vector.broadcast %cst_14 : f32 to vector<2x2048xf32>
      %c0_15 = arith.constant 0 : index
      %c0_16 = arith.constant 0 : index
      %20 = vector.load %arg5[%c0_15, %c0_16] : memref<2x2048xf32, #tpu.memory_space<vmem>>, vector<2x2048xf32>
      tpu.vector_store %arg5[%c0_15, %c0_16], %19 {strides = array<i32>} : memref<2x2048xf32, #tpu.memory_space<vmem>>, vector<2x2048xf32>,
    } else {
    }
    %c0_8 = arith.constant 0 : index
    %c0_9 = arith.constant 0 : index
    %10 = vector.load %arg5[%c0_8, %c0_9] : memref<2x2048xf32, #tpu.memory_space<vmem>>, vector<2x2048xf32>
    %cst_10 = arith.constant dense<0.000000e+00> : vector<2048xf32>
    %11 = vector.multi_reduction <add>, %5, %cst_10 [0] : vector<32x2048xf32> to vector<2048xf32>
    %12 = vector.shape_cast %11 : vector<2048xf32> to vector<1x2048xf32>
    %13 = arith.mulf %5, %5 : vector<32x2048xf32>
    %cst_11 = arith.constant dense<0.000000e+00> : vector<2048xf32>
    %14 = vector.multi_reduction <add>, %13, %cst_11 [0] : vector<32x2048xf32> to vector<2048xf32>
    %15 = vector.shape_cast %14 : vector<2048xf32> to vector<1x2048xf32>
    %16 = tpu.concatenate %12, %15 in 0 : vector<1x2048xf32>, vector<1x2048xf32> -> vector<2x2048xf32>
    %17 = arith.addf %10, %16 : vector<2x2048xf32>
    %c0_12 = arith.constant 0 : index
    %c0_13 = arith.constant 0 : index
    %18 = vector.load %arg5[%c0_12, %c0_13] : memref<2x2048xf32, #tpu.memory_space<vmem>>, vector<2x2048xf32>
    tpu.vector_store %arg5[%c0_12, %c0_13], %17 {strides = array<i32>} : memref<2x2048xf32, #tpu.memory_space<vmem>>, vector<2x2048xf32>,
    return
  }
  func.func @transform_0(%arg0: i32) -> (i32, i32) {
    %c0_i32 = arith.constant 0 : i32
    %c0_i32_0 = arith.constant 0 : i32
    return %arg0, %c0_i32 : i32, i32
  }
  func.func @transform_1(%arg0: i32) -> (i32, i32) {
    %c0_i32 = arith.constant 0 : i32
    %c0_i32_0 = arith.constant 0 : i32
    %c0_i32_1 = arith.constant 0 : i32
    return %c0_i32, %c0_i32_0 : i32, i32
  }
  func.func @transform_2(%arg0: i32) -> (i32, i32) {
    %c0_i32 = arith.constant 0 : i32
    %c0_i32_0 = arith.constant 0 : i32
    %c0_i32_1 = arith.constant 0 : i32
    return %c0_i32, %c0_i32_0 : i32, i32
  }
  func.func @transform_3(%arg0: i32) -> (i32, i32) {
    %c0_i32 = arith.constant 0 : i32
    %c0_i32_0 = arith.constant 0 : i32
    return %arg0, %c0_i32 : i32, i32
  }
  func.func @transform_4(%arg0: i32) -> (i32, i32) {
    %c0_i32 = arith.constant 0 : i32
    %c0_i32_0 = arith.constant 0 : i32
    %c0_i32_1 = arith.constant 0 : i32
    return %c0_i32, %c0_i32_0 : i32, i32
  }
}

module attributes {stable_mosaic.version = 11 : i64} {
  func.func @_scale_shift_act_kernel(%arg0: i32, %arg1: memref<32x2048xf32, #tpu.memory_space<vmem>>, %arg2: memref<1x2048xf32, #tpu.memory_space<vmem>>, %arg3: memref<1x2048xf32, #tpu.memory_space<vmem>>, %arg4: memref<32x2048xf32, #tpu.memory_space<vmem>>) attributes {dimension_semantics = [#tpu.dimension_semantics<parallel>], iteration_bounds = array<i64: 1>, scalar_prefetch = 0 : i64, scratch_operands = 0 : i64, tpu.core_type = #tpu.core_type<tc>, window_params = [{transform_indices = @transform_0, window_bounds = array<i64: 32, 2048>}, {pipeline_mode = #tpu.pipeline_mode<synchronous>, transform_indices = @transform_1, window_bounds = array<i64: 1, 2048>}, {pipeline_mode = #tpu.pipeline_mode<synchronous>, transform_indices = @transform_2, window_bounds = array<i64: 1, 2048>}, {transform_indices = @transform_3, window_bounds = array<i64: 32, 2048>}]} {
    %c0 = arith.constant 0 : index
    %c0_0 = arith.constant 0 : index
    %0 = vector.load %arg1[%c0, %c0_0] : memref<32x2048xf32, #tpu.memory_space<vmem>>, vector<32x2048xf32>
    %c0_1 = arith.constant 0 : index
    %c0_2 = arith.constant 0 : index
    %1 = vector.load %arg2[%c0_1, %c0_2] : memref<1x2048xf32, #tpu.memory_space<vmem>>, vector<1x2048xf32>
    %2 = vector.broadcast %1 : vector<1x2048xf32> to vector<32x2048xf32>
    %3 = arith.mulf %0, %2 : vector<32x2048xf32>
    %c0_3 = arith.constant 0 : index
    %c0_4 = arith.constant 0 : index
    %4 = vector.load %arg3[%c0_3, %c0_4] : memref<1x2048xf32, #tpu.memory_space<vmem>>, vector<1x2048xf32>
    %5 = vector.broadcast %4 : vector<1x2048xf32> to vector<32x2048xf32>
    %6 = arith.addf %3, %5 : vector<32x2048xf32>
    %cst = arith.constant 0.000000e+00 : f32
    %7 = vector.broadcast %cst : f32 to vector<32x2048xf32>
    %8 = arith.maximumf %6, %7 : vector<32x2048xf32>
    %c0_5 = arith.constant 0 : index
    %c0_6 = arith.constant 0 : index
    %9 = vector.load %arg4[%c0_5, %c0_6] : memref<32x2048xf32, #tpu.memory_space<vmem>>, vector<32x2048xf32>
    tpu.vector_store %arg4[%c0_5, %c0_6], %8 {strides = array<i32>} : memref<32x2048xf32, #tpu.memory_space<vmem>>, vector<32x2048xf32>,
    return
  }
  func.func @transform_0(%arg0: i32) -> (i32, i32) {
    %c0_i32 = arith.constant 0 : i32
    %c0_i32_0 = arith.constant 0 : i32
    return %arg0, %c0_i32 : i32, i32
  }
  func.func @transform_1(%arg0: i32) -> (i32, i32) {
    %c0_i32 = arith.constant 0 : i32
    %c0_i32_0 = arith.constant 0 : i32
    %c0_i32_1 = arith.constant 0 : i32
    return %c0_i32, %c0_i32_0 : i32, i32
  }
  func.func @transform_2(%arg0: i32) -> (i32, i32) {
    %c0_i32 = arith.constant 0 : i32
    %c0_i32_0 = arith.constant 0 : i32
    %c0_i32_1 = arith.constant 0 : i32
    return %c0_i32, %c0_i32_0 : i32, i32
  }
  func.func @transform_3(%arg0: i32) -> (i32, i32) {
    %c0_i32 = arith.constant 0 : i32
    %c0_i32_0 = arith.constant 0 : i32
    return %arg0, %c0_i32 : i32, i32
  }
}

module attributes {stable_mosaic.version = 11 : i64} {
  func.func @_matmul_bias_kernel(%arg0: i32, %arg1: memref<128x128xbf16, #tpu.memory_space<vmem>>, %arg2: memref<128x1024xbf16, #tpu.memory_space<vmem>>, %arg3: memref<1x1024xf32, #tpu.memory_space<vmem>>, %arg4: memref<128x1024xf32, #tpu.memory_space<vmem>>) attributes {dimension_semantics = [#tpu.dimension_semantics<parallel>], iteration_bounds = array<i64: 4>, scalar_prefetch = 0 : i64, scratch_operands = 0 : i64, tpu.core_type = #tpu.core_type<tc>, window_params = [{transform_indices = @transform_0, window_bounds = array<i64: 128, 128>}, {pipeline_mode = #tpu.pipeline_mode<synchronous>, transform_indices = @transform_1, window_bounds = array<i64: 128, 1024>}, {pipeline_mode = #tpu.pipeline_mode<synchronous>, transform_indices = @transform_2, window_bounds = array<i64: 1, 1024>}, {transform_indices = @transform_3, window_bounds = array<i64: 128, 1024>}]} {
    %c0 = arith.constant 0 : index
    %c0_0 = arith.constant 0 : index
    %0 = vector.load %arg1[%c0, %c0_0] : memref<128x128xbf16, #tpu.memory_space<vmem>>, vector<128x128xbf16>
    %c0_1 = arith.constant 0 : index
    %c0_2 = arith.constant 0 : index
    %1 = vector.load %arg2[%c0_1, %c0_2] : memref<128x1024xbf16, #tpu.memory_space<vmem>>, vector<128x1024xbf16>
    %cst = arith.constant dense<0.000000e+00> : vector<128x1024xf32>
    %2 = tpu.matmul %0, %1, %cst {dimension_numbers = #tpu.dot_dimension_numbers<[1], [0], [0], [1], [0, 0, 1, 1], [], []>} : vector<128x128xbf16>, vector<128x1024xbf16>, vector<128x1024xf32> -> vector<128x1024xf32>
    %c0_3 = arith.constant 0 : index
    %c0_4 = arith.constant 0 : index
    %3 = vector.load %arg3[%c0_3, %c0_4] : memref<1x1024xf32, #tpu.memory_space<vmem>>, vector<1x1024xf32>
    %4 = vector.broadcast %3 : vector<1x1024xf32> to vector<128x1024xf32>
    %5 = arith.addf %2, %4 : vector<128x1024xf32>
    %c0_5 = arith.constant 0 : index
    %c0_6 = arith.constant 0 : index
    %6 = vector.load %arg4[%c0_5, %c0_6] : memref<128x1024xf32, #tpu.memory_space<vmem>>, vector<128x1024xf32>
    tpu.vector_store %arg4[%c0_5, %c0_6], %5 {strides = array<i32>} : memref<128x1024xf32, #tpu.memory_space<vmem>>, vector<128x1024xf32>,
    return
  }
  func.func @transform_0(%arg0: i32) -> (i32, i32) {
    %c0_i32 = arith.constant 0 : i32
    %c0_i32_0 = arith.constant 0 : i32
    return %arg0, %c0_i32 : i32, i32
  }
  func.func @transform_1(%arg0: i32) -> (i32, i32) {
    %c0_i32 = arith.constant 0 : i32
    %c0_i32_0 = arith.constant 0 : i32
    %c0_i32_1 = arith.constant 0 : i32
    return %c0_i32, %c0_i32_0 : i32, i32
  }
  func.func @transform_2(%arg0: i32) -> (i32, i32) {
    %c0_i32 = arith.constant 0 : i32
    %c0_i32_0 = arith.constant 0 : i32
    %c0_i32_1 = arith.constant 0 : i32
    return %c0_i32, %c0_i32_0 : i32, i32
  }
  func.func @transform_3(%arg0: i32) -> (i32, i32) {
    %c0_i32 = arith.constant 0 : i32
    %c0_i32_0 = arith.constant 0 : i32
    return %arg0, %c0_i32 : i32, i32
  }
}

module attributes {stable_mosaic.version = 11 : i64} {
  func.func @_col_stats_kernel(%arg0: i32, %arg1: memref<128x512xf32, #tpu.memory_space<vmem>>, %arg2: memref<2x512xf32, #tpu.memory_space<vmem>>) attributes {dimension_semantics = [#tpu.dimension_semantics<arbitrary>], iteration_bounds = array<i64: 2>, scalar_prefetch = 0 : i64, scratch_operands = 0 : i64, tpu.core_type = #tpu.core_type<tc>, window_params = [{transform_indices = @transform_0, window_bounds = array<i64: 128, 512>}, {pipeline_mode = #tpu.pipeline_mode<synchronous>, transform_indices = @transform_1, window_bounds = array<i64: 2, 512>}]} {
    %c0_i32 = arith.constant 0 : i32
    %0 = arith.cmpi eq, %arg0, %c0_i32 : i32
    %1 = arith.extui %0 : i1 to i32
    %c0_i32_0 = arith.constant 0 : i32
    %2 = arith.cmpi ne, %1, %c0_i32_0 : i32
    scf.if %2 {
      %cst_7 = arith.constant 0.000000e+00 : f32
      %13 = vector.broadcast %cst_7 : f32 to vector<2x512xf32>
      %c0_8 = arith.constant 0 : index
      %c0_9 = arith.constant 0 : index
      %14 = vector.load %arg2[%c0_8, %c0_9] : memref<2x512xf32, #tpu.memory_space<vmem>>, vector<2x512xf32>
      tpu.vector_store %arg2[%c0_8, %c0_9], %13 {strides = array<i32>} : memref<2x512xf32, #tpu.memory_space<vmem>>, vector<2x512xf32>,
    } else {
    }
    %c0 = arith.constant 0 : index
    %c0_1 = arith.constant 0 : index
    %3 = vector.load %arg1[%c0, %c0_1] : memref<128x512xf32, #tpu.memory_space<vmem>>, vector<128x512xf32>
    %c0_2 = arith.constant 0 : index
    %c0_3 = arith.constant 0 : index
    %4 = vector.load %arg2[%c0_2, %c0_3] : memref<2x512xf32, #tpu.memory_space<vmem>>, vector<2x512xf32>
    %cst = arith.constant dense<0.000000e+00> : vector<512xf32>
    %5 = vector.multi_reduction <add>, %3, %cst [0] : vector<128x512xf32> to vector<512xf32>
    %6 = vector.shape_cast %5 : vector<512xf32> to vector<1x512xf32>
    %7 = arith.mulf %3, %3 : vector<128x512xf32>
    %cst_4 = arith.constant dense<0.000000e+00> : vector<512xf32>
    %8 = vector.multi_reduction <add>, %7, %cst_4 [0] : vector<128x512xf32> to vector<512xf32>
    %9 = vector.shape_cast %8 : vector<512xf32> to vector<1x512xf32>
    %10 = tpu.concatenate %6, %9 in 0 : vector<1x512xf32>, vector<1x512xf32> -> vector<2x512xf32>
    %11 = arith.addf %4, %10 : vector<2x512xf32>
    %c0_5 = arith.constant 0 : index
    %c0_6 = arith.constant 0 : index
    %12 = vector.load %arg2[%c0_5, %c0_6] : memref<2x512xf32, #tpu.memory_space<vmem>>, vector<2x512xf32>
    tpu.vector_store %arg2[%c0_5, %c0_6], %11 {strides = array<i32>} : memref<2x512xf32, #tpu.memory_space<vmem>>, vector<2x512xf32>,
    return
  }
  func.func @transform_0(%arg0: i32) -> (i32, i32) {
    %c0_i32 = arith.constant 0 : i32
    %c0_i32_0 = arith.constant 0 : i32
    return %arg0, %c0_i32 : i32, i32
  }
  func.func @transform_1(%arg0: i32) -> (i32, i32) {
    %c0_i32 = arith.constant 0 : i32
    %c0_i32_0 = arith.constant 0 : i32
    %c0_i32_1 = arith.constant 0 : i32
    return %c0_i32, %c0_i32_0 : i32, i32
  }
}

module attributes {stable_mosaic.version = 11 : i64} {
  func.func @_scale_shift_act_kernel(%arg0: i32, %arg1: memref<128x512xf32, #tpu.memory_space<vmem>>, %arg2: memref<1x512xf32, #tpu.memory_space<vmem>>, %arg3: memref<1x512xf32, #tpu.memory_space<vmem>>, %arg4: memref<128x512xf32, #tpu.memory_space<vmem>>) attributes {dimension_semantics = [#tpu.dimension_semantics<parallel>], iteration_bounds = array<i64: 2>, scalar_prefetch = 0 : i64, scratch_operands = 0 : i64, tpu.core_type = #tpu.core_type<tc>, window_params = [{transform_indices = @transform_0, window_bounds = array<i64: 128, 512>}, {pipeline_mode = #tpu.pipeline_mode<synchronous>, transform_indices = @transform_1, window_bounds = array<i64: 1, 512>}, {pipeline_mode = #tpu.pipeline_mode<synchronous>, transform_indices = @transform_2, window_bounds = array<i64: 1, 512>}, {transform_indices = @transform_3, window_bounds = array<i64: 128, 512>}]} {
    %c0 = arith.constant 0 : index
    %c0_0 = arith.constant 0 : index
    %0 = vector.load %arg1[%c0, %c0_0] : memref<128x512xf32, #tpu.memory_space<vmem>>, vector<128x512xf32>
    %c0_1 = arith.constant 0 : index
    %c0_2 = arith.constant 0 : index
    %1 = vector.load %arg2[%c0_1, %c0_2] : memref<1x512xf32, #tpu.memory_space<vmem>>, vector<1x512xf32>
    %2 = vector.broadcast %1 : vector<1x512xf32> to vector<128x512xf32>
    %3 = arith.mulf %0, %2 : vector<128x512xf32>
    %c0_3 = arith.constant 0 : index
    %c0_4 = arith.constant 0 : index
    %4 = vector.load %arg3[%c0_3, %c0_4] : memref<1x512xf32, #tpu.memory_space<vmem>>, vector<1x512xf32>
    %5 = vector.broadcast %4 : vector<1x512xf32> to vector<128x512xf32>
    %6 = arith.addf %3, %5 : vector<128x512xf32>
    %cst = arith.constant 0.000000e+00 : f32
    %7 = vector.broadcast %cst : f32 to vector<128x512xf32>
    %8 = arith.maximumf %6, %7 : vector<128x512xf32>
    %c0_5 = arith.constant 0 : index
    %c0_6 = arith.constant 0 : index
    %9 = vector.load %arg4[%c0_5, %c0_6] : memref<128x512xf32, #tpu.memory_space<vmem>>, vector<128x512xf32>
    tpu.vector_store %arg4[%c0_5, %c0_6], %8 {strides = array<i32>} : memref<128x512xf32, #tpu.memory_space<vmem>>, vector<128x512xf32>,
    return
  }
  func.func @transform_0(%arg0: i32) -> (i32, i32) {
    %c0_i32 = arith.constant 0 : i32
    %c0_i32_0 = arith.constant 0 : i32
    return %arg0, %c0_i32 : i32, i32
  }
  func.func @transform_1(%arg0: i32) -> (i32, i32) {
    %c0_i32 = arith.constant 0 : i32
    %c0_i32_0 = arith.constant 0 : i32
    %c0_i32_1 = arith.constant 0 : i32
    return %c0_i32, %c0_i32_0 : i32, i32
  }
  func.func @transform_2(%arg0: i32) -> (i32, i32) {
    %c0_i32 = arith.constant 0 : i32
    %c0_i32_0 = arith.constant 0 : i32
    %c0_i32_1 = arith.constant 0 : i32
    return %c0_i32, %c0_i32_0 : i32, i32
  }
  func.func @transform_3(%arg0: i32) -> (i32, i32) {
    %c0_i32 = arith.constant 0 : i32
    %c0_i32_0 = arith.constant 0 : i32
    return %arg0, %c0_i32 : i32, i32
  }
}

module attributes {stable_mosaic.version = 11 : i64} {
  func.func @_matmul_bias_kernel(%arg0: i32, %arg1: memref<128x64xbf16, #tpu.memory_space<vmem>>, %arg2: memref<64x16xbf16, #tpu.memory_space<vmem>>, %arg3: memref<1x16xf32, #tpu.memory_space<vmem>>, %arg4: memref<128x16xf32, #tpu.memory_space<vmem>>) attributes {dimension_semantics = [#tpu.dimension_semantics<parallel>], iteration_bounds = array<i64: 16>, scalar_prefetch = 0 : i64, scratch_operands = 0 : i64, tpu.core_type = #tpu.core_type<tc>, window_params = [{transform_indices = @transform_0, window_bounds = array<i64: 128, 64>}, {pipeline_mode = #tpu.pipeline_mode<synchronous>, transform_indices = @transform_1, window_bounds = array<i64: 64, 16>}, {pipeline_mode = #tpu.pipeline_mode<synchronous>, transform_indices = @transform_2, window_bounds = array<i64: 1, 16>}, {transform_indices = @transform_3, window_bounds = array<i64: 128, 16>}]} {
    %c0 = arith.constant 0 : index
    %c0_0 = arith.constant 0 : index
    %0 = vector.load %arg1[%c0, %c0_0] : memref<128x64xbf16, #tpu.memory_space<vmem>>, vector<128x64xbf16>
    %c0_1 = arith.constant 0 : index
    %c0_2 = arith.constant 0 : index
    %1 = vector.load %arg2[%c0_1, %c0_2] : memref<64x16xbf16, #tpu.memory_space<vmem>>, vector<64x16xbf16>
    %cst = arith.constant dense<0.000000e+00> : vector<128x16xf32>
    %2 = tpu.matmul %0, %1, %cst {dimension_numbers = #tpu.dot_dimension_numbers<[1], [0], [0], [1], [0, 0, 1, 1], [], []>} : vector<128x64xbf16>, vector<64x16xbf16>, vector<128x16xf32> -> vector<128x16xf32>
    %c0_3 = arith.constant 0 : index
    %c0_4 = arith.constant 0 : index
    %3 = vector.load %arg3[%c0_3, %c0_4] : memref<1x16xf32, #tpu.memory_space<vmem>>, vector<1x16xf32>
    %4 = vector.broadcast %3 : vector<1x16xf32> to vector<128x16xf32>
    %5 = arith.addf %2, %4 : vector<128x16xf32>
    %c0_5 = arith.constant 0 : index
    %c0_6 = arith.constant 0 : index
    %6 = vector.load %arg4[%c0_5, %c0_6] : memref<128x16xf32, #tpu.memory_space<vmem>>, vector<128x16xf32>
    tpu.vector_store %arg4[%c0_5, %c0_6], %5 {strides = array<i32>} : memref<128x16xf32, #tpu.memory_space<vmem>>, vector<128x16xf32>,
    return
  }
  func.func @transform_0(%arg0: i32) -> (i32, i32) {
    %c0_i32 = arith.constant 0 : i32
    %c0_i32_0 = arith.constant 0 : i32
    return %arg0, %c0_i32 : i32, i32
  }
  func.func @transform_1(%arg0: i32) -> (i32, i32) {
    %c0_i32 = arith.constant 0 : i32
    %c0_i32_0 = arith.constant 0 : i32
    %c0_i32_1 = arith.constant 0 : i32
    return %c0_i32, %c0_i32_0 : i32, i32
  }
  func.func @transform_2(%arg0: i32) -> (i32, i32) {
    %c0_i32 = arith.constant 0 : i32
    %c0_i32_0 = arith.constant 0 : i32
    %c0_i32_1 = arith.constant 0 : i32
    return %c0_i32, %c0_i32_0 : i32, i32
  }
  func.func @transform_3(%arg0: i32) -> (i32, i32) {
    %c0_i32 = arith.constant 0 : i32
    %c0_i32_0 = arith.constant 0 : i32
    return %arg0, %c0_i32 : i32, i32
  }
}

module attributes {stable_mosaic.version = 11 : i64} {
  func.func @_scale_shift_act_kernel(%arg0: i32, %arg1: memref<32x256xf32, #tpu.memory_space<vmem>>, %arg2: memref<1x256xf32, #tpu.memory_space<vmem>>, %arg3: memref<1x256xf32, #tpu.memory_space<vmem>>, %arg4: memref<32x256xf32, #tpu.memory_space<vmem>>) attributes {dimension_semantics = [#tpu.dimension_semantics<parallel>], iteration_bounds = array<i64: 1>, scalar_prefetch = 0 : i64, scratch_operands = 0 : i64, tpu.core_type = #tpu.core_type<tc>, window_params = [{transform_indices = @transform_0, window_bounds = array<i64: 32, 256>}, {pipeline_mode = #tpu.pipeline_mode<synchronous>, transform_indices = @transform_1, window_bounds = array<i64: 1, 256>}, {pipeline_mode = #tpu.pipeline_mode<synchronous>, transform_indices = @transform_2, window_bounds = array<i64: 1, 256>}, {transform_indices = @transform_3, window_bounds = array<i64: 32, 256>}]} {
    %c0 = arith.constant 0 : index
    %c0_0 = arith.constant 0 : index
    %0 = vector.load %arg1[%c0, %c0_0] : memref<32x256xf32, #tpu.memory_space<vmem>>, vector<32x256xf32>
    %c0_1 = arith.constant 0 : index
    %c0_2 = arith.constant 0 : index
    %1 = vector.load %arg2[%c0_1, %c0_2] : memref<1x256xf32, #tpu.memory_space<vmem>>, vector<1x256xf32>
    %2 = vector.broadcast %1 : vector<1x256xf32> to vector<32x256xf32>
    %3 = arith.mulf %0, %2 : vector<32x256xf32>
    %c0_3 = arith.constant 0 : index
    %c0_4 = arith.constant 0 : index
    %4 = vector.load %arg3[%c0_3, %c0_4] : memref<1x256xf32, #tpu.memory_space<vmem>>, vector<1x256xf32>
    %5 = vector.broadcast %4 : vector<1x256xf32> to vector<32x256xf32>
    %6 = arith.addf %3, %5 : vector<32x256xf32>
    %cst = arith.constant 0.000000e+00 : f32
    %7 = vector.broadcast %cst : f32 to vector<32x256xf32>
    %8 = arith.subf %7, %6 : vector<32x256xf32>
    %9 = math.exp %8 : vector<32x256xf32>
    %cst_5 = arith.constant 1.000000e+00 : f32
    %10 = vector.broadcast %cst_5 : f32 to vector<32x256xf32>
    %11 = arith.addf %10, %9 : vector<32x256xf32>
    %cst_6 = arith.constant 1.000000e+00 : f32
    %12 = vector.broadcast %cst_6 : f32 to vector<32x256xf32>
    %13 = arith.divf %12, %11 : vector<32x256xf32>
    %c0_7 = arith.constant 0 : index
    %c0_8 = arith.constant 0 : index
    %14 = vector.load %arg4[%c0_7, %c0_8] : memref<32x256xf32, #tpu.memory_space<vmem>>, vector<32x256xf32>
    tpu.vector_store %arg4[%c0_7, %c0_8], %13 {strides = array<i32>} : memref<32x256xf32, #tpu.memory_space<vmem>>, vector<32x256xf32>,
    return
  }
  func.func @transform_0(%arg0: i32) -> (i32, i32) {
    %c0_i32 = arith.constant 0 : i32
    %c0_i32_0 = arith.constant 0 : i32
    return %arg0, %c0_i32 : i32, i32
  }
  func.func @transform_1(%arg0: i32) -> (i32, i32) {
    %c0_i32 = arith.constant 0 : i32
    %c0_i32_0 = arith.constant 0 : i32
    %c0_i32_1 = arith.constant 0 : i32
    return %c0_i32, %c0_i32_0 : i32, i32
  }
  func.func @transform_2(%arg0: i32) -> (i32, i32) {
    %c0_i32 = arith.constant 0 : i32
    %c0_i32_0 = arith.constant 0 : i32
    %c0_i32_1 = arith.constant 0 : i32
    return %c0_i32, %c0_i32_0 : i32, i32
  }
  func.func @transform_3(%arg0: i32) -> (i32, i32) {
    %c0_i32 = arith.constant 0 : i32
    %c0_i32_0 = arith.constant 0 : i32
    return %arg0, %c0_i32 : i32, i32
  }
}

</mosaic_0001>

<bundles_post_ra>
// kernel: generator_forward.10
= control target key start
LH: loop header
LB: loop body
LE: loop exit
PB: predicated region body
PF: predicated region fallthrough
CT: control target
= control target key end

     0   :  { %v48_v0 = vlaneseq  ;;  %s576_s1 = inlined_call_operand.vmem [shape: f32[1,1024], index: 1, kind: input, shape index: {}]   ;;  %s577_s2 = inlined_call_operand.vmem [shape: f32[1,1024], index: 2, kind: input, shape index: {}]   ;;  %s578_s0 = inlined_call_operand.vmem [shape: f32[32,1024], index: 0, kind: input, shape index: {}]   ;;  %s579_s3 = inlined_call_operand.vmem [shape: f32[32,1024], index: 3, kind: output, shape index: {}]  }
   0x1   :  { %v46_v2 = vld [vmem:[%s576_s1] sm:$0xff]  ;;  %v15_v9 = vld [vmem:[%s578_s0 + $0x8] sm:$0xff]  ;;  %v16_v18 = vld [vmem:[%s578_s0 + $0x10] sm:$0xff] }
   0x2   :  { %v49_v1 = vshrl.u32 %v48_v0, 7  ;;  %v120_v3 = vld [vmem:[%s577_s2] sm:$0xff]  ;;  %v17_v19 = vld [vmem:[%s578_s0 + $0x18] sm:$0xff]  ;;  %v19_v29 = vld [vmem:[%s578_s0 + $0x28] sm:$0xff] }
   0x3   :  { %v14_v8 = vld [vmem:[%s578_s0] sm:$0xff]  ;;  %v20_v34 = vld [vmem:[%s578_s0 + $0x30] sm:$0xff]  ;;  %v21_v48 = vld [vmem:[%s578_s0 + $0x38] sm:$0xff] }
   0x4   :  { %v50_v4 = vsub.s32 0, %v49_v1  ;;  %v54_v5 = vsub.s32 1, %v49_v1  ;;  %v58_v6 = vsub.s32 2, %v49_v1  ;;  %v62_v7 = vsub.s32 3, %v49_v1  ;;  %v18_v24 = vld [vmem:[%s578_s0 + $0x20] sm:$0xff]  ;;  %v23_v49 = vld [vmem:[%s578_s0 + $0x48] sm:$0xff] }
   0x5   :  { %v66_v10 = vsub.s32 4, %v49_v1  ;;  %v70_v11 = vsub.s32 5, %v49_v1  ;;  %v74_v12 = vsub.s32 6, %v49_v1  ;;  %v78_v13 = vsub.s32 7, %v49_v1  ;;  %v22_v43 = vld [vmem:[%s578_s0 + $0x40] sm:$0xff]  ;;  %v24_v50 = vld [vmem:[%s578_s0 + $0x50] sm:$0xff] }
   0x6   :  { %v294_v14 = vrot.slane %v46_v2, %v50_v4  ;;  %v296_v15 = vrot.slane %v120_v3, %v50_v4  ;;  %v298_v16 = vrot.slane %v46_v2, %v54_v5  ;;  %v300_v17 = vrot.slane %v120_v3, %v54_v5  ;;  %v25_v55 = vld [vmem:[%s578_s0 + $0x58] sm:$0xff]  ;;  %v26_v56 = vld [vmem:[%s578_s0 + $0x60] sm:$0xff]  ;;  %v27_v61 = vld [vmem:[%s578_s0 + $0x68] sm:$0xff] }
   0x7   :  { %v308_v20 = vrot.slane %v46_v2, %v58_v6  ;;  %v310_v21 = vrot.slane %v120_v3, %v58_v6  ;;  %v312_v22 = vrot.slane %v46_v2, %v62_v7  ;;  %v314_v23 = vrot.slane %v120_v3, %v62_v7 }
   0x8   :  { %v88_v25 = vmul.f32 %v294_v14, %v14_v8  ;;  %v89_v26 = vmul.f32 %v298_v16, %v15_v9  ;;  %v321_v27 = vrot.slane %v46_v2, %v66_v10  ;;  %v323_v28 = vrot.slane %v120_v3, %v66_v10 }
   0x9   :  { %v90_v30 = vmul.f32 %v308_v20, %v16_v18  ;;  %v91_v31 = vmul.f32 %v312_v22, %v17_v19  ;;  %v330_v32 = vrot.slane %v46_v2, %v70_v11  ;;  %v332_v33 = vrot.slane %v120_v3, %v70_v11  ;;  %v29_v11 = vld [vmem:[%s578_s0 + $0x78] sm:$0xff] }
   0xa   :  { %v162_v35 = vadd.f32 %v296_v15, %v88_v25  ;;  %v163_v36 = vadd.f32 %v300_v17, %v89_v26  ;;  %v92_v37 = vmul.f32 %v321_v27, %v18_v24  ;;  %v340_v38 = vrot.slane %v46_v2, %v74_v12  ;;  %v30_v24 = vld [vmem:[%s578_s0 + $0x80] sm:$0xff]  ;;  %v31_v25 = vld [vmem:[%s578_s0 + $0x88] sm:$0xff]  ;;  %v32_v26 = vld [vmem:[%s578_s0 + $0x90] sm:$0xff] }
   0xb   :  { %v164_v39 = vadd.f32 %v310_v21, %v90_v30  ;;  %v165_v40 = vadd.f32 %v314_v23, %v91_v31  ;;  %v93_v41 = vmul.f32 %v330_v32, %v19_v29  ;;  %v345_v42 = vrot.slane %v120_v3, %v74_v12 }
   0xc   :  { %v194_v44 = vmax.f32 %v162_v35, 0.0  ;;  %v195_v45 = vmax.f32 %v163_v36, 0.0  ;;  %v166_v46 = vadd.f32 %v323_v28, %v92_v37  ;;  %v94_v47 = vmul.f32 %v340_v38, %v20_v34  ;;  %v33_v35 = vld [vmem:[%s578_s0 + $0x98] sm:$0xff]  ;;  %v34_v36 = vld [vmem:[%s578_s0 + $0xa0] sm:$0xff] }
   0xd   :  { %v196_v51 = vmax.f32 %v164_v39, 0.0  ;;  %v197_v52 = vmax.f32 %v165_v40, 0.0  ;;  %v167_v53 = vadd.f32 %v332_v33, %v93_v41  ;;  %v362_v54 = vrot.slane %v46_v2, %v78_v13  ;;  %v28_v2 = vld [vmem:[%s578_s0 + $0x70] sm:$0xff] }
   0xe   :  { %226 = vst [vmem:[%s579_s3] sm:$0xff] %v194_v44  ;;  %227 = vst [vmem:[%s579_s3 + $0x8] sm:$0xff] %v195_v45  ;;  %v198_v57 = vmax.f32 %v166_v46, 0.0  ;;  %v168_v58 = vadd.f32 %v345_v42, %v94_v47  ;;  %v377_v59 = vrot.slane %v120_v3, %v78_v13  ;;  %v96_v60 = vmul.f32 %v294_v14, %v22_v43  ;;  %v35_v43 = vld [vmem:[%s578_s0 + $0xa8] sm:$0xff] }
   0xf   :  { %228 = vst [vmem:[%s579_s3 + $0x10] sm:$0xff] %v196_v51  ;;  %229 = vst [vmem:[%s579_s3 + $0x18] sm:$0xff] %v197_v52  ;;  %v199_v62 = vmax.f32 %v167_v53, 0.0  ;;  %v95_v63 = vmul.f32 %v362_v54, %v21_v48  ;;  %v97_v0 = vmul.f32 %v298_v16, %v23_v49  ;;  %v98_v1 = vmul.f32 %v308_v20, %v24_v50  ;;  %v36_v48 = vld [vmem:[%s578_s0 + $0xb0] sm:$0xff] }
  0x10   :  { %230 = vst [vmem:[%s579_s3 + $0x20] sm:$0xff] %v198_v57  ;;  %v200_v3 = vmax.f32 %v168_v58, 0.0  ;;  %v170_v4 = vadd.f32 %v296_v15, %v96_v60  ;;  %v99_v5 = vmul.f32 %v312_v22, %v25_v55  ;;  %v100_v6 = vmul.f32 %v321_v27, %v26_v56  ;;  %v37_v58 = vld [vmem:[%s578_s0 + $0xb8] sm:$0xff] }
  0x11   :  { %231 = vst [vmem:[%s579_s3 + $0x28] sm:$0xff] %v199_v62  ;;  %v169_v7 = vadd.f32 %v377_v59, %v95_v63  ;;  %v171_v8 = vadd.f32 %v300_v17, %v97_v0  ;;  %v172_v9 = vadd.f32 %v310_v21, %v98_v1  ;;  %v101_v10 = vmul.f32 %v330_v32, %v27_v61  ;;  %v38_v0 = vld [vmem:[%s578_s0 + $0xc0] sm:$0xff]  ;;  %v39_v1 = vld [vmem:[%s578_s0 + $0xc8] sm:$0xff] }
  0x12   :  { %232 = vst [vmem:[%s579_s3 + $0x30] sm:$0xff] %v200_v3  ;;  %v202_v12 = vmax.f32 %v170_v4, 0.0  ;;  %v173_v13 = vadd.f32 %v314_v23, %v99_v5  ;;  %v174_v18 = vadd.f32 %v323_v28, %v100_v6  ;;  %v102_v19 = vmul.f32 %v340_v38, %v28_v2  ;;  %v40_v2 = vld [vmem:[%s578_s0 + $0xd0] sm:$0xff] }
  0x13   :  { %v201_v29 = vmax.f32 %v169_v7, 0.0  ;;  %v203_v30 = vmax.f32 %v171_v8, 0.0  ;;  %v204_v31 = vmax.f32 %v172_v9, 0.0  ;;  %v175_v34 = vadd.f32 %v332_v33, %v101_v10  ;;  %v41_v7 = vld [vmem:[%s578_s0 + $0xd8] sm:$0xff]  ;;  %v42_v8 = vld [vmem:[%s578_s0 + $0xe0] sm:$0xff] }
  0x14   :  { %234 = vst [vmem:[%s579_s3 + $0x40] sm:$0xff] %v202_v12  ;;  %v205_v37 = vmax.f32 %v173_v13, 0.0  ;;  %v206_v39 = vmax.f32 %v174_v18, 0.0  ;;  %v176_v40 = vadd.f32 %v345_v42, %v102_v19  ;;  %v103_v41 = vmul.f32 %v362_v54, %v29_v11  ;;  %v43_v13 = vld [vmem:[%s578_s0 + $0xe8] sm:$0xff] }
  0x15   :  { %233 = vst [vmem:[%s579_s3 + $0x38] sm:$0xff] %v201_v29  ;;  %235 = vst [vmem:[%s579_s3 + $0x48] sm:$0xff] %v203_v30  ;;  %v207_v44 = vmax.f32 %v175_v34, 0.0  ;;  %v104_v45 = vmul.f32 %v294_v14, %v30_v24  ;;  %v105_v46 = vmul.f32 %v298_v16, %v31_v25  ;;  %v106_v47 = vmul.f32 %v308_v20, %v32_v26  ;;  %v44_v26 = vld [vmem:[%s578_s0 + $0xf0] sm:$0xff] }
  0x16   :  { %236 = vst [vmem:[%s579_s3 + $0x50] sm:$0xff] %v204_v31  ;;  %237 = vst [vmem:[%s579_s3 + $0x58] sm:$0xff] %v205_v37  ;;  %v208_v49 = vmax.f32 %v176_v40, 0.0  ;;  %v177_v50 = vadd.f32 %v377_v59, %v103_v41  ;;  %v107_v51 = vmul.f32 %v312_v22, %v33_v35  ;;  %v108_v52 = vmul.f32 %v321_v27, %v34_v36  ;;  %v45_v36 = vld [vmem:[%s578_s0 + $0xf8] sm:$0xff] }
  0x17   :  { %238 = vst [vmem:[%s579_s3 + $0x60] sm:$0xff] %v206_v39  ;;  %239 = vst [vmem:[%s579_s3 + $0x68] sm:$0xff] %v207_v44  ;;  %v178_v53 = vadd.f32 %v296_v15, %v104_v45  ;;  %v179_v55 = vadd.f32 %v300_v17, %v105_v46  ;;  %v180_v56 = vadd.f32 %v310_v21, %v106_v47 }
  0x18   :  { %v109_v57 = vmul.f32 %v330_v32, %v35_v43  ;;  %240 = vst [vmem:[%s579_s3 + $0x70] sm:$0xff] %v208_v49  ;;  %v209_v60 = vmax.f32 %v177_v50, 0.0  ;;  %v181_v61 = vadd.f32 %v314_v23, %v107_v51  ;;  %v182_v62 = vadd.f32 %v323_v28, %v108_v52 }
  0x19   :  { %v110_v63 = vmul.f32 %v340_v38, %v36_v48  ;;  %v210_v3 = vmax.f32 %v178_v53, 0.0  ;;  %v211_v4 = vmax.f32 %v179_v55, 0.0  ;;  %v212_v5 = vmax.f32 %v180_v56, 0.0 }
  0x1a   :  { %v183_v6 = vadd.f32 %v332_v33, %v109_v57  ;;  %241 = vst [vmem:[%s579_s3 + $0x78] sm:$0xff] %v209_v60  ;;  %v213_v9 = vmax.f32 %v181_v61, 0.0  ;;  %v214_v10 = vmax.f32 %v182_v62, 0.0  ;;  %v111_v12 = vmul.f32 %v362_v54, %v37_v58 }
  0x1b   :  { %v184_v11 = vadd.f32 %v345_v42, %v110_v63  ;;  %242 = vst [vmem:[%s579_s3 + $0x80] sm:$0xff] %v210_v3  ;;  %243 = vst [vmem:[%s579_s3 + $0x88] sm:$0xff] %v211_v4  ;;  %v112_v19 = vmul.f32 %v294_v14, %v38_v0  ;;  %v113_v24 = vmul.f32 %v298_v16, %v39_v1 }
  0x1c   :  { %244 = vst [vmem:[%s579_s3 + $0x90] sm:$0xff] %v212_v5  ;;  %v215_v18 = vmax.f32 %v183_v6, 0.0  ;;  %v114_v25 = vmul.f32 %v308_v20, %v40_v2  ;;  %245 = vst [vmem:[%s579_s3 + $0x98] sm:$0xff] %v213_v9  ;;  %v185_v30 = vadd.f32 %v377_v59, %v111_v12  ;;  %v115_v14 = vmul.f32 %v312_v22, %v41_v7 }
  0x1d   :  { %246 = vst [vmem:[%s579_s3 + $0xa0] sm:$0xff] %v214_v10  ;;  %v216_v29 = vmax.f32 %v184_v11, 0.0  ;;  %v116_v16 = vmul.f32 %v321_v27, %v42_v8  ;;  %v186_v20 = vadd.f32 %v296_v15, %v112_v19  ;;  %v187_v31 = vadd.f32 %v300_v17, %v113_v24 }
  0x1e   :  { %247 = vst [vmem:[%s579_s3 + $0xa8] sm:$0xff] %v215_v18  ;;  %v188_v34 = vadd.f32 %v310_v21, %v114_v25  ;;  %v117_v35 = vmul.f32 %v330_v32, %v43_v13  ;;  %v217_v22 = vmax.f32 %v185_v30, 0.0  ;;  %v189_v27 = vadd.f32 %v314_v23, %v115_v14 }
  0x1f   :  { %248 = vst [vmem:[%s579_s3 + $0xb0] sm:$0xff] %v216_v29  ;;  %v190_v37 = vadd.f32 %v323_v28, %v116_v16  ;;  %v118_v15 = vmul.f32 %v340_v38, %v44_v26  ;;  %v218_v17 = vmax.f32 %v186_v20, 0.0  ;;  %v219_v39 = vmax.f32 %v187_v31, 0.0 }
  0x20   :  { %v220_v21 = vmax.f32 %v188_v34, 0.0  ;;  %v191_v32 = vadd.f32 %v332_v33, %v117_v35  ;;  %249 = vst [vmem:[%s579_s3 + $0xb8] sm:$0xff] %v217_v22  ;;  %v221_v40 = vmax.f32 %v189_v27, 0.0  ;;  %v119_v44 = vmul.f32 %v362_v54, %v45_v36 }
  0x21   :  { %v222_v41 = vmax.f32 %v190_v37, 0.0  ;;  %v192_v43 = vadd.f32 %v345_v42, %v118_v15  ;;  %250 = vst [vmem:[%s579_s3 + $0xc0] sm:$0xff] %v218_v17  ;;  %251 = vst [vmem:[%s579_s3 + $0xc8] sm:$0xff] %v219_v39 }
  0x22   :  { %252 = vst [vmem:[%s579_s3 + $0xd0] sm:$0xff] %v220_v21  ;;  %v223_v23 = vmax.f32 %v191_v32, 0.0  ;;  %253 = vst [vmem:[%s579_s3 + $0xd8] sm:$0xff] %v221_v40  ;;  %v193_v33 = vadd.f32 %v377_v59, %v119_v44 }
  0x23   :  { %254 = vst [vmem:[%s579_s3 + $0xe0] sm:$0xff] %v222_v41  ;;  %v224_v28 = vmax.f32 %v192_v43, 0.0 }
  0x24   :  { %255 = vst [vmem:[%s579_s3 + $0xe8] sm:$0xff] %v223_v23  ;;  %v225_v38 = vmax.f32 %v193_v33, 0.0 }
  0x25   :  { %256 = vst [vmem:[%s579_s3 + $0xf0] sm:$0xff] %v224_v28 }
  0x26   :  { %257 = vst [vmem:[%s579_s3 + $0xf8] sm:$0xff] %v225_v38 }

// kernel: generator_forward.9
= control target key start
LH: loop header
LB: loop body
LE: loop exit
PB: predicated region body
PF: predicated region fallthrough
CT: control target
= control target key end

     0   :  { %10 = vsyncpa [#allocation3], 0  ;;  %s850_s15 = smov [#allocation2]   ;;  %s1232_s0 = inlined_call_operand.vmem [shape: bf16[32,64], index: 0, kind: input, shape index: {}]   ;;  %s1233_s1 = inlined_call_operand.vmem [shape: bf16[64,1024], index: 1, kind: input, shape index: {}]   ;;  %s1234_s2 = inlined_call_operand.hbm [shape: f32[1,1024], index: 2, kind: input, shape index: {}]   ;;  %s1235_s3 = inlined_call_operand.vmem [shape: f32[32,1024], index: 3, kind: output, shape index: {0}]   ;;  %s1236_s4 = inlined_call_operand.vmem [shape: f32[2,1024], index: 4, kind: output, shape index: {1}]  }
   0x1   :  { %s21_s16 = sshll.u32 %s850_s15, 4  ;;  %s826_s19 = scalar_lea.hbm %s1234_s2, 128  ;;  %s22_s16 = int_to_ptr.vmem [resolvable:$true] %s21_s16 }
   0x2   :  { %p827_p0 = scmp.ne.s32.totalorder %s1234_s2, %s826_s19  ;;  %p830_p1 = scmp.lt.u32.totalorder %s826_s19, %s1234_s2 }
   0x4   :  { %p832_p2 = pnand %p830_p1, %p827_p0 }
   0x6   :  { %835 = shalt.err (!%p832_p2)
}
   0x7   :  { %s836_s24 = scalar_lea.vmem %s22_s16, 128  ;;  %p841_p4 = scmp.lt.s32.totalorder %s22_s16, %s22_s16 }
   0x8   :  { %p837_p3 = scmp.ne.s32.totalorder %s22_s16, %s836_s24  ;;  %p842_p5 = scmp.lt.s32.totalorder %s836_s24, %s836_s24 }
   0xa   :  { %p843_p6 = por %p842_p5, %p841_p4 }
   0xc   :  { %p844_p7 = pnand %p843_p6, %p837_p3 }
   0xe   :  { %847 = shalt.err (!%p844_p7)
}
   0xf   :  { %24 = dma.hbm_to_vmem [thread:$0]  %s1234_s2, 128, %s22_s16, [#allocation3]  }
  0x10   :  { %848 = dma.done.wait [#allocation3], 128  }
  0x11   :  { %849 = vsyncadd [#allocation3], 4294967168  ;;  %v851_v0 = vmov 0   ;;  %v33_v1 = vld [vmem:[%s1233_s1] sm:$0xff]  ;;  %v34_v3 = vld [vmem:[%s1233_s1 + $0x8] sm:$0xff]  ;;  %vm277_vm0 = vcmask 523264  }
  0x12   :  { %316 = vmatprep.mubr.bf16.mxu0 %v851_v0  ;;  %369 = vmatprep.mubr.bf16.mxu1 %v851_v0  ;;  %v37_v2 = vld [vmem:[%s1233_s1 + $0x20] sm:$0xff]  ;;  %v38_v5 = vld [vmem:[%s1233_s1 + $0x28] sm:$0xff]  ;;  %v35_v31 = vld [vmem:[%s1233_s1 + $0x10] sm:$0xff]  ;;  %vm712_vm1 = vcmask 1040384  }
  0x13   :  { %v781_v4 = vcombine.high %v33_v1, %v37_v2  ;;  %v780_v6 = vcombine.low %v33_v1, %v37_v2  ;;  %v41_v7 = vld [vmem:[%s1233_s1 + $0x40] sm:$0xff]  ;;  %v783_v9 = vcombine.high %v34_v3, %v38_v5  ;;  %v782_v10 = vcombine.low %v34_v3, %v38_v5  ;;  %v42_v12 = vld [vmem:[%s1233_s1 + $0x48] sm:$0xff]  ;;  %v39_v32 = vld [vmem:[%s1233_s1 + $0x30] sm:$0xff] }
  0x14   :  { %v45_v8 = vld [vmem:[%s1233_s1 + $0x60] sm:$0xff]  ;;  %v46_v13 = vld [vmem:[%s1233_s1 + $0x68] sm:$0xff]  ;;  %v36_v33 = vld [vmem:[%s1233_s1 + $0x18] sm:$0xff]  ;;  %v785_v37 = vcombine.high %v35_v31, %v39_v32  ;;  %v784_v44 = vcombine.low %v35_v31, %v39_v32 }
  0x15   :  { %v789_v11 = vcombine.high %v41_v7, %v45_v8  ;;  %v49_v14 = vld [vmem:[%s1233_s1 + $0x80] sm:$0xff]  ;;  %284 = vmatprep.subr.bf16.mxu0 %v781_v4  ;;  %v791_v15 = vcombine.high %v42_v12, %v46_v13  ;;  %v50_v17 = vld [vmem:[%s1233_s1 + $0x88] sm:$0xff]  ;;  %337 = vmatprep.subr.bf16.mxu1 %v783_v9  ;;  %v788_v19 = vcombine.low %v41_v7, %v45_v8  ;;  %v40_v34 = vld [vmem:[%s1233_s1 + $0x38] sm:$0xff]  ;;  %v67_v4 = vlaneseq }
  0x16   :  { %v53_v16 = vld [vmem:[%s1233_s1 + $0xa0] sm:$0xff]  ;;  %v54_v18 = vld [vmem:[%s1233_s1 + $0xa8] sm:$0xff]  ;;  %285 = vmatpush1.bf16.msra.mxu0 %v780_v6  ;;  %338 = vmatpush1.bf16.msra.mxu1 %v782_v10  ;;  %v790_v20 = vcombine.low %v42_v12, %v46_v13  ;;  %v787_v38 = vcombine.high %v36_v33, %v40_v34  ;;  %v43_v39 = vld [vmem:[%s1233_s1 + $0x50] sm:$0xff]  ;;  %v786_v45 = vcombine.low %v36_v33, %v40_v34 }
  0x17   :  { %286 = vmatprep.subr.bf16.mxu0 %v789_v11  ;;  %v797_v21 = vcombine.high %v49_v14, %v53_v16  ;;  %339 = vmatprep.subr.bf16.mxu1 %v791_v15  ;;  %v799_v22 = vcombine.high %v50_v17, %v54_v18  ;;  %v57_v23 = vld [vmem:[%s1233_s1 + $0xc0] sm:$0xff]  ;;  %v58_v25 = vld [vmem:[%s1233_s1 + $0xc8] sm:$0xff]  ;;  %v796_v27 = vcombine.low %v49_v14, %v53_v16  ;;  %v47_v40 = vld [vmem:[%s1233_s1 + $0x70] sm:$0xff]  ;;  %v1008_v5 = vshrl.u32 %v67_v4, 7 }
  0x18   :  { %v61_v24 = vld [vmem:[%s1233_s1 + $0xe0] sm:$0xff]  ;;  %v62_v26 = vld [vmem:[%s1233_s1 + $0xe8] sm:$0xff]  ;;  %v798_v28 = vcombine.low %v50_v17, %v54_v18  ;;  %v44_v42 = vld [vmem:[%s1233_s1 + $0x58] sm:$0xff]  ;;  %v793_v46 = vcombine.high %v43_v39, %v47_v40  ;;  %v792_v52 = vcombine.low %v43_v39, %v47_v40  ;;  %v852_v14 = vmov 1983009808  }
  0x19   :  { %v805_v29 = vcombine.high %v57_v23, %v61_v24  ;;  %v807_v30 = vcombine.high %v58_v25, %v62_v26  ;;  %v804_v35 = vcombine.low %v57_v23, %v61_v24  ;;  %v806_v36 = vcombine.low %v58_v25, %v62_v26  ;;  %v824_v41 = vld [vmem:[%s1232_s0] sm:$0xff]   ;;  %v48_v43 = vld [vmem:[%s1233_s1 + $0x78] sm:$0xff]  ;;  %v51_v48 = vld [vmem:[%s1233_s1 + $0x90] sm:$0xff] }
  0x1a   :  { %287 = vmatpush1.bf16.msra.mxu0 %v788_v19  ;;  %340 = vmatpush1.bf16.msra.mxu1 %v790_v20  ;;  %v795_v47 = vcombine.high %v44_v42, %v48_v43  ;;  %v55_v49 = vld [vmem:[%s1233_s1 + $0xb0] sm:$0xff]  ;;  %v52_v50 = vld [vmem:[%s1233_s1 + $0x98] sm:$0xff]  ;;  %v794_v53 = vcombine.low %v44_v42, %v48_v43  ;;  %v825_v58 = vld [vmem:[%s1232_s0 + $0x8] sm:$0xff]   ;;  %v69_v6 = vsub.s32 0, %v1008_v5  ;;  %v77_v8 = vsub.s32 2, %v1008_v5 }
  0x1b   :  { %288 = vmatprep.subr.bf16.mxu0 %v797_v21  ;;  %341 = vmatprep.subr.bf16.mxu1 %v799_v22  ;;  %v56_v51 = vld [vmem:[%s1233_s1 + $0xb8] sm:$0xff]  ;;  %v801_v54 = vcombine.high %v51_v48, %v55_v49  ;;  %v59_v56 = vld [vmem:[%s1233_s1 + $0xd0] sm:$0xff]  ;;  %v800_v61 = vcombine.low %v51_v48, %v55_v49  ;;  %v1011_v7 = vld [vmem:[#allocation2] sm:$0xff]  ;;  %v73_v9 = vsub.s32 1, %v1008_v5  ;;  %v81_v10 = vsub.s32 3, %v1008_v5 }
  0x1c   :  { %v803_v55 = vcombine.high %v52_v50, %v56_v51  ;;  %v63_v57 = vld [vmem:[%s1233_s1 + $0xf0] sm:$0xff]  ;;  %v60_v59 = vld [vmem:[%s1233_s1 + $0xd8] sm:$0xff]  ;;  %v802_v62 = vcombine.low %v52_v50, %v56_v51  ;;  %v1017_v11 = vrot.slane %v1011_v7, %v69_v6  ;;  %v732_v15 = vunpack.c.l.s4 %v852_v14 }
  0x1d   :  { %v64_v60 = vld [vmem:[%s1233_s1 + $0xf8] sm:$0xff]  ;;  %v809_v63 = vcombine.high %v59_v56, %v63_v57  ;;  %v808_v2 = vcombine.low %v59_v56, %v63_v57  ;;  %v1023_v12 = vrot.slane %v1011_v7, %v73_v9  ;;  %v1026_v13 = vrot.slane %v1011_v7, %v81_v10 }
  0x1e   :  { %289 = vmatpush1.bf16.msra.mxu0 %v796_v27  ;;  %342 = vmatpush1.bf16.msra.mxu1 %v798_v28  ;;  %v811_v1 = vcombine.high %v60_v59, %v64_v60  ;;  %v810_v3 = vcombine.low %v60_v59, %v64_v60  ;;  %v85_v20 = vsub.s32 4, %v1008_v5  ;;  %v93_v25 = vsub.s32 6, %v1008_v5 }
  0x1f   :  { %290 = vmatprep.subr.bf16.mxu0 %v805_v29  ;;  %343 = vmatprep.subr.bf16.mxu1 %v807_v30  ;;  %v89_v26 = vsub.s32 5, %v1008_v5  ;;  %v733_v31 = vunpack.c.0.s8 %v732_v15  ;;  %v97_v32 = vsub.s32 7, %v1008_v5 }
  0x21   :  { %v1072_v59 = vrot.slane %v1011_v7, %v89_v26 }
  0x22   :  { %291 = vmatpush1.bf16.msra.mxu0 %v804_v35  ;;  %344 = vmatpush1.bf16.msra.mxu1 %v806_v36 }
  0x23   :  { %390 = vmatprep.subr.bf16.mxu0 %v785_v37  ;;  %443 = vmatprep.subr.bf16.mxu1 %v787_v38 }
  0x25   :  { %812 = vmatmul.mubr.msk.bf16.vlgmr.msra.gmra.mrb[0].mxu0 %vm277_vm0, %v824_v41  ;;  %814 = vmatmul.mubr.msk.bf16.vlgmr.msra.gmra.mrb[0].mxu1 %vm277_vm0, %v824_v41 }
  0x26   :  { %391 = vmatpush1.bf16.msra.mxu0 %v784_v44  ;;  %444 = vmatpush1.bf16.msra.mxu1 %v786_v45 }
  0x27   :  { %392 = vmatprep.subr.bf16.mxu0 %v793_v46  ;;  %445 = vmatprep.subr.bf16.mxu1 %v795_v47 }
  0x28   :  { %326 = vmatprep.mubr.bf16.mxu0 %v851_v0  ;;  %379 = vmatprep.mubr.bf16.mxu1 %v851_v0 }
  0x2a   :  { %393 = vmatpush1.bf16.msra.mxu0 %v792_v52  ;;  %446 = vmatpush1.bf16.msra.mxu1 %v794_v53  ;;  %v1065_v53 = vrot.slane %v1011_v7, %v85_v20 }
  0x2b   :  { %394 = vmatprep.subr.bf16.mxu0 %v801_v54  ;;  %447 = vmatprep.subr.bf16.mxu1 %v803_v55 }
  0x2d   :  { %813 = vmatmul.mubr.msk.bf16.gmra.mrb[4].mxu0 %vm277_vm0, %v825_v58  ;;  %815 = vmatmul.mubr.msk.bf16.gmra.mrb[4].mxu1 %vm277_vm0, %v825_v58 }
  0x2e   :  { %395 = vmatpush1.bf16.msra.mxu0 %v800_v61  ;;  %448 = vmatpush1.bf16.msra.mxu1 %v802_v62 }
  0x2f   :  { %396 = vmatprep.subr.bf16.mxu0 %v809_v63  ;;  %449 = vmatprep.subr.bf16.mxu1 %v811_v1  ;;  %v1077_v1 = vsub.s32 %v733_v31, %v1008_v5 }
  0x30   :  { %422 = vmatprep.mubr.bf16.mxu0 %v851_v0  ;;  %475 = vmatprep.mubr.bf16.mxu1 %v851_v0 }
  0x32   :  { %397 = vmatpush1.bf16.msra.mxu0 %v808_v2  ;;  %450 = vmatpush1.bf16.msra.mxu1 %v810_v3  ;;  %v1080_v2 = vrot.slane %v1011_v7, %v97_v32 }
  0x35   :  { %816 = vmatmul.mubr.msk.bf16.vlgmr.msra.gmra.mrb[8].mxu0 %vm277_vm0, %v824_v41  ;;  %818 = vmatmul.mubr.msk.bf16.vlgmr.msra.gmra.mrb[8].mxu1 %vm277_vm0, %v824_v41 }
  0x36   :  { %432 = vmatprep.mubr.bf16.mxu0 %v851_v0  ;;  %485 = vmatprep.mubr.bf16.mxu1 %v851_v0  ;;  %v1020_v0 = vrot.slane %v1011_v7, %v77_v8 }
  0x3d   :  { %817 = vmatmul.mubr.msk.bf16.gmra.mrb[12].mxu0 %vm277_vm0, %v825_v58  ;;  %819 = vmatmul.mubr.msk.bf16.gmra.mrb[12].mxu1 %vm277_vm0, %v825_v58  ;;  %v1069_v58 = vrot.slane %v1011_v7, %v93_v25 }
  0xf8   :  { %v318_v16 = vpop.f32.mrb[0].mxu0  ;;  %v371_v18 = vpop.f32.mrb[0].mxu1 }
  0xf9   :  { %v319_v17 = vadd.f32 %v318_v16, %v1017_v11  ;;  %v320_v19 = vpop.f32.mrb[1].mxu0  ;;  %v372_v21 = vadd.f32 %v371_v18, %v1020_v0  ;;  %v373_v23 = vpop.f32.mrb[1].mxu1 }
  0xfa   :  { %v321_v22 = vadd.f32 %v320_v19, %v1023_v12  ;;  %v322_v24 = vpop.f32.mrb[2].mxu0  ;;  %v374_v27 = vadd.f32 %v373_v23, %v1026_v13  ;;  %v375_v29 = vpop.f32.mrb[2].mxu1 }
  0xfb   :  { %496 = vst [vmem:[%s1235_s3] sm:$0xff] %v319_v17  ;;  %v323_v28 = vadd.f32 %v322_v24, %v1017_v11  ;;  %v324_v30 = vpop.f32.mrb[3].mxu0  ;;  %v608_v33 = vmul.f32 %v319_v17, %v319_v17  ;;  %498 = vst [vmem:[%s1235_s3 + $0x10] sm:$0xff] %v372_v21  ;;  %v610_v34 = vmul.f32 %v372_v21, %v372_v21  ;;  %v377_v37 = vpop.f32.mrb[3].mxu1 }
  0xfc   :  { %497 = vst [vmem:[%s1235_s3 + $0x8] sm:$0xff] %v321_v22  ;;  %v376_v35 = vadd.f32 %v375_v29, %v1020_v0  ;;  %v325_v36 = vadd.f32 %v324_v30, %v1023_v12  ;;  %v609_v38 = vmul.f32 %v321_v22, %v321_v22  ;;  %499 = vst [vmem:[%s1235_s3 + $0x18] sm:$0xff] %v374_v27 }
  0xfd   :  { %504 = vst [vmem:[%s1235_s3 + $0x40] sm:$0xff] %v323_v28  ;;  %v536_v39 = vadd.f32 %v323_v28, %v319_v17  ;;  %v616_v40 = vmul.f32 %v323_v28, %v323_v28  ;;  %v378_v41 = vadd.f32 %v377_v37, %v1026_v13  ;;  %v611_v46 = vmul.f32 %v374_v27, %v374_v27 }
  0xfe   :  { %506 = vst [vmem:[%s1235_s3 + $0x50] sm:$0xff] %v376_v35  ;;  %v554_v42 = vadd.f32 %v376_v35, %v372_v21  ;;  %v618_v43 = vmul.f32 %v376_v35, %v376_v35  ;;  %505 = vst [vmem:[%s1235_s3 + $0x48] sm:$0xff] %v325_v36  ;;  %v545_v44 = vadd.f32 %v325_v36, %v321_v22 }
  0xff   :  { %v617_v45 = vmul.f32 %v325_v36, %v325_v36  ;;  %v640_v47 = vadd.f32 %v616_v40, %v608_v33  ;;  %507 = vst [vmem:[%s1235_s3 + $0x58] sm:$0xff] %v378_v41  ;;  %v563_v48 = vadd.f32 %v378_v41, %v374_v27  ;;  %v619_v49 = vmul.f32 %v378_v41, %v378_v41 }
 0x100   :  { %v658_v50 = vadd.f32 %v618_v43, %v610_v34  ;;  %v328_v52 = vpop.f32.mrb[4].mxu0  ;;  %v381_v56 = vpop.f32.mrb[4].mxu1 }
 0x101   :  { %v649_v51 = vadd.f32 %v617_v45, %v609_v38  ;;  %v667_v54 = vadd.f32 %v619_v49, %v611_v46  ;;  %v329_v55 = vadd.f32 %v328_v52, %v1017_v11  ;;  %v330_v57 = vpop.f32.mrb[5].mxu0  ;;  %v382_v60 = vadd.f32 %v381_v56, %v1020_v0  ;;  %v383_v62 = vpop.f32.mrb[5].mxu1 }
 0x102   :  { %v331_v61 = vadd.f32 %v330_v57, %v1023_v12  ;;  %v332_v63 = vpop.f32.mrb[6].mxu0  ;;  %v384_v6 = vadd.f32 %v383_v62, %v1026_v13  ;;  %v385_v9 = vpop.f32.mrb[6].mxu1 }
 0x103   :  { %512 = vst [vmem:[%s1235_s3 + $0x80] sm:$0xff] %v329_v55  ;;  %v537_v3 = vadd.f32 %v536_v39, %v329_v55  ;;  %v624_v4 = vmul.f32 %v329_v55, %v329_v55  ;;  %v333_v8 = vadd.f32 %v332_v63, %v1017_v11  ;;  %v334_v10 = vpop.f32.mrb[7].mxu0  ;;  %514 = vst [vmem:[%s1235_s3 + $0x90] sm:$0xff] %v382_v60  ;;  %v387_v16 = vpop.f32.mrb[7].mxu1 }
 0x104   :  { %v555_v5 = vadd.f32 %v554_v42, %v382_v60  ;;  %v626_v14 = vmul.f32 %v382_v60, %v382_v60  ;;  %513 = vst [vmem:[%s1235_s3 + $0x88] sm:$0xff] %v331_v61  ;;  %v546_v7 = vadd.f32 %v545_v44, %v331_v61  ;;  %v625_v15 = vmul.f32 %v331_v61, %v331_v61 }
 0x105   :  { %v641_v17 = vadd.f32 %v640_v47, %v624_v4  ;;  %515 = vst [vmem:[%s1235_s3 + $0x98] sm:$0xff] %v384_v6  ;;  %v564_v11 = vadd.f32 %v563_v48, %v384_v6  ;;  %v627_v18 = vmul.f32 %v384_v6, %v384_v6  ;;  %520 = vst [vmem:[%s1235_s3 + $0xc0] sm:$0xff] %v333_v8 }
 0x106   :  { %v538_v19 = vadd.f32 %v537_v3, %v333_v8  ;;  %v659_v20 = vadd.f32 %v658_v50, %v626_v14  ;;  %v650_v21 = vadd.f32 %v649_v51, %v625_v15  ;;  %v632_v22 = vmul.f32 %v333_v8, %v333_v8 }
 0x107   :  { %v386_v23 = vadd.f32 %v385_v9, %v1020_v0  ;;  %v668_v24 = vadd.f32 %v667_v54, %v627_v18  ;;  %v335_v26 = vadd.f32 %v334_v10, %v1023_v12  ;;  %v388_v27 = vadd.f32 %v387_v16, %v1026_v13 }
 0x108   :  { %v539_v25 = vrot.slane %v538_v19, 4  ;;  %v642_v28 = vadd.f32 %v641_v17, %v632_v22  ;;  %v424_v31 = vpop.f32.mrb[8].mxu0  ;;  %v1111_v13 = vpop.f32.mrb[8].mxu1 }
 0x109   :  { %522 = vst [vmem:[%s1235_s3 + $0xd0] sm:$0xff] %v386_v23  ;;  %v556_v29 = vadd.f32 %v555_v5, %v386_v23  ;;  %v634_v30 = vmul.f32 %v386_v23, %v386_v23  ;;  %521 = vst [vmem:[%s1235_s3 + $0xc8] sm:$0xff] %v335_v26  ;;  %v547_v0 = vadd.f32 %v546_v7, %v335_v26  ;;  %v1113_v34 = vpop.f32.mrb[9].mxu0  ;;  %v1115_v39 = vpop.f32.mrb[9].mxu1 }
 0x10a   :  { %v540_v32 = vadd.f32 %v539_v25, %v538_v19  ;;  %v633_v33 = vmul.f32 %v335_v26, %v335_v26  ;;  %523 = vst [vmem:[%s1235_s3 + $0xd8] sm:$0xff] %v388_v27  ;;  %v565_v12 = vadd.f32 %v564_v11, %v388_v27  ;;  %v643_v35 = vrot.slane %v642_v28, 4  ;;  %v1117_v40 = vpop.f32.mrb[10].mxu0  ;;  %v1119_v45 = vpop.f32.mrb[10].mxu1 }
 0x10b   :  { %v557_v36 = vrot.slane %v556_v29, 4  ;;  %v660_v37 = vadd.f32 %v659_v20, %v634_v30  ;;  %v635_v38 = vmul.f32 %v388_v27, %v388_v27  ;;  %v548_v42 = vrot.slane %v547_v0, 4  ;;  %v1121_v46 = vpop.f32.mrb[11].mxu0  ;;  %v1123_v51 = vpop.f32.mrb[11].mxu1 }
 0x10c   :  { %v541_v41 = vrot.slane %v540_v32, 2  ;;  %v651_v43 = vadd.f32 %v650_v21, %v633_v33  ;;  %v566_v44 = vrot.slane %v565_v12, 4  ;;  %v644_v47 = vadd.f32 %v643_v35, %v642_v28 }
 0x10d   :  { %v558_v48 = vadd.f32 %v557_v36, %v556_v29  ;;  %v661_v49 = vrot.slane %v660_v37, 4  ;;  %v669_v50 = vadd.f32 %v668_v24, %v635_v38  ;;  %v549_v54 = vadd.f32 %v548_v42, %v547_v0 }
 0x10e   :  { %v542_v52 = vadd.f32 %v541_v41, %v540_v32  ;;  %v652_v55 = vrot.slane %v651_v43, 4  ;;  %v567_v56 = vadd.f32 %v566_v44, %v565_v12  ;;  %v645_v57 = vrot.slane %v644_v47, 2 }
 0x10f   :  { %v559_v60 = vrot.slane %v558_v48, 2  ;;  %v662_v61 = vadd.f32 %v661_v49, %v660_v37  ;;  %v670_v62 = vrot.slane %v669_v50, 4  ;;  %v550_v3 = vrot.slane %v549_v54, 2 }
 0x110   :  { %v543_v63 = vrot.slane %v542_v52, 1  ;;  %v653_v4 = vadd.f32 %v652_v55, %v651_v43  ;;  %v568_v6 = vrot.slane %v567_v56, 2  ;;  %v646_v8 = vadd.f32 %v645_v57, %v644_v47  ;;  %v434_v14 = vpop.f32.mrb[12].mxu0  ;;  %v487_v11 = vpop.f32.mrb[12].mxu1 }
 0x111   :  { %v560_v9 = vadd.f32 %v559_v60, %v558_v48  ;;  %v663_v10 = vrot.slane %v662_v61, 2  ;;  %v671_v5 = vadd.f32 %v670_v62, %v669_v50  ;;  %v551_v15 = vadd.f32 %v550_v3, %v549_v54  ;;  %v1125_v18 = vpop.f32.mrb[13].mxu0  ;;  %v1127_v23 = vpop.f32.mrb[13].mxu1 }
 0x112   :  { %v544_v7 = vadd.f32 %v543_v63, %v542_v52  ;;  %v654_v16 = vrot.slane %v653_v4, 2  ;;  %v569_v17 = vadd.f32 %v568_v6, %v567_v56  ;;  %v647_v19 = vrot.slane %v646_v8, 1  ;;  %v1129_v24 = vpop.f32.mrb[14].mxu0  ;;  %v1132_v29 = vpop.f32.mrb[14].mxu1 }
 0x113   :  { %v561_v20 = vrot.slane %v560_v9, 1  ;;  %v664_v21 = vadd.f32 %v663_v10, %v662_v61  ;;  %v672_v22 = vrot.slane %v671_v5, 2  ;;  %v552_v25 = vrot.slane %v551_v15, 1  ;;  %v1134_v30 = vpop.f32.mrb[15].mxu0  ;;  %v1136_v35 = vpop.f32.mrb[15].mxu1 }
 0x114   :  { %v655_v26 = vadd.f32 %v654_v16, %v653_v4  ;;  %v570_v27 = vrot.slane %v569_v17, 1  ;;  %v425_v28 = vadd.f32 %v424_v31, %v1065_v53  ;;  %v648_v32 = vadd.f32 %v647_v19, %v646_v8 }
 0x115   :  { %v562_v0 = vadd.f32 %v561_v20, %v560_v9  ;;  %v665_v33 = vrot.slane %v664_v21, 1  ;;  %v673_v12 = vadd.f32 %v672_v22, %v671_v5  ;;  %v553_v36 = vadd.f32 %v552_v25, %v551_v15 }
 0x116   :  { %v656_v37 = vrot.slane %v655_v26, 1  ;;  %v571_v38 = vadd.f32 %v570_v27, %v569_v17  ;;  %500 = vst [vmem:[%s1235_s3 + $0x20] sm:$0xff] %v425_v28  ;;  %v612_v41 = vmul.f32 %v425_v28, %v425_v28  ;;  %v713_v31 = vsel %vm712_vm1, %v544_v7, %v648_v32 }
 0x117   :  { %v666_v42 = vadd.f32 %v665_v33, %v664_v21  ;;  %v674_v43 = vrot.slane %v673_v12, 1  ;;  %v478_v44 = vadd.f32 %v1111_v13, %v1069_v58  ;;  %v427_v48 = vadd.f32 %v1113_v34, %v1072_v59 }
 0x118   :  { %v657_v47 = vadd.f32 %v656_v37, %v655_v26  ;;  %v480_v49 = vadd.f32 %v1115_v39, %v1080_v2  ;;  %v429_v50 = vadd.f32 %v1117_v40, %v1065_v53  ;;  %v482_v13 = vadd.f32 %v1119_v45, %v1069_v58 }
 0x119   :  { %v715_v52 = vsel %vm712_vm1, %v562_v0, %v666_v42  ;;  %v675_v54 = vadd.f32 %v674_v43, %v673_v12  ;;  %502 = vst [vmem:[%s1235_s3 + $0x30] sm:$0xff] %v478_v44  ;;  %v614_v55 = vmul.f32 %v478_v44, %v478_v44  ;;  %501 = vst [vmem:[%s1235_s3 + $0x28] sm:$0xff] %v427_v48 }
 0x11a   :  { %v714_v56 = vsel %vm712_vm1, %v553_v36, %v657_v47  ;;  %v613_v34 = vmul.f32 %v427_v48, %v427_v48  ;;  %503 = vst [vmem:[%s1235_s3 + $0x38] sm:$0xff] %v480_v49  ;;  %v615_v39 = vmul.f32 %v480_v49, %v480_v49  ;;  %508 = vst [vmem:[%s1235_s3 + $0x60] sm:$0xff] %v429_v50 }
 0x11b   :  { %v572_v40 = vadd.f32 %v429_v50, %v425_v28  ;;  %v729_v57 = vcombine.low %v713_v31, %v714_v56  ;;  %v716_v45 = vsel %vm712_vm1, %v571_v38, %v675_v54  ;;  %v620_v60 = vmul.f32 %v429_v50, %v429_v50  ;;  %510 = vst [vmem:[%s1235_s3 + $0x70] sm:$0xff] %v482_v13 }
 0x11c   :  { %v590_v61 = vadd.f32 %v482_v13, %v478_v44  ;;  %v730_v62 = vcombine.low %v715_v52, %v716_v45  ;;  %v622_v63 = vmul.f32 %v482_v13, %v482_v13  ;;  %v431_v3 = vadd.f32 %v1121_v46, %v1072_v59 }
 0x11d   :  { %v484_v4 = vadd.f32 %v1123_v51, %v1080_v2  ;;  %v737_v6 = vrot.slane %v729_v57, %v1077_v1  ;;  %v676_v8 = vadd.f32 %v620_v60, %v612_v41  ;;  %v435_v9 = vadd.f32 %v434_v14, %v1065_v53 }
 0x11e   :  { %v488_v10 = vadd.f32 %v487_v11, %v1069_v58  ;;  %v744_v5 = vrot.slane %v730_v62, %v1077_v1  ;;  %v694_v7 = vadd.f32 %v622_v63, %v614_v55  ;;  %509 = vst [vmem:[%s1235_s3 + $0x68] sm:$0xff] %v431_v3  ;;  %v581_v15 = vadd.f32 %v431_v3, %v427_v48 }
 0x11f   :  { %v621_v16 = vmul.f32 %v431_v3, %v431_v3  ;;  %511 = vst [vmem:[%s1235_s3 + $0x78] sm:$0xff] %v484_v4  ;;  %v599_v46 = vadd.f32 %v484_v4, %v480_v49  ;;  %v623_v51 = vmul.f32 %v484_v4, %v484_v4  ;;  %516 = vst [vmem:[%s1235_s3 + $0xa0] sm:$0xff] %v435_v9 }
 0x120   :  { %v573_v14 = vadd.f32 %v572_v40, %v435_v9  ;;  %v628_v17 = vmul.f32 %v435_v9, %v435_v9  ;;  %518 = vst [vmem:[%s1235_s3 + $0xb0] sm:$0xff] %v488_v10  ;;  %v745_v11 = vcombine.low %v737_v6, %v744_v5  ;;  %v591_v20 = vadd.f32 %v590_v61, %v488_v10 }
 0x121   :  { %v685_v19 = vadd.f32 %v621_v16, %v613_v34  ;;  %v630_v21 = vmul.f32 %v488_v10, %v488_v10  ;;  %v703_v22 = vadd.f32 %v623_v51, %v615_v39  ;;  %v437_v26 = vadd.f32 %v1125_v18, %v1072_v59 }
 0x122   :  { %v677_v25 = vadd.f32 %v676_v8, %v628_v17  ;;  %v490_v27 = vadd.f32 %v1127_v23, %v1080_v2  ;;  %v439_v32 = vadd.f32 %v1129_v24, %v1065_v53  ;;  %v492_v0 = vadd.f32 %v1132_v29, %v1069_v58  ;;  %767 = vst [vmem:[%s1236_s4] sm:$0xff] %v745_v11 }
 0x123   :  { %v695_v28 = vadd.f32 %v694_v7, %v630_v21  ;;  %517 = vst [vmem:[%s1235_s3 + $0xa8] sm:$0xff] %v437_v26  ;;  %v582_v33 = vadd.f32 %v581_v15, %v437_v26  ;;  %v629_v12 = vmul.f32 %v437_v26, %v437_v26  ;;  %v441_v38 = vadd.f32 %v1134_v30, %v1072_v59 }
 0x124   :  { %519 = vst [vmem:[%s1235_s3 + $0xb8] sm:$0xff] %v490_v27  ;;  %v600_v18 = vadd.f32 %v599_v46, %v490_v27  ;;  %v631_v36 = vmul.f32 %v490_v27, %v490_v27  ;;  %524 = vst [vmem:[%s1235_s3 + $0xe0] sm:$0xff] %v439_v32  ;;  %v574_v53 = vadd.f32 %v573_v14, %v439_v32 }
 0x125   :  { %v636_v58 = vmul.f32 %v439_v32, %v439_v32  ;;  %526 = vst [vmem:[%s1235_s3 + $0xf0] sm:$0xff] %v492_v0  ;;  %v592_v23 = vadd.f32 %v591_v20, %v492_v0  ;;  %v638_v24 = vmul.f32 %v492_v0, %v492_v0  ;;  %v686_v29 = vadd.f32 %v685_v19, %v629_v12 }
 0x126   :  { %v704_v37 = vadd.f32 %v703_v22, %v631_v36  ;;  %v494_v41 = vadd.f32 %v1136_v35, %v1080_v2  ;;  %v575_v31 = vrot.slane %v574_v53, 4  ;;  %525 = vst [vmem:[%s1235_s3 + $0xe8] sm:$0xff] %v441_v38  ;;  %v583_v47 = vadd.f32 %v582_v33, %v441_v38 }
 0x127   :  { %v678_v42 = vadd.f32 %v677_v25, %v636_v58  ;;  %v593_v43 = vrot.slane %v592_v23, 4  ;;  %v696_v44 = vadd.f32 %v695_v28, %v638_v24  ;;  %v637_v48 = vmul.f32 %v441_v38, %v441_v38 }
 0x128   :  { %527 = vst [vmem:[%s1235_s3 + $0xf8] sm:$0xff] %v494_v41  ;;  %v601_v49 = vadd.f32 %v600_v18, %v494_v41  ;;  %v639_v50 = vmul.f32 %v494_v41, %v494_v41  ;;  %v576_v59 = vadd.f32 %v575_v31, %v574_v53  ;;  %v584_v35 = vrot.slane %v583_v47, 4 }
 0x129   :  { %v679_v30 = vrot.slane %v678_v42, 4  ;;  %v594_v52 = vadd.f32 %v593_v43, %v592_v23  ;;  %v697_v2 = vrot.slane %v696_v44, 4  ;;  %v687_v54 = vadd.f32 %v686_v29, %v637_v48 }
 0x12a   :  { %v602_v55 = vrot.slane %v601_v49, 4  ;;  %v705_v13 = vadd.f32 %v704_v37, %v639_v50  ;;  %v577_v56 = vrot.slane %v576_v59, 2  ;;  %v585_v57 = vadd.f32 %v584_v35, %v583_v47 }
 0x12b   :  { %v680_v34 = vadd.f32 %v679_v30, %v678_v42  ;;  %v595_v39 = vrot.slane %v594_v52, 2  ;;  %v698_v40 = vadd.f32 %v697_v2, %v696_v44  ;;  %v688_v45 = vrot.slane %v687_v54, 4 }
 0x12c   :  { %v603_v60 = vadd.f32 %v602_v55, %v601_v49  ;;  %v706_v61 = vrot.slane %v705_v13, 4  ;;  %v578_v62 = vadd.f32 %v577_v56, %v576_v59  ;;  %v586_v6 = vrot.slane %v585_v57, 2 }
 0x12d   :  { %v681_v63 = vrot.slane %v680_v34, 2  ;;  %v596_v3 = vadd.f32 %v595_v39, %v594_v52  ;;  %v699_v4 = vrot.slane %v698_v40, 2  ;;  %v689_v8 = vadd.f32 %v688_v45, %v687_v54 }
 0x12e   :  { %v604_v9 = vrot.slane %v603_v60, 2  ;;  %v707_v10 = vadd.f32 %v706_v61, %v705_v13  ;;  %v579_v5 = vrot.slane %v578_v62, 1  ;;  %v587_v46 = vadd.f32 %v586_v6, %v585_v57 }
 0x12f   :  { %v682_v7 = vadd.f32 %v681_v63, %v680_v34  ;;  %v597_v15 = vrot.slane %v596_v3, 1  ;;  %v700_v16 = vadd.f32 %v699_v4, %v698_v40  ;;  %v690_v51 = vrot.slane %v689_v8, 2 }
 0x130   :  { %v605_v14 = vadd.f32 %v604_v9, %v603_v60  ;;  %v708_v17 = vrot.slane %v707_v10, 2  ;;  %v588_v20 = vrot.slane %v587_v46, 1  ;;  %v580_v26 = vadd.f32 %v579_v5, %v578_v62 }
 0x131   :  { %v683_v11 = vrot.slane %v682_v7, 1  ;;  %v701_v19 = vrot.slane %v700_v16, 1  ;;  %v691_v21 = vadd.f32 %v690_v51, %v689_v8  ;;  %v598_v28 = vadd.f32 %v597_v15, %v596_v3 }
 0x132   :  { %v606_v22 = vrot.slane %v605_v14, 1  ;;  %v709_v25 = vadd.f32 %v708_v17, %v707_v10  ;;  %v589_v36 = vadd.f32 %v588_v20, %v587_v46 }
 0x133   :  { %v684_v27 = vadd.f32 %v683_v11, %v682_v7  ;;  %v702_v32 = vadd.f32 %v701_v19, %v700_v16  ;;  %v692_v0 = vrot.slane %v691_v21, 1 }
 0x134   :  { %v710_v33 = vrot.slane %v709_v25, 1  ;;  %v607_v58 = vadd.f32 %v606_v22, %v605_v14 }
 0x135   :  { %v717_v12 = vsel %vm712_vm1, %v580_v26, %v684_v27  ;;  %v719_v18 = vsel %vm712_vm1, %v598_v28, %v702_v32  ;;  %v693_v53 = vadd.f32 %v692_v0, %v691_v21 }
 0x136   :  { %v711_v23 = vadd.f32 %v710_v33, %v709_v25 }
 0x137   :  { %v718_v24 = vsel %vm712_vm1, %v589_v36, %v693_v53 }
 0x138   :  { %v720_v29 = vsel %vm712_vm1, %v607_v58, %v711_v23  ;;  %v746_v37 = vcombine.low %v717_v12, %v718_v24 }
 0x139   :  { %v747_v38 = vcombine.low %v719_v18, %v720_v29 }
 0x13a   :  { %v754_v41 = vrot.slane %v746_v37, %v1077_v1 }
 0x13b   :  { %v761_v31 = vrot.slane %v747_v38, %v1077_v1 }
 0x13d   :  { %v762_v42 = vcombine.low %v754_v41, %v761_v31 }
 0x13f   :  { %768 = vst [vmem:[%s1236_s4 + $0x8] sm:$0xff] %v762_v42 }
 0x140   :  { %777 = vsyncpa [#allocation3], 1 }

// kernel: generator_forward.12
= control target key start
LH: loop header
LB: loop body
LE: loop exit
PB: predicated region body
PF: predicated region fallthrough
CT: control target
= control target key end

     0   :  { %v82_v0 = vlaneseq  ;;  %s1182_s1 = inlined_call_operand.vmem [shape: f32[1,2048], index: 1, kind: input, shape index: {}]   ;;  %s1183_s2 = inlined_call_operand.vmem [shape: f32[1,2048], index: 2, kind: input, shape index: {}]   ;;  %s1184_s0 = inlined_call_operand.vmem [shape: f32[32,2048], index: 0, kind: input, shape index: {}]   ;;  %s1185_s3 = inlined_call_operand.vmem [shape: f32[32,2048], index: 3, kind: output, shape index: {}]  }
   0x1   :  { %v78_v2 = vld [vmem:[%s1182_s1] sm:$0xff]  ;;  %v15_v9 = vld [vmem:[%s1184_s0 + $0x8] sm:$0xff]  ;;  %v16_v18 = vld [vmem:[%s1184_s0 + $0x10] sm:$0xff] }
   0x2   :  { %v83_v1 = vshrl.u32 %v82_v0, 7  ;;  %v226_v3 = vld [vmem:[%s1183_s2] sm:$0xff]  ;;  %v17_v19 = vld [vmem:[%s1184_s0 + $0x18] sm:$0xff]  ;;  %v19_v29 = vld [vmem:[%s1184_s0 + $0x28] sm:$0xff] }
   0x3   :  { %v14_v8 = vld [vmem:[%s1184_s0] sm:$0xff]  ;;  %v20_v34 = vld [vmem:[%s1184_s0 + $0x30] sm:$0xff]  ;;  %v624_v43 = vld [vmem:[%s1182_s1 + $0x8] sm:$0xff] }
   0x4   :  { %v532_v4 = vsub.s32 0, %v83_v1  ;;  %v534_v5 = vsub.s32 1, %v83_v1  ;;  %v536_v6 = vsub.s32 2, %v83_v1  ;;  %v538_v7 = vsub.s32 3, %v83_v1  ;;  %v18_v24 = vld [vmem:[%s1184_s0 + $0x20] sm:$0xff]  ;;  %v21_v48 = vld [vmem:[%s1184_s0 + $0x38] sm:$0xff] }
   0x5   :  { %v546_v10 = vsub.s32 4, %v83_v1  ;;  %v548_v11 = vsub.s32 5, %v83_v1  ;;  %v550_v12 = vsub.s32 6, %v83_v1  ;;  %v552_v13 = vsub.s32 7, %v83_v1  ;;  %v634_v49 = vld [vmem:[%s1183_s2 + $0x8] sm:$0xff]  ;;  %v22_v54 = vld [vmem:[%s1184_s0 + $0x40] sm:$0xff] }
   0x6   :  { %v555_v14 = vrot.slane %v78_v2, %v532_v4  ;;  %v558_v15 = vrot.slane %v226_v3, %v532_v4  ;;  %v561_v16 = vrot.slane %v78_v2, %v534_v5  ;;  %v564_v17 = vrot.slane %v226_v3, %v534_v5  ;;  %v23_v59 = vld [vmem:[%s1184_s0 + $0x48] sm:$0xff]  ;;  %v24_v0 = vld [vmem:[%s1184_s0 + $0x50] sm:$0xff] }
   0x7   :  { %v573_v20 = vrot.slane %v78_v2, %v536_v6  ;;  %v576_v21 = vrot.slane %v226_v3, %v536_v6  ;;  %v579_v22 = vrot.slane %v78_v2, %v538_v7  ;;  %v582_v23 = vrot.slane %v226_v3, %v538_v7 }
   0x8   :  { %v162_v25 = vmul.f32 %v555_v14, %v14_v8  ;;  %v163_v26 = vmul.f32 %v561_v16, %v15_v9  ;;  %v590_v27 = vrot.slane %v78_v2, %v546_v10  ;;  %v593_v28 = vrot.slane %v226_v3, %v546_v10  ;;  %v25_v8 = vld [vmem:[%s1184_s0 + $0x58] sm:$0xff] }
   0x9   :  { %v164_v30 = vmul.f32 %v573_v20, %v16_v18  ;;  %v165_v31 = vmul.f32 %v579_v22, %v17_v19  ;;  %v601_v32 = vrot.slane %v78_v2, %v548_v11  ;;  %v604_v33 = vrot.slane %v226_v3, %v548_v11 }
   0xa   :  { %v310_v35 = vadd.f32 %v558_v15, %v162_v25  ;;  %v311_v36 = vadd.f32 %v564_v17, %v163_v26  ;;  %v166_v37 = vmul.f32 %v590_v27, %v18_v24  ;;  %v613_v38 = vrot.slane %v78_v2, %v550_v12  ;;  %v26_v24 = vld [vmem:[%s1184_s0 + $0x60] sm:$0xff] }
   0xb   :  { %v312_v39 = vadd.f32 %v576_v21, %v164_v30  ;;  %v313_v40 = vadd.f32 %v582_v23, %v165_v31  ;;  %v167_v41 = vmul.f32 %v601_v32, %v19_v29  ;;  %v619_v42 = vrot.slane %v226_v3, %v550_v12 }
   0xc   :  { %v374_v44 = vmax.f32 %v310_v35, 0.0  ;;  %v375_v45 = vmax.f32 %v311_v36, 0.0  ;;  %v314_v46 = vadd.f32 %v593_v28, %v166_v37  ;;  %v168_v47 = vmul.f32 %v613_v38, %v20_v34  ;;  %v27_v36 = vld [vmem:[%s1184_s0 + $0x68] sm:$0xff] }
   0xd   :  { %v376_v50 = vmax.f32 %v312_v39, 0.0  ;;  %v377_v51 = vmax.f32 %v313_v40, 0.0  ;;  %v315_v52 = vadd.f32 %v604_v33, %v167_v41  ;;  %v638_v53 = vrot.slane %v78_v2, %v552_v13  ;;  %v28_v41 = vld [vmem:[%s1184_s0 + $0x70] sm:$0xff] }
   0xe   :  { %438 = vst [vmem:[%s1185_s3] sm:$0xff] %v374_v44  ;;  %439 = vst [vmem:[%s1185_s3 + $0x8] sm:$0xff] %v375_v45  ;;  %v378_v55 = vmax.f32 %v314_v46, 0.0  ;;  %v316_v56 = vadd.f32 %v619_v42, %v168_v47  ;;  %v651_v57 = vrot.slane %v226_v3, %v552_v13  ;;  %v655_v58 = vrot.slane %v624_v43, %v532_v4  ;;  %v30_v47 = vld [vmem:[%s1184_s0 + $0x80] sm:$0xff] }
   0xf   :  { %440 = vst [vmem:[%s1185_s3 + $0x10] sm:$0xff] %v376_v50  ;;  %441 = vst [vmem:[%s1185_s3 + $0x18] sm:$0xff] %v377_v51  ;;  %v379_v60 = vmax.f32 %v315_v52, 0.0  ;;  %v169_v61 = vmul.f32 %v638_v53, %v21_v48  ;;  %v669_v62 = vrot.slane %v634_v49, %v532_v4  ;;  %v673_v63 = vrot.slane %v624_v43, %v534_v5  ;;  %v31_v48 = vld [vmem:[%s1184_s0 + $0x88] sm:$0xff] }
  0x10   :  { %442 = vst [vmem:[%s1185_s3 + $0x20] sm:$0xff] %v378_v55  ;;  %v380_v1 = vmax.f32 %v316_v56, 0.0  ;;  %v170_v2 = vmul.f32 %v655_v58, %v22_v54  ;;  %v684_v3 = vrot.slane %v634_v49, %v534_v5  ;;  %v688_v4 = vrot.slane %v624_v43, %v536_v6  ;;  %v29_v54 = vld [vmem:[%s1184_s0 + $0x78] sm:$0xff]  ;;  %v32_v55 = vld [vmem:[%s1184_s0 + $0x90] sm:$0xff] }
  0x11   :  { %443 = vst [vmem:[%s1185_s3 + $0x28] sm:$0xff] %v379_v60  ;;  %v317_v9 = vadd.f32 %v651_v57, %v169_v61  ;;  %v171_v18 = vmul.f32 %v673_v63, %v23_v59  ;;  %v700_v5 = vrot.slane %v634_v49, %v536_v6  ;;  %v704_v19 = vrot.slane %v624_v43, %v538_v7  ;;  %v33_v56 = vld [vmem:[%s1184_s0 + $0x98] sm:$0xff] }
  0x12   :  { %444 = vst [vmem:[%s1185_s3 + $0x30] sm:$0xff] %v380_v1  ;;  %v318_v25 = vadd.f32 %v669_v62, %v170_v2  ;;  %v172_v26 = vmul.f32 %v688_v4, %v24_v0  ;;  %v716_v6 = vrot.slane %v634_v49, %v538_v7  ;;  %v720_v29 = vrot.slane %v624_v43, %v546_v10  ;;  %v34_v0 = vld [vmem:[%s1184_s0 + $0xa0] sm:$0xff] }
  0x13   :  { %v381_v30 = vmax.f32 %v317_v9, 0.0  ;;  %v319_v31 = vadd.f32 %v684_v3, %v171_v18  ;;  %v173_v34 = vmul.f32 %v704_v19, %v25_v8  ;;  %v726_v35 = vrot.slane %v634_v49, %v546_v10 }
  0x14   :  { %v382_v37 = vmax.f32 %v318_v25, 0.0  ;;  %v320_v7 = vadd.f32 %v700_v5, %v172_v26  ;;  %v174_v39 = vmul.f32 %v720_v29, %v26_v24  ;;  %v735_v40 = vrot.slane %v624_v43, %v548_v11  ;;  %v35_v24 = vld [vmem:[%s1184_s0 + $0xa8] sm:$0xff] }
  0x15   :  { %445 = vst [vmem:[%s1185_s3 + $0x38] sm:$0xff] %v381_v30  ;;  %v383_v10 = vmax.f32 %v319_v31, 0.0  ;;  %v321_v44 = vadd.f32 %v716_v6, %v173_v34  ;;  %v746_v45 = vrot.slane %v634_v49, %v548_v11  ;;  %v750_v46 = vrot.slane %v624_v43, %v550_v12  ;;  %v36_v34 = vld [vmem:[%s1184_s0 + $0xb0] sm:$0xff] }
  0x16   :  { %446 = vst [vmem:[%s1185_s3 + $0x40] sm:$0xff] %v382_v37  ;;  %v384_v50 = vmax.f32 %v320_v7, 0.0  ;;  %v322_v11 = vadd.f32 %v726_v35, %v174_v39  ;;  %v175_v51 = vmul.f32 %v735_v40, %v27_v36  ;;  %v765_v52 = vrot.slane %v634_v49, %v550_v12 }
  0x17   :  { %447 = vst [vmem:[%s1185_s3 + $0x48] sm:$0xff] %v383_v10  ;;  %v385_v59 = vmax.f32 %v321_v44, 0.0  ;;  %v176_v12 = vmul.f32 %v750_v46, %v28_v41  ;;  %v782_v60 = vrot.slane %v624_v43, %v552_v13  ;;  %v786_v61 = vrot.slane %v634_v49, %v552_v13  ;;  %v37_v41 = vld [vmem:[%s1184_s0 + $0xb8] sm:$0xff]  ;;  %v38_v10 = vld [vmem:[%s1184_s0 + $0xc0] sm:$0xff] }
  0x18   :  { %448 = vst [vmem:[%s1185_s3 + $0x50] sm:$0xff] %v384_v50  ;;  %v386_v1 = vmax.f32 %v322_v11, 0.0  ;;  %v323_v2 = vadd.f32 %v746_v45, %v175_v51  ;;  %v178_v8 = vmul.f32 %v555_v14, %v30_v47  ;;  %v179_v43 = vmul.f32 %v561_v16, %v31_v48  ;;  %v39_v11 = vld [vmem:[%s1184_s0 + $0xc8] sm:$0xff]  ;;  %v40_v51 = vld [vmem:[%s1184_s0 + $0xd0] sm:$0xff] }
  0x19   :  { %449 = vst [vmem:[%s1185_s3 + $0x58] sm:$0xff] %v385_v59  ;;  %v324_v13 = vadd.f32 %v765_v52, %v176_v12  ;;  %v177_v49 = vmul.f32 %v782_v60, %v29_v54  ;;  %v180_v9 = vmul.f32 %v573_v20, %v32_v55  ;;  %v181_v18 = vmul.f32 %v579_v22, %v33_v56  ;;  %v41_v54 = vld [vmem:[%s1184_s0 + $0xd8] sm:$0xff] }
  0x1a   :  { %450 = vst [vmem:[%s1185_s3 + $0x60] sm:$0xff] %v386_v1  ;;  %v387_v25 = vmax.f32 %v323_v2, 0.0  ;;  %v326_v26 = vadd.f32 %v558_v15, %v178_v8  ;;  %v327_v30 = vadd.f32 %v564_v17, %v179_v43  ;;  %v182_v31 = vmul.f32 %v590_v27, %v34_v0  ;;  %v42_v0 = vld [vmem:[%s1184_s0 + $0xe0] sm:$0xff] }
  0x1b   :  { %v388_v36 = vmax.f32 %v324_v13, 0.0  ;;  %v325_v37 = vadd.f32 %v786_v61, %v177_v49  ;;  %v328_v7 = vadd.f32 %v576_v21, %v180_v9  ;;  %v329_v39 = vadd.f32 %v582_v23, %v181_v18 }
  0x1c   :  { %451 = vst [vmem:[%s1185_s3 + $0x68] sm:$0xff] %v387_v25  ;;  %v390_v44 = vmax.f32 %v326_v26, 0.0  ;;  %v391_v47 = vmax.f32 %v327_v30, 0.0  ;;  %v330_v48 = vadd.f32 %v593_v28, %v182_v31  ;;  %v183_v50 = vmul.f32 %v601_v32, %v35_v24  ;;  %v43_v24 = vld [vmem:[%s1184_s0 + $0xe8] sm:$0xff] }
  0x1d   :  { %452 = vst [vmem:[%s1185_s3 + $0x70] sm:$0xff] %v388_v36  ;;  %v389_v55 = vmax.f32 %v325_v37, 0.0  ;;  %v392_v56 = vmax.f32 %v328_v7, 0.0  ;;  %v393_v59 = vmax.f32 %v329_v39, 0.0  ;;  %v184_v12 = vmul.f32 %v613_v38, %v36_v34  ;;  %v44_v34 = vld [vmem:[%s1184_s0 + $0xf0] sm:$0xff] }
  0x1e   :  { %454 = vst [vmem:[%s1185_s3 + $0x80] sm:$0xff] %v390_v44  ;;  %455 = vst [vmem:[%s1185_s3 + $0x88] sm:$0xff] %v391_v47  ;;  %v394_v1 = vmax.f32 %v330_v48, 0.0  ;;  %v331_v2 = vadd.f32 %v604_v33, %v183_v50  ;;  %v185_v8 = vmul.f32 %v638_v53, %v37_v41  ;;  %v186_v43 = vmul.f32 %v655_v58, %v38_v10  ;;  %v45_v41 = vld [vmem:[%s1184_s0 + $0xf8] sm:$0xff]  ;;  %v46_v10 = vld [vmem:[%s1184_s0 + $0x100] sm:$0xff] }
  0x1f   :  { %453 = vst [vmem:[%s1185_s3 + $0x78] sm:$0xff] %v389_v55  ;;  %456 = vst [vmem:[%s1185_s3 + $0x90] sm:$0xff] %v392_v56  ;;  %v332_v13 = vadd.f32 %v619_v42, %v184_v12  ;;  %v187_v49 = vmul.f32 %v673_v63, %v39_v11  ;;  %v188_v9 = vmul.f32 %v688_v4, %v40_v51  ;;  %v47_v11 = vld [vmem:[%s1184_s0 + $0x108] sm:$0xff]  ;;  %v48_v51 = vld [vmem:[%s1184_s0 + $0x110] sm:$0xff] }
  0x20   :  { %457 = vst [vmem:[%s1185_s3 + $0x98] sm:$0xff] %v393_v59  ;;  %v189_v18 = vmul.f32 %v704_v19, %v41_v54  ;;  %458 = vst [vmem:[%s1185_s3 + $0xa0] sm:$0xff] %v394_v1  ;;  %v395_v25 = vmax.f32 %v331_v2, 0.0  ;;  %v333_v26 = vadd.f32 %v651_v57, %v185_v8  ;;  %v334_v30 = vadd.f32 %v669_v62, %v186_v43  ;;  %v49_v54 = vld [vmem:[%s1184_s0 + $0x118] sm:$0xff] }
  0x21   :  { %v190_v31 = vmul.f32 %v720_v29, %v42_v0  ;;  %v396_v36 = vmax.f32 %v332_v13, 0.0  ;;  %v335_v37 = vadd.f32 %v684_v3, %v187_v49  ;;  %v336_v7 = vadd.f32 %v700_v5, %v188_v9  ;;  %v50_v0 = vld [vmem:[%s1184_s0 + $0x120] sm:$0xff] }
  0x22   :  { %v337_v39 = vadd.f32 %v716_v6, %v189_v18  ;;  %459 = vst [vmem:[%s1185_s3 + $0xa8] sm:$0xff] %v395_v25  ;;  %v397_v44 = vmax.f32 %v333_v26, 0.0  ;;  %v398_v47 = vmax.f32 %v334_v30, 0.0  ;;  %v191_v50 = vmul.f32 %v735_v40, %v43_v24  ;;  %v51_v24 = vld [vmem:[%s1184_s0 + $0x128] sm:$0xff] }
  0x23   :  { %v338_v48 = vadd.f32 %v726_v35, %v190_v31  ;;  %460 = vst [vmem:[%s1185_s3 + $0xb0] sm:$0xff] %v396_v36  ;;  %v399_v55 = vmax.f32 %v335_v37, 0.0  ;;  %v400_v56 = vmax.f32 %v336_v7, 0.0  ;;  %v192_v12 = vmul.f32 %v750_v46, %v44_v34  ;;  %v52_v34 = vld [vmem:[%s1184_s0 + $0x130] sm:$0xff] }
  0x24   :  { %v401_v59 = vmax.f32 %v337_v39, 0.0  ;;  %461 = vst [vmem:[%s1185_s3 + $0xb8] sm:$0xff] %v397_v44  ;;  %462 = vst [vmem:[%s1185_s3 + $0xc0] sm:$0xff] %v398_v47  ;;  %v339_v2 = vadd.f32 %v746_v45, %v191_v50  ;;  %v193_v8 = vmul.f32 %v782_v60, %v45_v41  ;;  %v194_v43 = vmul.f32 %v555_v14, %v46_v10  ;;  %v53_v41 = vld [vmem:[%s1184_s0 + $0x138] sm:$0xff]  ;;  %v54_v10 = vld [vmem:[%s1184_s0 + $0x140] sm:$0xff] }
  0x25   :  { %v402_v1 = vmax.f32 %v338_v48, 0.0  ;;  %463 = vst [vmem:[%s1185_s3 + $0xc8] sm:$0xff] %v399_v55  ;;  %464 = vst [vmem:[%s1185_s3 + $0xd0] sm:$0xff] %v400_v56  ;;  %v340_v13 = vadd.f32 %v765_v52, %v192_v12  ;;  %v195_v49 = vmul.f32 %v561_v16, %v47_v11  ;;  %v196_v9 = vmul.f32 %v573_v20, %v48_v51  ;;  %v55_v11 = vld [vmem:[%s1184_s0 + $0x148] sm:$0xff]  ;;  %v56_v51 = vld [vmem:[%s1184_s0 + $0x150] sm:$0xff] }
  0x26   :  { %465 = vst [vmem:[%s1185_s3 + $0xd8] sm:$0xff] %v401_v59  ;;  %v197_v18 = vmul.f32 %v579_v22, %v49_v54  ;;  %v403_v25 = vmax.f32 %v339_v2, 0.0  ;;  %v341_v26 = vadd.f32 %v786_v61, %v193_v8  ;;  %v342_v30 = vadd.f32 %v558_v15, %v194_v43  ;;  %v57_v54 = vld [vmem:[%s1184_s0 + $0x158] sm:$0xff] }
  0x27   :  { %466 = vst [vmem:[%s1185_s3 + $0xe0] sm:$0xff] %v402_v1  ;;  %v198_v31 = vmul.f32 %v590_v27, %v50_v0  ;;  %v404_v36 = vmax.f32 %v340_v13, 0.0  ;;  %v343_v37 = vadd.f32 %v564_v17, %v195_v49  ;;  %v344_v7 = vadd.f32 %v576_v21, %v196_v9  ;;  %v58_v0 = vld [vmem:[%s1184_s0 + $0x160] sm:$0xff] }
  0x28   :  { %v345_v39 = vadd.f32 %v582_v23, %v197_v18  ;;  %467 = vst [vmem:[%s1185_s3 + $0xe8] sm:$0xff] %v403_v25  ;;  %v405_v44 = vmax.f32 %v341_v26, 0.0  ;;  %v406_v47 = vmax.f32 %v342_v30, 0.0  ;;  %v199_v50 = vmul.f32 %v601_v32, %v51_v24  ;;  %v59_v24 = vld [vmem:[%s1184_s0 + $0x168] sm:$0xff] }
  0x29   :  { %v346_v48 = vadd.f32 %v593_v28, %v198_v31  ;;  %468 = vst [vmem:[%s1185_s3 + $0xf0] sm:$0xff] %v404_v36  ;;  %v407_v55 = vmax.f32 %v343_v37, 0.0  ;;  %v408_v56 = vmax.f32 %v344_v7, 0.0  ;;  %v200_v12 = vmul.f32 %v613_v38, %v52_v34  ;;  %v60_v34 = vld [vmem:[%s1184_s0 + $0x170] sm:$0xff] }
  0x2a   :  { %v409_v59 = vmax.f32 %v345_v39, 0.0  ;;  %469 = vst [vmem:[%s1185_s3 + $0xf8] sm:$0xff] %v405_v44  ;;  %470 = vst [vmem:[%s1185_s3 + $0x100] sm:$0xff] %v406_v47  ;;  %v347_v2 = vadd.f32 %v604_v33, %v199_v50  ;;  %v201_v8 = vmul.f32 %v638_v53, %v53_v41  ;;  %v202_v43 = vmul.f32 %v655_v58, %v54_v10  ;;  %v61_v41 = vld [vmem:[%s1184_s0 + $0x178] sm:$0xff]  ;;  %v62_v10 = vld [vmem:[%s1184_s0 + $0x180] sm:$0xff] }
  0x2b   :  { %v410_v1 = vmax.f32 %v346_v48, 0.0  ;;  %471 = vst [vmem:[%s1185_s3 + $0x108] sm:$0xff] %v407_v55  ;;  %472 = vst [vmem:[%s1185_s3 + $0x110] sm:$0xff] %v408_v56  ;;  %v348_v13 = vadd.f32 %v619_v42, %v200_v12  ;;  %v203_v49 = vmul.f32 %v673_v63, %v55_v11  ;;  %v204_v9 = vmul.f32 %v688_v4, %v56_v51  ;;  %v63_v11 = vld [vmem:[%s1184_s0 + $0x188] sm:$0xff]  ;;  %v64_v51 = vld [vmem:[%s1184_s0 + $0x190] sm:$0xff] }
  0x2c   :  { %473 = vst [vmem:[%s1185_s3 + $0x118] sm:$0xff] %v409_v59  ;;  %v205_v18 = vmul.f32 %v704_v19, %v57_v54  ;;  %v411_v25 = vmax.f32 %v347_v2, 0.0  ;;  %v349_v26 = vadd.f32 %v651_v57, %v201_v8  ;;  %v350_v30 = vadd.f32 %v669_v62, %v202_v43  ;;  %v65_v54 = vld [vmem:[%s1184_s0 + $0x198] sm:$0xff] }
  0x2d   :  { %474 = vst [vmem:[%s1185_s3 + $0x120] sm:$0xff] %v410_v1  ;;  %v206_v31 = vmul.f32 %v720_v29, %v58_v0  ;;  %v412_v36 = vmax.f32 %v348_v13, 0.0  ;;  %v351_v37 = vadd.f32 %v684_v3, %v203_v49  ;;  %v352_v7 = vadd.f32 %v700_v5, %v204_v9  ;;  %v66_v0 = vld [vmem:[%s1184_s0 + $0x1a0] sm:$0xff] }
  0x2e   :  { %v353_v39 = vadd.f32 %v716_v6, %v205_v18  ;;  %475 = vst [vmem:[%s1185_s3 + $0x128] sm:$0xff] %v411_v25  ;;  %v413_v44 = vmax.f32 %v349_v26, 0.0  ;;  %v414_v47 = vmax.f32 %v350_v30, 0.0  ;;  %v207_v50 = vmul.f32 %v735_v40, %v59_v24  ;;  %v67_v18 = vld [vmem:[%s1184_s0 + $0x1a8] sm:$0xff] }
  0x2f   :  { %v354_v48 = vadd.f32 %v726_v35, %v206_v31  ;;  %476 = vst [vmem:[%s1185_s3 + $0x130] sm:$0xff] %v412_v36  ;;  %v415_v55 = vmax.f32 %v351_v37, 0.0  ;;  %v416_v56 = vmax.f32 %v352_v7, 0.0  ;;  %v208_v12 = vmul.f32 %v750_v46, %v60_v34  ;;  %v69_v36 = vld [vmem:[%s1184_s0 + $0x1b8] sm:$0xff]  ;;  %v72_v7 = vld [vmem:[%s1184_s0 + $0x1d0] sm:$0xff] }
  0x30   :  { %v417_v59 = vmax.f32 %v353_v39, 0.0  ;;  %477 = vst [vmem:[%s1185_s3 + $0x138] sm:$0xff] %v413_v44  ;;  %478 = vst [vmem:[%s1185_s3 + $0x140] sm:$0xff] %v414_v47  ;;  %v355_v2 = vadd.f32 %v746_v45, %v207_v50  ;;  %v209_v8 = vmul.f32 %v782_v60, %v61_v41  ;;  %v210_v43 = vmul.f32 %v555_v14, %v62_v10  ;;  %v73_v39 = vld [vmem:[%s1184_s0 + $0x1d8] sm:$0xff]  ;;  %v74_v44 = vld [vmem:[%s1184_s0 + $0x1e0] sm:$0xff] }
  0x31   :  { %v418_v1 = vmax.f32 %v354_v48, 0.0  ;;  %479 = vst [vmem:[%s1185_s3 + $0x148] sm:$0xff] %v415_v55  ;;  %480 = vst [vmem:[%s1185_s3 + $0x150] sm:$0xff] %v416_v56  ;;  %v356_v13 = vadd.f32 %v765_v52, %v208_v12  ;;  %v211_v49 = vmul.f32 %v561_v16, %v63_v11  ;;  %v212_v9 = vmul.f32 %v573_v20, %v64_v51  ;;  %v68_v16 = vld [vmem:[%s1184_s0 + $0x1b0] sm:$0xff]  ;;  %v75_v51 = vld [vmem:[%s1184_s0 + $0x1e8] sm:$0xff] }
  0x32   :  { %481 = vst [vmem:[%s1185_s3 + $0x158] sm:$0xff] %v417_v59  ;;  %v213_v14 = vmul.f32 %v579_v22, %v65_v54  ;;  %v419_v24 = vmax.f32 %v355_v2, 0.0  ;;  %v357_v25 = vadd.f32 %v786_v61, %v209_v8  ;;  %v358_v26 = vadd.f32 %v558_v15, %v210_v43  ;;  %v70_v15 = vld [vmem:[%s1184_s0 + $0x1c0] sm:$0xff] }
  0x33   :  { %482 = vst [vmem:[%s1185_s3 + $0x160] sm:$0xff] %v418_v1  ;;  %v214_v30 = vmul.f32 %v590_v27, %v66_v0  ;;  %v420_v20 = vmax.f32 %v356_v13, 0.0  ;;  %v359_v22 = vadd.f32 %v564_v17, %v211_v49  ;;  %v360_v31 = vadd.f32 %v576_v21, %v212_v9  ;;  %v77_v0 = vld [vmem:[%s1184_s0 + $0x1f8] sm:$0xff] }
  0x34   :  { %v361_v34 = vadd.f32 %v582_v23, %v213_v14  ;;  %483 = vst [vmem:[%s1185_s3 + $0x168] sm:$0xff] %v419_v24  ;;  %v421_v27 = vmax.f32 %v357_v25, 0.0  ;;  %v422_v37 = vmax.f32 %v358_v26, 0.0  ;;  %v215_v21 = vmul.f32 %v601_v32, %v67_v18  ;;  %v71_v23 = vld [vmem:[%s1184_s0 + $0x1c8] sm:$0xff] }
  0x35   :  { %v362_v17 = vadd.f32 %v593_v28, %v214_v30  ;;  %484 = vst [vmem:[%s1185_s3 + $0x170] sm:$0xff] %v420_v20  ;;  %v423_v41 = vmax.f32 %v359_v22, 0.0  ;;  %v424_v28 = vmax.f32 %v360_v31, 0.0  ;;  %v216_v32 = vmul.f32 %v613_v38, %v68_v16 }
  0x36   :  { %v425_v10 = vmax.f32 %v361_v34, 0.0  ;;  %485 = vst [vmem:[%s1185_s3 + $0x178] sm:$0xff] %v421_v27  ;;  %486 = vst [vmem:[%s1185_s3 + $0x180] sm:$0xff] %v422_v37  ;;  %v363_v48 = vadd.f32 %v604_v33, %v215_v21  ;;  %v217_v50 = vmul.f32 %v638_v53, %v69_v36  ;;  %v218_v11 = vmul.f32 %v655_v58, %v70_v15 }
  0x37   :  { %v426_v47 = vmax.f32 %v362_v17, 0.0  ;;  %487 = vst [vmem:[%s1185_s3 + $0x188] sm:$0xff] %v423_v41  ;;  %488 = vst [vmem:[%s1185_s3 + $0x190] sm:$0xff] %v424_v28  ;;  %v364_v38 = vadd.f32 %v619_v42, %v216_v32  ;;  %v219_v33 = vmul.f32 %v673_v63, %v71_v23  ;;  %v220_v53 = vmul.f32 %v688_v4, %v72_v7  ;;  %v76_v63 = vld [vmem:[%s1184_s0 + $0x1f0] sm:$0xff] }
  0x38   :  { %489 = vst [vmem:[%s1185_s3 + $0x198] sm:$0xff] %v425_v10  ;;  %v221_v58 = vmul.f32 %v704_v19, %v73_v39  ;;  %v427_v54 = vmax.f32 %v363_v48, 0.0  ;;  %v365_v55 = vadd.f32 %v651_v57, %v217_v50  ;;  %v366_v56 = vadd.f32 %v669_v62, %v218_v11 }
  0x39   :  { %490 = vst [vmem:[%s1185_s3 + $0x1a0] sm:$0xff] %v426_v47  ;;  %v222_v42 = vmul.f32 %v720_v29, %v74_v44  ;;  %v428_v4 = vmax.f32 %v364_v38, 0.0  ;;  %v367_v19 = vadd.f32 %v684_v3, %v219_v33  ;;  %v368_v59 = vadd.f32 %v700_v5, %v220_v53 }
  0x3a   :  { %v369_v12 = vadd.f32 %v716_v6, %v221_v58  ;;  %491 = vst [vmem:[%s1185_s3 + $0x1a8] sm:$0xff] %v427_v54  ;;  %v429_v57 = vmax.f32 %v365_v55, 0.0  ;;  %v430_v62 = vmax.f32 %v366_v56, 0.0  ;;  %v223_v1 = vmul.f32 %v735_v40, %v75_v51 }
  0x3b   :  { %v370_v29 = vadd.f32 %v726_v35, %v222_v42  ;;  %492 = vst [vmem:[%s1185_s3 + $0x1b0] sm:$0xff] %v428_v4  ;;  %v431_v3 = vmax.f32 %v367_v19, 0.0  ;;  %v432_v5 = vmax.f32 %v368_v59, 0.0  ;;  %v224_v2 = vmul.f32 %v750_v46, %v76_v63 }
  0x3c   :  { %v433_v6 = vmax.f32 %v369_v12, 0.0  ;;  %493 = vst [vmem:[%s1185_s3 + $0x1b8] sm:$0xff] %v429_v57  ;;  %494 = vst [vmem:[%s1185_s3 + $0x1c0] sm:$0xff] %v430_v62  ;;  %v371_v40 = vadd.f32 %v746_v45, %v223_v1  ;;  %v225_v8 = vmul.f32 %v782_v60, %v77_v0 }
  0x3d   :  { %v434_v35 = vmax.f32 %v370_v29, 0.0  ;;  %495 = vst [vmem:[%s1185_s3 + $0x1c8] sm:$0xff] %v431_v3  ;;  %496 = vst [vmem:[%s1185_s3 + $0x1d0] sm:$0xff] %v432_v5  ;;  %v372_v46 = vadd.f32 %v765_v52, %v224_v2 }
  0x3e   :  { %497 = vst [vmem:[%s1185_s3 + $0x1d8] sm:$0xff] %v433_v6  ;;  %v435_v45 = vmax.f32 %v371_v40, 0.0  ;;  %v373_v60 = vadd.f32 %v786_v61, %v225_v8 }
  0x3f   :  { %498 = vst [vmem:[%s1185_s3 + $0x1e0] sm:$0xff] %v434_v35  ;;  %v436_v43 = vmax.f32 %v372_v46, 0.0 }
  0x40   :  { %499 = vst [vmem:[%s1185_s3 + $0x1e8] sm:$0xff] %v435_v45  ;;  %v437_v13 = vmax.f32 %v373_v60, 0.0 }
  0x41   :  { %500 = vst [vmem:[%s1185_s3 + $0x1f0] sm:$0xff] %v436_v43 }
  0x42   :  { %501 = vst [vmem:[%s1185_s3 + $0x1f8] sm:$0xff] %v437_v13 }

// kernel: generator_forward.13
= control target key start
LH: loop header
LB: loop body
LE: loop exit
PB: predicated region body
PF: predicated region fallthrough
CT: control target
= control target key end

     0   :  { %s1436_s12 = smov 0   ;;  %s2006_s0 = inlined_call_operand.vmem [shape: bf16[512,128], index: 0, kind: input, shape index: {}]   ;;  %s2007_s1 = inlined_call_operand.vmem [shape: bf16[128,1024], index: 1, kind: input, shape index: {}]   ;;  %s2008_s2 = inlined_call_operand.vmem [shape: f32[1,1024], index: 2, kind: input, shape index: {}]   ;;  %s2009_s3 = inlined_call_operand.vmem [shape: f32[512,1024], index: 3, kind: output, shape index: {}]  }
   0x1 LB: > { %s1305_s13 = sadd.s32 4294967295, %s1413_s12   ;;  %p1309_p0 = scmp.ge.s32.totalorder %s1413_s12, 1  ;;  %s1413_s12 = sphi %s1436_s12, %s13_s12  }
   0x2   : > { %p138_p1 = scmp.lt.s32.totalorder %s1413_s12, 5 }
   0x4   : > { %p139_p2 = pnand %p1309_p0, %p138_p1 }
   0x5   : > { %v193_v0 = vld [vmem:[%s2007_s1] sm:$0xff] (!%p139_p2)  ;;  %v194_v2 = vld [vmem:[%s2007_s1 + $0x8] sm:$0xff] (!%p139_p2)  ;;  %s1310_s20 = sshll.u32 (!%p139_p2), %s1305_s13, 4  ;;  %v1415_v8 = vmov (!%p139_p2), 0   ;;  %v195_v63 = vld [vmem:[%s2007_s1 + $0x10] sm:$0xff] (!%p139_p2) }
   0x6   : > { %142 = sbr.rel (%p139_p2) target bundleno = 379 (0x17b), region = 32  ;;  %v197_v1 = vld [vmem:[%s2007_s1 + $0x20] sm:$0xff] (!%p139_p2)  ;;  %v198_v4 = vld [vmem:[%s2007_s1 + $0x28] sm:$0xff] (!%p139_p2)  ;;  %699 = vmatprep.mubr.bf16.mxu0 (!%p139_p2), %v1415_v8  ;;  %812 = vmatprep.mubr.bf16.mxu1 (!%p139_p2), %v1415_v8  ;;  %p164_p3 = scmp.lt.s32.totalorder (!%p139_p2), %s1310_s20, 63 }
   0x7   : > { %v1324_v3 = vcombine.high (!%p139_p2), %v193_v0, %v197_v1  ;;  %v1323_v5 = vcombine.low (!%p139_p2), %v193_v0, %v197_v1  ;;  %v201_v6 = vld [vmem:[%s2007_s1 + $0x40] sm:$0xff] (!%p139_p2)  ;;  %v1326_v9 = vcombine.high (!%p139_p2), %v194_v2, %v198_v4  ;;  %v1325_v10 = vcombine.low (!%p139_p2), %v194_v2, %v198_v4  ;;  %v202_v12 = vld [vmem:[%s2007_s1 + $0x48] sm:$0xff] (!%p139_p2)  ;;  %v199_v0 = vld [vmem:[%s2007_s1 + $0x30] sm:$0xff] (!%p139_p2) }
   0x8   : > { %v205_v7 = vld [vmem:[%s2007_s1 + $0x60] sm:$0xff] (!%p139_p2)  ;;  %v206_v13 = vld [vmem:[%s2007_s1 + $0x68] sm:$0xff] (!%p139_p2)  ;;  %v196_v1 = vld [vmem:[%s2007_s1 + $0x18] sm:$0xff] (!%p139_p2) }
   0x9   : > { %v1332_v11 = vcombine.high (!%p139_p2), %v201_v6, %v205_v7  ;;  %v209_v14 = vld [vmem:[%s2007_s1 + $0x80] sm:$0xff] (!%p139_p2)  ;;  %667 = vmatprep.subr.bf16.mxu0 (!%p139_p2), %v1324_v3  ;;  %v1334_v15 = vcombine.high (!%p139_p2), %v202_v12, %v206_v13  ;;  %v210_v17 = vld [vmem:[%s2007_s1 + $0x88] sm:$0xff] (!%p139_p2)  ;;  %780 = vmatprep.subr.bf16.mxu1 (!%p139_p2), %v1326_v9  ;;  %v1331_v19 = vcombine.low (!%p139_p2), %v201_v6, %v205_v7  ;;  %v200_v2 = vld [vmem:[%s2007_s1 + $0x38] sm:$0xff] (!%p139_p2) }
   0xa   : > { %v213_v16 = vld [vmem:[%s2007_s1 + $0xa0] sm:$0xff] (!%p139_p2)  ;;  %v214_v18 = vld [vmem:[%s2007_s1 + $0xa8] sm:$0xff] (!%p139_p2)  ;;  %668 = vmatpush1.bf16.msra.mxu0 (!%p139_p2), %v1323_v5  ;;  %781 = vmatpush1.bf16.msra.mxu1 (!%p139_p2), %v1325_v10  ;;  %v1333_v20 = vcombine.low (!%p139_p2), %v202_v12, %v206_v13  ;;  %v1328_v5 = vcombine.high (!%p139_p2), %v195_v63, %v199_v0  ;;  %v1330_v6 = vcombine.high (!%p139_p2), %v196_v1, %v200_v2  ;;  %v203_v9 = vld [vmem:[%s2007_s1 + $0x50] sm:$0xff] (!%p139_p2) }
   0xb   : > { %669 = vmatprep.subr.bf16.mxu0 (!%p139_p2), %v1332_v11  ;;  %v1340_v21 = vcombine.high (!%p139_p2), %v209_v14, %v213_v16  ;;  %782 = vmatprep.subr.bf16.mxu1 (!%p139_p2), %v1334_v15  ;;  %v1342_v22 = vcombine.high (!%p139_p2), %v210_v17, %v214_v18  ;;  %v217_v23 = vld [vmem:[%s2007_s1 + $0xc0] sm:$0xff] (!%p139_p2)  ;;  %v218_v25 = vld [vmem:[%s2007_s1 + $0xc8] sm:$0xff] (!%p139_p2)  ;;  %v1339_v27 = vcombine.low (!%p139_p2), %v209_v14, %v213_v16  ;;  %v207_v10 = vld [vmem:[%s2007_s1 + $0x70] sm:$0xff] (!%p139_p2) }
   0xc   : > { %v221_v24 = vld [vmem:[%s2007_s1 + $0xe0] sm:$0xff] (!%p139_p2)  ;;  %v222_v26 = vld [vmem:[%s2007_s1 + $0xe8] sm:$0xff] (!%p139_p2)  ;;  %v1341_v28 = vcombine.low (!%p139_p2), %v210_v17, %v214_v18  ;;  %v1327_v11 = vcombine.low (!%p139_p2), %v195_v63, %v199_v0  ;;  %v204_v12 = vld [vmem:[%s2007_s1 + $0x58] sm:$0xff] (!%p139_p2)  ;;  %v1329_v14 = vcombine.low (!%p139_p2), %v196_v1, %v200_v2  ;;  %v1336_v15 = vcombine.high (!%p139_p2), %v203_v9, %v207_v10 }
   0xd   : > { %s2011_s20 = smov (!%p164_p3, %s1310_s20), 63  ;;  %v1348_v29 = vcombine.high %v217_v23, %v221_v24  ;;  %v1350_v30 = vcombine.high %v218_v25, %v222_v26  ;;  %v225_v31 = vld [vmem:[%s2007_s1 + $0x100] sm:$0xff]  ;;  %v226_v33 = vld [vmem:[%s2007_s1 + $0x108] sm:$0xff]  ;;  %v1347_v35 = vcombine.low %v217_v23, %v221_v24  ;;  %v1349_v36 = vcombine.low %v218_v25, %v222_v26  ;;  %v208_v13 = vld [vmem:[%s2007_s1 + $0x78] sm:$0xff] }
   0xe   : > { %s1311_s17 = sshll.u32 %s2011_s20, 2  ;;  %670 = vmatpush1.bf16.msra.mxu0 %v1331_v19  ;;  %783 = vmatpush1.bf16.msra.mxu1 %v1333_v20  ;;  %v229_v32 = vld [vmem:[%s2007_s1 + $0x120] sm:$0xff]  ;;  %v230_v34 = vld [vmem:[%s2007_s1 + $0x128] sm:$0xff]  ;;  %v211_v16 = vld [vmem:[%s2007_s1 + $0x90] sm:$0xff]  ;;  %v1338_v18 = vcombine.high %v204_v12, %v208_v13  ;;  %s1389_s27 = sshll.u32 %s2011_s20, 6 }
   0xf   : > { %671 = vmatprep.subr.bf16.mxu0 %v1340_v21  ;;  %s1500_s25 = scalar_lea.vmem %s2006_s0, %s1311_s17  ;;  %784 = vmatprep.subr.bf16.mxu1 %v1342_v22  ;;  %v1356_v37 = vcombine.high %v225_v31, %v229_v32  ;;  %v1358_v38 = vcombine.high %v226_v33, %v230_v34  ;;  %v233_v39 = vld [vmem:[%s2007_s1 + $0x140] sm:$0xff]  ;;  %v234_v41 = vld [vmem:[%s2007_s1 + $0x148] sm:$0xff]  ;;  %v1355_v43 = vcombine.low %v225_v31, %v229_v32  ;;  %v215_v17 = vld [vmem:[%s2007_s1 + $0xb0] sm:$0xff]  ;;  %s1729_s30 = scalar_lea.vmem %s2009_s3, %s1389_s27 }
  0x10   : > { %v237_v40 = vld [vmem:[%s2007_s1 + $0x160] sm:$0xff]  ;;  %v238_v42 = vld [vmem:[%s2007_s1 + $0x168] sm:$0xff]  ;;  %v1357_v44 = vcombine.low %v226_v33, %v230_v34  ;;  %v212_v19 = vld [vmem:[%s2007_s1 + $0x98] sm:$0xff]  ;;  %v1335_v21 = vcombine.low %v203_v9, %v207_v10  ;;  %v1337_v22 = vcombine.low %v204_v12, %v208_v13  ;;  %v1344_v23 = vcombine.high %v211_v16, %v215_v17 }
  0x11   : > { %v1364_v45 = vcombine.high %v233_v39, %v237_v40  ;;  %v1366_v46 = vcombine.high %v234_v41, %v238_v42  ;;  %v241_v47 = vld [vmem:[%s2007_s1 + $0x180] sm:$0xff]  ;;  %v242_v49 = vld [vmem:[%s2007_s1 + $0x188] sm:$0xff]  ;;  %v1363_v51 = vcombine.low %v233_v39, %v237_v40  ;;  %v1365_v52 = vcombine.low %v234_v41, %v238_v42  ;;  %v216_v20 = vld [vmem:[%s2007_s1 + $0xb8] sm:$0xff] }
  0x12   : > { %672 = vmatpush1.bf16.msra.mxu0 %v1339_v27  ;;  %785 = vmatpush1.bf16.msra.mxu1 %v1341_v28  ;;  %v245_v48 = vld [vmem:[%s2007_s1 + $0x1a0] sm:$0xff]  ;;  %v246_v50 = vld [vmem:[%s2007_s1 + $0x1a8] sm:$0xff]  ;;  %v1346_v24 = vcombine.high %v212_v19, %v216_v20  ;;  %v219_v26 = vld [vmem:[%s2007_s1 + $0xd0] sm:$0xff]  ;;  %v1345_v31 = vcombine.low %v212_v19, %v216_v20 }
  0x13   : > { %673 = vmatprep.subr.bf16.mxu0 %v1348_v29  ;;  %786 = vmatprep.subr.bf16.mxu1 %v1350_v30  ;;  %v1372_v53 = vcombine.high %v241_v47, %v245_v48  ;;  %v249_v54 = vld [vmem:[%s2007_s1 + $0x1c0] sm:$0xff]  ;;  %v1374_v55 = vcombine.high %v242_v49, %v246_v50  ;;  %v250_v57 = vld [vmem:[%s2007_s1 + $0x1c8] sm:$0xff]  ;;  %v1371_v59 = vcombine.low %v241_v47, %v245_v48  ;;  %v223_v27 = vld [vmem:[%s2007_s1 + $0xf0] sm:$0xff] }
  0x14   : > { %v253_v56 = vld [vmem:[%s2007_s1 + $0x1e0] sm:$0xff]  ;;  %v254_v58 = vld [vmem:[%s2007_s1 + $0x1e8] sm:$0xff]  ;;  %v1373_v60 = vcombine.low %v242_v49, %v246_v50  ;;  %v220_v28 = vld [vmem:[%s2007_s1 + $0xd8] sm:$0xff]  ;;  %v1343_v30 = vcombine.low %v211_v16, %v215_v17  ;;  %v1352_v32 = vcombine.high %v219_v26, %v223_v27 }
  0x15   : > { %v1380_v61 = vcombine.high %v249_v54, %v253_v56  ;;  %v1382_v62 = vcombine.high %v250_v57, %v254_v58  ;;  %v1379_v3 = vcombine.low %v249_v54, %v253_v56  ;;  %v1381_v4 = vcombine.low %v250_v57, %v254_v58  ;;  %v1563_v7 = vld [vmem:[%s1500_s25] sm:$0xff]   ;;  %v1594_v25 = vld [vmem:[%s1500_s25 + $0x8] sm:$0xff]   ;;  %v224_v29 = vld [vmem:[%s2007_s1 + $0xf8] sm:$0xff] }
  0x16   : > { %674 = vmatpush1.bf16.msra.mxu0 %v1347_v35  ;;  %787 = vmatpush1.bf16.msra.mxu1 %v1349_v36  ;;  %v1354_v33 = vcombine.high %v220_v28, %v224_v29  ;;  %v227_v34 = vld [vmem:[%s2007_s1 + $0x110] sm:$0xff]  ;;  %v228_v36 = vld [vmem:[%s2007_s1 + $0x118] sm:$0xff]  ;;  %v1353_v39 = vcombine.low %v220_v28, %v224_v29  ;;  %v1404_v9 = vld [vmem:[%s1500_s25 + $0x28] sm:$0xff]  }
  0x17   : > { %675 = vmatprep.subr.bf16.mxu0 %v1356_v37  ;;  %788 = vmatprep.subr.bf16.mxu1 %v1358_v38  ;;  %v231_v35 = vld [vmem:[%s2007_s1 + $0x130] sm:$0xff]  ;;  %v232_v37 = vld [vmem:[%s2007_s1 + $0x138] sm:$0xff]  ;;  %v1351_v38 = vcombine.low %v219_v26, %v223_v27 }
  0x18   : > { %v1360_v40 = vcombine.high %v227_v34, %v231_v35  ;;  %v1625_v41 = vld [vmem:[%s1500_s25 + $0x10] sm:$0xff]   ;;  %v1362_v42 = vcombine.high %v228_v36, %v232_v37  ;;  %v1359_v47 = vcombine.low %v227_v34, %v231_v35  ;;  %v1361_v48 = vcombine.low %v228_v36, %v232_v37  ;;  %v248_v54 = vld [vmem:[%s2007_s1 + $0x1b8] sm:$0xff] }
  0x19   : > { %v1402_v58 = vld [vmem:[%s1500_s25 + $0x18] sm:$0xff]   ;;  %v1405_v10 = vld [vmem:[%s1500_s25 + $0x30] sm:$0xff]  }
  0x1a   : > { %676 = vmatpush1.bf16.msra.mxu0 %v1355_v43  ;;  %789 = vmatpush1.bf16.msra.mxu1 %v1357_v44  ;;  %v235_v43 = vld [vmem:[%s2007_s1 + $0x150] sm:$0xff]  ;;  %v256_v63 = vld [vmem:[%s2007_s1 + $0x1f8] sm:$0xff] }
  0x1b   : > { %677 = vmatprep.subr.bf16.mxu0 %v1364_v45  ;;  %790 = vmatprep.subr.bf16.mxu1 %v1366_v46  ;;  %v239_v44 = vld [vmem:[%s2007_s1 + $0x170] sm:$0xff]  ;;  %v236_v45 = vld [vmem:[%s2007_s1 + $0x158] sm:$0xff] }
  0x1c   : > { %v240_v46 = vld [vmem:[%s2007_s1 + $0x178] sm:$0xff]  ;;  %v1368_v49 = vcombine.high %v235_v43, %v239_v44 }
  0x1d   : > { %v1370_v50 = vcombine.high %v236_v45, %v240_v46  ;;  %v1369_v56 = vcombine.low %v236_v45, %v240_v46 }
  0x1e   : > { %678 = vmatpush1.bf16.msra.mxu0 %v1363_v51  ;;  %791 = vmatpush1.bf16.msra.mxu1 %v1365_v52  ;;  %v243_v51 = vld [vmem:[%s2007_s1 + $0x190] sm:$0xff] }
  0x1f   : > { %679 = vmatprep.subr.bf16.mxu0 %v1372_v53  ;;  %792 = vmatprep.subr.bf16.mxu1 %v1374_v55  ;;  %v247_v52 = vld [vmem:[%s2007_s1 + $0x1b0] sm:$0xff]  ;;  %v244_v53 = vld [vmem:[%s2007_s1 + $0x198] sm:$0xff]  ;;  %v1367_v55 = vcombine.low %v235_v43, %v239_v44 }
  0x20   : > { %v1376_v57 = vcombine.high %v243_v51, %v247_v52  ;;  %v1375_v0 = vcombine.low %v243_v51, %v247_v52  ;;  %v1377_v1 = vcombine.low %v244_v53, %v248_v54 }
  0x22   : > { %680 = vmatpush1.bf16.msra.mxu0 %v1371_v59  ;;  %793 = vmatpush1.bf16.msra.mxu1 %v1373_v60  ;;  %v1378_v59 = vcombine.high %v244_v53, %v248_v54  ;;  %v251_v60 = vld [vmem:[%s2007_s1 + $0x1d0] sm:$0xff] }
  0x23   : > { %681 = vmatprep.subr.bf16.mxu0 %v1380_v61  ;;  %794 = vmatprep.subr.bf16.mxu1 %v1382_v62  ;;  %v255_v61 = vld [vmem:[%s2007_s1 + $0x1f0] sm:$0xff]  ;;  %v252_v62 = vld [vmem:[%s2007_s1 + $0x1d8] sm:$0xff] }
  0x24   : > { %v1384_v2 = vcombine.high %v251_v60, %v255_v61 }
  0x26   : > { %682 = vmatpush1.bf16.msra.mxu0 %v1379_v3  ;;  %795 = vmatpush1.bf16.msra.mxu1 %v1381_v4  ;;  %v1386_v3 = vcombine.high %v252_v62, %v256_v63  ;;  %v1383_v4 = vcombine.low %v251_v60, %v255_v61 }
  0x27   : > { %893 = vmatprep.subr.bf16.mxu0 %v1328_v5  ;;  %1006 = vmatprep.subr.bf16.mxu1 %v1330_v6  ;;  %v1385_v5 = vcombine.low %v252_v62, %v256_v63  ;;  %v1403_v6 = vld [vmem:[%s1500_s25 + $0x20] sm:$0xff]  }
  0x29   : > { %700 = vmatmul.mubr.bf16.vlgmr.msra.gmra.mrb[0].mxu0 %v1563_v7  ;;  %813 = vmatmul.mubr.bf16.vlgmr.msra.gmra.mrb[0].mxu1 %v1563_v7 }
  0x2a   : > { %894 = vmatpush1.bf16.msra.mxu0 %v1327_v11  ;;  %1007 = vmatpush1.bf16.msra.mxu1 %v1329_v14  ;;  %v1406_v11 = vld [vmem:[%s1500_s25 + $0x38] sm:$0xff]   ;;  %v1708_v14 = vld [vmem:[%s2008_s2] sm:$0xff] }
  0x2b   : > { %709 = vmatprep.mubr.bf16.mxu0 %v1415_v8  ;;  %822 = vmatprep.mubr.bf16.mxu1 %v1415_v8 }
  0x2c   : > { %895 = vmatprep.subr.bf16.mxu0 %v1336_v15  ;;  %1008 = vmatprep.subr.bf16.mxu1 %v1338_v18 }
  0x2e   : > { %896 = vmatpush1.bf16.msra.mxu0 %v1335_v21  ;;  %1009 = vmatpush1.bf16.msra.mxu1 %v1337_v22 }
  0x2f   : > { %897 = vmatprep.subr.bf16.mxu0 %v1344_v23  ;;  %1010 = vmatprep.subr.bf16.mxu1 %v1346_v24 }
  0x31   : > { %710 = vmatmul.mubr.bf16.gmra.mrb[4].mxu0 %v1594_v25  ;;  %823 = vmatmul.mubr.bf16.gmra.mrb[4].mxu1 %v1594_v25 }
  0x32   : > { %719 = vmatprep.mubr.bf16.mxu0 %v1415_v8  ;;  %832 = vmatprep.mubr.bf16.mxu1 %v1415_v8 }
  0x33   : > { %898 = vmatpush1.bf16.msra.mxu0 %v1343_v30  ;;  %1011 = vmatpush1.bf16.msra.mxu1 %v1345_v31 }
  0x34   : > { %899 = vmatprep.subr.bf16.mxu0 %v1352_v32  ;;  %1012 = vmatprep.subr.bf16.mxu1 %v1354_v33 }
  0x37   : > { %900 = vmatpush1.bf16.msra.mxu0 %v1351_v38  ;;  %1013 = vmatpush1.bf16.msra.mxu1 %v1353_v39 }
  0x38   : > { %901 = vmatprep.subr.bf16.mxu0 %v1360_v40  ;;  %1014 = vmatprep.subr.bf16.mxu1 %v1362_v42 }
  0x39   : > { %720 = vmatmul.mubr.bf16.gmra.mrb[8].mxu0 %v1625_v41  ;;  %833 = vmatmul.mubr.bf16.gmra.mrb[8].mxu1 %v1625_v41 }
  0x3a   : > { %729 = vmatprep.mubr.bf16.mxu0 %v1415_v8  ;;  %842 = vmatprep.mubr.bf16.mxu1 %v1415_v8 }
  0x3b   : > { %902 = vmatpush1.bf16.msra.mxu0 %v1359_v47  ;;  %1015 = vmatpush1.bf16.msra.mxu1 %v1361_v48 }
  0x3c   : > { %903 = vmatprep.subr.bf16.mxu0 %v1368_v49  ;;  %1016 = vmatprep.subr.bf16.mxu1 %v1370_v50 }
  0x3f   : > { %904 = vmatpush1.bf16.msra.mxu0 %v1367_v55  ;;  %1017 = vmatpush1.bf16.msra.mxu1 %v1369_v56 }
  0x40   : > { %905 = vmatprep.subr.bf16.mxu0 %v1376_v57  ;;  %1018 = vmatprep.subr.bf16.mxu1 %v1378_v59 }
  0x41   : > { %730 = vmatmul.mubr.bf16.gmra.mrb[12].mxu0 %v1402_v58  ;;  %843 = vmatmul.mubr.bf16.gmra.mrb[12].mxu1 %v1402_v58 }
  0x42   : > { %739 = vmatprep.mubr.bf16.mxu0 %v1415_v8  ;;  %852 = vmatprep.mubr.bf16.mxu1 %v1415_v8 }
  0x43   : > { %906 = vmatpush1.bf16.msra.mxu0 %v1375_v0  ;;  %1019 = vmatpush1.bf16.msra.mxu1 %v1377_v1 }
  0x44   : > { %907 = vmatprep.subr.bf16.mxu0 %v1384_v2  ;;  %1020 = vmatprep.subr.bf16.mxu1 %v1386_v3 }
  0x47   : > { %908 = vmatpush1.bf16.msra.mxu0 %v1383_v4  ;;  %1021 = vmatpush1.bf16.msra.mxu1 %v1385_v5 }
  0x49   : > { %740 = vmatmul.mubr.bf16.gmra.mrb[16].mxu0 %v1403_v6  ;;  %853 = vmatmul.mubr.bf16.gmra.mrb[16].mxu1 %v1403_v6 }
  0x4a   : > { %749 = vmatprep.mubr.bf16.mxu0 %v1415_v8  ;;  %862 = vmatprep.mubr.bf16.mxu1 %v1415_v8 }
  0x51   : > { %750 = vmatmul.mubr.bf16.gmra.mrb[20].mxu0 %v1404_v9  ;;  %863 = vmatmul.mubr.bf16.gmra.mrb[20].mxu1 %v1404_v9 }
  0x52   : > { %759 = vmatprep.mubr.bf16.mxu0 %v1415_v8  ;;  %872 = vmatprep.mubr.bf16.mxu1 %v1415_v8 }
  0x59   : > { %760 = vmatmul.mubr.bf16.gmra.mrb[24].mxu0 %v1405_v10  ;;  %873 = vmatmul.mubr.bf16.gmra.mrb[24].mxu1 %v1405_v10 }
  0x5a   : > { %769 = vmatprep.mubr.bf16.mxu0 %v1415_v8  ;;  %882 = vmatprep.mubr.bf16.mxu1 %v1415_v8 }
  0x61   : > { %770 = vmatmul.mubr.bf16.gmra.mrb[28].mxu0 %v1406_v11  ;;  %883 = vmatmul.mubr.bf16.gmra.mrb[28].mxu1 %v1406_v11 }
  0x62   : > { %925 = vmatprep.mubr.bf16.mxu0 %v1415_v8  ;;  %1038 = vmatprep.mubr.bf16.mxu1 %v1415_v8 }
  0x69   : > { %926 = vmatmul.mubr.bf16.vlgmr.msra.gmra.mrb[32].mxu0 %v1563_v7  ;;  %1039 = vmatmul.mubr.bf16.vlgmr.msra.gmra.mrb[32].mxu1 %v1563_v7  ;;  %v259_v7 = vlaneseq }
  0x6a   : > { %935 = vmatprep.mubr.bf16.mxu0 %v1415_v8  ;;  %1048 = vmatprep.mubr.bf16.mxu1 %v1415_v8 }
  0x6b   : > { %v1702_v12 = vshrl.u32 %v259_v7, 7 }
  0x6d   : > { %v261_v13 = vsub.s32 0, %v1702_v12  ;;  %v269_v15 = vsub.s32 2, %v1702_v12  ;;  %v265_v16 = vsub.s32 1, %v1702_v12  ;;  %v273_v17 = vsub.s32 3, %v1702_v12 }
  0x6f   : > { %v1718_v18 = vrot.slane %v1708_v14, %v269_v15  ;;  %v1721_v19 = vrot.slane %v1708_v14, %v265_v16  ;;  %v1724_v20 = vrot.slane %v1708_v14, %v273_v17 }
  0x71   : > { %936 = vmatmul.mubr.bf16.gmra.mrb[36].mxu0 %v1594_v25  ;;  %1049 = vmatmul.mubr.bf16.gmra.mrb[36].mxu1 %v1594_v25 }
  0x72   : > { %945 = vmatprep.mubr.bf16.mxu0 %v1415_v8  ;;  %1058 = vmatprep.mubr.bf16.mxu1 %v1415_v8 }
  0x79   : > { %946 = vmatmul.mubr.bf16.gmra.mrb[40].mxu0 %v1625_v41  ;;  %1059 = vmatmul.mubr.bf16.gmra.mrb[40].mxu1 %v1625_v41 }
  0x7a   : > { %955 = vmatprep.mubr.bf16.mxu0 %v1415_v8  ;;  %1068 = vmatprep.mubr.bf16.mxu1 %v1415_v8 }
  0x81   : > { %956 = vmatmul.mubr.bf16.gmra.mrb[44].mxu0 %v1402_v58  ;;  %1069 = vmatmul.mubr.bf16.gmra.mrb[44].mxu1 %v1402_v58 }
  0x82   : > { %965 = vmatprep.mubr.bf16.mxu0 %v1415_v8  ;;  %1078 = vmatprep.mubr.bf16.mxu1 %v1415_v8 }
  0x89   : > { %966 = vmatmul.mubr.bf16.gmra.mrb[48].mxu0 %v1403_v6  ;;  %1079 = vmatmul.mubr.bf16.gmra.mrb[48].mxu1 %v1403_v6 }
  0x8a   : > { %975 = vmatprep.mubr.bf16.mxu0 %v1415_v8  ;;  %1088 = vmatprep.mubr.bf16.mxu1 %v1415_v8 }
  0x91   : > { %976 = vmatmul.mubr.bf16.gmra.mrb[52].mxu0 %v1404_v9  ;;  %1089 = vmatmul.mubr.bf16.gmra.mrb[52].mxu1 %v1404_v9 }
  0x92   : > { %985 = vmatprep.mubr.bf16.mxu0 %v1415_v8  ;;  %1098 = vmatprep.mubr.bf16.mxu1 %v1415_v8 }
  0x99   : > { %986 = vmatmul.mubr.bf16.gmra.mrb[56].mxu0 %v1405_v10  ;;  %1099 = vmatmul.mubr.bf16.gmra.mrb[56].mxu1 %v1405_v10 }
  0x9a   : > { %995 = vmatprep.mubr.bf16.mxu0 %v1415_v8  ;;  %1108 = vmatprep.mubr.bf16.mxu1 %v1415_v8  ;;  %v1715_v8 = vrot.slane %v1708_v14, %v261_v13 }
  0xa1   : > { %996 = vmatmul.mubr.bf16.gmra.mrb[60].mxu0 %v1406_v11  ;;  %1109 = vmatmul.mubr.bf16.gmra.mrb[60].mxu1 %v1406_v11 }
  0xfc   : > { %v701_v21 = vpop.f32.mrb[0].mxu0  ;;  %v814_v23 = vpop.f32.mrb[0].mxu1 }
  0xfd   : > { %v702_v22 = vadd.f32 %v701_v21, %v1715_v8  ;;  %v703_v24 = vpop.f32.mrb[1].mxu0  ;;  %v815_v25 = vadd.f32 %v814_v23, %v1718_v18  ;;  %v816_v27 = vpop.f32.mrb[1].mxu1 }
  0xfe   : > { %v704_v26 = vadd.f32 %v703_v24, %v1721_v19  ;;  %v705_v28 = vpop.f32.mrb[2].mxu0  ;;  %v817_v29 = vadd.f32 %v816_v27, %v1724_v20  ;;  %v818_v31 = vpop.f32.mrb[2].mxu1 }
  0xff   : > { %1119 = vst [vmem:[%s1729_s30] sm:$0xff] %v702_v22  ;;  %v706_v30 = vadd.f32 %v705_v28, %v1715_v8  ;;  %v707_v32 = vpop.f32.mrb[3].mxu0  ;;  %1121 = vst [vmem:[%s1729_s30 + $0x10] sm:$0xff] %v815_v25  ;;  %v819_v33 = vadd.f32 %v818_v31, %v1718_v18  ;;  %v820_v35 = vpop.f32.mrb[3].mxu1 }
 0x100   : > { %1120 = vst [vmem:[%s1729_s30 + $0x8] sm:$0xff] %v704_v26  ;;  %v708_v34 = vadd.f32 %v707_v32, %v1721_v19  ;;  %1122 = vst [vmem:[%s1729_s30 + $0x18] sm:$0xff] %v817_v29  ;;  %v821_v36 = vadd.f32 %v820_v35, %v1724_v20 }
 0x101   : > { %1127 = vst [vmem:[%s1729_s30 + $0x40] sm:$0xff] %v706_v30  ;;  %1129 = vst [vmem:[%s1729_s30 + $0x50] sm:$0xff] %v819_v33 }
 0x102   : > { %1128 = vst [vmem:[%s1729_s30 + $0x48] sm:$0xff] %v708_v34  ;;  %1130 = vst [vmem:[%s1729_s30 + $0x58] sm:$0xff] %v821_v36 }
 0x104   : > { %v711_v37 = vpop.f32.mrb[4].mxu0  ;;  %v824_v39 = vpop.f32.mrb[4].mxu1 }
 0x105   : > { %v712_v38 = vadd.f32 %v711_v37, %v1715_v8  ;;  %v713_v40 = vpop.f32.mrb[5].mxu0  ;;  %v825_v41 = vadd.f32 %v824_v39, %v1718_v18  ;;  %v826_v43 = vpop.f32.mrb[5].mxu1 }
 0x106   : > { %v714_v42 = vadd.f32 %v713_v40, %v1721_v19  ;;  %v715_v44 = vpop.f32.mrb[6].mxu0  ;;  %v827_v45 = vadd.f32 %v826_v43, %v1724_v20  ;;  %v828_v47 = vpop.f32.mrb[6].mxu1 }
 0x107   : > { %1135 = vst [vmem:[%s1729_s30 + $0x80] sm:$0xff] %v712_v38  ;;  %v716_v46 = vadd.f32 %v715_v44, %v1715_v8  ;;  %v717_v48 = vpop.f32.mrb[7].mxu0  ;;  %1137 = vst [vmem:[%s1729_s30 + $0x90] sm:$0xff] %v825_v41  ;;  %v829_v49 = vadd.f32 %v828_v47, %v1718_v18  ;;  %v830_v51 = vpop.f32.mrb[7].mxu1 }
 0x108   : > { %1136 = vst [vmem:[%s1729_s30 + $0x88] sm:$0xff] %v714_v42  ;;  %v718_v50 = vadd.f32 %v717_v48, %v1721_v19  ;;  %1138 = vst [vmem:[%s1729_s30 + $0x98] sm:$0xff] %v827_v45  ;;  %v831_v52 = vadd.f32 %v830_v51, %v1724_v20 }
 0x109   : > { %1143 = vst [vmem:[%s1729_s30 + $0xc0] sm:$0xff] %v716_v46  ;;  %1145 = vst [vmem:[%s1729_s30 + $0xd0] sm:$0xff] %v829_v49 }
 0x10a   : > { %1144 = vst [vmem:[%s1729_s30 + $0xc8] sm:$0xff] %v718_v50  ;;  %1146 = vst [vmem:[%s1729_s30 + $0xd8] sm:$0xff] %v831_v52 }
 0x10c   : > { %v721_v53 = vpop.f32.mrb[8].mxu0  ;;  %v834_v55 = vpop.f32.mrb[8].mxu1 }
 0x10d   : > { %v722_v54 = vadd.f32 %v721_v53, %v1715_v8  ;;  %v723_v56 = vpop.f32.mrb[9].mxu0  ;;  %v835_v57 = vadd.f32 %v834_v55, %v1718_v18  ;;  %v836_v59 = vpop.f32.mrb[9].mxu1 }
 0x10e   : > { %v724_v58 = vadd.f32 %v723_v56, %v1721_v19  ;;  %v725_v60 = vpop.f32.mrb[10].mxu0  ;;  %v837_v61 = vadd.f32 %v836_v59, %v1724_v20  ;;  %v838_v63 = vpop.f32.mrb[10].mxu1 }
 0x10f   : > { %1151 = vst [vmem:[%s1729_s30 + $0x100] sm:$0xff] %v722_v54  ;;  %v726_v62 = vadd.f32 %v725_v60, %v1715_v8  ;;  %v727_v0 = vpop.f32.mrb[11].mxu0  ;;  %1153 = vst [vmem:[%s1729_s30 + $0x110] sm:$0xff] %v835_v57  ;;  %v839_v1 = vadd.f32 %v838_v63, %v1718_v18  ;;  %v840_v3 = vpop.f32.mrb[11].mxu1 }
 0x110   : > { %1152 = vst [vmem:[%s1729_s30 + $0x108] sm:$0xff] %v724_v58  ;;  %v728_v2 = vadd.f32 %v727_v0, %v1721_v19  ;;  %1154 = vst [vmem:[%s1729_s30 + $0x118] sm:$0xff] %v837_v61  ;;  %v841_v4 = vadd.f32 %v840_v3, %v1724_v20 }
 0x111   : > { %1159 = vst [vmem:[%s1729_s30 + $0x140] sm:$0xff] %v726_v62  ;;  %1161 = vst [vmem:[%s1729_s30 + $0x150] sm:$0xff] %v839_v1 }
 0x112   : > { %1160 = vst [vmem:[%s1729_s30 + $0x148] sm:$0xff] %v728_v2  ;;  %1162 = vst [vmem:[%s1729_s30 + $0x158] sm:$0xff] %v841_v4 }
 0x114   : > { %v731_v5 = vpop.f32.mrb[12].mxu0  ;;  %v844_v9 = vpop.f32.mrb[12].mxu1 }
 0x115   : > { %v732_v6 = vadd.f32 %v731_v5, %v1715_v8  ;;  %v733_v10 = vpop.f32.mrb[13].mxu0  ;;  %v845_v11 = vadd.f32 %v844_v9, %v1718_v18  ;;  %v846_v13 = vpop.f32.mrb[13].mxu1 }
 0x116   : > { %v734_v7 = vadd.f32 %v733_v10, %v1721_v19  ;;  %v735_v15 = vpop.f32.mrb[14].mxu0  ;;  %v847_v16 = vadd.f32 %v846_v13, %v1724_v20  ;;  %v848_v21 = vpop.f32.mrb[14].mxu1 }
 0x117   : > { %1167 = vst [vmem:[%s1729_s30 + $0x180] sm:$0xff] %v732_v6  ;;  %v736_v17 = vadd.f32 %v735_v15, %v1715_v8  ;;  %v737_v22 = vpop.f32.mrb[15].mxu0  ;;  %1169 = vst [vmem:[%s1729_s30 + $0x190] sm:$0xff] %v845_v11  ;;  %v849_v23 = vadd.f32 %v848_v21, %v1718_v18  ;;  %v850_v25 = vpop.f32.mrb[15].mxu1  ;;  %v277_v21 = vsub.s32 4, %v1702_v12 }
 0x118   : > { %1168 = vst [vmem:[%s1729_s30 + $0x188] sm:$0xff] %v734_v7  ;;  %v738_v24 = vadd.f32 %v737_v22, %v1721_v19  ;;  %1170 = vst [vmem:[%s1729_s30 + $0x198] sm:$0xff] %v847_v16  ;;  %v851_v26 = vadd.f32 %v850_v25, %v1724_v20 }
 0x119   : > { %1175 = vst [vmem:[%s1729_s30 + $0x1c0] sm:$0xff] %v736_v17  ;;  %1177 = vst [vmem:[%s1729_s30 + $0x1d0] sm:$0xff] %v849_v23 }
 0x11a   : > { %1176 = vst [vmem:[%s1729_s30 + $0x1c8] sm:$0xff] %v738_v24  ;;  %1178 = vst [vmem:[%s1729_s30 + $0x1d8] sm:$0xff] %v851_v26  ;;  %v285_v26 = vsub.s32 6, %v1702_v12 }
 0x11c   : > { %v741_v27 = vpop.f32.mrb[16].mxu0  ;;  %v854_v29 = vpop.f32.mrb[16].mxu1 }
 0x11d   : > { %v742_v28 = vadd.f32 %v741_v27, %v1715_v8  ;;  %v743_v30 = vpop.f32.mrb[17].mxu0  ;;  %v855_v31 = vadd.f32 %v854_v29, %v1718_v18  ;;  %v856_v33 = vpop.f32.mrb[17].mxu1  ;;  %v281_v27 = vsub.s32 5, %v1702_v12 }
 0x11e   : > { %v744_v32 = vadd.f32 %v743_v30, %v1721_v19  ;;  %v745_v34 = vpop.f32.mrb[18].mxu0  ;;  %v857_v35 = vadd.f32 %v856_v33, %v1724_v20  ;;  %v858_v37 = vpop.f32.mrb[18].mxu1 }
 0x11f   : > { %1183 = vst [vmem:[%s1729_s30 + $0x200] sm:$0xff] %v742_v28  ;;  %v746_v36 = vadd.f32 %v745_v34, %v1715_v8  ;;  %v747_v38 = vpop.f32.mrb[19].mxu0  ;;  %1185 = vst [vmem:[%s1729_s30 + $0x210] sm:$0xff] %v855_v31  ;;  %v859_v39 = vadd.f32 %v858_v37, %v1718_v18  ;;  %v860_v41 = vpop.f32.mrb[19].mxu1  ;;  %v1861_v37 = vrot.slane %v1708_v14, %v277_v21 }
 0x120   : > { %1184 = vst [vmem:[%s1729_s30 + $0x208] sm:$0xff] %v744_v32  ;;  %v748_v40 = vadd.f32 %v747_v38, %v1721_v19  ;;  %1186 = vst [vmem:[%s1729_s30 + $0x218] sm:$0xff] %v857_v35  ;;  %v861_v42 = vadd.f32 %v860_v41, %v1724_v20  ;;  %v289_v32 = vsub.s32 7, %v1702_v12  ;;  %v1869_v12 = vrot.slane %v1708_v14, %v281_v27 }
 0x121   : > { %1191 = vst [vmem:[%s1729_s30 + $0x240] sm:$0xff] %v746_v36  ;;  %1193 = vst [vmem:[%s1729_s30 + $0x250] sm:$0xff] %v859_v39 }
 0x122   : > { %1192 = vst [vmem:[%s1729_s30 + $0x248] sm:$0xff] %v748_v40  ;;  %1194 = vst [vmem:[%s1729_s30 + $0x258] sm:$0xff] %v861_v42 }
 0x124   : > { %v751_v43 = vpop.f32.mrb[20].mxu0  ;;  %v864_v45 = vpop.f32.mrb[20].mxu1 }
 0x125   : > { %v752_v44 = vadd.f32 %v751_v43, %v1715_v8  ;;  %v753_v46 = vpop.f32.mrb[21].mxu0  ;;  %v865_v47 = vadd.f32 %v864_v45, %v1718_v18  ;;  %v866_v49 = vpop.f32.mrb[21].mxu1 }
 0x126   : > { %v754_v48 = vadd.f32 %v753_v46, %v1721_v19  ;;  %v755_v50 = vpop.f32.mrb[22].mxu0  ;;  %v867_v51 = vadd.f32 %v866_v49, %v1724_v20  ;;  %v868_v53 = vpop.f32.mrb[22].mxu1 }
 0x127   : > { %1199 = vst [vmem:[%s1729_s30 + $0x280] sm:$0xff] %v752_v44  ;;  %v756_v52 = vadd.f32 %v755_v50, %v1715_v8  ;;  %v757_v54 = vpop.f32.mrb[23].mxu0  ;;  %1201 = vst [vmem:[%s1729_s30 + $0x290] sm:$0xff] %v865_v47  ;;  %v869_v55 = vadd.f32 %v868_v53, %v1718_v18  ;;  %v870_v57 = vpop.f32.mrb[23].mxu1 }
 0x128   : > { %1200 = vst [vmem:[%s1729_s30 + $0x288] sm:$0xff] %v754_v48  ;;  %v758_v56 = vadd.f32 %v757_v54, %v1721_v19  ;;  %1202 = vst [vmem:[%s1729_s30 + $0x298] sm:$0xff] %v867_v51  ;;  %v871_v58 = vadd.f32 %v870_v57, %v1724_v20 }
 0x129   : > { %1207 = vst [vmem:[%s1729_s30 + $0x2c0] sm:$0xff] %v756_v52  ;;  %1209 = vst [vmem:[%s1729_s30 + $0x2d0] sm:$0xff] %v869_v55 }
 0x12a   : > { %1208 = vst [vmem:[%s1729_s30 + $0x2c8] sm:$0xff] %v758_v56  ;;  %1210 = vst [vmem:[%s1729_s30 + $0x2d8] sm:$0xff] %v871_v58 }
 0x12c   : > { %v761_v59 = vpop.f32.mrb[24].mxu0  ;;  %v874_v61 = vpop.f32.mrb[24].mxu1 }
 0x12d   : > { %v762_v60 = vadd.f32 %v761_v59, %v1715_v8  ;;  %v763_v62 = vpop.f32.mrb[25].mxu0  ;;  %v875_v63 = vadd.f32 %v874_v61, %v1718_v18  ;;  %v876_v1 = vpop.f32.mrb[25].mxu1 }
 0x12e   : > { %v764_v0 = vadd.f32 %v763_v62, %v1721_v19  ;;  %v765_v2 = vpop.f32.mrb[26].mxu0  ;;  %v877_v3 = vadd.f32 %v876_v1, %v1724_v20  ;;  %v878_v5 = vpop.f32.mrb[26].mxu1 }
 0x12f   : > { %1215 = vst [vmem:[%s1729_s30 + $0x300] sm:$0xff] %v762_v60  ;;  %v766_v4 = vadd.f32 %v765_v2, %v1715_v8  ;;  %v767_v6 = vpop.f32.mrb[27].mxu0  ;;  %1217 = vst [vmem:[%s1729_s30 + $0x310] sm:$0xff] %v875_v63  ;;  %v879_v9 = vadd.f32 %v878_v5, %v1718_v18  ;;  %v880_v11 = vpop.f32.mrb[27].mxu1 }
 0x130   : > { %1216 = vst [vmem:[%s1729_s30 + $0x308] sm:$0xff] %v764_v0  ;;  %v768_v10 = vadd.f32 %v767_v6, %v1721_v19  ;;  %1218 = vst [vmem:[%s1729_s30 + $0x318] sm:$0xff] %v877_v3  ;;  %v881_v7 = vadd.f32 %v880_v11, %v1724_v20 }
 0x131   : > { %1223 = vst [vmem:[%s1729_s30 + $0x340] sm:$0xff] %v766_v4  ;;  %1225 = vst [vmem:[%s1729_s30 + $0x350] sm:$0xff] %v879_v9 }
 0x132   : > { %1224 = vst [vmem:[%s1729_s30 + $0x348] sm:$0xff] %v768_v10  ;;  %1226 = vst [vmem:[%s1729_s30 + $0x358] sm:$0xff] %v881_v7 }
 0x134   : > { %v771_v13 = vpop.f32.mrb[28].mxu0  ;;  %v884_v16 = vpop.f32.mrb[28].mxu1 }
 0x135   : > { %v772_v15 = vadd.f32 %v771_v13, %v1715_v8  ;;  %v773_v17 = vpop.f32.mrb[29].mxu0  ;;  %v885_v22 = vadd.f32 %v884_v16, %v1718_v18  ;;  %v886_v24 = vpop.f32.mrb[29].mxu1 }
 0x136   : > { %v774_v23 = vadd.f32 %v773_v17, %v1721_v19  ;;  %v775_v25 = vpop.f32.mrb[30].mxu0  ;;  %v887_v28 = vadd.f32 %v886_v24, %v1724_v20  ;;  %v888_v30 = vpop.f32.mrb[30].mxu1 }
 0x137   : > { %1231 = vst [vmem:[%s1729_s30 + $0x380] sm:$0xff] %v772_v15  ;;  %v776_v29 = vadd.f32 %v775_v25, %v1715_v8  ;;  %v777_v31 = vpop.f32.mrb[31].mxu0  ;;  %1233 = vst [vmem:[%s1729_s30 + $0x390] sm:$0xff] %v885_v22  ;;  %v889_v33 = vadd.f32 %v888_v30, %v1718_v18  ;;  %v890_v35 = vpop.f32.mrb[31].mxu1  ;;  %v1866_v8 = vrot.slane %v1708_v14, %v285_v26 }
 0x138   : > { %1232 = vst [vmem:[%s1729_s30 + $0x388] sm:$0xff] %v774_v23  ;;  %v778_v34 = vadd.f32 %v777_v31, %v1721_v19  ;;  %1234 = vst [vmem:[%s1729_s30 + $0x398] sm:$0xff] %v887_v28  ;;  %v891_v36 = vadd.f32 %v890_v35, %v1724_v20  ;;  %v1873_v18 = vrot.slane %v1708_v14, %v289_v32 }
 0x139   : > { %1239 = vst [vmem:[%s1729_s30 + $0x3c0] sm:$0xff] %v776_v29  ;;  %1241 = vst [vmem:[%s1729_s30 + $0x3d0] sm:$0xff] %v889_v33 }
 0x13a   : > { %1240 = vst [vmem:[%s1729_s30 + $0x3c8] sm:$0xff] %v778_v34  ;;  %1242 = vst [vmem:[%s1729_s30 + $0x3d8] sm:$0xff] %v891_v36 }
 0x13c   : > { %v927_v19 = vpop.f32.mrb[32].mxu0  ;;  %v1040_v38 = vpop.f32.mrb[32].mxu1 }
 0x13d   : > { %v928_v20 = vadd.f32 %v927_v19, %v1861_v37  ;;  %v929_v39 = vpop.f32.mrb[33].mxu0  ;;  %v1041_v40 = vadd.f32 %v1040_v38, %v1866_v8  ;;  %v1042_v42 = vpop.f32.mrb[33].mxu1 }
 0x13e   : > { %v930_v41 = vadd.f32 %v929_v39, %v1869_v12  ;;  %v931_v43 = vpop.f32.mrb[34].mxu0  ;;  %v1043_v14 = vadd.f32 %v1042_v42, %v1873_v18  ;;  %v1044_v45 = vpop.f32.mrb[34].mxu1 }
 0x13f   : > { %1123 = vst [vmem:[%s1729_s30 + $0x20] sm:$0xff] %v928_v20  ;;  %v932_v44 = vadd.f32 %v931_v43, %v1861_v37  ;;  %v933_v46 = vpop.f32.mrb[35].mxu0  ;;  %1125 = vst [vmem:[%s1729_s30 + $0x30] sm:$0xff] %v1041_v40  ;;  %v1045_v47 = vadd.f32 %v1044_v45, %v1866_v8  ;;  %v1046_v49 = vpop.f32.mrb[35].mxu1 }
 0x140   : > { %1124 = vst [vmem:[%s1729_s30 + $0x28] sm:$0xff] %v930_v41  ;;  %v934_v48 = vadd.f32 %v933_v46, %v1869_v12  ;;  %1126 = vst [vmem:[%s1729_s30 + $0x38] sm:$0xff] %v1043_v14  ;;  %v1047_v50 = vadd.f32 %v1046_v49, %v1873_v18 }
 0x141   : > { %1131 = vst [vmem:[%s1729_s30 + $0x60] sm:$0xff] %v932_v44  ;;  %1133 = vst [vmem:[%s1729_s30 + $0x70] sm:$0xff] %v1045_v47 }
 0x142   : > { %1132 = vst [vmem:[%s1729_s30 + $0x68] sm:$0xff] %v934_v48  ;;  %1134 = vst [vmem:[%s1729_s30 + $0x78] sm:$0xff] %v1047_v50 }
 0x144   : > { %v937_v51 = vpop.f32.mrb[36].mxu0  ;;  %v1050_v53 = vpop.f32.mrb[36].mxu1 }
 0x145   : > { %v938_v52 = vadd.f32 %v937_v51, %v1861_v37  ;;  %v939_v54 = vpop.f32.mrb[37].mxu0  ;;  %v1051_v55 = vadd.f32 %v1050_v53, %v1866_v8  ;;  %v1052_v57 = vpop.f32.mrb[37].mxu1 }
 0x146   : > { %v940_v56 = vadd.f32 %v939_v54, %v1869_v12  ;;  %v941_v58 = vpop.f32.mrb[38].mxu0  ;;  %v1053_v59 = vadd.f32 %v1052_v57, %v1873_v18  ;;  %v1054_v61 = vpop.f32.mrb[38].mxu1 }
 0x147   : > { %1139 = vst [vmem:[%s1729_s30 + $0xa0] sm:$0xff] %v938_v52  ;;  %v942_v60 = vadd.f32 %v941_v58, %v1861_v37  ;;  %v943_v62 = vpop.f32.mrb[39].mxu0  ;;  %1141 = vst [vmem:[%s1729_s30 + $0xb0] sm:$0xff] %v1051_v55  ;;  %v1055_v63 = vadd.f32 %v1054_v61, %v1866_v8  ;;  %v1056_v1 = vpop.f32.mrb[39].mxu1 }
 0x148   : > { %1140 = vst [vmem:[%s1729_s30 + $0xa8] sm:$0xff] %v940_v56  ;;  %v944_v0 = vadd.f32 %v943_v62, %v1869_v12  ;;  %1142 = vst [vmem:[%s1729_s30 + $0xb8] sm:$0xff] %v1053_v59  ;;  %v1057_v2 = vadd.f32 %v1056_v1, %v1873_v18 }
 0x149   : > { %1147 = vst [vmem:[%s1729_s30 + $0xe0] sm:$0xff] %v942_v60  ;;  %1149 = vst [vmem:[%s1729_s30 + $0xf0] sm:$0xff] %v1055_v63 }
 0x14a   : > { %1148 = vst [vmem:[%s1729_s30 + $0xe8] sm:$0xff] %v944_v0  ;;  %1150 = vst [vmem:[%s1729_s30 + $0xf8] sm:$0xff] %v1057_v2 }
 0x14c   : > { %v947_v3 = vpop.f32.mrb[40].mxu0  ;;  %v1060_v5 = vpop.f32.mrb[40].mxu1 }
 0x14d   : > { %v948_v4 = vadd.f32 %v947_v3, %v1861_v37  ;;  %v949_v6 = vpop.f32.mrb[41].mxu0  ;;  %v1061_v9 = vadd.f32 %v1060_v5, %v1866_v8  ;;  %v1062_v11 = vpop.f32.mrb[41].mxu1 }
 0x14e   : > { %v950_v10 = vadd.f32 %v949_v6, %v1869_v12  ;;  %v951_v7 = vpop.f32.mrb[42].mxu0  ;;  %v1063_v13 = vadd.f32 %v1062_v11, %v1873_v18  ;;  %v1064_v16 = vpop.f32.mrb[42].mxu1 }
 0x14f   : > { %1155 = vst [vmem:[%s1729_s30 + $0x120] sm:$0xff] %v948_v4  ;;  %v952_v15 = vadd.f32 %v951_v7, %v1861_v37  ;;  %v953_v17 = vpop.f32.mrb[43].mxu0  ;;  %1157 = vst [vmem:[%s1729_s30 + $0x130] sm:$0xff] %v1061_v9  ;;  %v1065_v21 = vadd.f32 %v1064_v16, %v1866_v8  ;;  %v1066_v23 = vpop.f32.mrb[43].mxu1 }
 0x150   : > { %1156 = vst [vmem:[%s1729_s30 + $0x128] sm:$0xff] %v950_v10  ;;  %v954_v22 = vadd.f32 %v953_v17, %v1869_v12  ;;  %1158 = vst [vmem:[%s1729_s30 + $0x138] sm:$0xff] %v1063_v13  ;;  %v1067_v24 = vadd.f32 %v1066_v23, %v1873_v18 }
 0x151   : > { %1163 = vst [vmem:[%s1729_s30 + $0x160] sm:$0xff] %v952_v15  ;;  %1165 = vst [vmem:[%s1729_s30 + $0x170] sm:$0xff] %v1065_v21 }
 0x152   : > { %1164 = vst [vmem:[%s1729_s30 + $0x168] sm:$0xff] %v954_v22  ;;  %1166 = vst [vmem:[%s1729_s30 + $0x178] sm:$0xff] %v1067_v24 }
 0x154   : > { %v957_v25 = vpop.f32.mrb[44].mxu0  ;;  %v1070_v27 = vpop.f32.mrb[44].mxu1 }
 0x155   : > { %v958_v26 = vadd.f32 %v957_v25, %v1861_v37  ;;  %v959_v28 = vpop.f32.mrb[45].mxu0  ;;  %v1071_v29 = vadd.f32 %v1070_v27, %v1866_v8  ;;  %v1072_v31 = vpop.f32.mrb[45].mxu1 }
 0x156   : > { %v960_v30 = vadd.f32 %v959_v28, %v1869_v12  ;;  %v961_v32 = vpop.f32.mrb[46].mxu0  ;;  %v1073_v33 = vadd.f32 %v1072_v31, %v1873_v18  ;;  %v1074_v35 = vpop.f32.mrb[46].mxu1 }
 0x157   : > { %1171 = vst [vmem:[%s1729_s30 + $0x1a0] sm:$0xff] %v958_v26  ;;  %v962_v34 = vadd.f32 %v961_v32, %v1861_v37  ;;  %v963_v36 = vpop.f32.mrb[47].mxu0  ;;  %1173 = vst [vmem:[%s1729_s30 + $0x1b0] sm:$0xff] %v1071_v29  ;;  %v1075_v19 = vadd.f32 %v1074_v35, %v1866_v8  ;;  %v1076_v38 = vpop.f32.mrb[47].mxu1 }
 0x158   : > { %1172 = vst [vmem:[%s1729_s30 + $0x1a8] sm:$0xff] %v960_v30  ;;  %v964_v20 = vadd.f32 %v963_v36, %v1869_v12  ;;  %1174 = vst [vmem:[%s1729_s30 + $0x1b8] sm:$0xff] %v1073_v33  ;;  %v1077_v39 = vadd.f32 %v1076_v38, %v1873_v18 }
 0x159   : > { %1179 = vst [vmem:[%s1729_s30 + $0x1e0] sm:$0xff] %v962_v34  ;;  %1181 = vst [vmem:[%s1729_s30 + $0x1f0] sm:$0xff] %v1075_v19 }
 0x15a   : > { %1180 = vst [vmem:[%s1729_s30 + $0x1e8] sm:$0xff] %v964_v20  ;;  %1182 = vst [vmem:[%s1729_s30 + $0x1f8] sm:$0xff] %v1077_v39 }
 0x15c   : > { %v967_v40 = vpop.f32.mrb[48].mxu0  ;;  %v1080_v42 = vpop.f32.mrb[48].mxu1 }
 0x15d   : > { %v968_v41 = vadd.f32 %v967_v40, %v1861_v37  ;;  %v969_v43 = vpop.f32.mrb[49].mxu0  ;;  %v1081_v14 = vadd.f32 %v1080_v42, %v1866_v8  ;;  %v1082_v45 = vpop.f32.mrb[49].mxu1 }
 0x15e   : > { %v970_v44 = vadd.f32 %v969_v43, %v1869_v12  ;;  %v971_v46 = vpop.f32.mrb[50].mxu0  ;;  %v1083_v47 = vadd.f32 %v1082_v45, %v1873_v18  ;;  %v1084_v49 = vpop.f32.mrb[50].mxu1 }
 0x15f   : > { %1187 = vst [vmem:[%s1729_s30 + $0x220] sm:$0xff] %v968_v41  ;;  %v972_v48 = vadd.f32 %v971_v46, %v1861_v37  ;;  %v973_v50 = vpop.f32.mrb[51].mxu0  ;;  %1189 = vst [vmem:[%s1729_s30 + $0x230] sm:$0xff] %v1081_v14  ;;  %v1085_v51 = vadd.f32 %v1084_v49, %v1866_v8  ;;  %v1086_v53 = vpop.f32.mrb[51].mxu1 }
 0x160   : > { %1188 = vst [vmem:[%s1729_s30 + $0x228] sm:$0xff] %v970_v44  ;;  %v974_v52 = vadd.f32 %v973_v50, %v1869_v12  ;;  %1190 = vst [vmem:[%s1729_s30 + $0x238] sm:$0xff] %v1083_v47  ;;  %v1087_v54 = vadd.f32 %v1086_v53, %v1873_v18 }
 0x161   : > { %1195 = vst [vmem:[%s1729_s30 + $0x260] sm:$0xff] %v972_v48  ;;  %1197 = vst [vmem:[%s1729_s30 + $0x270] sm:$0xff] %v1085_v51 }
 0x162   : > { %1196 = vst [vmem:[%s1729_s30 + $0x268] sm:$0xff] %v974_v52  ;;  %1198 = vst [vmem:[%s1729_s30 + $0x278] sm:$0xff] %v1087_v54 }
 0x164   : > { %v977_v55 = vpop.f32.mrb[52].mxu0  ;;  %v1090_v57 = vpop.f32.mrb[52].mxu1 }
 0x165   : > { %v978_v56 = vadd.f32 %v977_v55, %v1861_v37  ;;  %v979_v58 = vpop.f32.mrb[53].mxu0  ;;  %v1091_v59 = vadd.f32 %v1090_v57, %v1866_v8  ;;  %v1092_v61 = vpop.f32.mrb[53].mxu1 }
 0x166   : > { %v980_v60 = vadd.f32 %v979_v58, %v1869_v12  ;;  %v981_v62 = vpop.f32.mrb[54].mxu0  ;;  %v1093_v63 = vadd.f32 %v1092_v61, %v1873_v18  ;;  %v1094_v1 = vpop.f32.mrb[54].mxu1 }
 0x167   : > { %1203 = vst [vmem:[%s1729_s30 + $0x2a0] sm:$0xff] %v978_v56  ;;  %v982_v0 = vadd.f32 %v981_v62, %v1861_v37  ;;  %v983_v2 = vpop.f32.mrb[55].mxu0  ;;  %1205 = vst [vmem:[%s1729_s30 + $0x2b0] sm:$0xff] %v1091_v59  ;;  %v1095_v3 = vadd.f32 %v1094_v1, %v1866_v8  ;;  %v1096_v5 = vpop.f32.mrb[55].mxu1 }
 0x168   : > { %1204 = vst [vmem:[%s1729_s30 + $0x2a8] sm:$0xff] %v980_v60  ;;  %v984_v4 = vadd.f32 %v983_v2, %v1869_v12  ;;  %1206 = vst [vmem:[%s1729_s30 + $0x2b8] sm:$0xff] %v1093_v63  ;;  %v1097_v6 = vadd.f32 %v1096_v5, %v1873_v18 }
 0x169   : > { %1211 = vst [vmem:[%s1729_s30 + $0x2e0] sm:$0xff] %v982_v0  ;;  %1213 = vst [vmem:[%s1729_s30 + $0x2f0] sm:$0xff] %v1095_v3 }
 0x16a   : > { %1212 = vst [vmem:[%s1729_s30 + $0x2e8] sm:$0xff] %v984_v4  ;;  %1214 = vst [vmem:[%s1729_s30 + $0x2f8] sm:$0xff] %v1097_v6 }
 0x16c   : > { %v987_v9 = vpop.f32.mrb[56].mxu0  ;;  %v1100_v11 = vpop.f32.mrb[56].mxu1 }
 0x16d   : > { %v988_v10 = vadd.f32 %v987_v9, %v1861_v37  ;;  %v989_v7 = vpop.f32.mrb[57].mxu0  ;;  %v1101_v13 = vadd.f32 %v1100_v11, %v1866_v8  ;;  %v1102_v16 = vpop.f32.mrb[57].mxu1 }
 0x16e   : > { %v990_v15 = vadd.f32 %v989_v7, %v1869_v12  ;;  %v991_v17 = vpop.f32.mrb[58].mxu0  ;;  %v1103_v21 = vadd.f32 %v1102_v16, %v1873_v18  ;;  %v1104_v23 = vpop.f32.mrb[58].mxu1 }
 0x16f   : > { %1219 = vst [vmem:[%s1729_s30 + $0x320] sm:$0xff] %v988_v10  ;;  %v992_v22 = vadd.f32 %v991_v17, %v1861_v37  ;;  %v993_v24 = vpop.f32.mrb[59].mxu0  ;;  %1221 = vst [vmem:[%s1729_s30 + $0x330] sm:$0xff] %v1101_v13  ;;  %v1105_v25 = vadd.f32 %v1104_v23, %v1866_v8  ;;  %v1106_v27 = vpop.f32.mrb[59].mxu1 }
 0x170   : > { %1220 = vst [vmem:[%s1729_s30 + $0x328] sm:$0xff] %v990_v15  ;;  %v994_v26 = vadd.f32 %v993_v24, %v1869_v12  ;;  %1222 = vst [vmem:[%s1729_s30 + $0x338] sm:$0xff] %v1103_v21  ;;  %v1107_v28 = vadd.f32 %v1106_v27, %v1873_v18 }
 0x171   : > { %1227 = vst [vmem:[%s1729_s30 + $0x360] sm:$0xff] %v992_v22  ;;  %1229 = vst [vmem:[%s1729_s30 + $0x370] sm:$0xff] %v1105_v25 }
 0x172   : > { %1228 = vst [vmem:[%s1729_s30 + $0x368] sm:$0xff] %v994_v26  ;;  %1230 = vst [vmem:[%s1729_s30 + $0x378] sm:$0xff] %v1107_v28 }
 0x174   : > { %v997_v29 = vpop.f32.mrb[60].mxu0  ;;  %v1110_v31 = vpop.f32.mrb[60].mxu1 }
 0x175   : > { %v998_v30 = vadd.f32 %v997_v29, %v1861_v37  ;;  %v999_v32 = vpop.f32.mrb[61].mxu0  ;;  %v1111_v33 = vadd.f32 %v1110_v31, %v1866_v8  ;;  %v1112_v35 = vpop.f32.mrb[61].mxu1 }
 0x176   : > { %v1000_v34 = vadd.f32 %v999_v32, %v1869_v12  ;;  %v1001_v36 = vpop.f32.mrb[62].mxu0  ;;  %v1113_v19 = vadd.f32 %v1112_v35, %v1873_v18  ;;  %v1114_v38 = vpop.f32.mrb[62].mxu1 }
 0x177   : > { %1235 = vst [vmem:[%s1729_s30 + $0x3a0] sm:$0xff] %v998_v30  ;;  %v1002_v20 = vadd.f32 %v1001_v36, %v1861_v37  ;;  %v1003_v39 = vpop.f32.mrb[63].mxu0  ;;  %1237 = vst [vmem:[%s1729_s30 + $0x3b0] sm:$0xff] %v1111_v33  ;;  %v1115_v40 = vadd.f32 %v1114_v38, %v1866_v8  ;;  %v1116_v42 = vpop.f32.mrb[63].mxu1 }
 0x178   : > { %1236 = vst [vmem:[%s1729_s30 + $0x3a8] sm:$0xff] %v1000_v34  ;;  %v1004_v41 = vadd.f32 %v1003_v39, %v1869_v12  ;;  %1238 = vst [vmem:[%s1729_s30 + $0x3b8] sm:$0xff] %v1113_v19  ;;  %v1117_v43 = vadd.f32 %v1116_v42, %v1873_v18 }
 0x179   : > { %1243 = vst [vmem:[%s1729_s30 + $0x3e0] sm:$0xff] %v1002_v20  ;;  %1245 = vst [vmem:[%s1729_s30 + $0x3f0] sm:$0xff] %v1115_v40 }
 0x17a   : > { %1244 = vst [vmem:[%s1729_s30 + $0x3e8] sm:$0xff] %v1004_v41  ;;  %1246 = vst [vmem:[%s1729_s30 + $0x3f8] sm:$0xff] %v1117_v43 }
 0x17b PF: > { %s13_s12 = sadd.s32 1, %s1413_s12  }
 0x17c   : > { %p10_p4 = scmp.ge.s32.totalorder %s13_s12, 6  }
 0x17e   :  { %12 = sbr.rel (!%p10_p4) target bundleno = 1 (0x1), region = 62 }

// kernel: generator_forward.11
= control target key start
LH: loop header
LB: loop body
LE: loop exit
PB: predicated region body
PF: predicated region fallthrough
CT: control target
= control target key end

     0   :  { %vm8464_vm0 = vcmask 1040384   ;;  %s14279_s1 = inlined_call_operand.vmem [shape: bf16[1024,2048], index: 1, kind: input, shape index: {}]   ;;  %s14280_s0 = inlined_call_operand.vmem [shape: bf16[32,1024], index: 0, kind: input, shape index: {}]   ;;  %s14281_s2 = inlined_call_operand.vmem [shape: f32[1,2048], index: 2, kind: input, shape index: {}]   ;;  %s14282_s3 = inlined_call_operand.vmem [shape: f32[32,2048], index: 3, kind: output, shape index: {0}]   ;;  %s14283_s4 = inlined_call_operand.vmem [shape: f32[2,2048], index: 4, kind: output, shape index: {1}]  }
   0x1   :  { %v32_v0 = vld [vmem:[%s14279_s1] sm:$0xff]  ;;  %v33_v2 = vld [vmem:[%s14279_s1 + $0x8] sm:$0xff] }
   0x2   :  { %v40_v1 = vld [vmem:[%s14279_s1 + $0x40] sm:$0xff]  ;;  %v41_v4 = vld [vmem:[%s14279_s1 + $0x48] sm:$0xff] }
   0x3   :  { %v8602_v3 = vcombine.high %v32_v0, %v40_v1  ;;  %v8601_v5 = vcombine.low %v32_v0, %v40_v1  ;;  %v48_v6 = vld [vmem:[%s14279_s1 + $0x80] sm:$0xff]  ;;  %v8604_v8 = vcombine.high %v33_v2, %v41_v4  ;;  %v8603_v9 = vcombine.low %v33_v2, %v41_v4  ;;  %v49_v11 = vld [vmem:[%s14279_s1 + $0x88] sm:$0xff] }
   0x4   :  { %v56_v7 = vld [vmem:[%s14279_s1 + $0xc0] sm:$0xff]  ;;  %v57_v12 = vld [vmem:[%s14279_s1 + $0xc8] sm:$0xff] }
   0x5   :  { %v8618_v10 = vcombine.high %v48_v6, %v56_v7  ;;  %v64_v13 = vld [vmem:[%s14279_s1 + $0x100] sm:$0xff]  ;;  %6340 = vmatprep.subr.bf16.mxu0 %v8602_v3  ;;  %v8620_v14 = vcombine.high %v49_v11, %v57_v12  ;;  %v65_v16 = vld [vmem:[%s14279_s1 + $0x108] sm:$0xff]  ;;  %6552 = vmatprep.subr.bf16.mxu1 %v8604_v8  ;;  %v8617_v18 = vcombine.low %v48_v6, %v56_v7 }
   0x6   :  { %v72_v15 = vld [vmem:[%s14279_s1 + $0x140] sm:$0xff]  ;;  %v73_v17 = vld [vmem:[%s14279_s1 + $0x148] sm:$0xff]  ;;  %6341 = vmatpush1.bf16.msra.mxu0 %v8601_v5  ;;  %6553 = vmatpush1.bf16.msra.mxu1 %v8603_v9  ;;  %v8619_v19 = vcombine.low %v49_v11, %v57_v12 }
   0x7   :  { %6342 = vmatprep.subr.bf16.mxu0 %v8618_v10  ;;  %v8634_v20 = vcombine.high %v64_v13, %v72_v15  ;;  %6554 = vmatprep.subr.bf16.mxu1 %v8620_v14  ;;  %v8636_v21 = vcombine.high %v65_v16, %v73_v17  ;;  %v80_v22 = vld [vmem:[%s14279_s1 + $0x180] sm:$0xff]  ;;  %v81_v24 = vld [vmem:[%s14279_s1 + $0x188] sm:$0xff]  ;;  %v8633_v26 = vcombine.low %v64_v13, %v72_v15 }
   0x8   :  { %v88_v23 = vld [vmem:[%s14279_s1 + $0x1c0] sm:$0xff]  ;;  %v89_v25 = vld [vmem:[%s14279_s1 + $0x1c8] sm:$0xff]  ;;  %v8635_v27 = vcombine.low %v65_v16, %v73_v17 }
   0x9   :  { %v8650_v28 = vcombine.high %v80_v22, %v88_v23  ;;  %v8652_v29 = vcombine.high %v81_v24, %v89_v25  ;;  %v96_v30 = vld [vmem:[%s14279_s1 + $0x200] sm:$0xff]  ;;  %v97_v32 = vld [vmem:[%s14279_s1 + $0x208] sm:$0xff]  ;;  %v8649_v34 = vcombine.low %v80_v22, %v88_v23  ;;  %v8651_v35 = vcombine.low %v81_v24, %v89_v25 }
   0xa   :  { %6343 = vmatpush1.bf16.msra.mxu0 %v8617_v18  ;;  %6555 = vmatpush1.bf16.msra.mxu1 %v8619_v19  ;;  %v104_v31 = vld [vmem:[%s14279_s1 + $0x240] sm:$0xff]  ;;  %v105_v33 = vld [vmem:[%s14279_s1 + $0x248] sm:$0xff] }
   0xb   :  { %6344 = vmatprep.subr.bf16.mxu0 %v8634_v20  ;;  %6556 = vmatprep.subr.bf16.mxu1 %v8636_v21  ;;  %v8666_v36 = vcombine.high %v96_v30, %v104_v31  ;;  %v8668_v37 = vcombine.high %v97_v32, %v105_v33  ;;  %v112_v38 = vld [vmem:[%s14279_s1 + $0x280] sm:$0xff]  ;;  %v113_v40 = vld [vmem:[%s14279_s1 + $0x288] sm:$0xff]  ;;  %v8665_v42 = vcombine.low %v96_v30, %v104_v31 }
   0xc   :  { %v120_v39 = vld [vmem:[%s14279_s1 + $0x2c0] sm:$0xff]  ;;  %v121_v41 = vld [vmem:[%s14279_s1 + $0x2c8] sm:$0xff]  ;;  %v8667_v43 = vcombine.low %v97_v32, %v105_v33 }
   0xd   :  { %v8682_v44 = vcombine.high %v112_v38, %v120_v39  ;;  %v8684_v45 = vcombine.high %v113_v40, %v121_v41  ;;  %v128_v46 = vld [vmem:[%s14279_s1 + $0x300] sm:$0xff]  ;;  %v129_v48 = vld [vmem:[%s14279_s1 + $0x308] sm:$0xff]  ;;  %v8681_v50 = vcombine.low %v112_v38, %v120_v39  ;;  %v8683_v51 = vcombine.low %v113_v40, %v121_v41 }
   0xe   :  { %6345 = vmatpush1.bf16.msra.mxu0 %v8633_v26  ;;  %6557 = vmatpush1.bf16.msra.mxu1 %v8635_v27  ;;  %v136_v47 = vld [vmem:[%s14279_s1 + $0x340] sm:$0xff]  ;;  %v137_v49 = vld [vmem:[%s14279_s1 + $0x348] sm:$0xff] }
   0xf   :  { %6346 = vmatprep.subr.bf16.mxu0 %v8650_v28  ;;  %6558 = vmatprep.subr.bf16.mxu1 %v8652_v29  ;;  %v8698_v52 = vcombine.high %v128_v46, %v136_v47  ;;  %v9997_v53 = vld [vmem:[%s14280_s0] sm:$0xff]  ;;  %v8700_v55 = vcombine.high %v129_v48, %v137_v49  ;;  %v145_v59 = vld [vmem:[%s14279_s1 + $0x388] sm:$0xff]  ;;  %v8697_v61 = vcombine.low %v128_v46, %v136_v47 }
  0x10   :  { %v10002_v54 = vld [vmem:[%s14280_s0 + $0x20] sm:$0xff]  ;;  %v153_v60 = vld [vmem:[%s14279_s1 + $0x3c8] sm:$0xff]  ;;  %v8699_v62 = vcombine.low %v129_v48, %v137_v49 }
  0x11   :  { %v144_v56 = vld [vmem:[%s14279_s1 + $0x380] sm:$0xff]  ;;  %v10012_v58 = vcombine.high %v9997_v53, %v10002_v54  ;;  %v8716_v0 = vcombine.high %v145_v59, %v153_v60  ;;  %v161_v3 = vld [vmem:[%s14279_s1 + $0x408] sm:$0xff]  ;;  %v8715_v6 = vcombine.low %v145_v59, %v153_v60 }
  0x12   :  { %6347 = vmatpush1.bf16.msra.mxu0 %v8649_v34  ;;  %6559 = vmatpush1.bf16.msra.mxu1 %v8651_v35  ;;  %v152_v57 = vld [vmem:[%s14279_s1 + $0x3c0] sm:$0xff]  ;;  %v169_v4 = vld [vmem:[%s14279_s1 + $0x448] sm:$0xff] }
  0x13   :  { %6348 = vmatprep.subr.bf16.mxu0 %v8666_v36  ;;  %6560 = vmatprep.subr.bf16.mxu1 %v8668_v37  ;;  %v8714_v63 = vcombine.high %v144_v56, %v152_v57  ;;  %v160_v1 = vld [vmem:[%s14279_s1 + $0x400] sm:$0xff]  ;;  %v8713_v5 = vcombine.low %v144_v56, %v152_v57  ;;  %v8732_v8 = vcombine.high %v161_v3, %v169_v4  ;;  %v177_v11 = vld [vmem:[%s14279_s1 + $0x488] sm:$0xff] }
  0x14   :  { %6372 = vmatprep.mubr.bf16.mxu0 %v10012_v58  ;;  %v168_v2 = vld [vmem:[%s14279_s1 + $0x440] sm:$0xff]  ;;  %6584 = vmatprep.mubr.bf16.mxu1 %v10012_v58  ;;  %v185_v12 = vld [vmem:[%s14279_s1 + $0x4c8] sm:$0xff]  ;;  %v8731_v14 = vcombine.low %v161_v3, %v169_v4 }
  0x15   :  { %v8730_v7 = vcombine.high %v160_v1, %v168_v2  ;;  %v176_v9 = vld [vmem:[%s14279_s1 + $0x480] sm:$0xff]  ;;  %v8729_v13 = vcombine.low %v160_v1, %v168_v2  ;;  %v8748_v16 = vcombine.high %v177_v11, %v185_v12  ;;  %v193_v19 = vld [vmem:[%s14279_s1 + $0x508] sm:$0xff]  ;;  %v8747_v22 = vcombine.low %v177_v11, %v185_v12 }
  0x16   :  { %6349 = vmatpush1.bf16.msra.mxu0 %v8665_v42  ;;  %6561 = vmatpush1.bf16.msra.mxu1 %v8667_v43  ;;  %v184_v10 = vld [vmem:[%s14279_s1 + $0x4c0] sm:$0xff]  ;;  %v201_v20 = vld [vmem:[%s14279_s1 + $0x548] sm:$0xff] }
  0x17   :  { %6350 = vmatprep.subr.bf16.mxu0 %v8682_v44  ;;  %6562 = vmatprep.subr.bf16.mxu1 %v8684_v45  ;;  %v8746_v15 = vcombine.high %v176_v9, %v184_v10  ;;  %v192_v17 = vld [vmem:[%s14279_s1 + $0x500] sm:$0xff]  ;;  %v8745_v21 = vcombine.low %v176_v9, %v184_v10  ;;  %v8764_v24 = vcombine.high %v193_v19, %v201_v20  ;;  %v209_v27 = vld [vmem:[%s14279_s1 + $0x588] sm:$0xff] }
  0x18   :  { %v200_v18 = vld [vmem:[%s14279_s1 + $0x540] sm:$0xff]  ;;  %v217_v28 = vld [vmem:[%s14279_s1 + $0x5c8] sm:$0xff]  ;;  %v8763_v30 = vcombine.low %v193_v19, %v201_v20 }
  0x19   :  { %v8762_v23 = vcombine.high %v192_v17, %v200_v18  ;;  %v208_v25 = vld [vmem:[%s14279_s1 + $0x580] sm:$0xff]  ;;  %v8761_v29 = vcombine.low %v192_v17, %v200_v18  ;;  %v8780_v32 = vcombine.high %v209_v27, %v217_v28  ;;  %v225_v35 = vld [vmem:[%s14279_s1 + $0x608] sm:$0xff]  ;;  %v8779_v38 = vcombine.low %v209_v27, %v217_v28 }
  0x1a   :  { %6351 = vmatpush1.bf16.msra.mxu0 %v8681_v50  ;;  %6563 = vmatpush1.bf16.msra.mxu1 %v8683_v51  ;;  %v216_v26 = vld [vmem:[%s14279_s1 + $0x5c0] sm:$0xff]  ;;  %v233_v36 = vld [vmem:[%s14279_s1 + $0x648] sm:$0xff] }
  0x1b   :  { %6352 = vmatprep.subr.bf16.mxu0 %v8698_v52  ;;  %6564 = vmatprep.subr.bf16.mxu1 %v8700_v55  ;;  %v8778_v31 = vcombine.high %v208_v25, %v216_v26  ;;  %v224_v33 = vld [vmem:[%s14279_s1 + $0x600] sm:$0xff]  ;;  %v8777_v37 = vcombine.low %v208_v25, %v216_v26  ;;  %v8796_v40 = vcombine.high %v225_v35, %v233_v36  ;;  %v241_v43 = vld [vmem:[%s14279_s1 + $0x688] sm:$0xff] }
  0x1c   :  { %v232_v34 = vld [vmem:[%s14279_s1 + $0x640] sm:$0xff]  ;;  %v249_v44 = vld [vmem:[%s14279_s1 + $0x6c8] sm:$0xff]  ;;  %v8795_v46 = vcombine.low %v225_v35, %v233_v36 }
  0x1d   :  { %v8794_v39 = vcombine.high %v224_v33, %v232_v34  ;;  %v240_v41 = vld [vmem:[%s14279_s1 + $0x680] sm:$0xff]  ;;  %v8793_v45 = vcombine.low %v224_v33, %v232_v34  ;;  %v8812_v48 = vcombine.high %v241_v43, %v249_v44  ;;  %v257_v51 = vld [vmem:[%s14279_s1 + $0x708] sm:$0xff]  ;;  %v8811_v56 = vcombine.low %v241_v43, %v249_v44 }
  0x1e   :  { %6353 = vmatpush1.bf16.msra.mxu0 %v8697_v61  ;;  %6565 = vmatpush1.bf16.msra.mxu1 %v8699_v62  ;;  %v248_v42 = vld [vmem:[%s14279_s1 + $0x6c0] sm:$0xff]  ;;  %v265_v52 = vld [vmem:[%s14279_s1 + $0x748] sm:$0xff] }
  0x1f   :  { %6354 = vmatprep.subr.bf16.mxu0 %v8714_v63  ;;  %6566 = vmatprep.subr.bf16.mxu1 %v8716_v0  ;;  %v8810_v47 = vcombine.high %v240_v41, %v248_v42  ;;  %v256_v49 = vld [vmem:[%s14279_s1 + $0x700] sm:$0xff]  ;;  %v8809_v55 = vcombine.low %v240_v41, %v248_v42  ;;  %v8828_v59 = vcombine.high %v257_v51, %v265_v52  ;;  %v273_v62 = vld [vmem:[%s14279_s1 + $0x788] sm:$0xff] }
  0x20   :  { %v264_v50 = vld [vmem:[%s14279_s1 + $0x740] sm:$0xff]  ;;  %v281_v63 = vld [vmem:[%s14279_s1 + $0x7c8] sm:$0xff]  ;;  %v8827_v1 = vcombine.low %v257_v51, %v265_v52 }
  0x21   :  { %v8826_v57 = vcombine.high %v256_v49, %v264_v50  ;;  %v272_v60 = vld [vmem:[%s14279_s1 + $0x780] sm:$0xff]  ;;  %v8825_v0 = vcombine.low %v256_v49, %v264_v50  ;;  %v8844_v3 = vcombine.high %v273_v62, %v281_v63  ;;  %v8843_v9 = vcombine.low %v273_v62, %v281_v63  ;;  %v329_v25 = vld [vmem:[%s14279_s1 + $0x948] sm:$0xff] }
  0x22   :  { %6355 = vmatpush1.bf16.msra.mxu0 %v8713_v5  ;;  %6567 = vmatpush1.bf16.msra.mxu1 %v8715_v6  ;;  %v280_v61 = vld [vmem:[%s14279_s1 + $0x7c0] sm:$0xff]  ;;  %v289_v6 = vld [vmem:[%s14279_s1 + $0x808] sm:$0xff] }
  0x23   :  { %6356 = vmatprep.subr.bf16.mxu0 %v8730_v7  ;;  %6568 = vmatprep.subr.bf16.mxu1 %v8732_v8  ;;  %v8842_v2 = vcombine.high %v272_v60, %v280_v61  ;;  %v288_v4 = vld [vmem:[%s14279_s1 + $0x800] sm:$0xff]  ;;  %v297_v7 = vld [vmem:[%s14279_s1 + $0x848] sm:$0xff]  ;;  %v8841_v8 = vcombine.low %v272_v60, %v280_v61 }
  0x24   :  { %v296_v5 = vld [vmem:[%s14279_s1 + $0x840] sm:$0xff]  ;;  %v8860_v11 = vcombine.high %v289_v6, %v297_v7  ;;  %v8859_v20 = vcombine.low %v289_v6, %v297_v7  ;;  %v345_v33 = vld [vmem:[%s14279_s1 + $0x9c8] sm:$0xff] }
  0x25   :  { %v8858_v10 = vcombine.high %v288_v4, %v296_v5  ;;  %v304_v12 = vld [vmem:[%s14279_s1 + $0x880] sm:$0xff]  ;;  %v8857_v19 = vcombine.low %v288_v4, %v296_v5  ;;  %v10187_v35 = vld [vmem:[%s14280_s0 + $0x8] sm:$0xff] }
  0x26   :  { %6357 = vmatpush1.bf16.msra.mxu0 %v8729_v13  ;;  %6569 = vmatpush1.bf16.msra.mxu1 %v8731_v14  ;;  %v312_v13 = vld [vmem:[%s14279_s1 + $0x8c0] sm:$0xff]  ;;  %v305_v14 = vld [vmem:[%s14279_s1 + $0x888] sm:$0xff] }
  0x27   :  { %6358 = vmatprep.subr.bf16.mxu0 %v8746_v15  ;;  %6570 = vmatprep.subr.bf16.mxu1 %v8748_v16  ;;  %v10141_v15 = vcombine.low %v9997_v53, %v10002_v54  ;;  %v313_v16 = vld [vmem:[%s14279_s1 + $0x8c8] sm:$0xff]  ;;  %v24_v17 = vld [vmem:[%s14280_s0 + $0x40] sm:$0xff]  ;;  %v8873_v26 = vcombine.low %v304_v12, %v312_v13 }
  0x28   :  { %v28_v18 = vld [vmem:[%s14280_s0 + $0x60] sm:$0xff]  ;;  %v8876_v53 = vcombine.high %v305_v14, %v313_v16  ;;  %v8875_v27 = vcombine.low %v305_v14, %v313_v16  ;;  %v10192_v36 = vld [vmem:[%s14280_s0 + $0x28] sm:$0xff] }
  0x29   :  { %v320_v54 = vld [vmem:[%s14279_s1 + $0x900] sm:$0xff]  ;;  %v10182_v34 = vcombine.low %v24_v17, %v28_v18  ;;  %v10202_v43 = vcombine.high %v10187_v35, %v10192_v36  ;;  %v353_v44 = vld [vmem:[%s14279_s1 + $0xa08] sm:$0xff] }
  0x2a   :  { %6359 = vmatpush1.bf16.msra.mxu0 %v8745_v21  ;;  %6571 = vmatpush1.bf16.msra.mxu1 %v8747_v22  ;;  %v8874_v21 = vcombine.high %v304_v12, %v312_v13  ;;  %v328_v22 = vld [vmem:[%s14279_s1 + $0x940] sm:$0xff]  ;;  %v369_v52 = vld [vmem:[%s14279_s1 + $0xa88] sm:$0xff] }
  0x2b   :  { %6360 = vmatprep.subr.bf16.mxu0 %v8762_v23  ;;  %6572 = vmatprep.subr.bf16.mxu1 %v8764_v24  ;;  %v10158_v23 = vcombine.high %v24_v17, %v28_v18  ;;  %v321_v24 = vld [vmem:[%s14279_s1 + $0x908] sm:$0xff]  ;;  %v8890_v28 = vcombine.high %v320_v54, %v328_v22  ;;  %v352_v41 = vld [vmem:[%s14279_s1 + $0xa00] sm:$0xff] }
  0x2c   :  { %v360_v42 = vld [vmem:[%s14279_s1 + $0xa40] sm:$0xff]  ;;  %v385_v63 = vld [vmem:[%s14279_s1 + $0xb08] sm:$0xff] }
  0x2d   :  { %v368_v50 = vld [vmem:[%s14279_s1 + $0xa80] sm:$0xff]  ;;  %v401_v7 = vld [vmem:[%s14279_s1 + $0xb88] sm:$0xff] }
  0x2e   :  { %6361 = vmatpush1.bf16.msra.mxu0 %v8761_v29  ;;  %6573 = vmatpush1.bf16.msra.mxu1 %v8763_v30  ;;  %v8892_v29 = vcombine.high %v321_v24, %v329_v25  ;;  %v336_v30 = vld [vmem:[%s14279_s1 + $0x980] sm:$0xff]  ;;  %v417_v16 = vld [vmem:[%s14279_s1 + $0xc08] sm:$0xff] }
  0x2f   :  { %6362 = vmatprep.subr.bf16.mxu0 %v8778_v31  ;;  %6574 = vmatprep.subr.bf16.mxu1 %v8780_v32  ;;  %v344_v31 = vld [vmem:[%s14279_s1 + $0x9c0] sm:$0xff]  ;;  %v337_v32 = vld [vmem:[%s14279_s1 + $0x988] sm:$0xff] }
  0x30   :  { %v376_v51 = vld [vmem:[%s14279_s1 + $0xac0] sm:$0xff]  ;;  %v425_v17 = vld [vmem:[%s14279_s1 + $0xc48] sm:$0xff] }
  0x31   :  { %v384_v61 = vld [vmem:[%s14279_s1 + $0xb00] sm:$0xff] }
  0x32   :  { %6363 = vmatpush1.bf16.msra.mxu0 %v8777_v37  ;;  %6575 = vmatpush1.bf16.msra.mxu1 %v8779_v38  ;;  %v8889_v37 = vcombine.low %v320_v54, %v328_v22  ;;  %v8891_v38 = vcombine.low %v321_v24, %v329_v25  ;;  %v392_v62 = vld [vmem:[%s14279_s1 + $0xb40] sm:$0xff]  ;;  %v433_v22 = vld [vmem:[%s14279_s1 + $0xc88] sm:$0xff] }
  0x33   :  { %6364 = vmatprep.subr.bf16.mxu0 %v8794_v39  ;;  %6576 = vmatprep.subr.bf16.mxu1 %v8796_v40  ;;  %v8906_v39 = vcombine.high %v336_v30, %v344_v31  ;;  %v8908_v40 = vcombine.high %v337_v32, %v345_v33  ;;  %v400_v5 = vld [vmem:[%s14279_s1 + $0xb80] sm:$0xff]  ;;  %v441_v24 = vld [vmem:[%s14279_s1 + $0xcc8] sm:$0xff] }
  0x34   :  { %v408_v6 = vld [vmem:[%s14279_s1 + $0xbc0] sm:$0xff] }
  0x35   :  { %v416_v13 = vld [vmem:[%s14279_s1 + $0xc00] sm:$0xff]  ;;  %v8969_v18 = vcombine.low %v400_v5, %v408_v6 }
  0x36   :  { %6365 = vmatpush1.bf16.msra.mxu0 %v8793_v45  ;;  %6577 = vmatpush1.bf16.msra.mxu1 %v8795_v46  ;;  %v361_v45 = vld [vmem:[%s14279_s1 + $0xa48] sm:$0xff]  ;;  %v8905_v46 = vcombine.low %v336_v30, %v344_v31  ;;  %v424_v14 = vld [vmem:[%s14279_s1 + $0xc40] sm:$0xff] }
  0x37   :  { %6366 = vmatprep.subr.bf16.mxu0 %v8810_v47  ;;  %6578 = vmatprep.subr.bf16.mxu1 %v8812_v48  ;;  %v8907_v47 = vcombine.low %v337_v32, %v345_v33  ;;  %v8922_v48 = vcombine.high %v352_v41, %v360_v42  ;;  %v8924_v49 = vcombine.high %v353_v44, %v361_v45  ;;  %v440_v54 = vld [vmem:[%s14279_s1 + $0xcc0] sm:$0xff]  ;;  %v449_v31 = vld [vmem:[%s14279_s1 + $0xd08] sm:$0xff] }
  0x38   :  { %v8985_v25 = vcombine.low %v416_v13, %v424_v14  ;;  %v456_v30 = vld [vmem:[%s14279_s1 + $0xd40] sm:$0xff]  ;;  %v457_v32 = vld [vmem:[%s14279_s1 + $0xd48] sm:$0xff] }
  0x3a   :  { %6367 = vmatpush1.bf16.msra.mxu0 %v8809_v55  ;;  %6579 = vmatpush1.bf16.msra.mxu1 %v8811_v56  ;;  %v377_v55 = vld [vmem:[%s14279_s1 + $0xac8] sm:$0xff]  ;;  %v8921_v56 = vcombine.low %v352_v41, %v360_v42  ;;  %v472_v41 = vld [vmem:[%s14279_s1 + $0xdc0] sm:$0xff] }
  0x3b   :  { %6368 = vmatprep.subr.bf16.mxu0 %v8826_v57  ;;  %6580 = vmatprep.subr.bf16.mxu1 %v8828_v59  ;;  %v8923_v57 = vcombine.low %v353_v44, %v361_v45  ;;  %v8938_v59 = vcombine.high %v368_v50, %v376_v51  ;;  %v8940_v60 = vcombine.high %v369_v52, %v377_v55  ;;  %v465_v42 = vld [vmem:[%s14279_s1 + $0xd88] sm:$0xff] }
  0x3c   :  { %v473_v44 = vld [vmem:[%s14279_s1 + $0xdc8] sm:$0xff] }
  0x3e   :  { %6369 = vmatpush1.bf16.msra.mxu0 %v8825_v0  ;;  %6581 = vmatpush1.bf16.msra.mxu1 %v8827_v1  ;;  %v393_v0 = vld [vmem:[%s14279_s1 + $0xb48] sm:$0xff]  ;;  %v8937_v1 = vcombine.low %v368_v50, %v376_v51  ;;  %v488_v50 = vld [vmem:[%s14279_s1 + $0xe40] sm:$0xff] }
  0x3f   :  { %6370 = vmatprep.subr.bf16.mxu0 %v8842_v2  ;;  %6582 = vmatprep.subr.bf16.mxu1 %v8844_v3  ;;  %v8939_v2 = vcombine.low %v369_v52, %v377_v55  ;;  %v8954_v3 = vcombine.high %v384_v61, %v392_v62  ;;  %v8956_v4 = vcombine.high %v385_v63, %v393_v0  ;;  %v481_v51 = vld [vmem:[%s14279_s1 + $0xe08] sm:$0xff] }
  0x40   :  { %v489_v52 = vld [vmem:[%s14279_s1 + $0xe48] sm:$0xff] }
  0x42   :  { %6371 = vmatpush1.bf16.msra.mxu0 %v8841_v8  ;;  %6583 = vmatpush1.bf16.msra.mxu1 %v8843_v9  ;;  %v409_v8 = vld [vmem:[%s14279_s1 + $0xbc8] sm:$0xff]  ;;  %v8953_v9 = vcombine.low %v384_v61, %v392_v62  ;;  %v504_v61 = vld [vmem:[%s14279_s1 + $0xec0] sm:$0xff] }
  0x43   :  { %6393 = vmatprep.subr.bf16.mxu0 %v8858_v10  ;;  %6605 = vmatprep.subr.bf16.mxu1 %v8860_v11  ;;  %v8955_v10 = vcombine.low %v385_v63, %v393_v0  ;;  %v8970_v11 = vcombine.high %v400_v5, %v408_v6  ;;  %v8972_v12 = vcombine.high %v401_v7, %v409_v8  ;;  %v497_v62 = vld [vmem:[%s14279_s1 + $0xe88] sm:$0xff]  ;;  %v520_v5 = vld [vmem:[%s14279_s1 + $0xf40] sm:$0xff] }
  0x44   :  { %v505_v63 = vld [vmem:[%s14279_s1 + $0xec8] sm:$0xff] }
  0x45   :  { %6373 = vmatmul.mubr.bf16.vlgmr.msra.gmra.mrb[0].mxu0 %v10141_v15  ;;  %6585 = vmatmul.mubr.bf16.vlgmr.msra.gmra.mrb[0].mxu1 %v10141_v15  ;;  %v513_v6 = vld [vmem:[%s14279_s1 + $0xf08] sm:$0xff] }
  0x46   :  { %6394 = vmatpush1.bf16.msra.mxu0 %v8857_v19  ;;  %6606 = vmatpush1.bf16.msra.mxu1 %v8859_v20  ;;  %v8971_v19 = vcombine.low %v401_v7, %v409_v8  ;;  %v8986_v20 = vcombine.high %v416_v13, %v424_v14  ;;  %v521_v7 = vld [vmem:[%s14279_s1 + $0xf48] sm:$0xff]  ;;  %v536_v13 = vld [vmem:[%s14279_s1 + $0xfc0] sm:$0xff] }
  0x47   :  { %6395 = vmatprep.subr.bf16.mxu0 %v8874_v21  ;;  %6607 = vmatprep.subr.bf16.mxu1 %v8876_v53  ;;  %v8988_v21 = vcombine.high %v417_v16, %v425_v17  ;;  %v432_v53 = vld [vmem:[%s14279_s1 + $0xc80] sm:$0xff]  ;;  %v529_v14 = vld [vmem:[%s14279_s1 + $0xf88] sm:$0xff] }
  0x48   :  { %6382 = vmatprep.mubr.bf16.mxu0 %v10158_v23  ;;  %6594 = vmatprep.mubr.bf16.mxu1 %v10158_v23  ;;  %v9001_v33 = vcombine.low %v432_v53, %v440_v54 }
  0x4a   :  { %6396 = vmatpush1.bf16.msra.mxu0 %v8873_v26  ;;  %6608 = vmatpush1.bf16.msra.mxu1 %v8875_v27  ;;  %v8987_v26 = vcombine.low %v417_v16, %v425_v17  ;;  %v9002_v27 = vcombine.high %v432_v53, %v440_v54  ;;  %v537_v16 = vld [vmem:[%s14279_s1 + $0xfc8] sm:$0xff]  ;;  %v552_v53 = vld [vmem:[%s14279_s1 + $0x1040] sm:$0xff] }
  0x4b   :  { %6397 = vmatprep.subr.bf16.mxu0 %v8890_v28  ;;  %6609 = vmatprep.subr.bf16.mxu1 %v8892_v29  ;;  %v9004_v28 = vcombine.high %v433_v22, %v441_v24  ;;  %v448_v29 = vld [vmem:[%s14279_s1 + $0xd00] sm:$0xff]  ;;  %v545_v54 = vld [vmem:[%s14279_s1 + $0x1008] sm:$0xff] }
  0x4c   :  { %v9017_v45 = vcombine.low %v448_v29, %v456_v30 }
  0x4d   :  { %6383 = vmatmul.mubr.bf16.gmra.mrb[4].mxu0 %v10182_v34  ;;  %6595 = vmatmul.mubr.bf16.gmra.mrb[4].mxu1 %v10182_v34 }
  0x4e   :  { %6398 = vmatpush1.bf16.msra.mxu0 %v8889_v37  ;;  %6610 = vmatpush1.bf16.msra.mxu1 %v8891_v38  ;;  %v9003_v37 = vcombine.low %v433_v22, %v441_v24  ;;  %v9018_v38 = vcombine.high %v448_v29, %v456_v30  ;;  %v553_v22 = vld [vmem:[%s14279_s1 + $0x1048] sm:$0xff]  ;;  %v568_v29 = vld [vmem:[%s14279_s1 + $0x10c0] sm:$0xff] }
  0x4f   :  { %6399 = vmatprep.subr.bf16.mxu0 %v8906_v39  ;;  %6611 = vmatprep.subr.bf16.mxu1 %v8908_v40  ;;  %v9020_v39 = vcombine.high %v449_v31, %v457_v32  ;;  %v464_v40 = vld [vmem:[%s14279_s1 + $0xd80] sm:$0xff]  ;;  %v561_v30 = vld [vmem:[%s14279_s1 + $0x1088] sm:$0xff] }
  0x50   :  { %6425 = vmatprep.mubr.bf16.mxu0 %v10202_v43  ;;  %6637 = vmatprep.mubr.bf16.mxu1 %v10202_v43  ;;  %v9033_v55 = vcombine.low %v464_v40, %v472_v41 }
  0x52   :  { %6400 = vmatpush1.bf16.msra.mxu0 %v8905_v46  ;;  %6612 = vmatpush1.bf16.msra.mxu1 %v8907_v47  ;;  %v9019_v46 = vcombine.low %v449_v31, %v457_v32  ;;  %v9034_v47 = vcombine.high %v464_v40, %v472_v41  ;;  %v10369_v31 = vcombine.low %v10187_v35, %v10192_v36  ;;  %v569_v32 = vld [vmem:[%s14279_s1 + $0x10c8] sm:$0xff]  ;;  %v576_v36 = vld [vmem:[%s14279_s1 + $0x1100] sm:$0xff] }
  0x53   :  { %6401 = vmatprep.subr.bf16.mxu0 %v8922_v48  ;;  %6613 = vmatprep.subr.bf16.mxu1 %v8924_v49  ;;  %v9036_v48 = vcombine.high %v465_v42, %v473_v44  ;;  %v480_v49 = vld [vmem:[%s14279_s1 + $0xe00] sm:$0xff]  ;;  %v9132_v35 = vcombine.high %v561_v30, %v569_v32 }
  0x54   :  { %v9049_v0 = vcombine.low %v480_v49, %v488_v50  ;;  %v584_v41 = vld [vmem:[%s14279_s1 + $0x1140] sm:$0xff] }
  0x56   :  { %6402 = vmatpush1.bf16.msra.mxu0 %v8921_v56  ;;  %6614 = vmatpush1.bf16.msra.mxu1 %v8923_v57  ;;  %v9035_v56 = vcombine.low %v465_v42, %v473_v44  ;;  %v9050_v57 = vcombine.high %v480_v49, %v488_v50  ;;  %v577_v44 = vld [vmem:[%s14279_s1 + $0x1108] sm:$0xff]  ;;  %v592_v50 = vld [vmem:[%s14279_s1 + $0x1180] sm:$0xff] }
  0x57   :  { %6403 = vmatprep.subr.bf16.mxu0 %v8938_v59  ;;  %6615 = vmatprep.subr.bf16.mxu1 %v8940_v60  ;;  %v9052_v59 = vcombine.high %v481_v51, %v489_v52  ;;  %v496_v60 = vld [vmem:[%s14279_s1 + $0xe80] sm:$0xff] }
  0x58   :  { %v9065_v8 = vcombine.low %v496_v60, %v504_v61 }
  0x5a   :  { %6404 = vmatpush1.bf16.msra.mxu0 %v8937_v1  ;;  %6616 = vmatpush1.bf16.msra.mxu1 %v8939_v2  ;;  %v9051_v1 = vcombine.low %v481_v51, %v489_v52  ;;  %v9066_v2 = vcombine.high %v496_v60, %v504_v61  ;;  %v600_v51 = vld [vmem:[%s14279_s1 + $0x11c0] sm:$0xff]  ;;  %v593_v52 = vld [vmem:[%s14279_s1 + $0x1188] sm:$0xff]  ;;  %v9145_v60 = vcombine.low %v576_v36, %v584_v41 }
  0x5b   :  { %6405 = vmatprep.subr.bf16.mxu0 %v8954_v3  ;;  %6617 = vmatprep.subr.bf16.mxu1 %v8956_v4  ;;  %v9068_v3 = vcombine.high %v497_v62, %v505_v63  ;;  %v512_v4 = vld [vmem:[%s14279_s1 + $0xf00] sm:$0xff] }
  0x5c   :  { %v9081_v17 = vcombine.low %v512_v4, %v520_v5 }
  0x5e   :  { %6406 = vmatpush1.bf16.msra.mxu0 %v8953_v9  ;;  %6618 = vmatpush1.bf16.msra.mxu1 %v8955_v10  ;;  %v9067_v9 = vcombine.low %v497_v62, %v505_v63  ;;  %v9082_v10 = vcombine.high %v512_v4, %v520_v5  ;;  %v9162_v62 = vcombine.high %v592_v50, %v600_v51  ;;  %v617_v4 = vld [vmem:[%s14279_s1 + $0x1248] sm:$0xff] }
  0x5f   :  { %6407 = vmatprep.subr.bf16.mxu0 %v8970_v11  ;;  %6619 = vmatprep.subr.bf16.mxu1 %v8972_v12  ;;  %v9084_v11 = vcombine.high %v513_v6, %v521_v7  ;;  %v528_v12 = vld [vmem:[%s14279_s1 + $0xf80] sm:$0xff]  ;;  %v9161_v5 = vcombine.low %v592_v50, %v600_v51 }
  0x60   :  { %v9097_v24 = vcombine.low %v528_v12, %v536_v13 }
  0x62   :  { %6408 = vmatpush1.bf16.msra.mxu0 %v8969_v18  ;;  %6620 = vmatpush1.bf16.msra.mxu1 %v8971_v19  ;;  %v9083_v18 = vcombine.low %v513_v6, %v521_v7  ;;  %v9098_v19 = vcombine.high %v528_v12, %v536_v13  ;;  %v633_v12 = vld [vmem:[%s14279_s1 + $0x12c8] sm:$0xff] }
  0x63   :  { %6409 = vmatprep.subr.bf16.mxu0 %v8986_v20  ;;  %6621 = vmatprep.subr.bf16.mxu1 %v8988_v21  ;;  %v9100_v20 = vcombine.high %v529_v14, %v537_v16  ;;  %v544_v21 = vld [vmem:[%s14279_s1 + $0x1000] sm:$0xff] }
  0x66   :  { %6410 = vmatpush1.bf16.msra.mxu0 %v8985_v25  ;;  %6622 = vmatpush1.bf16.msra.mxu1 %v8987_v26  ;;  %v9099_v25 = vcombine.low %v529_v14, %v537_v16  ;;  %v9114_v26 = vcombine.high %v544_v21, %v552_v53 }
  0x67   :  { %6411 = vmatprep.subr.bf16.mxu0 %v9002_v27  ;;  %6623 = vmatprep.subr.bf16.mxu1 %v9004_v28  ;;  %v9116_v27 = vcombine.high %v545_v54, %v553_v22  ;;  %v560_v28 = vld [vmem:[%s14279_s1 + $0x1080] sm:$0xff] }
  0x68   :  { %v9130_v40 = vcombine.high %v560_v28, %v568_v29 }
  0x6a   :  { %6412 = vmatpush1.bf16.msra.mxu0 %v9001_v33  ;;  %6624 = vmatpush1.bf16.msra.mxu1 %v9003_v37  ;;  %v25_v33 = vld [vmem:[%s14280_s0 + $0x48] sm:$0xff] }
  0x6b   :  { %6413 = vmatprep.subr.bf16.mxu0 %v9018_v38  ;;  %6625 = vmatprep.subr.bf16.mxu1 %v9020_v39  ;;  %v29_v37 = vld [vmem:[%s14280_s0 + $0x68] sm:$0xff]  ;;  %v9113_v38 = vcombine.low %v544_v21, %v552_v53  ;;  %v9115_v39 = vcombine.low %v545_v54, %v553_v22 }
  0x6c   :  { %v10386_v42 = vcombine.high %v25_v33, %v29_v37  ;;  %v649_v21 = vld [vmem:[%s14279_s1 + $0x1348] sm:$0xff] }
  0x6e   :  { %6414 = vmatpush1.bf16.msra.mxu0 %v9017_v45  ;;  %6626 = vmatpush1.bf16.msra.mxu1 %v9019_v46  ;;  %v585_v45 = vld [vmem:[%s14279_s1 + $0x1148] sm:$0xff]  ;;  %v9129_v46 = vcombine.low %v560_v28, %v568_v29 }
  0x6f   :  { %6415 = vmatprep.subr.bf16.mxu0 %v9034_v47  ;;  %6627 = vmatprep.subr.bf16.mxu1 %v9036_v48  ;;  %v9131_v47 = vcombine.low %v561_v30, %v569_v32  ;;  %v9146_v48 = vcombine.high %v576_v36, %v584_v41  ;;  %v9148_v49 = vcombine.high %v577_v44, %v585_v45  ;;  %v665_v28 = vld [vmem:[%s14279_s1 + $0x13c8] sm:$0xff] }
  0x70   :  { %v9147_v61 = vcombine.low %v577_v44, %v585_v45  ;;  %v688_v45 = vld [vmem:[%s14279_s1 + $0x1480] sm:$0xff] }
  0x72   :  { %6416 = vmatpush1.bf16.msra.mxu0 %v9033_v55  ;;  %6628 = vmatpush1.bf16.msra.mxu1 %v9035_v56  ;;  %v601_v55 = vld [vmem:[%s14279_s1 + $0x11c8] sm:$0xff]  ;;  %v10410_v56 = vcombine.low %v25_v33, %v29_v37  ;;  %v672_v37 = vld [vmem:[%s14279_s1 + $0x1400] sm:$0xff] }
  0x73   :  { %6417 = vmatprep.subr.bf16.mxu0 %v9050_v57  ;;  %6629 = vmatprep.subr.bf16.mxu1 %v9052_v59  ;;  %v10415_v57 = vld [vmem:[%s14280_s0 + $0x10] sm:$0xff]  ;;  %v9164_v63 = vcombine.high %v593_v52, %v601_v55  ;;  %v9163_v6 = vcombine.low %v593_v52, %v601_v55  ;;  %v704_v55 = vld [vmem:[%s14279_s1 + $0x1500] sm:$0xff] }
  0x74   :  { %v10420_v59 = vld [vmem:[%s14280_s0 + $0x30] sm:$0xff] }
  0x76   :  { %6418 = vmatpush1.bf16.msra.mxu0 %v9049_v0  ;;  %6630 = vmatpush1.bf16.msra.mxu1 %v9051_v1  ;;  %v608_v0 = vld [vmem:[%s14279_s1 + $0x1200] sm:$0xff] }
  0x77   :  { %6419 = vmatprep.subr.bf16.mxu0 %v9066_v2  ;;  %6631 = vmatprep.subr.bf16.mxu1 %v9068_v3  ;;  %v616_v1 = vld [vmem:[%s14279_s1 + $0x1240] sm:$0xff]  ;;  %v10430_v2 = vcombine.high %v10415_v57, %v10420_v59  ;;  %v609_v3 = vld [vmem:[%s14279_s1 + $0x1208] sm:$0xff] }
  0x78   :  { %v9178_v7 = vcombine.high %v608_v0, %v616_v1  ;;  %v9177_v13 = vcombine.low %v608_v0, %v616_v1  ;;  %v9179_v14 = vcombine.low %v609_v3, %v617_v4 }
  0x7a   :  { %6420 = vmatpush1.bf16.msra.mxu0 %v9065_v8  ;;  %6632 = vmatpush1.bf16.msra.mxu1 %v9067_v9  ;;  %v9180_v8 = vcombine.high %v609_v3, %v617_v4  ;;  %v624_v9 = vld [vmem:[%s14279_s1 + $0x1280] sm:$0xff] }
  0x7b   :  { %6421 = vmatprep.subr.bf16.mxu0 %v9082_v10  ;;  %6633 = vmatprep.subr.bf16.mxu1 %v9084_v11  ;;  %v632_v10 = vld [vmem:[%s14279_s1 + $0x12c0] sm:$0xff]  ;;  %v625_v11 = vld [vmem:[%s14279_s1 + $0x1288] sm:$0xff] }
  0x7c   :  { %v9194_v16 = vcombine.high %v624_v9, %v632_v10  ;;  %v9193_v53 = vcombine.low %v624_v9, %v632_v10  ;;  %v9195_v54 = vcombine.low %v625_v11, %v633_v12  ;;  %v720_v4 = vld [vmem:[%s14279_s1 + $0x1580] sm:$0xff] }
  0x7e   :  { %6422 = vmatpush1.bf16.msra.mxu0 %v9081_v17  ;;  %6634 = vmatpush1.bf16.msra.mxu1 %v9083_v18  ;;  %v9196_v17 = vcombine.high %v625_v11, %v633_v12  ;;  %v640_v18 = vld [vmem:[%s14279_s1 + $0x1300] sm:$0xff] }
  0x7f   :  { %6423 = vmatprep.subr.bf16.mxu0 %v9098_v19  ;;  %6635 = vmatprep.subr.bf16.mxu1 %v9100_v20  ;;  %v648_v19 = vld [vmem:[%s14279_s1 + $0x1340] sm:$0xff]  ;;  %v641_v20 = vld [vmem:[%s14279_s1 + $0x1308] sm:$0xff] }
  0x80   :  { %v9210_v22 = vcombine.high %v640_v18, %v648_v19  ;;  %v9209_v29 = vcombine.low %v640_v18, %v648_v19  ;;  %v9211_v30 = vcombine.low %v641_v20, %v649_v21  ;;  %v736_v12 = vld [vmem:[%s14279_s1 + $0x1600] sm:$0xff] }
  0x82   :  { %6424 = vmatpush1.bf16.msra.mxu0 %v9097_v24  ;;  %6636 = vmatpush1.bf16.msra.mxu1 %v9099_v25  ;;  %v9212_v24 = vcombine.high %v641_v20, %v649_v21  ;;  %v656_v25 = vld [vmem:[%s14279_s1 + $0x1380] sm:$0xff] }
  0x83   :  { %6446 = vmatprep.subr.bf16.mxu0 %v9114_v26  ;;  %6658 = vmatprep.subr.bf16.mxu1 %v9116_v27  ;;  %v664_v26 = vld [vmem:[%s14279_s1 + $0x13c0] sm:$0xff]  ;;  %v657_v27 = vld [vmem:[%s14279_s1 + $0x1388] sm:$0xff] }
  0x84   :  { %v9226_v32 = vcombine.high %v656_v25, %v664_v26  ;;  %v9228_v33 = vcombine.high %v657_v27, %v665_v28  ;;  %v9227_v36 = vcombine.low %v657_v27, %v665_v28  ;;  %v752_v21 = vld [vmem:[%s14279_s1 + $0x1680] sm:$0xff] }
  0x85   :  { %6426 = vmatmul.mubr.bf16.vlgmr.msra.gmra.mrb[0].mxu0 %v10369_v31  ;;  %6638 = vmatmul.mubr.bf16.vlgmr.msra.gmra.mrb[0].mxu1 %v10369_v31  ;;  %v768_v28 = vld [vmem:[%s14279_s1 + $0x1700] sm:$0xff] }
  0x86   :  { %6447 = vmatpush1.bf16.msra.mxu0 %v9113_v38  ;;  %6659 = vmatpush1.bf16.msra.mxu1 %v9115_v39  ;;  %v680_v38 = vld [vmem:[%s14279_s1 + $0x1440] sm:$0xff]  ;;  %v673_v39 = vld [vmem:[%s14279_s1 + $0x1408] sm:$0xff] }
  0x87   :  { %6448 = vmatprep.subr.bf16.mxu0 %v9130_v40  ;;  %6660 = vmatprep.subr.bf16.mxu1 %v9132_v35  ;;  %v681_v40 = vld [vmem:[%s14279_s1 + $0x1448] sm:$0xff]  ;;  %v9225_v35 = vcombine.low %v656_v25, %v664_v26  ;;  %v9242_v41 = vcombine.high %v672_v37, %v680_v38 }
  0x88   :  { %6435 = vmatprep.mubr.bf16.mxu0 %v10386_v42  ;;  %6647 = vmatprep.mubr.bf16.mxu1 %v10386_v42  ;;  %v9244_v44 = vcombine.high %v673_v39, %v681_v40  ;;  %v9243_v50 = vcombine.low %v673_v39, %v681_v40  ;;  %v784_v40 = vld [vmem:[%s14279_s1 + $0x1780] sm:$0xff] }
  0x8a   :  { %6449 = vmatpush1.bf16.msra.mxu0 %v9129_v46  ;;  %6661 = vmatpush1.bf16.msra.mxu1 %v9131_v47  ;;  %v696_v46 = vld [vmem:[%s14279_s1 + $0x14c0] sm:$0xff]  ;;  %v689_v47 = vld [vmem:[%s14279_s1 + $0x1488] sm:$0xff] }
  0x8b   :  { %6450 = vmatprep.subr.bf16.mxu0 %v9146_v48  ;;  %6662 = vmatprep.subr.bf16.mxu1 %v9148_v49  ;;  %v697_v48 = vld [vmem:[%s14279_s1 + $0x14c8] sm:$0xff]  ;;  %v9241_v49 = vcombine.low %v672_v37, %v680_v38  ;;  %v9258_v51 = vcombine.high %v688_v45, %v696_v46 }
  0x8c   :  { %v9260_v52 = vcombine.high %v689_v47, %v697_v48  ;;  %v9259_v0 = vcombine.low %v689_v47, %v697_v48  ;;  %v800_v48 = vld [vmem:[%s14279_s1 + $0x1800] sm:$0xff] }
  0x8d   :  { %6436 = vmatmul.mubr.bf16.gmra.mrb[4].mxu0 %v10410_v56  ;;  %6648 = vmatmul.mubr.bf16.gmra.mrb[4].mxu1 %v10410_v56 }
  0x8e   :  { %6451 = vmatpush1.bf16.msra.mxu0 %v9145_v60  ;;  %6663 = vmatpush1.bf16.msra.mxu1 %v9147_v61  ;;  %v712_v60 = vld [vmem:[%s14279_s1 + $0x1540] sm:$0xff]  ;;  %v705_v61 = vld [vmem:[%s14279_s1 + $0x1508] sm:$0xff] }
  0x8f   :  { %6452 = vmatprep.subr.bf16.mxu0 %v9162_v62  ;;  %6664 = vmatprep.subr.bf16.mxu1 %v9164_v63  ;;  %v713_v62 = vld [vmem:[%s14279_s1 + $0x1548] sm:$0xff]  ;;  %v9257_v63 = vcombine.low %v688_v45, %v696_v46  ;;  %v9274_v1 = vcombine.high %v704_v55, %v712_v60 }
  0x90   :  { %6478 = vmatprep.mubr.bf16.mxu0 %v10430_v2  ;;  %6690 = vmatprep.mubr.bf16.mxu1 %v10430_v2  ;;  %v9276_v3 = vcombine.high %v705_v61, %v713_v62  ;;  %v9275_v9 = vcombine.low %v705_v61, %v713_v62  ;;  %v816_v62 = vld [vmem:[%s14279_s1 + $0x1880] sm:$0xff] }
  0x92   :  { %6453 = vmatpush1.bf16.msra.mxu0 %v9161_v5  ;;  %6665 = vmatpush1.bf16.msra.mxu1 %v9163_v6  ;;  %v728_v5 = vld [vmem:[%s14279_s1 + $0x15c0] sm:$0xff]  ;;  %v721_v6 = vld [vmem:[%s14279_s1 + $0x1588] sm:$0xff] }
  0x93   :  { %6454 = vmatprep.subr.bf16.mxu0 %v9178_v7  ;;  %6666 = vmatprep.subr.bf16.mxu1 %v9180_v8  ;;  %v729_v7 = vld [vmem:[%s14279_s1 + $0x15c8] sm:$0xff]  ;;  %v9273_v8 = vcombine.low %v704_v55, %v712_v60  ;;  %v9290_v10 = vcombine.high %v720_v4, %v728_v5 }
  0x94   :  { %v9292_v11 = vcombine.high %v721_v6, %v729_v7  ;;  %v9291_v18 = vcombine.low %v721_v6, %v729_v7 }
  0x96   :  { %6455 = vmatpush1.bf16.msra.mxu0 %v9177_v13  ;;  %6667 = vmatpush1.bf16.msra.mxu1 %v9179_v14  ;;  %v744_v13 = vld [vmem:[%s14279_s1 + $0x1640] sm:$0xff]  ;;  %v737_v14 = vld [vmem:[%s14279_s1 + $0x1608] sm:$0xff] }
  0x97   :  { %6456 = vmatprep.subr.bf16.mxu0 %v9194_v16  ;;  %6668 = vmatprep.subr.bf16.mxu1 %v9196_v17  ;;  %v745_v16 = vld [vmem:[%s14279_s1 + $0x1648] sm:$0xff]  ;;  %v9289_v17 = vcombine.low %v720_v4, %v728_v5  ;;  %v9306_v19 = vcombine.high %v736_v12, %v744_v13  ;;  %v26_v4 = vld [vmem:[%s14280_s0 + $0x50] sm:$0xff] }
  0x98   :  { %v9308_v20 = vcombine.high %v737_v14, %v745_v16  ;;  %v9307_v25 = vcombine.low %v737_v14, %v745_v16  ;;  %v30_v5 = vld [vmem:[%s14280_s0 + $0x70] sm:$0xff] }
  0x9a   :  { %6457 = vmatpush1.bf16.msra.mxu0 %v9193_v53  ;;  %6669 = vmatpush1.bf16.msra.mxu1 %v9195_v54  ;;  %v760_v53 = vld [vmem:[%s14279_s1 + $0x16c0] sm:$0xff]  ;;  %v753_v54 = vld [vmem:[%s14279_s1 + $0x1688] sm:$0xff] }
  0x9b   :  { %6458 = vmatprep.subr.bf16.mxu0 %v9210_v22  ;;  %6670 = vmatprep.subr.bf16.mxu1 %v9212_v24  ;;  %v761_v22 = vld [vmem:[%s14279_s1 + $0x16c8] sm:$0xff]  ;;  %v9305_v24 = vcombine.low %v736_v12, %v744_v13  ;;  %v9322_v26 = vcombine.high %v752_v21, %v760_v53 }
  0x9c   :  { %v9324_v27 = vcombine.high %v753_v54, %v761_v22  ;;  %v9323_v37 = vcombine.low %v753_v54, %v761_v22  ;;  %v841_v12 = vld [vmem:[%s14279_s1 + $0x1948] sm:$0xff]  ;;  %v10643_v54 = vld [vmem:[%s14280_s0 + $0x18] sm:$0xff] }
  0x9d   :  { %v10648_v22 = vld [vmem:[%s14280_s0 + $0x38] sm:$0xff] }
  0x9e   :  { %6459 = vmatpush1.bf16.msra.mxu0 %v9209_v29  ;;  %6671 = vmatpush1.bf16.msra.mxu1 %v9211_v30  ;;  %v776_v29 = vld [vmem:[%s14279_s1 + $0x1740] sm:$0xff]  ;;  %v769_v30 = vld [vmem:[%s14279_s1 + $0x1708] sm:$0xff] }
  0x9f   :  { %6460 = vmatprep.subr.bf16.mxu0 %v9226_v32  ;;  %6672 = vmatprep.subr.bf16.mxu1 %v9228_v33  ;;  %v777_v32 = vld [vmem:[%s14279_s1 + $0x1748] sm:$0xff]  ;;  %v9321_v33 = vcombine.low %v752_v21, %v760_v53  ;;  %v9338_v38 = vcombine.high %v768_v28, %v776_v29  ;;  %v10638_v53 = vcombine.low %v26_v4, %v30_v5 }
  0xa0   :  { %v9340_v39 = vcombine.high %v769_v30, %v777_v32  ;;  %v9339_v45 = vcombine.low %v769_v30, %v777_v32  ;;  %v857_v21 = vld [vmem:[%s14279_s1 + $0x19c8] sm:$0xff]  ;;  %v10658_v30 = vcombine.high %v10643_v54, %v10648_v22 }
  0xa1   :  { %14306 = vst [vmem:[#allocation4_spill] sm:$0xff] %v10638_v53  ;;  %v865_v32 = vld [vmem:[%s14279_s1 + $0x1a08] sm:$0xff] }
  0xa2   :  { %6461 = vmatpush1.bf16.msra.mxu0 %v9225_v35  ;;  %6673 = vmatpush1.bf16.msra.mxu1 %v9227_v36  ;;  %v792_v35 = vld [vmem:[%s14279_s1 + $0x17c0] sm:$0xff]  ;;  %v785_v36 = vld [vmem:[%s14279_s1 + $0x1788] sm:$0xff]  ;;  %14307 = vst [vmem:[#allocation5_spill] sm:$0xff] %v10658_v30 }
  0xa3   :  { %6462 = vmatprep.subr.bf16.mxu0 %v9242_v41  ;;  %6674 = vmatprep.subr.bf16.mxu1 %v9244_v44  ;;  %v793_v41 = vld [vmem:[%s14279_s1 + $0x17c8] sm:$0xff]  ;;  %v9337_v44 = vcombine.low %v768_v28, %v776_v29  ;;  %v9354_v46 = vcombine.high %v784_v40, %v792_v35  ;;  %v864_v28 = vld [vmem:[%s14279_s1 + $0x1a00] sm:$0xff] }
  0xa4   :  { %v9356_v47 = vcombine.high %v785_v36, %v793_v41  ;;  %v9355_v55 = vcombine.low %v785_v36, %v793_v41  ;;  %v872_v29 = vld [vmem:[%s14279_s1 + $0x1a40] sm:$0xff]  ;;  %v881_v41 = vld [vmem:[%s14279_s1 + $0x1a88] sm:$0xff] }
  0xa5   :  { %v888_v36 = vld [vmem:[%s14279_s1 + $0x1ac0] sm:$0xff] }
  0xa6   :  { %6463 = vmatpush1.bf16.msra.mxu0 %v9241_v49  ;;  %6675 = vmatpush1.bf16.msra.mxu1 %v9243_v50  ;;  %v808_v49 = vld [vmem:[%s14279_s1 + $0x1840] sm:$0xff]  ;;  %v801_v50 = vld [vmem:[%s14279_s1 + $0x1808] sm:$0xff] }
  0xa7   :  { %6464 = vmatprep.subr.bf16.mxu0 %v9258_v51  ;;  %6676 = vmatprep.subr.bf16.mxu1 %v9260_v52  ;;  %v809_v51 = vld [vmem:[%s14279_s1 + $0x1848] sm:$0xff]  ;;  %v9353_v52 = vcombine.low %v784_v40, %v792_v35  ;;  %v9370_v60 = vcombine.high %v800_v48, %v808_v49  ;;  %v9369_v6 = vcombine.low %v800_v48, %v808_v49  ;;  %v880_v35 = vld [vmem:[%s14279_s1 + $0x1a80] sm:$0xff] }
  0xa8   :  { %v9372_v61 = vcombine.high %v801_v50, %v809_v51  ;;  %v9371_v7 = vcombine.low %v801_v50, %v809_v51  ;;  %v896_v49 = vld [vmem:[%s14279_s1 + $0x1b00] sm:$0xff]  ;;  %v897_v51 = vld [vmem:[%s14279_s1 + $0x1b08] sm:$0xff] }
  0xa9   :  { %v904_v50 = vld [vmem:[%s14279_s1 + $0x1b40] sm:$0xff] }
  0xaa   :  { %6465 = vmatpush1.bf16.msra.mxu0 %v9257_v63  ;;  %6677 = vmatpush1.bf16.msra.mxu1 %v9259_v0  ;;  %v824_v63 = vld [vmem:[%s14279_s1 + $0x18c0] sm:$0xff]  ;;  %v817_v0 = vld [vmem:[%s14279_s1 + $0x1888] sm:$0xff] }
  0xab   :  { %6466 = vmatprep.subr.bf16.mxu0 %v9274_v1  ;;  %6678 = vmatprep.subr.bf16.mxu1 %v9276_v3  ;;  %v10597_v1 = vcombine.low %v10415_v57, %v10420_v59  ;;  %v825_v3 = vld [vmem:[%s14279_s1 + $0x18c8] sm:$0xff]  ;;  %v832_v59 = vld [vmem:[%s14279_s1 + $0x1900] sm:$0xff]  ;;  %v9385_v13 = vcombine.low %v816_v62, %v824_v63 }
  0xac   :  { %v9388_v57 = vcombine.high %v817_v0, %v825_v3  ;;  %v9387_v14 = vcombine.low %v817_v0, %v825_v3  ;;  %v920_v0 = vld [vmem:[%s14279_s1 + $0x1bc0] sm:$0xff]  ;;  %v913_v3 = vld [vmem:[%s14279_s1 + $0x1b88] sm:$0xff] }
  0xad   :  { %14304 = vst [vmem:[#allocation2_spill] sm:$0xff] %v10597_v1 }
  0xae   :  { %6467 = vmatpush1.bf16.msra.mxu0 %v9273_v8  ;;  %6679 = vmatpush1.bf16.msra.mxu1 %v9275_v9  ;;  %v9386_v8 = vcombine.high %v816_v62, %v824_v63  ;;  %v840_v9 = vld [vmem:[%s14279_s1 + $0x1940] sm:$0xff] }
  0xaf   :  { %6468 = vmatprep.subr.bf16.mxu0 %v9290_v10  ;;  %6680 = vmatprep.subr.bf16.mxu1 %v9292_v11  ;;  %v10614_v10 = vcombine.high %v26_v4, %v30_v5  ;;  %v833_v11 = vld [vmem:[%s14279_s1 + $0x1908] sm:$0xff]  ;;  %v9402_v16 = vcombine.high %v832_v59, %v840_v9  ;;  %v912_v63 = vld [vmem:[%s14279_s1 + $0x1b80] sm:$0xff]  ;;  %v9465_v5 = vcombine.low %v896_v49, %v904_v50 }
  0xb0   :  { %v921_v4 = vld [vmem:[%s14279_s1 + $0x1bc8] sm:$0xff] }
  0xb1   :  { %14305 = vst [vmem:[#allocation3_spill] sm:$0xff] %v10614_v10 }
  0xb2   :  { %6469 = vmatpush1.bf16.msra.mxu0 %v9289_v17  ;;  %6681 = vmatpush1.bf16.msra.mxu1 %v9291_v18  ;;  %v9404_v17 = vcombine.high %v833_v11, %v841_v12  ;;  %v848_v18 = vld [vmem:[%s14279_s1 + $0x1980] sm:$0xff] }
  0xb3   :  { %6470 = vmatprep.subr.bf16.mxu0 %v9306_v19  ;;  %6682 = vmatprep.subr.bf16.mxu1 %v9308_v20  ;;  %v856_v19 = vld [vmem:[%s14279_s1 + $0x19c0] sm:$0xff]  ;;  %v849_v20 = vld [vmem:[%s14279_s1 + $0x1988] sm:$0xff] }
  0xb6   :  { %6471 = vmatpush1.bf16.msra.mxu0 %v9305_v24  ;;  %6683 = vmatpush1.bf16.msra.mxu1 %v9307_v25  ;;  %v9401_v24 = vcombine.low %v832_v59, %v840_v9  ;;  %v9403_v25 = vcombine.low %v833_v11, %v841_v12  ;;  %v936_v59 = vld [vmem:[%s14279_s1 + $0x1c40] sm:$0xff]  ;;  %v929_v9 = vld [vmem:[%s14279_s1 + $0x1c08] sm:$0xff]  ;;  %v9481_v12 = vcombine.low %v912_v63, %v920_v0 }
  0xb7   :  { %6472 = vmatprep.subr.bf16.mxu0 %v9322_v26  ;;  %6684 = vmatprep.subr.bf16.mxu1 %v9324_v27  ;;  %v9418_v26 = vcombine.high %v848_v18, %v856_v19  ;;  %v9420_v27 = vcombine.high %v849_v20, %v857_v21  ;;  %v937_v11 = vld [vmem:[%s14279_s1 + $0x1c48] sm:$0xff] }
  0xba   :  { %6473 = vmatpush1.bf16.msra.mxu0 %v9321_v33  ;;  %6685 = vmatpush1.bf16.msra.mxu1 %v9323_v37  ;;  %v873_v33 = vld [vmem:[%s14279_s1 + $0x1a48] sm:$0xff]  ;;  %v9417_v37 = vcombine.low %v848_v18, %v856_v19  ;;  %v952_v18 = vld [vmem:[%s14279_s1 + $0x1cc0] sm:$0xff] }
  0xbb   :  { %6474 = vmatprep.subr.bf16.mxu0 %v9338_v38  ;;  %6686 = vmatprep.subr.bf16.mxu1 %v9340_v39  ;;  %v9419_v38 = vcombine.low %v849_v20, %v857_v21  ;;  %v9434_v39 = vcombine.high %v864_v28, %v872_v29  ;;  %v9436_v40 = vcombine.high %v865_v32, %v873_v33  ;;  %v945_v19 = vld [vmem:[%s14279_s1 + $0x1c88] sm:$0xff] }
  0xbc   :  { %v953_v20 = vld [vmem:[%s14279_s1 + $0x1cc8] sm:$0xff] }
  0xbe   :  { %6475 = vmatpush1.bf16.msra.mxu0 %v9337_v44  ;;  %6687 = vmatpush1.bf16.msra.mxu1 %v9339_v45  ;;  %v889_v44 = vld [vmem:[%s14279_s1 + $0x1ac8] sm:$0xff]  ;;  %v9433_v45 = vcombine.low %v864_v28, %v872_v29  ;;  %v968_v28 = vld [vmem:[%s14279_s1 + $0x1d40] sm:$0xff] }
  0xbf   :  { %6476 = vmatprep.subr.bf16.mxu0 %v9354_v46  ;;  %6688 = vmatprep.subr.bf16.mxu1 %v9356_v47  ;;  %v9435_v46 = vcombine.low %v865_v32, %v873_v33  ;;  %v9450_v47 = vcombine.high %v880_v35, %v888_v36  ;;  %v9452_v48 = vcombine.high %v881_v41, %v889_v44  ;;  %v961_v29 = vld [vmem:[%s14279_s1 + $0x1d08] sm:$0xff] }
  0xc0   :  { %v969_v32 = vld [vmem:[%s14279_s1 + $0x1d48] sm:$0xff] }
  0xc2   :  { %6477 = vmatpush1.bf16.msra.mxu0 %v9353_v52  ;;  %6689 = vmatpush1.bf16.msra.mxu1 %v9355_v55  ;;  %v905_v52 = vld [vmem:[%s14279_s1 + $0x1b48] sm:$0xff]  ;;  %v9449_v55 = vcombine.low %v880_v35, %v888_v36  ;;  %v984_v35 = vld [vmem:[%s14279_s1 + $0x1dc0] sm:$0xff] }
  0xc3   :  { %6499 = vmatprep.subr.bf16.mxu0 %v9370_v60  ;;  %6711 = vmatprep.subr.bf16.mxu1 %v9372_v61  ;;  %v9451_v60 = vcombine.low %v881_v41, %v889_v44  ;;  %v9466_v61 = vcombine.high %v896_v49, %v904_v50  ;;  %v9468_v62 = vcombine.high %v897_v51, %v905_v52  ;;  %v977_v36 = vld [vmem:[%s14279_s1 + $0x1d88] sm:$0xff]  ;;  %v1000_v49 = vld [vmem:[%s14279_s1 + $0x1e40] sm:$0xff] }
  0xc4   :  { %v985_v41 = vld [vmem:[%s14279_s1 + $0x1dc8] sm:$0xff] }
  0xc5   :  { %6479 = vmatmul.mubr.bf16.vlgmr.msra.gmra.mrb[0].mxu0 %v10597_v1  ;;  %6691 = vmatmul.mubr.bf16.vlgmr.msra.gmra.mrb[0].mxu1 %v10597_v1  ;;  %v993_v50 = vld [vmem:[%s14279_s1 + $0x1e08] sm:$0xff] }
  0xc6   :  { %6500 = vmatpush1.bf16.msra.mxu0 %v9369_v6  ;;  %6712 = vmatpush1.bf16.msra.mxu1 %v9371_v7  ;;  %v9467_v6 = vcombine.low %v897_v51, %v905_v52  ;;  %v9482_v7 = vcombine.high %v912_v63, %v920_v0  ;;  %v1001_v51 = vld [vmem:[%s14279_s1 + $0x1e48] sm:$0xff]  ;;  %v1016_v63 = vld [vmem:[%s14279_s1 + $0x1ec0] sm:$0xff] }
  0xc7   :  { %6501 = vmatprep.subr.bf16.mxu0 %v9386_v8  ;;  %6713 = vmatprep.subr.bf16.mxu1 %v9388_v57  ;;  %v9484_v8 = vcombine.high %v913_v3, %v921_v4  ;;  %v928_v57 = vld [vmem:[%s14279_s1 + $0x1c00] sm:$0xff]  ;;  %v1009_v0 = vld [vmem:[%s14279_s1 + $0x1e88] sm:$0xff] }
  0xc8   :  { %6488 = vmatprep.mubr.bf16.mxu0 %v10614_v10  ;;  %6700 = vmatprep.mubr.bf16.mxu1 %v10614_v10  ;;  %v9497_v21 = vcombine.low %v928_v57, %v936_v59 }
  0xca   :  { %6502 = vmatpush1.bf16.msra.mxu0 %v9385_v13  ;;  %6714 = vmatpush1.bf16.msra.mxu1 %v9387_v14  ;;  %v9483_v13 = vcombine.low %v913_v3, %v921_v4  ;;  %v9498_v14 = vcombine.high %v928_v57, %v936_v59  ;;  %v1017_v3 = vld [vmem:[%s14279_s1 + $0x1ec8] sm:$0xff]  ;;  %v1032_v57 = vld [vmem:[%s14279_s1 + $0x1f40] sm:$0xff] }
  0xcb   :  { %6503 = vmatprep.subr.bf16.mxu0 %v9402_v16  ;;  %6715 = vmatprep.subr.bf16.mxu1 %v9404_v17  ;;  %v9500_v16 = vcombine.high %v929_v9, %v937_v11  ;;  %v944_v17 = vld [vmem:[%s14279_s1 + $0x1c80] sm:$0xff]  ;;  %v1025_v59 = vld [vmem:[%s14279_s1 + $0x1f08] sm:$0xff] }
  0xcc   :  { %v9513_v33 = vcombine.low %v944_v17, %v952_v18 }
  0xcd   :  { %6489 = vmatmul.mubr.bf16.gmra.mrb[4].mxu0 %v10638_v53  ;;  %6701 = vmatmul.mubr.bf16.gmra.mrb[4].mxu1 %v10638_v53 }
  0xce   :  { %6504 = vmatpush1.bf16.msra.mxu0 %v9401_v24  ;;  %6716 = vmatpush1.bf16.msra.mxu1 %v9403_v25  ;;  %v9499_v24 = vcombine.low %v929_v9, %v937_v11  ;;  %v9514_v25 = vcombine.high %v944_v17, %v952_v18  ;;  %v1033_v9 = vld [vmem:[%s14279_s1 + $0x1f48] sm:$0xff]  ;;  %v1048_v17 = vld [vmem:[%s14279_s1 + $0x1fc0] sm:$0xff] }
  0xcf   :  { %6505 = vmatprep.subr.bf16.mxu0 %v9418_v26  ;;  %6717 = vmatprep.subr.bf16.mxu1 %v9420_v27  ;;  %v9516_v26 = vcombine.high %v945_v19, %v953_v20  ;;  %v960_v27 = vld [vmem:[%s14279_s1 + $0x1d00] sm:$0xff]  ;;  %v1041_v18 = vld [vmem:[%s14279_s1 + $0x1f88] sm:$0xff] }
  0xd0   :  { %6531 = vmatprep.mubr.bf16.mxu0 %v10658_v30  ;;  %6743 = vmatprep.mubr.bf16.mxu1 %v10658_v30  ;;  %v9529_v44 = vcombine.low %v960_v27, %v968_v28 }
  0xd2   :  { %6506 = vmatpush1.bf16.msra.mxu0 %v9417_v37  ;;  %6718 = vmatpush1.bf16.msra.mxu1 %v9419_v38  ;;  %v9515_v37 = vcombine.low %v945_v19, %v953_v20  ;;  %v9530_v38 = vcombine.high %v960_v27, %v968_v28  ;;  %v1049_v19 = vld [vmem:[%s14279_s1 + $0x1fc8] sm:$0xff]  ;;  %v42_v27 = vld [vmem:[%s14279_s1 + $0x50] sm:$0xff]  ;;  %v35_v28 = vld [vmem:[%s14279_s1 + $0x18] sm:$0xff] }
  0xd3   :  { %6507 = vmatprep.subr.bf16.mxu0 %v9434_v39  ;;  %6719 = vmatprep.subr.bf16.mxu1 %v9436_v40  ;;  %v9532_v39 = vcombine.high %v961_v29, %v969_v32  ;;  %v976_v40 = vld [vmem:[%s14279_s1 + $0x1d80] sm:$0xff] }
  0xd4   :  { %v9545_v52 = vcombine.low %v976_v40, %v984_v35 }
  0xd6   :  { %6508 = vmatpush1.bf16.msra.mxu0 %v9433_v45  ;;  %6720 = vmatpush1.bf16.msra.mxu1 %v9435_v46  ;;  %v9531_v45 = vcombine.low %v961_v29, %v969_v32  ;;  %v9546_v46 = vcombine.high %v976_v40, %v984_v35  ;;  %v43_v29 = vld [vmem:[%s14279_s1 + $0x58] sm:$0xff]  ;;  %v58_v40 = vld [vmem:[%s14279_s1 + $0xd0] sm:$0xff] }
  0xd7   :  { %6509 = vmatprep.subr.bf16.mxu0 %v9450_v47  ;;  %6721 = vmatprep.subr.bf16.mxu1 %v9452_v48  ;;  %v9548_v47 = vcombine.high %v977_v36, %v985_v41  ;;  %v992_v48 = vld [vmem:[%s14279_s1 + $0x1e00] sm:$0xff]  ;;  %v51_v35 = vld [vmem:[%s14279_s1 + $0x98] sm:$0xff] }
  0xd8   :  { %v9561_v4 = vcombine.low %v992_v48, %v1000_v49 }
  0xda   :  { %6510 = vmatpush1.bf16.msra.mxu0 %v9449_v55  ;;  %6722 = vmatpush1.bf16.msra.mxu1 %v9451_v60  ;;  %v9547_v55 = vcombine.low %v977_v36, %v985_v41  ;;  %v9562_v60 = vcombine.high %v992_v48, %v1000_v49  ;;  %v10825_v36 = vcombine.low %v10643_v54, %v10648_v22  ;;  %v59_v41 = vld [vmem:[%s14279_s1 + $0xd8] sm:$0xff]  ;;  %v66_v49 = vld [vmem:[%s14279_s1 + $0x110] sm:$0xff] }
  0xdb   :  { %6511 = vmatprep.subr.bf16.mxu0 %v9466_v61  ;;  %6723 = vmatprep.subr.bf16.mxu1 %v9468_v62  ;;  %v9564_v61 = vcombine.high %v993_v50, %v1001_v51  ;;  %v1008_v62 = vld [vmem:[%s14279_s1 + $0x1e80] sm:$0xff]  ;;  %v8624_v54 = vcombine.high %v51_v35, %v59_v41 }
  0xdc   :  { %v9577_v11 = vcombine.low %v1008_v62, %v1016_v63 }
  0xde   :  { %6512 = vmatpush1.bf16.msra.mxu0 %v9465_v5  ;;  %6724 = vmatpush1.bf16.msra.mxu1 %v9467_v6  ;;  %v9563_v5 = vcombine.low %v993_v50, %v1001_v51  ;;  %v9578_v6 = vcombine.high %v1008_v62, %v1016_v63  ;;  %v74_v50 = vld [vmem:[%s14279_s1 + $0x150] sm:$0xff]  ;;  %v67_v51 = vld [vmem:[%s14279_s1 + $0x118] sm:$0xff] }
  0xdf   :  { %6513 = vmatprep.subr.bf16.mxu0 %v9482_v7  ;;  %6725 = vmatprep.subr.bf16.mxu1 %v9484_v8  ;;  %v9580_v7 = vcombine.high %v1009_v0, %v1017_v3  ;;  %v1024_v8 = vld [vmem:[%s14279_s1 + $0x1f00] sm:$0xff]  ;;  %v82_v63 = vld [vmem:[%s14279_s1 + $0x190] sm:$0xff] }
  0xe0   :  { %v9593_v20 = vcombine.low %v1024_v8, %v1032_v57 }
  0xe2   :  { %6514 = vmatpush1.bf16.msra.mxu0 %v9481_v12  ;;  %6726 = vmatpush1.bf16.msra.mxu1 %v9483_v13  ;;  %v9579_v12 = vcombine.low %v1009_v0, %v1017_v3  ;;  %v9594_v13 = vcombine.high %v1024_v8, %v1032_v57  ;;  %v90_v0 = vld [vmem:[%s14279_s1 + $0x1d0] sm:$0xff] }
  0xe3   :  { %6515 = vmatprep.subr.bf16.mxu0 %v9498_v14  ;;  %6727 = vmatprep.subr.bf16.mxu1 %v9500_v16  ;;  %v9596_v14 = vcombine.high %v1025_v59, %v1033_v9  ;;  %v1040_v16 = vld [vmem:[%s14279_s1 + $0x1f80] sm:$0xff]  ;;  %v8654_v8 = vcombine.high %v82_v63, %v90_v0 }
  0xe4   :  { %v9609_v32 = vcombine.low %v1040_v16, %v1048_v17 }
  0xe6   :  { %6516 = vmatpush1.bf16.msra.mxu0 %v9497_v21  ;;  %6728 = vmatpush1.bf16.msra.mxu1 %v9499_v24  ;;  %v9595_v21 = vcombine.low %v1025_v59, %v1033_v9  ;;  %v9610_v24 = vcombine.high %v1040_v16, %v1048_v17  ;;  %v98_v59 = vld [vmem:[%s14279_s1 + $0x210] sm:$0xff] }
  0xe7   :  { %6517 = vmatprep.subr.bf16.mxu0 %v9514_v25  ;;  %6729 = vmatprep.subr.bf16.mxu1 %v9516_v26  ;;  %v9612_v25 = vcombine.high %v1041_v18, %v1049_v19  ;;  %v34_v26 = vld [vmem:[%s14279_s1 + $0x10] sm:$0xff] }
  0xe8   :  { %v106_v9 = vld [vmem:[%s14279_s1 + $0x250] sm:$0xff] }
  0xe9   :  { %v8670_v16 = vcombine.high %v98_v59, %v106_v9 }
  0xea   :  { %6518 = vmatpush1.bf16.msra.mxu0 %v9513_v33  ;;  %6730 = vmatpush1.bf16.msra.mxu1 %v9515_v37  ;;  %v9611_v33 = vcombine.low %v1041_v18, %v1049_v19  ;;  %v8606_v37 = vcombine.high %v34_v26, %v42_v27  ;;  %v114_v18 = vld [vmem:[%s14279_s1 + $0x290] sm:$0xff] }
  0xeb   :  { %6519 = vmatprep.subr.bf16.mxu0 %v9530_v38  ;;  %6731 = vmatprep.subr.bf16.mxu1 %v9532_v39  ;;  %v8608_v38 = vcombine.high %v35_v28, %v43_v29  ;;  %v50_v39 = vld [vmem:[%s14279_s1 + $0x90] sm:$0xff] }
  0xec   :  { %v8622_v48 = vcombine.high %v50_v39, %v58_v40  ;;  %v122_v19 = vld [vmem:[%s14279_s1 + $0x2d0] sm:$0xff] }
  0xee   :  { %6520 = vmatpush1.bf16.msra.mxu0 %v9529_v44  ;;  %6732 = vmatpush1.bf16.msra.mxu1 %v9531_v45  ;;  %v27_v44 = vld [vmem:[%s14280_s0 + $0x58] sm:$0xff] }
  0xef   :  { %6521 = vmatprep.subr.bf16.mxu0 %v9546_v46  ;;  %6733 = vmatprep.subr.bf16.mxu1 %v9548_v47  ;;  %v31_v45 = vld [vmem:[%s14280_s0 + $0x78] sm:$0xff]  ;;  %v8605_v46 = vcombine.low %v34_v26, %v42_v27  ;;  %v8607_v47 = vcombine.low %v35_v28, %v43_v29  ;;  %v8686_v26 = vcombine.high %v114_v18, %v122_v19  ;;  %v130_v28 = vld [vmem:[%s14279_s1 + $0x310] sm:$0xff] }
  0xf0   :  { %v10836_v22 = vcombine.high %v27_v44, %v31_v45  ;;  %v10860_v3 = vcombine.low %v27_v44, %v31_v45  ;;  %v138_v29 = vld [vmem:[%s14279_s1 + $0x350] sm:$0xff]  ;;  %v147_v44 = vld [vmem:[%s14279_s1 + $0x398] sm:$0xff] }
  0xf1   :  { %v155_v45 = vld [vmem:[%s14279_s1 + $0x3d8] sm:$0xff] }
  0xf2   :  { %6522 = vmatpush1.bf16.msra.mxu0 %v9545_v52  ;;  %6734 = vmatpush1.bf16.msra.mxu1 %v9547_v55  ;;  %v75_v52 = vld [vmem:[%s14279_s1 + $0x158] sm:$0xff]  ;;  %v8621_v55 = vcombine.low %v50_v39, %v58_v40  ;;  %v8702_v39 = vcombine.high %v130_v28, %v138_v29 }
  0xf3   :  { %6523 = vmatprep.subr.bf16.mxu0 %v9562_v60  ;;  %6735 = vmatprep.subr.bf16.mxu1 %v9564_v61  ;;  %v8623_v60 = vcombine.low %v51_v35, %v59_v41  ;;  %v8638_v61 = vcombine.high %v66_v49, %v74_v50  ;;  %v8640_v62 = vcombine.high %v67_v51, %v75_v52  ;;  %v146_v35 = vld [vmem:[%s14279_s1 + $0x390] sm:$0xff] }
  0xf4   :  { %v154_v41 = vld [vmem:[%s14279_s1 + $0x3d0] sm:$0xff] }
  0xf6   :  { %6524 = vmatpush1.bf16.msra.mxu0 %v9561_v4  ;;  %6736 = vmatpush1.bf16.msra.mxu1 %v9563_v5  ;;  %v83_v4 = vld [vmem:[%s14279_s1 + $0x198] sm:$0xff] }
  0xf7   :  { %6525 = vmatprep.subr.bf16.mxu0 %v9578_v6  ;;  %6737 = vmatprep.subr.bf16.mxu1 %v9580_v7  ;;  %v91_v5 = vld [vmem:[%s14279_s1 + $0x1d8] sm:$0xff]  ;;  %v8637_v6 = vcombine.low %v66_v49, %v74_v50  ;;  %v8639_v7 = vcombine.low %v67_v51, %v75_v52  ;;  %v162_v49 = vld [vmem:[%s14279_s1 + $0x410] sm:$0xff] }
  0xf8   :  { %v8656_v57 = vcombine.high %v83_v4, %v91_v5  ;;  %v170_v50 = vld [vmem:[%s14279_s1 + $0x450] sm:$0xff]  ;;  %v163_v51 = vld [vmem:[%s14279_s1 + $0x418] sm:$0xff] }
  0xf9   :  { %v171_v52 = vld [vmem:[%s14279_s1 + $0x458] sm:$0xff] }
  0xfa   :  { %6526 = vmatpush1.bf16.msra.mxu0 %v9577_v11  ;;  %6738 = vmatpush1.bf16.msra.mxu1 %v9579_v12  ;;  %v99_v11 = vld [vmem:[%s14279_s1 + $0x218] sm:$0xff] }
  0xfb   :  { %6527 = vmatprep.subr.bf16.mxu0 %v9594_v13  ;;  %6739 = vmatprep.subr.bf16.mxu1 %v9596_v14  ;;  %v107_v12 = vld [vmem:[%s14279_s1 + $0x258] sm:$0xff]  ;;  %v8653_v13 = vcombine.low %v82_v63, %v90_v0  ;;  %v8655_v14 = vcombine.low %v83_v4, %v91_v5  ;;  %v178_v63 = vld [vmem:[%s14279_s1 + $0x490] sm:$0xff] }
  0xfc   :  { %v8672_v17 = vcombine.high %v99_v11, %v107_v12  ;;  %v186_v0 = vld [vmem:[%s14279_s1 + $0x4d0] sm:$0xff]  ;;  %v179_v4 = vld [vmem:[%s14279_s1 + $0x498] sm:$0xff] }
  0xfd   :  { %v187_v5 = vld [vmem:[%s14279_s1 + $0x4d8] sm:$0xff] }
  0xfe   :  { %6528 = vmatpush1.bf16.msra.mxu0 %v9593_v20  ;;  %6740 = vmatpush1.bf16.msra.mxu1 %v9595_v21  ;;  %v115_v20 = vld [vmem:[%s14279_s1 + $0x298] sm:$0xff] }
  0xff   :  { %6529 = vmatprep.subr.bf16.mxu0 %v9610_v24  ;;  %6741 = vmatprep.subr.bf16.mxu1 %v9612_v25  ;;  %v123_v21 = vld [vmem:[%s14279_s1 + $0x2d8] sm:$0xff]  ;;  %v8669_v24 = vcombine.low %v98_v59, %v106_v9  ;;  %v8671_v25 = vcombine.low %v99_v11, %v107_v12  ;;  %v194_v59 = vld [vmem:[%s14279_s1 + $0x510] sm:$0xff] }
 0x100   :  { %v8688_v27 = vcombine.high %v115_v20, %v123_v21  ;;  %v202_v9 = vld [vmem:[%s14279_s1 + $0x550] sm:$0xff]  ;;  %v195_v11 = vld [vmem:[%s14279_s1 + $0x518] sm:$0xff] }
 0x101   :  { %v203_v12 = vld [vmem:[%s14279_s1 + $0x558] sm:$0xff] }
 0x102   :  { %6530 = vmatpush1.bf16.msra.mxu0 %v9609_v32  ;;  %6742 = vmatpush1.bf16.msra.mxu1 %v9611_v33  ;;  %v131_v32 = vld [vmem:[%s14279_s1 + $0x318] sm:$0xff] }
 0x103   :  { %6764 = vmatprep.subr.bf16.mxu0 %v8606_v37  ;;  %6976 = vmatprep.subr.bf16.mxu1 %v8608_v38  ;;  %v139_v33 = vld [vmem:[%s14279_s1 + $0x358] sm:$0xff]  ;;  %v8685_v37 = vcombine.low %v114_v18, %v122_v19  ;;  %v8687_v38 = vcombine.low %v115_v20, %v123_v21  ;;  %v210_v18 = vld [vmem:[%s14279_s1 + $0x590] sm:$0xff] }
 0x104   :  { %v8704_v40 = vcombine.high %v131_v32, %v139_v33  ;;  %v218_v19 = vld [vmem:[%s14279_s1 + $0x5d0] sm:$0xff]  ;;  %v211_v20 = vld [vmem:[%s14279_s1 + $0x598] sm:$0xff] }
 0x105   :  { %6532 = vmatmul.mubr.bf16.vlgmr.msra.gmra.mrb[0].mxu0 %v10825_v36  ;;  %6744 = vmatmul.mubr.bf16.vlgmr.msra.gmra.mrb[0].mxu1 %v10825_v36  ;;  %v219_v21 = vld [vmem:[%s14279_s1 + $0x5d8] sm:$0xff] }
 0x106   :  { %6765 = vmatpush1.bf16.msra.mxu0 %v8605_v46  ;;  %6977 = vmatpush1.bf16.msra.mxu1 %v8607_v47  ;;  %v8701_v46 = vcombine.low %v130_v28, %v138_v29  ;;  %v8703_v47 = vcombine.low %v131_v32, %v139_v33  ;;  %v226_v28 = vld [vmem:[%s14279_s1 + $0x610] sm:$0xff]  ;;  %v227_v32 = vld [vmem:[%s14279_s1 + $0x618] sm:$0xff] }
 0x107   :  { %6766 = vmatprep.subr.bf16.mxu0 %v8622_v48  ;;  %6978 = vmatprep.subr.bf16.mxu1 %v8624_v54  ;;  %v8718_v48 = vcombine.high %v146_v35, %v154_v41  ;;  %v8720_v54 = vcombine.high %v147_v44, %v155_v45  ;;  %v234_v29 = vld [vmem:[%s14279_s1 + $0x650] sm:$0xff]  ;;  %v235_v33 = vld [vmem:[%s14279_s1 + $0x658] sm:$0xff] }
 0x108   :  { %6541 = vmatprep.mubr.bf16.mxu0 %v10836_v22  ;;  %6753 = vmatprep.mubr.bf16.mxu1 %v10836_v22 }
 0x10a   :  { %6767 = vmatpush1.bf16.msra.mxu0 %v8621_v55  ;;  %6979 = vmatpush1.bf16.msra.mxu1 %v8623_v60  ;;  %v8717_v55 = vcombine.low %v146_v35, %v154_v41  ;;  %v8719_v60 = vcombine.low %v147_v44, %v155_v45  ;;  %v242_v35 = vld [vmem:[%s14279_s1 + $0x690] sm:$0xff]  ;;  %v243_v44 = vld [vmem:[%s14279_s1 + $0x698] sm:$0xff] }
 0x10b   :  { %6768 = vmatprep.subr.bf16.mxu0 %v8638_v61  ;;  %6980 = vmatprep.subr.bf16.mxu1 %v8640_v62  ;;  %v8734_v61 = vcombine.high %v162_v49, %v170_v50  ;;  %v8736_v62 = vcombine.high %v163_v51, %v171_v52  ;;  %v250_v41 = vld [vmem:[%s14279_s1 + $0x6d0] sm:$0xff]  ;;  %v251_v45 = vld [vmem:[%s14279_s1 + $0x6d8] sm:$0xff] }
 0x10d   :  { %6542 = vmatmul.mubr.bf16.gmra.mrb[4].mxu0 %v10860_v3  ;;  %6754 = vmatmul.mubr.bf16.gmra.mrb[4].mxu1 %v10860_v3 }
 0x10e   :  { %6769 = vmatpush1.bf16.msra.mxu0 %v8637_v6  ;;  %6981 = vmatpush1.bf16.msra.mxu1 %v8639_v7  ;;  %v8733_v6 = vcombine.low %v162_v49, %v170_v50  ;;  %v8735_v7 = vcombine.low %v163_v51, %v171_v52  ;;  %v258_v49 = vld [vmem:[%s14279_s1 + $0x710] sm:$0xff]  ;;  %v259_v51 = vld [vmem:[%s14279_s1 + $0x718] sm:$0xff] }
 0x10f   :  { %6770 = vmatprep.subr.bf16.mxu0 %v8654_v8  ;;  %6982 = vmatprep.subr.bf16.mxu1 %v8656_v57  ;;  %v8750_v8 = vcombine.high %v178_v63, %v186_v0  ;;  %v8752_v57 = vcombine.high %v179_v4, %v187_v5  ;;  %v266_v50 = vld [vmem:[%s14279_s1 + $0x750] sm:$0xff]  ;;  %v267_v52 = vld [vmem:[%s14279_s1 + $0x758] sm:$0xff] }
 0x110   :  { %6796 = vmatprep.mubr.bf16.mxu0 %v10012_v58  ;;  %7008 = vmatprep.mubr.bf16.mxu1 %v10012_v58 }
 0x112   :  { %6771 = vmatpush1.bf16.msra.mxu0 %v8653_v13  ;;  %6983 = vmatpush1.bf16.msra.mxu1 %v8655_v14  ;;  %v8749_v13 = vcombine.low %v178_v63, %v186_v0  ;;  %v8751_v14 = vcombine.low %v179_v4, %v187_v5  ;;  %v274_v63 = vld [vmem:[%s14279_s1 + $0x790] sm:$0xff]  ;;  %v275_v4 = vld [vmem:[%s14279_s1 + $0x798] sm:$0xff] }
 0x113   :  { %6772 = vmatprep.subr.bf16.mxu0 %v8670_v16  ;;  %6984 = vmatprep.subr.bf16.mxu1 %v8672_v17  ;;  %v8766_v16 = vcombine.high %v194_v59, %v202_v9  ;;  %v8768_v17 = vcombine.high %v195_v11, %v203_v12  ;;  %v282_v0 = vld [vmem:[%s14279_s1 + $0x7d0] sm:$0xff]  ;;  %v283_v5 = vld [vmem:[%s14279_s1 + $0x7d8] sm:$0xff] }
 0x116   :  { %6773 = vmatpush1.bf16.msra.mxu0 %v8669_v24  ;;  %6985 = vmatpush1.bf16.msra.mxu1 %v8671_v25  ;;  %v8765_v24 = vcombine.low %v194_v59, %v202_v9  ;;  %v8767_v25 = vcombine.low %v195_v11, %v203_v12  ;;  %v290_v59 = vld [vmem:[%s14279_s1 + $0x810] sm:$0xff]  ;;  %v291_v11 = vld [vmem:[%s14279_s1 + $0x818] sm:$0xff] }
 0x117   :  { %6774 = vmatprep.subr.bf16.mxu0 %v8686_v26  ;;  %6986 = vmatprep.subr.bf16.mxu1 %v8688_v27  ;;  %v8782_v26 = vcombine.high %v210_v18, %v218_v19  ;;  %v8784_v27 = vcombine.high %v211_v20, %v219_v21  ;;  %v298_v9 = vld [vmem:[%s14279_s1 + $0x850] sm:$0xff]  ;;  %v299_v12 = vld [vmem:[%s14279_s1 + $0x858] sm:$0xff] }
 0x11a   :  { %6775 = vmatpush1.bf16.msra.mxu0 %v8685_v37  ;;  %6987 = vmatpush1.bf16.msra.mxu1 %v8687_v38  ;;  %v8781_v37 = vcombine.low %v210_v18, %v218_v19  ;;  %v8783_v38 = vcombine.low %v211_v20, %v219_v21  ;;  %v306_v18 = vld [vmem:[%s14279_s1 + $0x890] sm:$0xff]  ;;  %v307_v20 = vld [vmem:[%s14279_s1 + $0x898] sm:$0xff] }
 0x11b   :  { %6776 = vmatprep.subr.bf16.mxu0 %v8702_v39  ;;  %6988 = vmatprep.subr.bf16.mxu1 %v8704_v40  ;;  %v8798_v39 = vcombine.high %v226_v28, %v234_v29  ;;  %v8800_v40 = vcombine.high %v227_v32, %v235_v33  ;;  %v314_v19 = vld [vmem:[%s14279_s1 + $0x8d0] sm:$0xff]  ;;  %v315_v21 = vld [vmem:[%s14279_s1 + $0x8d8] sm:$0xff] }
 0x11e   :  { %6777 = vmatpush1.bf16.msra.mxu0 %v8701_v46  ;;  %6989 = vmatpush1.bf16.msra.mxu1 %v8703_v47  ;;  %v8797_v46 = vcombine.low %v226_v28, %v234_v29  ;;  %v8799_v47 = vcombine.low %v227_v32, %v235_v33  ;;  %v322_v28 = vld [vmem:[%s14279_s1 + $0x910] sm:$0xff]  ;;  %v323_v32 = vld [vmem:[%s14279_s1 + $0x918] sm:$0xff] }
 0x11f   :  { %6778 = vmatprep.subr.bf16.mxu0 %v8718_v48  ;;  %6990 = vmatprep.subr.bf16.mxu1 %v8720_v54  ;;  %v8814_v48 = vcombine.high %v242_v35, %v250_v41  ;;  %v8816_v54 = vcombine.high %v243_v44, %v251_v45  ;;  %v330_v29 = vld [vmem:[%s14279_s1 + $0x950] sm:$0xff]  ;;  %v331_v33 = vld [vmem:[%s14279_s1 + $0x958] sm:$0xff] }
 0x122   :  { %6779 = vmatpush1.bf16.msra.mxu0 %v8717_v55  ;;  %6991 = vmatpush1.bf16.msra.mxu1 %v8719_v60  ;;  %v8813_v55 = vcombine.low %v242_v35, %v250_v41  ;;  %v8815_v60 = vcombine.low %v243_v44, %v251_v45  ;;  %v338_v35 = vld [vmem:[%s14279_s1 + $0x990] sm:$0xff]  ;;  %v339_v44 = vld [vmem:[%s14279_s1 + $0x998] sm:$0xff] }
 0x123   :  { %6780 = vmatprep.subr.bf16.mxu0 %v8734_v61  ;;  %6992 = vmatprep.subr.bf16.mxu1 %v8736_v62  ;;  %v8830_v61 = vcombine.high %v258_v49, %v266_v50  ;;  %v8832_v62 = vcombine.high %v259_v51, %v267_v52  ;;  %v346_v41 = vld [vmem:[%s14279_s1 + $0x9d0] sm:$0xff]  ;;  %v347_v45 = vld [vmem:[%s14279_s1 + $0x9d8] sm:$0xff] }
 0x126   :  { %6781 = vmatpush1.bf16.msra.mxu0 %v8733_v6  ;;  %6993 = vmatpush1.bf16.msra.mxu1 %v8735_v7  ;;  %v8829_v6 = vcombine.low %v258_v49, %v266_v50  ;;  %v8831_v7 = vcombine.low %v259_v51, %v267_v52  ;;  %v354_v49 = vld [vmem:[%s14279_s1 + $0xa10] sm:$0xff]  ;;  %v355_v51 = vld [vmem:[%s14279_s1 + $0xa18] sm:$0xff] }
 0x127   :  { %6782 = vmatprep.subr.bf16.mxu0 %v8750_v8  ;;  %6994 = vmatprep.subr.bf16.mxu1 %v8752_v57  ;;  %v8846_v8 = vcombine.high %v274_v63, %v282_v0  ;;  %v8848_v57 = vcombine.high %v275_v4, %v283_v5  ;;  %v362_v50 = vld [vmem:[%s14279_s1 + $0xa50] sm:$0xff]  ;;  %v363_v52 = vld [vmem:[%s14279_s1 + $0xa58] sm:$0xff] }
 0x12a   :  { %6783 = vmatpush1.bf16.msra.mxu0 %v8749_v13  ;;  %6995 = vmatpush1.bf16.msra.mxu1 %v8751_v14  ;;  %v8845_v13 = vcombine.low %v274_v63, %v282_v0  ;;  %v8847_v14 = vcombine.low %v275_v4, %v283_v5  ;;  %v370_v63 = vld [vmem:[%s14279_s1 + $0xa90] sm:$0xff]  ;;  %v371_v4 = vld [vmem:[%s14279_s1 + $0xa98] sm:$0xff] }
 0x12b   :  { %6784 = vmatprep.subr.bf16.mxu0 %v8766_v16  ;;  %6996 = vmatprep.subr.bf16.mxu1 %v8768_v17  ;;  %v8862_v16 = vcombine.high %v290_v59, %v298_v9  ;;  %v8864_v17 = vcombine.high %v291_v11, %v299_v12  ;;  %v378_v0 = vld [vmem:[%s14279_s1 + $0xad0] sm:$0xff]  ;;  %v379_v5 = vld [vmem:[%s14279_s1 + $0xad8] sm:$0xff] }
 0x12e   :  { %6785 = vmatpush1.bf16.msra.mxu0 %v8765_v24  ;;  %6997 = vmatpush1.bf16.msra.mxu1 %v8767_v25  ;;  %v8861_v24 = vcombine.low %v290_v59, %v298_v9  ;;  %v8863_v25 = vcombine.low %v291_v11, %v299_v12  ;;  %v386_v59 = vld [vmem:[%s14279_s1 + $0xb10] sm:$0xff]  ;;  %v387_v11 = vld [vmem:[%s14279_s1 + $0xb18] sm:$0xff] }
 0x12f   :  { %6786 = vmatprep.subr.bf16.mxu0 %v8782_v26  ;;  %6998 = vmatprep.subr.bf16.mxu1 %v8784_v27  ;;  %v8878_v26 = vcombine.high %v306_v18, %v314_v19  ;;  %v8880_v27 = vcombine.high %v307_v20, %v315_v21  ;;  %v394_v9 = vld [vmem:[%s14279_s1 + $0xb50] sm:$0xff]  ;;  %v395_v12 = vld [vmem:[%s14279_s1 + $0xb58] sm:$0xff] }
 0x132   :  { %6787 = vmatpush1.bf16.msra.mxu0 %v8781_v37  ;;  %6999 = vmatpush1.bf16.msra.mxu1 %v8783_v38  ;;  %v8877_v37 = vcombine.low %v306_v18, %v314_v19  ;;  %v8879_v38 = vcombine.low %v307_v20, %v315_v21  ;;  %v402_v18 = vld [vmem:[%s14279_s1 + $0xb90] sm:$0xff]  ;;  %v403_v20 = vld [vmem:[%s14279_s1 + $0xb98] sm:$0xff] }
 0x133   :  { %6788 = vmatprep.subr.bf16.mxu0 %v8798_v39  ;;  %7000 = vmatprep.subr.bf16.mxu1 %v8800_v40  ;;  %v8894_v39 = vcombine.high %v322_v28, %v330_v29  ;;  %v8896_v40 = vcombine.high %v323_v32, %v331_v33  ;;  %v410_v19 = vld [vmem:[%s14279_s1 + $0xbd0] sm:$0xff]  ;;  %v411_v21 = vld [vmem:[%s14279_s1 + $0xbd8] sm:$0xff] }
 0x136   :  { %6789 = vmatpush1.bf16.msra.mxu0 %v8797_v46  ;;  %7001 = vmatpush1.bf16.msra.mxu1 %v8799_v47  ;;  %v8893_v46 = vcombine.low %v322_v28, %v330_v29  ;;  %v8895_v47 = vcombine.low %v323_v32, %v331_v33  ;;  %v418_v28 = vld [vmem:[%s14279_s1 + $0xc10] sm:$0xff]  ;;  %v419_v32 = vld [vmem:[%s14279_s1 + $0xc18] sm:$0xff] }
 0x137   :  { %6790 = vmatprep.subr.bf16.mxu0 %v8814_v48  ;;  %7002 = vmatprep.subr.bf16.mxu1 %v8816_v54  ;;  %v8910_v48 = vcombine.high %v338_v35, %v346_v41  ;;  %v8912_v54 = vcombine.high %v339_v44, %v347_v45  ;;  %v426_v29 = vld [vmem:[%s14279_s1 + $0xc50] sm:$0xff]  ;;  %v427_v33 = vld [vmem:[%s14279_s1 + $0xc58] sm:$0xff] }
 0x13a   :  { %6791 = vmatpush1.bf16.msra.mxu0 %v8813_v55  ;;  %7003 = vmatpush1.bf16.msra.mxu1 %v8815_v60  ;;  %v8909_v55 = vcombine.low %v338_v35, %v346_v41  ;;  %v8911_v60 = vcombine.low %v339_v44, %v347_v45  ;;  %v434_v35 = vld [vmem:[%s14279_s1 + $0xc90] sm:$0xff]  ;;  %v435_v44 = vld [vmem:[%s14279_s1 + $0xc98] sm:$0xff] }
 0x13b   :  { %6792 = vmatprep.subr.bf16.mxu0 %v8830_v61  ;;  %7004 = vmatprep.subr.bf16.mxu1 %v8832_v62  ;;  %v8926_v61 = vcombine.high %v354_v49, %v362_v50  ;;  %v8928_v62 = vcombine.high %v355_v51, %v363_v52  ;;  %v442_v41 = vld [vmem:[%s14279_s1 + $0xcd0] sm:$0xff]  ;;  %v443_v45 = vld [vmem:[%s14279_s1 + $0xcd8] sm:$0xff] }
 0x13e   :  { %6793 = vmatpush1.bf16.msra.mxu0 %v8829_v6  ;;  %7005 = vmatpush1.bf16.msra.mxu1 %v8831_v7  ;;  %v8925_v6 = vcombine.low %v354_v49, %v362_v50  ;;  %v8927_v7 = vcombine.low %v355_v51, %v363_v52  ;;  %v450_v49 = vld [vmem:[%s14279_s1 + $0xd10] sm:$0xff]  ;;  %v451_v51 = vld [vmem:[%s14279_s1 + $0xd18] sm:$0xff] }
 0x13f   :  { %6794 = vmatprep.subr.bf16.mxu0 %v8846_v8  ;;  %7006 = vmatprep.subr.bf16.mxu1 %v8848_v57  ;;  %v8942_v8 = vcombine.high %v370_v63, %v378_v0  ;;  %v8944_v57 = vcombine.high %v371_v4, %v379_v5  ;;  %v458_v50 = vld [vmem:[%s14279_s1 + $0xd50] sm:$0xff]  ;;  %v459_v52 = vld [vmem:[%s14279_s1 + $0xd58] sm:$0xff] }
 0x142   :  { %6795 = vmatpush1.bf16.msra.mxu0 %v8845_v13  ;;  %7007 = vmatpush1.bf16.msra.mxu1 %v8847_v14  ;;  %v8941_v13 = vcombine.low %v370_v63, %v378_v0  ;;  %v8943_v14 = vcombine.low %v371_v4, %v379_v5  ;;  %v466_v63 = vld [vmem:[%s14279_s1 + $0xd90] sm:$0xff]  ;;  %v467_v4 = vld [vmem:[%s14279_s1 + $0xd98] sm:$0xff] }
 0x143   :  { %6817 = vmatprep.subr.bf16.mxu0 %v8862_v16  ;;  %7029 = vmatprep.subr.bf16.mxu1 %v8864_v17  ;;  %v8958_v16 = vcombine.high %v386_v59, %v394_v9  ;;  %v8960_v17 = vcombine.high %v387_v11, %v395_v12  ;;  %v474_v0 = vld [vmem:[%s14279_s1 + $0xdd0] sm:$0xff]  ;;  %v475_v5 = vld [vmem:[%s14279_s1 + $0xdd8] sm:$0xff] }
 0x145   :  { %6797 = vmatmul.mubr.bf16.vlgmr.msra.gmra.mrb[8].mxu0 %v10141_v15  ;;  %7009 = vmatmul.mubr.bf16.vlgmr.msra.gmra.mrb[8].mxu1 %v10141_v15 }
 0x146   :  { %6818 = vmatpush1.bf16.msra.mxu0 %v8861_v24  ;;  %7030 = vmatpush1.bf16.msra.mxu1 %v8863_v25  ;;  %v8957_v24 = vcombine.low %v386_v59, %v394_v9  ;;  %v8959_v25 = vcombine.low %v387_v11, %v395_v12  ;;  %v482_v59 = vld [vmem:[%s14279_s1 + $0xe10] sm:$0xff]  ;;  %v483_v11 = vld [vmem:[%s14279_s1 + $0xe18] sm:$0xff] }
 0x147   :  { %6819 = vmatprep.subr.bf16.mxu0 %v8878_v26  ;;  %7031 = vmatprep.subr.bf16.mxu1 %v8880_v27  ;;  %v8974_v26 = vcombine.high %v402_v18, %v410_v19  ;;  %v8976_v27 = vcombine.high %v403_v20, %v411_v21  ;;  %v490_v9 = vld [vmem:[%s14279_s1 + $0xe50] sm:$0xff]  ;;  %v491_v12 = vld [vmem:[%s14279_s1 + $0xe58] sm:$0xff] }
 0x148   :  { %6806 = vmatprep.mubr.bf16.mxu0 %v10158_v23  ;;  %7018 = vmatprep.mubr.bf16.mxu1 %v10158_v23 }
 0x14a   :  { %6820 = vmatpush1.bf16.msra.mxu0 %v8877_v37  ;;  %7032 = vmatpush1.bf16.msra.mxu1 %v8879_v38  ;;  %v8973_v37 = vcombine.low %v402_v18, %v410_v19  ;;  %v8975_v38 = vcombine.low %v403_v20, %v411_v21  ;;  %v498_v18 = vld [vmem:[%s14279_s1 + $0xe90] sm:$0xff]  ;;  %v499_v20 = vld [vmem:[%s14279_s1 + $0xe98] sm:$0xff] }
 0x14b   :  { %6821 = vmatprep.subr.bf16.mxu0 %v8894_v39  ;;  %7033 = vmatprep.subr.bf16.mxu1 %v8896_v40  ;;  %v8990_v39 = vcombine.high %v418_v28, %v426_v29  ;;  %v8992_v40 = vcombine.high %v419_v32, %v427_v33  ;;  %v506_v19 = vld [vmem:[%s14279_s1 + $0xed0] sm:$0xff]  ;;  %v507_v21 = vld [vmem:[%s14279_s1 + $0xed8] sm:$0xff] }
 0x14d   :  { %6807 = vmatmul.mubr.bf16.gmra.mrb[12].mxu0 %v10182_v34  ;;  %7019 = vmatmul.mubr.bf16.gmra.mrb[12].mxu1 %v10182_v34 }
 0x14e   :  { %6822 = vmatpush1.bf16.msra.mxu0 %v8893_v46  ;;  %7034 = vmatpush1.bf16.msra.mxu1 %v8895_v47  ;;  %v8989_v46 = vcombine.low %v418_v28, %v426_v29  ;;  %v8991_v47 = vcombine.low %v419_v32, %v427_v33  ;;  %v514_v28 = vld [vmem:[%s14279_s1 + $0xf10] sm:$0xff]  ;;  %v515_v32 = vld [vmem:[%s14279_s1 + $0xf18] sm:$0xff] }
 0x14f   :  { %6823 = vmatprep.subr.bf16.mxu0 %v8910_v48  ;;  %7035 = vmatprep.subr.bf16.mxu1 %v8912_v54  ;;  %v9006_v48 = vcombine.high %v434_v35, %v442_v41  ;;  %v9008_v54 = vcombine.high %v435_v44, %v443_v45  ;;  %v522_v29 = vld [vmem:[%s14279_s1 + $0xf50] sm:$0xff]  ;;  %v523_v33 = vld [vmem:[%s14279_s1 + $0xf58] sm:$0xff] }
 0x150   :  { %6849 = vmatprep.mubr.bf16.mxu0 %v10202_v43  ;;  %7061 = vmatprep.mubr.bf16.mxu1 %v10202_v43 }
 0x152   :  { %6824 = vmatpush1.bf16.msra.mxu0 %v8909_v55  ;;  %7036 = vmatpush1.bf16.msra.mxu1 %v8911_v60  ;;  %v9005_v55 = vcombine.low %v434_v35, %v442_v41  ;;  %v9007_v60 = vcombine.low %v435_v44, %v443_v45  ;;  %v530_v35 = vld [vmem:[%s14279_s1 + $0xf90] sm:$0xff]  ;;  %v531_v44 = vld [vmem:[%s14279_s1 + $0xf98] sm:$0xff] }
 0x153   :  { %6825 = vmatprep.subr.bf16.mxu0 %v8926_v61  ;;  %7037 = vmatprep.subr.bf16.mxu1 %v8928_v62  ;;  %v9022_v61 = vcombine.high %v450_v49, %v458_v50  ;;  %v9024_v62 = vcombine.high %v451_v51, %v459_v52  ;;  %v538_v41 = vld [vmem:[%s14279_s1 + $0xfd0] sm:$0xff]  ;;  %v539_v45 = vld [vmem:[%s14279_s1 + $0xfd8] sm:$0xff] }
 0x156   :  { %6826 = vmatpush1.bf16.msra.mxu0 %v8925_v6  ;;  %7038 = vmatpush1.bf16.msra.mxu1 %v8927_v7  ;;  %v9021_v6 = vcombine.low %v450_v49, %v458_v50  ;;  %v9023_v7 = vcombine.low %v451_v51, %v459_v52  ;;  %v546_v49 = vld [vmem:[%s14279_s1 + $0x1010] sm:$0xff]  ;;  %v547_v51 = vld [vmem:[%s14279_s1 + $0x1018] sm:$0xff] }
 0x157   :  { %6827 = vmatprep.subr.bf16.mxu0 %v8942_v8  ;;  %7039 = vmatprep.subr.bf16.mxu1 %v8944_v57  ;;  %v9038_v8 = vcombine.high %v466_v63, %v474_v0  ;;  %v9040_v57 = vcombine.high %v467_v4, %v475_v5  ;;  %v554_v50 = vld [vmem:[%s14279_s1 + $0x1050] sm:$0xff]  ;;  %v555_v52 = vld [vmem:[%s14279_s1 + $0x1058] sm:$0xff] }
 0x15a   :  { %6828 = vmatpush1.bf16.msra.mxu0 %v8941_v13  ;;  %7040 = vmatpush1.bf16.msra.mxu1 %v8943_v14  ;;  %v9037_v13 = vcombine.low %v466_v63, %v474_v0  ;;  %v9039_v14 = vcombine.low %v467_v4, %v475_v5  ;;  %v562_v63 = vld [vmem:[%s14279_s1 + $0x1090] sm:$0xff]  ;;  %v563_v4 = vld [vmem:[%s14279_s1 + $0x1098] sm:$0xff] }
 0x15b   :  { %6829 = vmatprep.subr.bf16.mxu0 %v8958_v16  ;;  %7041 = vmatprep.subr.bf16.mxu1 %v8960_v17  ;;  %v9054_v16 = vcombine.high %v482_v59, %v490_v9  ;;  %v9056_v17 = vcombine.high %v483_v11, %v491_v12  ;;  %v570_v0 = vld [vmem:[%s14279_s1 + $0x10d0] sm:$0xff]  ;;  %v571_v5 = vld [vmem:[%s14279_s1 + $0x10d8] sm:$0xff] }
 0x15e   :  { %6830 = vmatpush1.bf16.msra.mxu0 %v8957_v24  ;;  %7042 = vmatpush1.bf16.msra.mxu1 %v8959_v25  ;;  %v9053_v24 = vcombine.low %v482_v59, %v490_v9  ;;  %v9055_v25 = vcombine.low %v483_v11, %v491_v12  ;;  %v578_v59 = vld [vmem:[%s14279_s1 + $0x1110] sm:$0xff]  ;;  %v579_v11 = vld [vmem:[%s14279_s1 + $0x1118] sm:$0xff] }
 0x15f   :  { %6831 = vmatprep.subr.bf16.mxu0 %v8974_v26  ;;  %7043 = vmatprep.subr.bf16.mxu1 %v8976_v27  ;;  %v9070_v26 = vcombine.high %v498_v18, %v506_v19  ;;  %v9072_v27 = vcombine.high %v499_v20, %v507_v21  ;;  %v586_v9 = vld [vmem:[%s14279_s1 + $0x1150] sm:$0xff]  ;;  %v587_v12 = vld [vmem:[%s14279_s1 + $0x1158] sm:$0xff] }
 0x162   :  { %6832 = vmatpush1.bf16.msra.mxu0 %v8973_v37  ;;  %7044 = vmatpush1.bf16.msra.mxu1 %v8975_v38  ;;  %v9069_v37 = vcombine.low %v498_v18, %v506_v19  ;;  %v9071_v38 = vcombine.low %v499_v20, %v507_v21  ;;  %v594_v18 = vld [vmem:[%s14279_s1 + $0x1190] sm:$0xff]  ;;  %v595_v20 = vld [vmem:[%s14279_s1 + $0x1198] sm:$0xff] }
 0x163   :  { %6833 = vmatprep.subr.bf16.mxu0 %v8990_v39  ;;  %7045 = vmatprep.subr.bf16.mxu1 %v8992_v40  ;;  %v9086_v39 = vcombine.high %v514_v28, %v522_v29  ;;  %v9088_v40 = vcombine.high %v515_v32, %v523_v33  ;;  %v602_v19 = vld [vmem:[%s14279_s1 + $0x11d0] sm:$0xff]  ;;  %v603_v21 = vld [vmem:[%s14279_s1 + $0x11d8] sm:$0xff] }
 0x166   :  { %6834 = vmatpush1.bf16.msra.mxu0 %v8989_v46  ;;  %7046 = vmatpush1.bf16.msra.mxu1 %v8991_v47  ;;  %v9085_v46 = vcombine.low %v514_v28, %v522_v29  ;;  %v9087_v47 = vcombine.low %v515_v32, %v523_v33  ;;  %v610_v28 = vld [vmem:[%s14279_s1 + $0x1210] sm:$0xff]  ;;  %v611_v32 = vld [vmem:[%s14279_s1 + $0x1218] sm:$0xff] }
 0x167   :  { %6835 = vmatprep.subr.bf16.mxu0 %v9006_v48  ;;  %7047 = vmatprep.subr.bf16.mxu1 %v9008_v54  ;;  %v9102_v48 = vcombine.high %v530_v35, %v538_v41  ;;  %v9104_v54 = vcombine.high %v531_v44, %v539_v45  ;;  %v618_v29 = vld [vmem:[%s14279_s1 + $0x1250] sm:$0xff]  ;;  %v619_v33 = vld [vmem:[%s14279_s1 + $0x1258] sm:$0xff] }
 0x16a   :  { %6836 = vmatpush1.bf16.msra.mxu0 %v9005_v55  ;;  %7048 = vmatpush1.bf16.msra.mxu1 %v9007_v60  ;;  %v9101_v55 = vcombine.low %v530_v35, %v538_v41  ;;  %v9103_v60 = vcombine.low %v531_v44, %v539_v45  ;;  %v626_v35 = vld [vmem:[%s14279_s1 + $0x1290] sm:$0xff]  ;;  %v627_v44 = vld [vmem:[%s14279_s1 + $0x1298] sm:$0xff] }
 0x16b   :  { %6837 = vmatprep.subr.bf16.mxu0 %v9022_v61  ;;  %7049 = vmatprep.subr.bf16.mxu1 %v9024_v62  ;;  %v9118_v61 = vcombine.high %v546_v49, %v554_v50  ;;  %v9120_v62 = vcombine.high %v547_v51, %v555_v52  ;;  %v634_v41 = vld [vmem:[%s14279_s1 + $0x12d0] sm:$0xff]  ;;  %v635_v45 = vld [vmem:[%s14279_s1 + $0x12d8] sm:$0xff] }
 0x16e   :  { %6838 = vmatpush1.bf16.msra.mxu0 %v9021_v6  ;;  %7050 = vmatpush1.bf16.msra.mxu1 %v9023_v7  ;;  %v9117_v6 = vcombine.low %v546_v49, %v554_v50  ;;  %v9119_v7 = vcombine.low %v547_v51, %v555_v52  ;;  %v642_v49 = vld [vmem:[%s14279_s1 + $0x1310] sm:$0xff]  ;;  %v643_v51 = vld [vmem:[%s14279_s1 + $0x1318] sm:$0xff] }
 0x16f   :  { %6839 = vmatprep.subr.bf16.mxu0 %v9038_v8  ;;  %7051 = vmatprep.subr.bf16.mxu1 %v9040_v57  ;;  %v9134_v8 = vcombine.high %v562_v63, %v570_v0  ;;  %v9136_v57 = vcombine.high %v563_v4, %v571_v5  ;;  %v650_v50 = vld [vmem:[%s14279_s1 + $0x1350] sm:$0xff]  ;;  %v651_v52 = vld [vmem:[%s14279_s1 + $0x1358] sm:$0xff] }
 0x172   :  { %6840 = vmatpush1.bf16.msra.mxu0 %v9037_v13  ;;  %7052 = vmatpush1.bf16.msra.mxu1 %v9039_v14  ;;  %v9133_v13 = vcombine.low %v562_v63, %v570_v0  ;;  %v9135_v14 = vcombine.low %v563_v4, %v571_v5  ;;  %v658_v63 = vld [vmem:[%s14279_s1 + $0x1390] sm:$0xff]  ;;  %v659_v4 = vld [vmem:[%s14279_s1 + $0x1398] sm:$0xff] }
 0x173   :  { %6841 = vmatprep.subr.bf16.mxu0 %v9054_v16  ;;  %7053 = vmatprep.subr.bf16.mxu1 %v9056_v17  ;;  %v9150_v16 = vcombine.high %v578_v59, %v586_v9  ;;  %v9152_v17 = vcombine.high %v579_v11, %v587_v12  ;;  %v666_v0 = vld [vmem:[%s14279_s1 + $0x13d0] sm:$0xff]  ;;  %v667_v5 = vld [vmem:[%s14279_s1 + $0x13d8] sm:$0xff] }
 0x176   :  { %6842 = vmatpush1.bf16.msra.mxu0 %v9053_v24  ;;  %7054 = vmatpush1.bf16.msra.mxu1 %v9055_v25  ;;  %v9149_v24 = vcombine.low %v578_v59, %v586_v9  ;;  %v9151_v25 = vcombine.low %v579_v11, %v587_v12  ;;  %v674_v59 = vld [vmem:[%s14279_s1 + $0x1410] sm:$0xff]  ;;  %v675_v11 = vld [vmem:[%s14279_s1 + $0x1418] sm:$0xff] }
 0x177   :  { %6843 = vmatprep.subr.bf16.mxu0 %v9070_v26  ;;  %7055 = vmatprep.subr.bf16.mxu1 %v9072_v27  ;;  %v9166_v26 = vcombine.high %v594_v18, %v602_v19  ;;  %v9168_v27 = vcombine.high %v595_v20, %v603_v21  ;;  %v682_v9 = vld [vmem:[%s14279_s1 + $0x1450] sm:$0xff]  ;;  %v683_v12 = vld [vmem:[%s14279_s1 + $0x1458] sm:$0xff] }
 0x17a   :  { %6844 = vmatpush1.bf16.msra.mxu0 %v9069_v37  ;;  %7056 = vmatpush1.bf16.msra.mxu1 %v9071_v38  ;;  %v9165_v37 = vcombine.low %v594_v18, %v602_v19  ;;  %v9167_v38 = vcombine.low %v595_v20, %v603_v21  ;;  %v690_v18 = vld [vmem:[%s14279_s1 + $0x1490] sm:$0xff]  ;;  %v691_v20 = vld [vmem:[%s14279_s1 + $0x1498] sm:$0xff] }
 0x17b   :  { %6845 = vmatprep.subr.bf16.mxu0 %v9086_v39  ;;  %7057 = vmatprep.subr.bf16.mxu1 %v9088_v40  ;;  %v9182_v39 = vcombine.high %v610_v28, %v618_v29  ;;  %v9184_v40 = vcombine.high %v611_v32, %v619_v33  ;;  %v698_v19 = vld [vmem:[%s14279_s1 + $0x14d0] sm:$0xff]  ;;  %v699_v21 = vld [vmem:[%s14279_s1 + $0x14d8] sm:$0xff] }
 0x17e   :  { %6846 = vmatpush1.bf16.msra.mxu0 %v9085_v46  ;;  %7058 = vmatpush1.bf16.msra.mxu1 %v9087_v47  ;;  %v9181_v46 = vcombine.low %v610_v28, %v618_v29  ;;  %v9183_v47 = vcombine.low %v611_v32, %v619_v33  ;;  %v706_v28 = vld [vmem:[%s14279_s1 + $0x1510] sm:$0xff]  ;;  %v707_v32 = vld [vmem:[%s14279_s1 + $0x1518] sm:$0xff] }
 0x17f   :  { %6847 = vmatprep.subr.bf16.mxu0 %v9102_v48  ;;  %7059 = vmatprep.subr.bf16.mxu1 %v9104_v54  ;;  %v9198_v48 = vcombine.high %v626_v35, %v634_v41  ;;  %v9200_v54 = vcombine.high %v627_v44, %v635_v45  ;;  %v714_v29 = vld [vmem:[%s14279_s1 + $0x1550] sm:$0xff]  ;;  %v715_v33 = vld [vmem:[%s14279_s1 + $0x1558] sm:$0xff] }
 0x182   :  { %6848 = vmatpush1.bf16.msra.mxu0 %v9101_v55  ;;  %7060 = vmatpush1.bf16.msra.mxu1 %v9103_v60  ;;  %v9197_v55 = vcombine.low %v626_v35, %v634_v41  ;;  %v9199_v60 = vcombine.low %v627_v44, %v635_v45  ;;  %v722_v35 = vld [vmem:[%s14279_s1 + $0x1590] sm:$0xff]  ;;  %v723_v44 = vld [vmem:[%s14279_s1 + $0x1598] sm:$0xff] }
 0x183   :  { %6870 = vmatprep.subr.bf16.mxu0 %v9118_v61  ;;  %7082 = vmatprep.subr.bf16.mxu1 %v9120_v62  ;;  %v9214_v61 = vcombine.high %v642_v49, %v650_v50  ;;  %v9216_v62 = vcombine.high %v643_v51, %v651_v52  ;;  %v730_v41 = vld [vmem:[%s14279_s1 + $0x15d0] sm:$0xff]  ;;  %v731_v45 = vld [vmem:[%s14279_s1 + $0x15d8] sm:$0xff] }
 0x185   :  { %6850 = vmatmul.mubr.bf16.vlgmr.msra.gmra.mrb[8].mxu0 %v10369_v31  ;;  %7062 = vmatmul.mubr.bf16.vlgmr.msra.gmra.mrb[8].mxu1 %v10369_v31 }
 0x186   :  { %6871 = vmatpush1.bf16.msra.mxu0 %v9117_v6  ;;  %7083 = vmatpush1.bf16.msra.mxu1 %v9119_v7  ;;  %v9213_v6 = vcombine.low %v642_v49, %v650_v50  ;;  %v9215_v7 = vcombine.low %v643_v51, %v651_v52  ;;  %v738_v49 = vld [vmem:[%s14279_s1 + $0x1610] sm:$0xff]  ;;  %v739_v51 = vld [vmem:[%s14279_s1 + $0x1618] sm:$0xff] }
 0x187   :  { %6872 = vmatprep.subr.bf16.mxu0 %v9134_v8  ;;  %7084 = vmatprep.subr.bf16.mxu1 %v9136_v57  ;;  %v9230_v8 = vcombine.high %v658_v63, %v666_v0  ;;  %v9232_v57 = vcombine.high %v659_v4, %v667_v5  ;;  %v746_v50 = vld [vmem:[%s14279_s1 + $0x1650] sm:$0xff]  ;;  %v747_v52 = vld [vmem:[%s14279_s1 + $0x1658] sm:$0xff] }
 0x188   :  { %6859 = vmatprep.mubr.bf16.mxu0 %v10386_v42  ;;  %7071 = vmatprep.mubr.bf16.mxu1 %v10386_v42 }
 0x18a   :  { %6873 = vmatpush1.bf16.msra.mxu0 %v9133_v13  ;;  %7085 = vmatpush1.bf16.msra.mxu1 %v9135_v14  ;;  %v9229_v13 = vcombine.low %v658_v63, %v666_v0  ;;  %v9231_v14 = vcombine.low %v659_v4, %v667_v5  ;;  %v754_v63 = vld [vmem:[%s14279_s1 + $0x1690] sm:$0xff]  ;;  %v755_v4 = vld [vmem:[%s14279_s1 + $0x1698] sm:$0xff] }
 0x18b   :  { %6874 = vmatprep.subr.bf16.mxu0 %v9150_v16  ;;  %7086 = vmatprep.subr.bf16.mxu1 %v9152_v17  ;;  %v9246_v16 = vcombine.high %v674_v59, %v682_v9  ;;  %v9248_v17 = vcombine.high %v675_v11, %v683_v12  ;;  %v762_v0 = vld [vmem:[%s14279_s1 + $0x16d0] sm:$0xff]  ;;  %v763_v5 = vld [vmem:[%s14279_s1 + $0x16d8] sm:$0xff] }
 0x18d   :  { %6860 = vmatmul.mubr.bf16.gmra.mrb[12].mxu0 %v10410_v56  ;;  %7072 = vmatmul.mubr.bf16.gmra.mrb[12].mxu1 %v10410_v56 }
 0x18e   :  { %6875 = vmatpush1.bf16.msra.mxu0 %v9149_v24  ;;  %7087 = vmatpush1.bf16.msra.mxu1 %v9151_v25  ;;  %v9245_v24 = vcombine.low %v674_v59, %v682_v9  ;;  %v9247_v25 = vcombine.low %v675_v11, %v683_v12  ;;  %v770_v59 = vld [vmem:[%s14279_s1 + $0x1710] sm:$0xff]  ;;  %v771_v11 = vld [vmem:[%s14279_s1 + $0x1718] sm:$0xff] }
 0x18f   :  { %6876 = vmatprep.subr.bf16.mxu0 %v9166_v26  ;;  %7088 = vmatprep.subr.bf16.mxu1 %v9168_v27  ;;  %v9262_v26 = vcombine.high %v690_v18, %v698_v19  ;;  %v9264_v27 = vcombine.high %v691_v20, %v699_v21  ;;  %v778_v9 = vld [vmem:[%s14279_s1 + $0x1750] sm:$0xff]  ;;  %v779_v12 = vld [vmem:[%s14279_s1 + $0x1758] sm:$0xff] }
 0x190   :  { %6902 = vmatprep.mubr.bf16.mxu0 %v10430_v2  ;;  %7114 = vmatprep.mubr.bf16.mxu1 %v10430_v2 }
 0x192   :  { %6877 = vmatpush1.bf16.msra.mxu0 %v9165_v37  ;;  %7089 = vmatpush1.bf16.msra.mxu1 %v9167_v38  ;;  %v9261_v37 = vcombine.low %v690_v18, %v698_v19  ;;  %v9263_v38 = vcombine.low %v691_v20, %v699_v21  ;;  %v786_v18 = vld [vmem:[%s14279_s1 + $0x1790] sm:$0xff]  ;;  %v787_v20 = vld [vmem:[%s14279_s1 + $0x1798] sm:$0xff] }
 0x193   :  { %6878 = vmatprep.subr.bf16.mxu0 %v9182_v39  ;;  %7090 = vmatprep.subr.bf16.mxu1 %v9184_v40  ;;  %v9278_v39 = vcombine.high %v706_v28, %v714_v29  ;;  %v9280_v40 = vcombine.high %v707_v32, %v715_v33  ;;  %v794_v19 = vld [vmem:[%s14279_s1 + $0x17d0] sm:$0xff]  ;;  %v795_v21 = vld [vmem:[%s14279_s1 + $0x17d8] sm:$0xff] }
 0x196   :  { %6879 = vmatpush1.bf16.msra.mxu0 %v9181_v46  ;;  %7091 = vmatpush1.bf16.msra.mxu1 %v9183_v47  ;;  %v9277_v46 = vcombine.low %v706_v28, %v714_v29  ;;  %v9279_v47 = vcombine.low %v707_v32, %v715_v33  ;;  %v802_v28 = vld [vmem:[%s14279_s1 + $0x1810] sm:$0xff]  ;;  %v803_v32 = vld [vmem:[%s14279_s1 + $0x1818] sm:$0xff] }
 0x197   :  { %6880 = vmatprep.subr.bf16.mxu0 %v9198_v48  ;;  %7092 = vmatprep.subr.bf16.mxu1 %v9200_v54  ;;  %v9294_v48 = vcombine.high %v722_v35, %v730_v41  ;;  %v9296_v54 = vcombine.high %v723_v44, %v731_v45  ;;  %v810_v29 = vld [vmem:[%s14279_s1 + $0x1850] sm:$0xff]  ;;  %v811_v33 = vld [vmem:[%s14279_s1 + $0x1858] sm:$0xff] }
 0x19a   :  { %6881 = vmatpush1.bf16.msra.mxu0 %v9197_v55  ;;  %7093 = vmatpush1.bf16.msra.mxu1 %v9199_v60  ;;  %v9293_v55 = vcombine.low %v722_v35, %v730_v41  ;;  %v9295_v60 = vcombine.low %v723_v44, %v731_v45  ;;  %v818_v35 = vld [vmem:[%s14279_s1 + $0x1890] sm:$0xff]  ;;  %v819_v44 = vld [vmem:[%s14279_s1 + $0x1898] sm:$0xff] }
 0x19b   :  { %6882 = vmatprep.subr.bf16.mxu0 %v9214_v61  ;;  %7094 = vmatprep.subr.bf16.mxu1 %v9216_v62  ;;  %v9310_v61 = vcombine.high %v738_v49, %v746_v50  ;;  %v9312_v62 = vcombine.high %v739_v51, %v747_v52  ;;  %v826_v41 = vld [vmem:[%s14279_s1 + $0x18d0] sm:$0xff]  ;;  %v827_v45 = vld [vmem:[%s14279_s1 + $0x18d8] sm:$0xff] }
 0x19e   :  { %6883 = vmatpush1.bf16.msra.mxu0 %v9213_v6  ;;  %7095 = vmatpush1.bf16.msra.mxu1 %v9215_v7  ;;  %v9309_v6 = vcombine.low %v738_v49, %v746_v50  ;;  %v9311_v7 = vcombine.low %v739_v51, %v747_v52  ;;  %v834_v49 = vld [vmem:[%s14279_s1 + $0x1910] sm:$0xff]  ;;  %v835_v51 = vld [vmem:[%s14279_s1 + $0x1918] sm:$0xff] }
 0x19f   :  { %6884 = vmatprep.subr.bf16.mxu0 %v9230_v8  ;;  %7096 = vmatprep.subr.bf16.mxu1 %v9232_v57  ;;  %v9326_v8 = vcombine.high %v754_v63, %v762_v0  ;;  %v9328_v57 = vcombine.high %v755_v4, %v763_v5  ;;  %v842_v50 = vld [vmem:[%s14279_s1 + $0x1950] sm:$0xff]  ;;  %v843_v52 = vld [vmem:[%s14279_s1 + $0x1958] sm:$0xff] }
 0x1a2   :  { %6885 = vmatpush1.bf16.msra.mxu0 %v9229_v13  ;;  %7097 = vmatpush1.bf16.msra.mxu1 %v9231_v14  ;;  %v9325_v13 = vcombine.low %v754_v63, %v762_v0  ;;  %v9327_v14 = vcombine.low %v755_v4, %v763_v5  ;;  %v9408_v63 = vcombine.high %v835_v51, %v843_v52  ;;  %v850_v0 = vld [vmem:[%s14279_s1 + $0x1990] sm:$0xff]  ;;  %v851_v5 = vld [vmem:[%s14279_s1 + $0x1998] sm:$0xff] }
 0x1a3   :  { %6886 = vmatprep.subr.bf16.mxu0 %v9246_v16  ;;  %7098 = vmatprep.subr.bf16.mxu1 %v9248_v17  ;;  %v9342_v16 = vcombine.high %v770_v59, %v778_v9  ;;  %v9344_v17 = vcombine.high %v771_v11, %v779_v12  ;;  %v858_v4 = vld [vmem:[%s14279_s1 + $0x19d0] sm:$0xff] }
 0x1a6   :  { %6887 = vmatpush1.bf16.msra.mxu0 %v9245_v24  ;;  %7099 = vmatpush1.bf16.msra.mxu1 %v9247_v25  ;;  %v9341_v24 = vcombine.low %v770_v59, %v778_v9  ;;  %v9343_v25 = vcombine.low %v771_v11, %v779_v12  ;;  %v9422_v59 = vcombine.high %v850_v0, %v858_v4  ;;  %v11473_v11 = vld [vmem:[%s14279_s1 + $0x1a10] sm:$0xff] }
 0x1a7   :  { %6888 = vmatprep.subr.bf16.mxu0 %v9262_v26  ;;  %7100 = vmatprep.subr.bf16.mxu1 %v9264_v27  ;;  %v9358_v26 = vcombine.high %v786_v18, %v794_v19  ;;  %v9360_v27 = vcombine.high %v787_v20, %v795_v21  ;;  %v11478_v12 = vld [vmem:[%s14279_s1 + $0x1a50] sm:$0xff] }
 0x1aa   :  { %6889 = vmatpush1.bf16.msra.mxu0 %v9261_v37  ;;  %7101 = vmatpush1.bf16.msra.mxu1 %v9263_v38  ;;  %v9357_v37 = vcombine.low %v786_v18, %v794_v19  ;;  %v9359_v38 = vcombine.low %v787_v20, %v795_v21  ;;  %v11500_v21 = vld [vmem:[%s14279_s1 + $0x1a90] sm:$0xff] }
 0x1ab   :  { %6890 = vmatprep.subr.bf16.mxu0 %v9278_v39  ;;  %7102 = vmatprep.subr.bf16.mxu1 %v9280_v40  ;;  %v9374_v39 = vcombine.high %v802_v28, %v810_v29  ;;  %v9376_v40 = vcombine.high %v803_v32, %v811_v33 }
 0x1ae   :  { %6891 = vmatpush1.bf16.msra.mxu0 %v9277_v46  ;;  %7103 = vmatpush1.bf16.msra.mxu1 %v9279_v47  ;;  %v9373_v46 = vcombine.low %v802_v28, %v810_v29  ;;  %v9375_v47 = vcombine.low %v803_v32, %v811_v33  ;;  %v11514_v28 = vld [vmem:[%s14279_s1 + $0x1a98] sm:$0xff]  ;;  %v11526_v33 = vld [vmem:[%s14279_s1 + $0x1b10] sm:$0xff] }
 0x1af   :  { %6892 = vmatprep.subr.bf16.mxu0 %v9294_v48  ;;  %7104 = vmatprep.subr.bf16.mxu1 %v9296_v54  ;;  %v9390_v48 = vcombine.high %v818_v35, %v826_v41  ;;  %v9392_v54 = vcombine.high %v819_v44, %v827_v45  ;;  %v11519_v29 = vld [vmem:[%s14279_s1 + $0x1ad8] sm:$0xff] }
 0x1b2   :  { %6893 = vmatpush1.bf16.msra.mxu0 %v9293_v55  ;;  %7105 = vmatpush1.bf16.msra.mxu1 %v9295_v60  ;;  %v9389_v55 = vcombine.low %v818_v35, %v826_v41  ;;  %v1060_v60 = vlaneseq  ;;  %v11546_v35 = vld [vmem:[%s14279_s1 + $0x1b58] sm:$0xff]  ;;  %v11551_v41 = vld [vmem:[%s14279_s1 + $0x1b90] sm:$0xff] }
 0x1b3   :  { %6894 = vmatprep.subr.bf16.mxu0 %v9310_v61  ;;  %7106 = vmatprep.subr.bf16.mxu1 %v9312_v62  ;;  %v9391_v61 = vcombine.low %v819_v44, %v827_v45  ;;  %v9406_v62 = vcombine.high %v834_v49, %v842_v50  ;;  %v11556_v44 = vld [vmem:[%s14279_s1 + $0x1bd0] sm:$0xff] }
 0x1b6   :  { %6895 = vmatpush1.bf16.msra.mxu0 %v9309_v6  ;;  %7107 = vmatpush1.bf16.msra.mxu1 %v9311_v7  ;;  %v859_v6 = vld [vmem:[%s14279_s1 + $0x19d8] sm:$0xff]  ;;  %v9405_v7 = vcombine.low %v834_v49, %v842_v50  ;;  %v11586_v50 = vld [vmem:[%s14279_s1 + $0x1c10] sm:$0xff] }
 0x1b7   :  { %6896 = vmatprep.subr.bf16.mxu0 %v9326_v8  ;;  %7108 = vmatprep.subr.bf16.mxu1 %v9328_v57  ;;  %v11468_v8 = vshrl.u32 %v1060_v60, 7  ;;  %v9407_v57 = vcombine.low %v835_v51, %v843_v52  ;;  %v9424_v9 = vcombine.high %v851_v5, %v859_v6  ;;  %v11581_v49 = vld [vmem:[%s14279_s1 + $0x1bd8] sm:$0xff]  ;;  %v11599_v60 = vld [vmem:[%s14279_s1 + $0x1c50] sm:$0xff] }
 0x1b9   :  { %14308 = vst [vmem:[#allocation6_spill] sm:$0xff] %v11468_v8  ;;  %v14287_v18 = vsub.s32 0, %v11468_v8  ;;  %v14286_v19 = vsub.s32 2, %v11468_v8  ;;  %v14285_v20 = vsub.s32 1, %v11468_v8 }
 0x1ba   :  { %6897 = vmatpush1.bf16.msra.mxu0 %v9325_v13  ;;  %7109 = vmatpush1.bf16.msra.mxu1 %v9327_v14  ;;  %v11483_v13 = vld [vmem:[%s14279_s1 + $0x1a18] sm:$0xff] }
 0x1bb   :  { %6898 = vmatprep.subr.bf16.mxu0 %v9342_v16  ;;  %7110 = vmatprep.subr.bf16.mxu1 %v9344_v17  ;;  %v11488_v14 = vld [vmem:[%s14279_s1 + $0x1a58] sm:$0xff]  ;;  %v9421_v16 = vcombine.low %v850_v0, %v858_v4  ;;  %v1056_v17 = vld [vmem:[%s14281_s2] sm:$0xff] }
 0x1bc   :  { %v9440_v32 = vcombine.high %v11483_v13, %v11488_v14  ;;  %v11561_v45 = vrot.slane %v1056_v17, %v14287_v18 }
 0x1be   :  { %6899 = vmatpush1.bf16.msra.mxu0 %v9341_v24  ;;  %7111 = vmatpush1.bf16.msra.mxu1 %v9343_v25  ;;  %v9423_v24 = vcombine.low %v851_v5, %v859_v6  ;;  %v9438_v25 = vcombine.high %v11473_v11, %v11478_v12  ;;  %v11622_v6 = vld [vmem:[%s14279_s1 + $0x1c90] sm:$0xff] }
 0x1bf   :  { %6900 = vmatprep.subr.bf16.mxu0 %v9358_v26  ;;  %7112 = vmatprep.subr.bf16.mxu1 %v9360_v27  ;;  %v14284_v26 = vsub.s32 3, %v11468_v8  ;;  %v11509_v27 = vld [vmem:[%s14279_s1 + $0x1ad0] sm:$0xff] }
 0x1c0   :  { %v9453_v52 = vcombine.low %v11500_v21, %v11509_v27 }
 0x1c1   :  { %v11590_v51 = vrot.slane %v1056_v17, %v14284_v26  ;;  %v11684_v26 = vld [vmem:[%s14279_s1 + $0x1d90] sm:$0xff] }
 0x1c2   :  { %6901 = vmatpush1.bf16.msra.mxu0 %v9357_v37  ;;  %7113 = vmatpush1.bf16.msra.mxu1 %v9359_v38  ;;  %v11531_v37 = vld [vmem:[%s14279_s1 + $0x1b50] sm:$0xff]  ;;  %v11536_v38 = vld [vmem:[%s14279_s1 + $0x1b18] sm:$0xff] }
 0x1c3   :  { %6923 = vmatprep.subr.bf16.mxu0 %v9374_v39  ;;  %7135 = vmatprep.subr.bf16.mxu1 %v9376_v40  ;;  %v9437_v39 = vcombine.low %v11473_v11, %v11478_v12  ;;  %v9439_v40 = vcombine.low %v11483_v13, %v11488_v14  ;;  %v9469_v0 = vcombine.low %v11526_v33, %v11531_v37  ;;  %v11645_v13 = vld [vmem:[%s14279_s1 + $0x1cd8] sm:$0xff]  ;;  %v11650_v14 = vld [vmem:[%s14279_s1 + $0x1d10] sm:$0xff] }
 0x1c4   :  { %v9470_v4 = vcombine.high %v11526_v33, %v11531_v37  ;;  %v14309_v33 = vcombine.low %v11536_v38, %v11546_v35  ;;  %v14310_v37 = vcombine.high %v11551_v41, %v11556_v44 }
 0x1c5   :  { %6903 = vmatmul.mubr.bf16.vlgmr.msra.gmra.mrb[8].mxu0 %v10597_v1  ;;  %7115 = vmatmul.mubr.bf16.vlgmr.msra.gmra.mrb[8].mxu1 %v10597_v1 }
 0x1c6   :  { %6924 = vmatpush1.bf16.msra.mxu0 %v9373_v46  ;;  %7136 = vmatpush1.bf16.msra.mxu1 %v9375_v47  ;;  %v11565_v46 = vrot.slane %v1056_v17, %v14286_v19  ;;  %v11569_v47 = vrot.slane %v1056_v17, %v14285_v20  ;;  %v11689_v20 = vld [vmem:[%s14279_s1 + $0x1dd0] sm:$0xff] }
 0x1c7   :  { %6925 = vmatprep.subr.bf16.mxu0 %v9390_v48  ;;  %7137 = vmatprep.subr.bf16.mxu1 %v9392_v54  ;;  %v9454_v48 = vcombine.high %v11500_v21, %v11509_v27  ;;  %v11576_v54 = vld [vmem:[%s14279_s1 + $0x1b98] sm:$0xff] }
 0x1c8   :  { %6912 = vmatprep.mubr.bf16.mxu0 %v10614_v10  ;;  %7124 = vmatprep.mubr.bf16.mxu1 %v10614_v10  ;;  %v11668_v27 = vld [vmem:[%s14279_s1 + $0x1d18] sm:$0xff] }
 0x1ca   :  { %6926 = vmatpush1.bf16.msra.mxu0 %v9389_v55  ;;  %7138 = vmatpush1.bf16.msra.mxu1 %v9391_v61  ;;  %v9455_v55 = vcombine.low %v11514_v28, %v11519_v29  ;;  %v11604_v61 = vld [vmem:[%s14279_s1 + $0x1c18] sm:$0xff] }
 0x1cb   :  { %6927 = vmatprep.subr.bf16.mxu0 %v9406_v62  ;;  %7139 = vmatprep.subr.bf16.mxu1 %v9408_v63  ;;  %v11609_v62 = vld [vmem:[%s14279_s1 + $0x1c58] sm:$0xff]  ;;  %v9456_v63 = vcombine.high %v11514_v28, %v11519_v29 }
 0x1cc   :  { %v11673_v28 = vld [vmem:[%s14279_s1 + $0x1d58] sm:$0xff] }
 0x1cd   :  { %6913 = vmatmul.mubr.bf16.gmra.mrb[12].mxu0 %v10638_v53  ;;  %7125 = vmatmul.mubr.bf16.gmra.mrb[12].mxu1 %v10638_v53 }
 0x1ce   :  { %6928 = vmatpush1.bf16.msra.mxu0 %v9405_v7  ;;  %7140 = vmatpush1.bf16.msra.mxu1 %v9407_v57  ;;  %v11627_v7 = vld [vmem:[%s14279_s1 + $0x1cd0] sm:$0xff]  ;;  %v11632_v57 = vld [vmem:[%s14279_s1 + $0x1c98] sm:$0xff] }
 0x1cf   :  { %6929 = vmatprep.subr.bf16.mxu0 %v9422_v59  ;;  %7141 = vmatprep.subr.bf16.mxu1 %v9424_v9  ;;  %v9472_v59 = vcombine.high %v11536_v38, %v11546_v35  ;;  %v14311_v38 = vcombine.high %v11576_v54, %v11581_v49  ;;  %v14312_v35 = vcombine.low %v11551_v41, %v11556_v44 }
 0x1d0   :  { %6955 = vmatprep.mubr.bf16.mxu0 %v10658_v30  ;;  %7167 = vmatprep.mubr.bf16.mxu1 %v10658_v30  ;;  %v14313_v41 = vcombine.low %v11576_v54, %v11581_v49 }
 0x1d2   :  { %6930 = vmatpush1.bf16.msra.mxu0 %v9421_v16  ;;  %7142 = vmatpush1.bf16.msra.mxu1 %v9423_v24  ;;  %v11655_v16 = vld [vmem:[%s14279_s1 + $0x1d50] sm:$0xff] }
 0x1d3   :  { %6931 = vmatprep.subr.bf16.mxu0 %v9438_v25  ;;  %7143 = vmatprep.subr.bf16.mxu1 %v9440_v32 }
 0x1d6   :  { %6932 = vmatpush1.bf16.msra.mxu0 %v9437_v39  ;;  %7144 = vmatpush1.bf16.msra.mxu1 %v9439_v40 }
 0x1d7   :  { %6933 = vmatprep.subr.bf16.mxu0 %v9454_v48  ;;  %7145 = vmatprep.subr.bf16.mxu1 %v9456_v63 }
 0x1d8   :  { %v6533_v40 = vpop.f32.mrb[0].mxu0  ;;  %v6745_v39 = vpop.f32.mrb[0].mxu1 }
 0x1d9   :  { %v9625_v32 = vadd.f32 %v6533_v40, %v11561_v45  ;;  %v6535_v25 = vpop.f32.mrb[1].mxu0  ;;  %v9633_v48 = vadd.f32 %v6745_v39, %v11565_v46  ;;  %v6747_v24 = vpop.f32.mrb[1].mxu1 }
 0x1da   :  { %v9626_v19 = vadd.f32 %v6535_v25, %v11569_v47  ;;  %v6537_v12 = vpop.f32.mrb[2].mxu0  ;;  %6934 = vmatpush1.bf16.msra.mxu0 %v9453_v52  ;;  %v9634_v21 = vadd.f32 %v6747_v24, %v11590_v51  ;;  %v6749_v63 = vpop.f32.mrb[2].mxu1  ;;  %7146 = vmatpush1.bf16.msra.mxu1 %v9455_v55  ;;  %v9884_v52 = vmov 1983009808  }
 0x1db   :  { %8036 = vst [vmem:[%s14282_s3] sm:$0xff] %v9625_v32  ;;  %v8256_v29 = vmul.f32 %v9625_v32, %v9625_v32  ;;  %v9627_v39 = vadd.f32 %v6537_v12, %v11561_v45  ;;  %v6539_v25 = vpop.f32.mrb[3].mxu0  ;;  %6935 = vmatprep.subr.bf16.mxu0 %v9470_v4  ;;  %v11715_v9 = vunpack.c.l.s4 %v9884_v52  ;;  %8038 = vst [vmem:[%s14282_s3 + $0x10] sm:$0xff] %v9633_v48  ;;  %v6751_v55 = vpop.f32.mrb[3].mxu1  ;;  %7147 = vmatprep.subr.bf16.mxu1 %v9472_v59  ;;  %v11740_v59 = vld [vmem:[%s14279_s1 + $0x1dd8] sm:$0xff] }
 0x1dc   :  { %v8258_v40 = vmul.f32 %v9633_v48, %v9633_v48  ;;  %8037 = vst [vmem:[%s14282_s3 + $0x8] sm:$0xff] %v9626_v19  ;;  %v8257_v18 = vmul.f32 %v9626_v19, %v9626_v19  ;;  %v9635_v24 = vadd.f32 %v6749_v63, %v11565_v46  ;;  %v9628_v12 = vadd.f32 %v6539_v25, %v11569_v47  ;;  %v11735_v63 = vld [vmem:[%s14279_s1 + $0x1d98] sm:$0xff] }
 0x1dd   :  { %8039 = vst [vmem:[%s14282_s3 + $0x18] sm:$0xff] %v9634_v21  ;;  %v8259_v4 = vmul.f32 %v9634_v21, %v9634_v21  ;;  %8052 = vst [vmem:[%s14282_s3 + $0x80] sm:$0xff] %v9627_v39  ;;  %v8112_v52 = vadd.f32 %v9627_v39, %v9625_v32  ;;  %v8272_v17 = vmul.f32 %v9627_v39, %v9627_v39 }
 0x1de   :  { %v9636_v11 = vadd.f32 %v6751_v55, %v11590_v51  ;;  %8054 = vst [vmem:[%s14282_s3 + $0x90] sm:$0xff] %v9635_v24  ;;  %v8130_v25 = vadd.f32 %v9635_v24, %v9633_v48  ;;  %v8274_v5 = vmul.f32 %v9635_v24, %v9635_v24  ;;  %8053 = vst [vmem:[%s14282_s3 + $0x88] sm:$0xff] %v9628_v12  ;;  %6936 = vmatpush1.bf16.msra.mxu0 %v9469_v0  ;;  %v11754_v55 = vld [vmem:[%s14279_s1 + $0x1e10] sm:$0xff]  ;;  %v11773_v0 = vld [vmem:[%s14279_s1 + $0x1e18] sm:$0xff] }
 0x1df   :  { %v8121_v32 = vadd.f32 %v9628_v12, %v9626_v19  ;;  %v8273_v39 = vmul.f32 %v9628_v12, %v9628_v12  ;;  %v11759_v48 = vld [vmem:[%s14279_s1 + $0x1e50] sm:$0xff]  ;;  %v8320_v24 = vadd.f32 %v8272_v17, %v8256_v29  ;;  %7148 = vmatpush1.bf16.msra.mxu1 %v14309_v33  ;;  %6937 = vmatprep.subr.bf16.mxu0 %v14310_v37  ;;  %v11778_v17 = vld [vmem:[%s14279_s1 + $0x1e58] sm:$0xff] }
 0x1e0   :  { %8055 = vst [vmem:[%s14282_s3 + $0x98] sm:$0xff] %v9636_v11  ;;  %v8139_v19 = vadd.f32 %v9636_v11, %v9634_v21  ;;  %v8275_v12 = vmul.f32 %v9636_v11, %v9636_v11  ;;  %v8338_v21 = vadd.f32 %v8274_v5, %v8258_v40  ;;  %v6543_v29 = vpop.f32.mrb[4].mxu0  ;;  %7149 = vmatprep.subr.bf16.mxu1 %v14311_v38  ;;  %v6755_v53 = vpop.f32.mrb[4].mxu1 }
 0x1e1   :  { %v8329_v11 = vadd.f32 %v8273_v39, %v8257_v18  ;;  %v9552_v33 = vcombine.high %v11735_v63, %v11740_v59  ;;  %v9629_v30 = vadd.f32 %v6543_v29, %v11561_v45  ;;  %v6545_v10 = vpop.f32.mrb[5].mxu0  ;;  %v9637_v5 = vadd.f32 %v6755_v53, %v11565_v46  ;;  %v6757_v39 = vpop.f32.mrb[5].mxu1 }
 0x1e2   :  { %v8347_v37 = vadd.f32 %v8275_v12, %v8259_v4  ;;  %v9630_v40 = vadd.f32 %v6545_v10, %v11569_v47  ;;  %v6547_v38 = vpop.f32.mrb[6].mxu0  ;;  %6938 = vmatpush1.bf16.msra.mxu0 %v14312_v35  ;;  %v9638_v10 = vadd.f32 %v6757_v39, %v11590_v51  ;;  %v6759_v18 = vpop.f32.mrb[6].mxu1 }
 0x1e3   :  { %8068 = vst [vmem:[%s14282_s3 + $0x100] sm:$0xff] %v9629_v30  ;;  %v8113_v29 = vadd.f32 %v9629_v30, %v8112_v52  ;;  %v8288_v53 = vmul.f32 %v9629_v30, %v9629_v30  ;;  %v9631_v1 = vadd.f32 %v6547_v38, %v11561_v45  ;;  %7150 = vmatpush1.bf16.msra.mxu1 %v14313_v41  ;;  %v6549_v44 = vpop.f32.mrb[7].mxu0  ;;  %8070 = vst [vmem:[%s14282_s3 + $0x110] sm:$0xff] %v9637_v5  ;;  %v6761_v39 = vpop.f32.mrb[7].mxu1 }
 0x1e4   :  { %v8131_v35 = vadd.f32 %v9637_v5, %v8130_v25  ;;  %v8290_v12 = vmul.f32 %v9637_v5, %v9637_v5  ;;  %8069 = vst [vmem:[%s14282_s3 + $0x108] sm:$0xff] %v9630_v40  ;;  %v8122_v30 = vadd.f32 %v9630_v40, %v8121_v32  ;;  %v8289_v52 = vmul.f32 %v9630_v40, %v9630_v40 }
 0x1e5   :  { %v14314_v45 = vcombine.high %v11586_v50, %v11599_v60  ;;  %v8321_v54 = vadd.f32 %v8320_v24, %v8288_v53  ;;  %8071 = vst [vmem:[%s14282_s3 + $0x118] sm:$0xff] %v9638_v10  ;;  %v8140_v49 = vadd.f32 %v9638_v10, %v8139_v19  ;;  %v8291_v38 = vmul.f32 %v9638_v10, %v9638_v10 }
 0x1e6   :  { %8084 = vst [vmem:[%s14282_s3 + $0x180] sm:$0xff] %v9631_v1  ;;  %v8114_v25 = vadd.f32 %v9631_v1, %v8113_v29  ;;  %v14315_v32 = vcombine.high %v11604_v61, %v11609_v62  ;;  %v8339_v5 = vadd.f32 %v8338_v21, %v8290_v12  ;;  %v8330_v40 = vadd.f32 %v8329_v11, %v8289_v52 }
 0x1e7   :  { %6939 = vmatprep.subr.bf16.mxu0 %v14314_v45  ;;  %v8304_v41 = vmul.f32 %v9631_v1, %v9631_v1  ;;  %v9639_v24 = vadd.f32 %v6759_v18, %v11565_v46  ;;  %v14316_v53 = vcombine.low %v11586_v50, %v11599_v60  ;;  %v8348_v19 = vadd.f32 %v8347_v37, %v8291_v38 }
 0x1e8   :  { %7151 = vmatprep.subr.bf16.mxu1 %v14315_v32  ;;  %v8115_v10 = vrot.slane %v8114_v25, 4  ;;  %v9632_v45 = vadd.f32 %v6549_v44, %v11569_v47  ;;  %v9640_v4 = vadd.f32 %v6761_v39, %v11590_v51  ;;  %v14317_v29 = vcombine.low %v11604_v61, %v11609_v62 }
 0x1e9   :  { %6940 = vmatpush1.bf16.msra.mxu0 %v14316_v53  ;;  %v14318_v21 = vcombine.high %v11622_v6, %v11627_v7  ;;  %v8322_v1 = vadd.f32 %v8321_v54, %v8304_v41  ;;  %8086 = vst [vmem:[%s14282_s3 + $0x190] sm:$0xff] %v9639_v24  ;;  %v8132_v46 = vadd.f32 %v9639_v24, %v8131_v35 }
 0x1ea   :  { %7152 = vmatpush1.bf16.msra.mxu1 %v14317_v29  ;;  %v8306_v50 = vmul.f32 %v9639_v24, %v9639_v24  ;;  %v14319_v47 = vcombine.high %v11632_v57, %v11645_v13  ;;  %v9568_v51 = vcombine.high %v11773_v0, %v11778_v17  ;;  %v8116_v60 = vadd.f32 %v8115_v10, %v8114_v25  ;;  %v11875_v29 = vld [vmem:[%s14279_s1 + $0x1ed0] sm:$0xff] }
 0x1eb   :  { %6941 = vmatprep.subr.bf16.mxu0 %v14318_v21  ;;  %8085 = vst [vmem:[%s14282_s3 + $0x188] sm:$0xff] %v9632_v45  ;;  %v8123_v61 = vadd.f32 %v9632_v45, %v8122_v30  ;;  %v8305_v62 = vmul.f32 %v9632_v45, %v9632_v45  ;;  %8087 = vst [vmem:[%s14282_s3 + $0x198] sm:$0xff] %v9640_v4  ;;  %v8141_v11 = vadd.f32 %v9640_v4, %v8140_v49 }
 0x1ec   :  { %7153 = vmatprep.subr.bf16.mxu1 %v14319_v47  ;;  %v8323_v37 = vrot.slane %v8322_v1, 4  ;;  %v8133_v18 = vrot.slane %v8132_v46, 4  ;;  %v8340_v12 = vadd.f32 %v8339_v5, %v8306_v50  ;;  %v8307_v44 = vmul.f32 %v9640_v4, %v9640_v4 }
 0x1ed   :  { %v14320_v35 = vcombine.low %v11622_v6, %v11627_v7  ;;  %v8117_v52 = vrot.slane %v8116_v60, 2  ;;  %v8124_v39 = vrot.slane %v8123_v61, 4  ;;  %v8331_v54 = vadd.f32 %v8330_v40, %v8305_v62 }
 0x1ee   :  { %v8142_v38 = vrot.slane %v8141_v11, 4  ;;  %v14321_v30 = vcombine.low %v11632_v57, %v11645_v13  ;;  %v14322_v49 = vcombine.high %v11650_v14, %v11655_v16  ;;  %v8324_v25 = vadd.f32 %v8323_v37, %v8322_v1 }
 0x1ef   :  { %6942 = vmatpush1.bf16.msra.mxu0 %v14320_v35  ;;  %v8134_v32 = vadd.f32 %v8133_v18, %v8132_v46  ;;  %v8341_v4 = vrot.slane %v8340_v12, 4  ;;  %v8349_v5 = vadd.f32 %v8348_v19, %v8307_v44  ;;  %v14323_v6 = vcombine.high %v11668_v27, %v11673_v28  ;;  %v11870_v19 = vld [vmem:[%s14279_s1 + $0x1e90] sm:$0xff] }
 0x1f0   :  { %7154 = vmatpush1.bf16.msra.mxu1 %v14321_v30  ;;  %6943 = vmatprep.subr.bf16.mxu0 %v14322_v49  ;;  %v8118_v7 = vadd.f32 %v8117_v52, %v8116_v60  ;;  %v8125_v41 = vadd.f32 %v8124_v39, %v8123_v61  ;;  %v8332_v40 = vrot.slane %v8331_v54, 4  ;;  %v8143_v24 = vadd.f32 %v8142_v38, %v8141_v11  ;;  %v1011_v11 = vld [vmem:[%s14279_s1 + $0x1e98] sm:$0xff] }
 0x1f1   :  { %7155 = vmatprep.subr.bf16.mxu1 %v14323_v6  ;;  %v8325_v53 = vrot.slane %v8324_v25, 2  ;;  %v8135_v10 = vrot.slane %v8134_v32, 2  ;;  %v8342_v57 = vadd.f32 %v8341_v4, %v8340_v12  ;;  %v8350_v13 = vrot.slane %v8349_v5, 4 }
 0x1f2   :  { %v14324_v45 = vcombine.low %v11650_v14, %v11655_v16  ;;  %v8119_v21 = vrot.slane %v8118_v7, 1  ;;  %v8126_v1 = vrot.slane %v8125_v41, 2  ;;  %v8333_v46 = vadd.f32 %v8332_v40, %v8331_v54 }
 0x1f3   :  { %v8144_v50 = vrot.slane %v8143_v24, 2  ;;  %v14325_v47 = vcombine.low %v11668_v27, %v11673_v28  ;;  %v14326_v14 = vcombine.high %v11684_v26, %v11689_v20  ;;  %v8326_v16 = vadd.f32 %v8325_v53, %v8324_v25  ;;  %v1019_v27 = vld [vmem:[%s14279_s1 + $0x1ed8] sm:$0xff] }
 0x1f4   :  { %6944 = vmatpush1.bf16.msra.mxu0 %v14324_v45  ;;  %v8136_v60 = vadd.f32 %v8135_v10, %v8134_v32  ;;  %v8343_v61 = vrot.slane %v8342_v57, 2  ;;  %v8351_v62 = vadd.f32 %v8350_v13, %v8349_v5  ;;  %v8127_v28 = vadd.f32 %v8126_v1, %v8125_v41  ;;  %v1035_v53 = vld [vmem:[%s14279_s1 + $0x1f58] sm:$0xff] }
 0x1f5   :  { %7156 = vmatpush1.bf16.msra.mxu1 %v14325_v47  ;;  %6945 = vmatprep.subr.bf16.mxu0 %v14326_v14  ;;  %v8334_v37 = vrot.slane %v8333_v46, 2  ;;  %v8145_v18 = vadd.f32 %v8144_v50, %v8143_v24  ;;  %v9582_v12 = vcombine.high %v11870_v19, %v11875_v29  ;;  %v8327_v44 = vrot.slane %v8326_v16, 1 }
 0x1f6   :  { %7157 = vmatprep.subr.bf16.mxu1 %v9552_v33  ;;  %v8137_v35 = vrot.slane %v8136_v60, 1  ;;  %v8344_v52 = vadd.f32 %v8343_v61, %v8342_v57  ;;  %v8352_v39 = vrot.slane %v8351_v62, 2  ;;  %v14327_v33 = vcombine.low %v11684_v26, %v11689_v20  ;;  %v1026_v20 = vld [vmem:[%s14279_s1 + $0x1f10] sm:$0xff] }
 0x1f7   :  { %v8120_v54 = vadd.f32 %v8119_v21, %v8118_v7  ;;  %v8128_v38 = vrot.slane %v8127_v28, 1  ;;  %v8335_v30 = vadd.f32 %v8334_v37, %v8333_v46  ;;  %v14328_v49 = vcombine.low %v11735_v63, %v11740_v59  ;;  %v1034_v26 = vld [vmem:[%s14279_s1 + $0x1f50] sm:$0xff] }
 0x1f8   :  { %6946 = vmatpush1.bf16.msra.mxu0 %v14327_v33  ;;  %v14329_v25 = vcombine.high %v11754_v55, %v11759_v48  ;;  %v9584_v32 = vcombine.high %v1011_v11, %v1019_v27  ;;  %v8328_v4 = vadd.f32 %v8327_v44, %v8326_v16  ;;  %v8345_v5 = vrot.slane %v8344_v52, 1  ;;  %v1042_v16 = vld [vmem:[%s14279_s1 + $0x1f90] sm:$0xff]  ;;  %v44_v44 = vld [vmem:[%s14279_s1 + $0x60] sm:$0xff] }
 0x1f9   :  { %7158 = vmatpush1.bf16.msra.mxu1 %v14328_v49  ;;  %v8146_v6 = vrot.slane %v8145_v18, 1  ;;  %v8353_v41 = vadd.f32 %v8352_v39, %v8351_v62  ;;  %v8336_v63 = vrot.slane %v8335_v30, 1  ;;  %v14330_v59 = vunpack.c.0.s8 %v11715_v9  ;;  %v45_v39 = vld [vmem:[%s14279_s1 + $0x68] sm:$0xff] }
 0x1fa   :  { %6947 = vmatprep.subr.bf16.mxu0 %v14329_v25  ;;  %7159 = vmatprep.subr.bf16.mxu1 %v9568_v51  ;;  %v9581_v40 = vcombine.low %v11870_v19, %v11875_v29  ;;  %v9583_v24 = vcombine.low %v1011_v11, %v1019_v27  ;;  %v1027_v51 = vld [vmem:[%s14279_s1 + $0x1f18] sm:$0xff]  ;;  %v8465_v10 = vsel %vm8464_vm0, %v8120_v54, %v8328_v4  ;;  %v52_v25 = vld [vmem:[%s14279_s1 + $0xa0] sm:$0xff]  ;;  %v53_v4 = vld [vmem:[%s14279_s1 + $0xa8] sm:$0xff] }
 0x1fb   :  { %v11915_v7 = vsub.s32 %v14330_v59, %v11468_v8  ;;  %v8138_v57 = vadd.f32 %v8137_v35, %v8136_v60  ;;  %v8346_v13 = vadd.f32 %v8345_v5, %v8344_v52  ;;  %v8354_v45 = vrot.slane %v8353_v41, 1  ;;  %v37_v52 = vld [vmem:[%s14279_s1 + $0x28] sm:$0xff]  ;;  %v76_v59 = vld [vmem:[%s14279_s1 + $0x160] sm:$0xff] }
 0x1fc   :  { %v14331_v9 = vcombine.low %v11754_v55, %v11759_v48  ;;  %v8129_v21 = vadd.f32 %v8128_v38, %v8127_v28  ;;  %v8337_v19 = vadd.f32 %v8336_v63, %v8335_v30  ;;  %v14332_v29 = vcombine.low %v11773_v0, %v11778_v17  ;;  %v1050_v55 = vld [vmem:[%s14279_s1 + $0x1fd0] sm:$0xff]  ;;  %v1043_v0 = vld [vmem:[%s14279_s1 + $0x1f98] sm:$0xff]  ;;  %v61_v5 = vld [vmem:[%s14279_s1 + $0xe8] sm:$0xff] }
 0x1fd   :  { %v9598_v1 = vcombine.high %v1026_v20, %v1034_v26  ;;  %v8467_v46 = vsel %vm8464_vm0, %v8138_v57, %v8346_v13  ;;  %v8147_v50 = vadd.f32 %v8146_v6, %v8145_v18  ;;  %v8355_v47 = vadd.f32 %v8354_v45, %v8353_v41  ;;  %v1051_v17 = vld [vmem:[%s14279_s1 + $0x1fd8] sm:$0xff]  ;;  %v68_v63 = vld [vmem:[%s14279_s1 + $0x120] sm:$0xff] }
 0x1fe   :  { %6948 = vmatpush1.bf16.msra.mxu0 %v14331_v9  ;;  %7160 = vmatpush1.bf16.msra.mxu1 %v14332_v29  ;;  %v9600_v14 = vcombine.high %v1027_v51, %v1035_v53  ;;  %v8466_v48 = vsel %vm8464_vm0, %v8129_v21, %v8337_v19  ;;  %v9597_v62 = vcombine.low %v1026_v20, %v1034_v26  ;;  %v84_v13 = vld [vmem:[%s14279_s1 + $0x1a0] sm:$0xff]  ;;  %v85_v9 = vld [vmem:[%s14279_s1 + $0x1a8] sm:$0xff] }
 0x1ff   :  { %6949 = vmatprep.subr.bf16.mxu0 %v9582_v12  ;;  %7161 = vmatprep.subr.bf16.mxu1 %v9584_v32  ;;  %v8497_v60 = vcombine.low %v8465_v10, %v8466_v48  ;;  %v8468_v61 = vsel %vm8464_vm0, %v8147_v50, %v8355_v47  ;;  %v9599_v27 = vcombine.low %v1027_v51, %v1035_v53  ;;  %v36_v12 = vld [vmem:[%s14279_s1 + $0x20] sm:$0xff]  ;;  %v93_v21 = vld [vmem:[%s14279_s1 + $0x1e8] sm:$0xff] }
 0x200   :  { %v8498_v11 = vcombine.low %v8467_v46, %v8468_v61  ;;  %v9614_v28 = vcombine.high %v1042_v16, %v1050_v55  ;;  %v9616_v18 = vcombine.high %v1043_v0, %v1051_v17  ;;  %v9613_v33 = vcombine.low %v1042_v16, %v1050_v55  ;;  %v60_v32 = vld [vmem:[%s14279_s1 + $0xe0] sm:$0xff]  ;;  %v109_v16 = vld [vmem:[%s14279_s1 + $0x268] sm:$0xff] }
 0x201   :  { %v8505_v37 = vrot.slane %v8497_v60, %v11915_v7  ;;  %v9615_v38 = vcombine.low %v1043_v0, %v1051_v17  ;;  %v8610_v30 = vcombine.high %v36_v12, %v44_v44  ;;  %v8612_v49 = vcombine.high %v37_v52, %v45_v39  ;;  %v92_v45 = vld [vmem:[%s14279_s1 + $0x1e0] sm:$0xff] }
 0x202   :  { %6950 = vmatpush1.bf16.msra.mxu0 %v9581_v40  ;;  %7162 = vmatpush1.bf16.msra.mxu1 %v9583_v24  ;;  %v8512_v35 = vrot.slane %v8498_v11, %v11915_v7  ;;  %v8609_v6 = vcombine.low %v36_v12, %v44_v44  ;;  %v8611_v41 = vcombine.low %v37_v52, %v45_v39  ;;  %v69_v40 = vld [vmem:[%s14279_s1 + $0x128] sm:$0xff]  ;;  %v100_v50 = vld [vmem:[%s14279_s1 + $0x220] sm:$0xff] }
 0x203   :  { %6951 = vmatprep.subr.bf16.mxu0 %v9598_v1  ;;  %7163 = vmatprep.subr.bf16.mxu1 %v9600_v14  ;;  %v8626_v20 = vcombine.high %v52_v25, %v60_v32  ;;  %v8628_v26 = vcombine.high %v53_v4, %v61_v5  ;;  %v77_v24 = vld [vmem:[%s14279_s1 + $0x168] sm:$0xff]  ;;  %v8625_v51 = vcombine.low %v52_v25, %v60_v32  ;;  %v108_v47 = vld [vmem:[%s14279_s1 + $0x260] sm:$0xff] }
 0x204   :  { %v8513_v54 = vcombine.low %v8505_v37, %v8512_v35  ;;  %v8627_v53 = vcombine.low %v53_v4, %v61_v5  ;;  %v8642_v10 = vcombine.high %v68_v63, %v76_v59  ;;  %v8644_v57 = vcombine.high %v69_v40, %v77_v24  ;;  %v101_v14 = vld [vmem:[%s14279_s1 + $0x228] sm:$0xff]  ;;  %v116_v60 = vld [vmem:[%s14279_s1 + $0x2a0] sm:$0xff] }
 0x205   :  { %v8641_v19 = vcombine.low %v68_v63, %v76_v59  ;;  %v8643_v29 = vcombine.low %v69_v40, %v77_v24  ;;  %v8658_v1 = vcombine.high %v84_v13, %v92_v45  ;;  %v8660_v46 = vcombine.high %v85_v9, %v93_v21  ;;  %v124_v61 = vld [vmem:[%s14279_s1 + $0x2e0] sm:$0xff]  ;;  %v125_v11 = vld [vmem:[%s14279_s1 + $0x2e8] sm:$0xff] }
 0x206   :  { %6952 = vmatpush1.bf16.msra.mxu0 %v9597_v62  ;;  %7164 = vmatpush1.bf16.msra.mxu1 %v9599_v27  ;;  %8573 = vst [vmem:[%s14283_s4] sm:$0xff] %v8513_v54  ;;  %v8657_v55 = vcombine.low %v84_v13, %v92_v45  ;;  %v8659_v48 = vcombine.low %v85_v9, %v93_v21  ;;  %v117_v62 = vld [vmem:[%s14279_s1 + $0x2a8] sm:$0xff]  ;;  %v132_v12 = vld [vmem:[%s14279_s1 + $0x320] sm:$0xff] }
 0x207   :  { %6953 = vmatprep.subr.bf16.mxu0 %v9614_v28  ;;  %7165 = vmatprep.subr.bf16.mxu1 %v9616_v18  ;;  %v8674_v0 = vcombine.high %v100_v50, %v108_v47  ;;  %v8676_v17 = vcombine.high %v101_v14, %v109_v16  ;;  %v8673_v27 = vcombine.low %v100_v50, %v108_v47  ;;  %v140_v44 = vld [vmem:[%s14279_s1 + $0x360] sm:$0xff]  ;;  %v133_v35 = vld [vmem:[%s14279_s1 + $0x328] sm:$0xff] }
 0x208   :  { %v8675_v28 = vcombine.low %v101_v14, %v109_v16  ;;  %v8690_v37 = vcombine.high %v116_v60, %v124_v61  ;;  %v8692_v18 = vcombine.high %v117_v62, %v125_v11  ;;  %v141_v52 = vld [vmem:[%s14279_s1 + $0x368] sm:$0xff]  ;;  %v8689_v39 = vcombine.low %v116_v60, %v124_v61 }
 0x209   :  { %v8706_v54 = vcombine.high %v132_v12, %v140_v44  ;;  %v149_v25 = vld [vmem:[%s14279_s1 + $0x3a8] sm:$0xff]  ;;  %v8705_v4 = vcombine.low %v132_v12, %v140_v44  ;;  %v8707_v5 = vcombine.low %v133_v35, %v141_v52 }
 0x20a   :  { %6954 = vmatpush1.bf16.msra.mxu0 %v9613_v33  ;;  %7166 = vmatpush1.bf16.msra.mxu1 %v9615_v38  ;;  %v8691_v33 = vcombine.low %v117_v62, %v125_v11  ;;  %v8708_v38 = vcombine.high %v133_v35, %v141_v52  ;;  %v157_v32 = vld [vmem:[%s14279_s1 + $0x3e8] sm:$0xff] }
 0x20b   :  { %7188 = vmatprep.subr.bf16.mxu0 %v8610_v30  ;;  %7400 = vmatprep.subr.bf16.mxu1 %v8612_v49  ;;  %v148_v30 = vld [vmem:[%s14279_s1 + $0x3a0] sm:$0xff]  ;;  %v165_v63 = vld [vmem:[%s14279_s1 + $0x428] sm:$0xff]  ;;  %v8723_v24 = vcombine.low %v149_v25, %v157_v32 }
 0x20c   :  { %v156_v49 = vld [vmem:[%s14279_s1 + $0x3e0] sm:$0xff]  ;;  %v173_v59 = vld [vmem:[%s14279_s1 + $0x468] sm:$0xff] }
 0x20d   :  { %6956 = vmatmul.mubr.bf16.vlgmr.msra.gmra.mrb[8].mxu0 %v10825_v36  ;;  %7168 = vmatmul.mubr.bf16.vlgmr.msra.gmra.mrb[8].mxu1 %v10825_v36  ;;  %v8721_v40 = vcombine.low %v148_v30, %v156_v49  ;;  %v181_v13 = vld [vmem:[%s14279_s1 + $0x4a8] sm:$0xff]  ;;  %v8739_v21 = vcombine.low %v165_v63, %v173_v59 }
 0x20e   :  { %7189 = vmatpush1.bf16.msra.mxu0 %v8609_v6  ;;  %7401 = vmatpush1.bf16.msra.mxu1 %v8611_v41  ;;  %v8722_v6 = vcombine.high %v148_v30, %v156_v49  ;;  %v8724_v41 = vcombine.high %v149_v25, %v157_v32  ;;  %v189_v45 = vld [vmem:[%s14279_s1 + $0x4e8] sm:$0xff] }
 0x20f   :  { %7190 = vmatprep.subr.bf16.mxu0 %v8626_v20  ;;  %7402 = vmatprep.subr.bf16.mxu1 %v8628_v26  ;;  %v164_v20 = vld [vmem:[%s14279_s1 + $0x420] sm:$0xff]  ;;  %v197_v50 = vld [vmem:[%s14279_s1 + $0x528] sm:$0xff]  ;;  %v8755_v16 = vcombine.low %v181_v13, %v189_v45 }
 0x210   :  { %6965 = vmatprep.mubr.bf16.mxu0 %v10836_v22  ;;  %7177 = vmatprep.mubr.bf16.mxu1 %v10836_v22  ;;  %v172_v26 = vld [vmem:[%s14279_s1 + $0x460] sm:$0xff]  ;;  %v205_v47 = vld [vmem:[%s14279_s1 + $0x568] sm:$0xff] }
 0x211   :  { %v8737_v9 = vcombine.low %v164_v20, %v172_v26  ;;  %v213_v60 = vld [vmem:[%s14279_s1 + $0x5a8] sm:$0xff]  ;;  %v8771_v11 = vcombine.low %v197_v50, %v205_v47 }
 0x212   :  { %7191 = vmatpush1.bf16.msra.mxu0 %v8625_v51  ;;  %7403 = vmatpush1.bf16.msra.mxu1 %v8627_v53  ;;  %v8738_v51 = vcombine.high %v164_v20, %v172_v26  ;;  %v8740_v53 = vcombine.high %v165_v63, %v173_v59  ;;  %v221_v61 = vld [vmem:[%s14279_s1 + $0x5e8] sm:$0xff] }
 0x213   :  { %7192 = vmatprep.subr.bf16.mxu0 %v8642_v10  ;;  %7404 = vmatprep.subr.bf16.mxu1 %v8644_v57  ;;  %v180_v10 = vld [vmem:[%s14279_s1 + $0x4a0] sm:$0xff]  ;;  %v229_v12 = vld [vmem:[%s14279_s1 + $0x628] sm:$0xff]  ;;  %v8787_v52 = vcombine.low %v213_v60, %v221_v61 }
 0x214   :  { %v188_v57 = vld [vmem:[%s14279_s1 + $0x4e0] sm:$0xff]  ;;  %v237_v44 = vld [vmem:[%s14279_s1 + $0x668] sm:$0xff] }
 0x215   :  { %6966 = vmatmul.mubr.bf16.gmra.mrb[12].mxu0 %v10860_v3  ;;  %7178 = vmatmul.mubr.bf16.gmra.mrb[12].mxu1 %v10860_v3  ;;  %v8753_v14 = vcombine.low %v180_v10, %v188_v57  ;;  %v245_v30 = vld [vmem:[%s14279_s1 + $0x6a8] sm:$0xff]  ;;  %v8803_v32 = vcombine.low %v229_v12, %v237_v44 }
 0x216   :  { %7193 = vmatpush1.bf16.msra.mxu0 %v8641_v19  ;;  %7405 = vmatpush1.bf16.msra.mxu1 %v8643_v29  ;;  %v8754_v19 = vcombine.high %v180_v10, %v188_v57  ;;  %v8756_v29 = vcombine.high %v181_v13, %v189_v45  ;;  %v253_v49 = vld [vmem:[%s14279_s1 + $0x6e8] sm:$0xff] }
 0x217   :  { %7194 = vmatprep.subr.bf16.mxu0 %v8658_v1  ;;  %7406 = vmatprep.subr.bf16.mxu1 %v8660_v46  ;;  %v196_v1 = vld [vmem:[%s14279_s1 + $0x520] sm:$0xff]  ;;  %v261_v20 = vld [vmem:[%s14279_s1 + $0x728] sm:$0xff]  ;;  %v8819_v59 = vcombine.low %v245_v30, %v253_v49 }
 0x218   :  { %7220 = vmatprep.mubr.bf16.mxu0 %v10012_v58  ;;  %7432 = vmatprep.mubr.bf16.mxu1 %v10012_v58  ;;  %v204_v46 = vld [vmem:[%s14279_s1 + $0x560] sm:$0xff]  ;;  %v269_v26 = vld [vmem:[%s14279_s1 + $0x768] sm:$0xff] }
 0x219   :  { %v8769_v62 = vcombine.low %v196_v1, %v204_v46  ;;  %v277_v10 = vld [vmem:[%s14279_s1 + $0x7a8] sm:$0xff]  ;;  %v8835_v45 = vcombine.low %v261_v20, %v269_v26 }
 0x21a   :  { %7195 = vmatpush1.bf16.msra.mxu0 %v8657_v55  ;;  %7407 = vmatpush1.bf16.msra.mxu1 %v8659_v48  ;;  %v8770_v55 = vcombine.high %v196_v1, %v204_v46  ;;  %v8772_v48 = vcombine.high %v197_v50, %v205_v47  ;;  %v285_v57 = vld [vmem:[%s14279_s1 + $0x7e8] sm:$0xff] }
 0x21b   :  { %7196 = vmatprep.subr.bf16.mxu0 %v8674_v0  ;;  %7408 = vmatprep.subr.bf16.mxu1 %v8676_v17  ;;  %v212_v0 = vld [vmem:[%s14279_s1 + $0x5a0] sm:$0xff]  ;;  %v293_v1 = vld [vmem:[%s14279_s1 + $0x828] sm:$0xff]  ;;  %v8851_v47 = vcombine.low %v277_v10, %v285_v57 }
 0x21c   :  { %v220_v17 = vld [vmem:[%s14279_s1 + $0x5e0] sm:$0xff]  ;;  %v301_v46 = vld [vmem:[%s14279_s1 + $0x868] sm:$0xff] }
 0x21d   :  { %v8785_v35 = vcombine.low %v212_v0, %v220_v17 }
 0x21e   :  { %7197 = vmatpush1.bf16.msra.mxu0 %v8673_v27  ;;  %7409 = vmatpush1.bf16.msra.mxu1 %v8675_v28  ;;  %v8786_v27 = vcombine.high %v212_v0, %v220_v17  ;;  %v8788_v28 = vcombine.high %v213_v60, %v221_v61  ;;  %v309_v0 = vld [vmem:[%s14279_s1 + $0x8a8] sm:$0xff]  ;;  %v8867_v61 = vcombine.low %v293_v1, %v301_v46 }
 0x21f   :  { %7198 = vmatprep.subr.bf16.mxu0 %v8690_v37  ;;  %7410 = vmatprep.subr.bf16.mxu1 %v8692_v18  ;;  %v228_v37 = vld [vmem:[%s14279_s1 + $0x620] sm:$0xff]  ;;  %v317_v17 = vld [vmem:[%s14279_s1 + $0x8e8] sm:$0xff] }
 0x220   :  { %v236_v18 = vld [vmem:[%s14279_s1 + $0x660] sm:$0xff] }
 0x221   :  { %v8801_v25 = vcombine.low %v228_v37, %v236_v18 }
 0x222   :  { %7199 = vmatpush1.bf16.msra.mxu0 %v8689_v39  ;;  %7411 = vmatpush1.bf16.msra.mxu1 %v8691_v33  ;;  %v8802_v39 = vcombine.high %v228_v37, %v236_v18  ;;  %v8804_v33 = vcombine.high %v229_v12, %v237_v44  ;;  %v325_v37 = vld [vmem:[%s14279_s1 + $0x928] sm:$0xff]  ;;  %v8883_v44 = vcombine.low %v309_v0, %v317_v17 }
 0x223   :  { %7200 = vmatprep.subr.bf16.mxu0 %v8706_v54  ;;  %7412 = vmatprep.subr.bf16.mxu1 %v8708_v38  ;;  %v244_v54 = vld [vmem:[%s14279_s1 + $0x6a0] sm:$0xff]  ;;  %v333_v18 = vld [vmem:[%s14279_s1 + $0x968] sm:$0xff] }
 0x224   :  { %v252_v38 = vld [vmem:[%s14279_s1 + $0x6e0] sm:$0xff] }
 0x225   :  { %v8817_v63 = vcombine.low %v244_v54, %v252_v38 }
 0x226   :  { %7201 = vmatpush1.bf16.msra.mxu0 %v8705_v4  ;;  %7413 = vmatpush1.bf16.msra.mxu1 %v8707_v5  ;;  %v8818_v4 = vcombine.high %v244_v54, %v252_v38  ;;  %v8820_v5 = vcombine.high %v245_v30, %v253_v49  ;;  %v341_v54 = vld [vmem:[%s14279_s1 + $0x9a8] sm:$0xff]  ;;  %v8899_v49 = vcombine.low %v325_v37, %v333_v18 }
 0x227   :  { %7202 = vmatprep.subr.bf16.mxu0 %v8722_v6  ;;  %7414 = vmatprep.subr.bf16.mxu1 %v8724_v41  ;;  %v260_v6 = vld [vmem:[%s14279_s1 + $0x720] sm:$0xff]  ;;  %v349_v38 = vld [vmem:[%s14279_s1 + $0x9e8] sm:$0xff] }
 0x228   :  { %v268_v41 = vld [vmem:[%s14279_s1 + $0x760] sm:$0xff] }
 0x229   :  { %v8833_v13 = vcombine.low %v260_v6, %v268_v41 }
 0x22a   :  { %7203 = vmatpush1.bf16.msra.mxu0 %v8721_v40  ;;  %7415 = vmatpush1.bf16.msra.mxu1 %v8723_v24  ;;  %v8834_v40 = vcombine.high %v260_v6, %v268_v41  ;;  %v8836_v24 = vcombine.high %v261_v20, %v269_v26  ;;  %v357_v6 = vld [vmem:[%s14279_s1 + $0xa28] sm:$0xff]  ;;  %v8915_v26 = vcombine.low %v341_v54, %v349_v38 }
 0x22b   :  { %7204 = vmatprep.subr.bf16.mxu0 %v8738_v51  ;;  %7416 = vmatprep.subr.bf16.mxu1 %v8740_v53  ;;  %v276_v51 = vld [vmem:[%s14279_s1 + $0x7a0] sm:$0xff]  ;;  %v365_v41 = vld [vmem:[%s14279_s1 + $0xa68] sm:$0xff] }
 0x22c   :  { %v284_v53 = vld [vmem:[%s14279_s1 + $0x7e0] sm:$0xff] }
 0x22d   :  { %v8849_v50 = vcombine.low %v276_v51, %v284_v53 }
 0x22e   :  { %7205 = vmatpush1.bf16.msra.mxu0 %v8737_v9  ;;  %7417 = vmatpush1.bf16.msra.mxu1 %v8739_v21  ;;  %v8850_v9 = vcombine.high %v276_v51, %v284_v53  ;;  %v8852_v21 = vcombine.high %v277_v10, %v285_v57  ;;  %v373_v51 = vld [vmem:[%s14279_s1 + $0xaa8] sm:$0xff]  ;;  %v8931_v57 = vcombine.low %v357_v6, %v365_v41 }
 0x22f   :  { %7206 = vmatprep.subr.bf16.mxu0 %v8754_v19  ;;  %7418 = vmatprep.subr.bf16.mxu1 %v8756_v29  ;;  %v292_v19 = vld [vmem:[%s14279_s1 + $0x820] sm:$0xff]  ;;  %v381_v53 = vld [vmem:[%s14279_s1 + $0xae8] sm:$0xff] }
 0x230   :  { %v300_v29 = vld [vmem:[%s14279_s1 + $0x860] sm:$0xff] }
 0x231   :  { %v8865_v60 = vcombine.low %v292_v19, %v300_v29 }
 0x232   :  { %7207 = vmatpush1.bf16.msra.mxu0 %v8753_v14  ;;  %7419 = vmatpush1.bf16.msra.mxu1 %v8755_v16  ;;  %v8866_v14 = vcombine.high %v292_v19, %v300_v29  ;;  %v8868_v16 = vcombine.high %v293_v1, %v301_v46  ;;  %v389_v19 = vld [vmem:[%s14279_s1 + $0xb28] sm:$0xff]  ;;  %v8947_v46 = vcombine.low %v373_v51, %v381_v53 }
 0x233   :  { %7208 = vmatprep.subr.bf16.mxu0 %v8770_v55  ;;  %7420 = vmatprep.subr.bf16.mxu1 %v8772_v48  ;;  %v308_v55 = vld [vmem:[%s14279_s1 + $0x8a0] sm:$0xff]  ;;  %v397_v29 = vld [vmem:[%s14279_s1 + $0xb68] sm:$0xff] }
 0x234   :  { %v316_v48 = vld [vmem:[%s14279_s1 + $0x8e0] sm:$0xff] }
 0x235   :  { %v8881_v12 = vcombine.low %v308_v55, %v316_v48 }
 0x236   :  { %7209 = vmatpush1.bf16.msra.mxu0 %v8769_v62  ;;  %7421 = vmatpush1.bf16.msra.mxu1 %v8771_v11  ;;  %v8882_v62 = vcombine.high %v308_v55, %v316_v48  ;;  %v8884_v11 = vcombine.high %v309_v0, %v317_v17  ;;  %v405_v55 = vld [vmem:[%s14279_s1 + $0xba8] sm:$0xff]  ;;  %v8963_v17 = vcombine.low %v389_v19, %v397_v29 }
 0x237   :  { %7210 = vmatprep.subr.bf16.mxu0 %v8786_v27  ;;  %7422 = vmatprep.subr.bf16.mxu1 %v8788_v28  ;;  %v324_v27 = vld [vmem:[%s14279_s1 + $0x920] sm:$0xff]  ;;  %v413_v48 = vld [vmem:[%s14279_s1 + $0xbe8] sm:$0xff] }
 0x238   :  { %v332_v28 = vld [vmem:[%s14279_s1 + $0x960] sm:$0xff] }
 0x239   :  { %v8897_v30 = vcombine.low %v324_v27, %v332_v28 }
 0x23a   :  { %7211 = vmatpush1.bf16.msra.mxu0 %v8785_v35  ;;  %7423 = vmatpush1.bf16.msra.mxu1 %v8787_v52  ;;  %v8898_v35 = vcombine.high %v324_v27, %v332_v28  ;;  %v8900_v52 = vcombine.high %v325_v37, %v333_v18  ;;  %v421_v27 = vld [vmem:[%s14279_s1 + $0xc28] sm:$0xff]  ;;  %v8979_v18 = vcombine.low %v405_v55, %v413_v48 }
 0x23b   :  { %7212 = vmatprep.subr.bf16.mxu0 %v8802_v39  ;;  %7424 = vmatprep.subr.bf16.mxu1 %v8804_v33  ;;  %v340_v39 = vld [vmem:[%s14279_s1 + $0x9a0] sm:$0xff]  ;;  %v429_v28 = vld [vmem:[%s14279_s1 + $0xc68] sm:$0xff] }
 0x23c   :  { %v348_v33 = vld [vmem:[%s14279_s1 + $0x9e0] sm:$0xff] }
 0x23d   :  { %v8913_v20 = vcombine.low %v340_v39, %v348_v33 }
 0x23e   :  { %7213 = vmatpush1.bf16.msra.mxu0 %v8801_v25  ;;  %7425 = vmatpush1.bf16.msra.mxu1 %v8803_v32  ;;  %v8914_v25 = vcombine.high %v340_v39, %v348_v33  ;;  %v8916_v32 = vcombine.high %v341_v54, %v349_v38  ;;  %v437_v39 = vld [vmem:[%s14279_s1 + $0xca8] sm:$0xff]  ;;  %v8995_v38 = vcombine.low %v421_v27, %v429_v28 }
 0x23f   :  { %7214 = vmatprep.subr.bf16.mxu0 %v8818_v4  ;;  %7426 = vmatprep.subr.bf16.mxu1 %v8820_v5  ;;  %v356_v4 = vld [vmem:[%s14279_s1 + $0xa20] sm:$0xff]  ;;  %v445_v33 = vld [vmem:[%s14279_s1 + $0xce8] sm:$0xff] }
 0x240   :  { %v364_v5 = vld [vmem:[%s14279_s1 + $0xa60] sm:$0xff] }
 0x241   :  { %v8929_v10 = vcombine.low %v356_v4, %v364_v5 }
 0x242   :  { %7215 = vmatpush1.bf16.msra.mxu0 %v8817_v63  ;;  %7427 = vmatpush1.bf16.msra.mxu1 %v8819_v59  ;;  %v8930_v63 = vcombine.high %v356_v4, %v364_v5  ;;  %v8932_v59 = vcombine.high %v357_v6, %v365_v41  ;;  %v453_v4 = vld [vmem:[%s14279_s1 + $0xd28] sm:$0xff]  ;;  %v9011_v41 = vcombine.low %v437_v39, %v445_v33 }
 0x243   :  { %7216 = vmatprep.subr.bf16.mxu0 %v8834_v40  ;;  %7428 = vmatprep.subr.bf16.mxu1 %v8836_v24  ;;  %v372_v40 = vld [vmem:[%s14279_s1 + $0xaa0] sm:$0xff]  ;;  %v461_v5 = vld [vmem:[%s14279_s1 + $0xd68] sm:$0xff] }
 0x244   :  { %v380_v24 = vld [vmem:[%s14279_s1 + $0xae0] sm:$0xff] }
 0x245   :  { %v8945_v1 = vcombine.low %v372_v40, %v380_v24 }
 0x246   :  { %7217 = vmatpush1.bf16.msra.mxu0 %v8833_v13  ;;  %7429 = vmatpush1.bf16.msra.mxu1 %v8835_v45  ;;  %v8946_v13 = vcombine.high %v372_v40, %v380_v24  ;;  %v8948_v45 = vcombine.high %v373_v51, %v381_v53  ;;  %v469_v40 = vld [vmem:[%s14279_s1 + $0xda8] sm:$0xff]  ;;  %v9027_v53 = vcombine.low %v453_v4, %v461_v5 }
 0x247   :  { %7218 = vmatprep.subr.bf16.mxu0 %v8850_v9  ;;  %7430 = vmatprep.subr.bf16.mxu1 %v8852_v21  ;;  %v388_v9 = vld [vmem:[%s14279_s1 + $0xb20] sm:$0xff]  ;;  %v477_v24 = vld [vmem:[%s14279_s1 + $0xde8] sm:$0xff] }
 0x248   :  { %v396_v21 = vld [vmem:[%s14279_s1 + $0xb60] sm:$0xff] }
 0x249   :  { %v8961_v0 = vcombine.low %v388_v9, %v396_v21 }
 0x24a   :  { %7219 = vmatpush1.bf16.msra.mxu0 %v8849_v50  ;;  %7431 = vmatpush1.bf16.msra.mxu1 %v8851_v47  ;;  %v8962_v50 = vcombine.high %v388_v9, %v396_v21  ;;  %v8964_v47 = vcombine.high %v389_v19, %v397_v29  ;;  %v485_v9 = vld [vmem:[%s14279_s1 + $0xe28] sm:$0xff]  ;;  %v9043_v29 = vcombine.low %v469_v40, %v477_v24 }
 0x24b   :  { %7241 = vmatprep.subr.bf16.mxu0 %v8866_v14  ;;  %7453 = vmatprep.subr.bf16.mxu1 %v8868_v16  ;;  %v404_v14 = vld [vmem:[%s14279_s1 + $0xba0] sm:$0xff]  ;;  %v493_v21 = vld [vmem:[%s14279_s1 + $0xe68] sm:$0xff] }
 0x24c   :  { %v412_v16 = vld [vmem:[%s14279_s1 + $0xbe0] sm:$0xff] }
 0x24d   :  { %7221 = vmatmul.mubr.bf16.vlgmr.msra.gmra.mrb[16].mxu0 %v10141_v15  ;;  %7433 = vmatmul.mubr.bf16.vlgmr.msra.gmra.mrb[16].mxu1 %v10141_v15  ;;  %v8977_v37 = vcombine.low %v404_v14, %v412_v16 }
 0x24e   :  { %7242 = vmatpush1.bf16.msra.mxu0 %v8865_v60  ;;  %7454 = vmatpush1.bf16.msra.mxu1 %v8867_v61  ;;  %v8978_v60 = vcombine.high %v404_v14, %v412_v16  ;;  %v8980_v61 = vcombine.high %v405_v55, %v413_v48  ;;  %v501_v14 = vld [vmem:[%s14279_s1 + $0xea8] sm:$0xff]  ;;  %v9059_v48 = vcombine.low %v485_v9, %v493_v21 }
 0x24f   :  { %7243 = vmatprep.subr.bf16.mxu0 %v8882_v62  ;;  %7455 = vmatprep.subr.bf16.mxu1 %v8884_v11  ;;  %v420_v62 = vld [vmem:[%s14279_s1 + $0xc20] sm:$0xff]  ;;  %v509_v16 = vld [vmem:[%s14279_s1 + $0xee8] sm:$0xff] }
 0x250   :  { %7230 = vmatprep.mubr.bf16.mxu0 %v10158_v23  ;;  %7442 = vmatprep.mubr.bf16.mxu1 %v10158_v23  ;;  %v428_v11 = vld [vmem:[%s14279_s1 + $0xc60] sm:$0xff] }
 0x251   :  { %v8993_v54 = vcombine.low %v420_v62, %v428_v11 }
 0x252   :  { %7244 = vmatpush1.bf16.msra.mxu0 %v8881_v12  ;;  %7456 = vmatpush1.bf16.msra.mxu1 %v8883_v44  ;;  %v8994_v12 = vcombine.high %v420_v62, %v428_v11  ;;  %v8996_v44 = vcombine.high %v421_v27, %v429_v28  ;;  %v517_v62 = vld [vmem:[%s14279_s1 + $0xf28] sm:$0xff]  ;;  %v9075_v28 = vcombine.low %v501_v14, %v509_v16 }
 0x253   :  { %7245 = vmatprep.subr.bf16.mxu0 %v8898_v35  ;;  %7457 = vmatprep.subr.bf16.mxu1 %v8900_v52  ;;  %v436_v35 = vld [vmem:[%s14279_s1 + $0xca0] sm:$0xff]  ;;  %v525_v11 = vld [vmem:[%s14279_s1 + $0xf68] sm:$0xff] }
 0x254   :  { %v444_v52 = vld [vmem:[%s14279_s1 + $0xce0] sm:$0xff] }
 0x255   :  { %7231 = vmatmul.mubr.bf16.gmra.mrb[20].mxu0 %v10182_v34  ;;  %7443 = vmatmul.mubr.bf16.gmra.mrb[20].mxu1 %v10182_v34  ;;  %v9009_v6 = vcombine.low %v436_v35, %v444_v52 }
 0x256   :  { %7246 = vmatpush1.bf16.msra.mxu0 %v8897_v30  ;;  %7458 = vmatpush1.bf16.msra.mxu1 %v8899_v49  ;;  %v9010_v30 = vcombine.high %v436_v35, %v444_v52  ;;  %v9012_v49 = vcombine.high %v437_v39, %v445_v33  ;;  %v533_v35 = vld [vmem:[%s14279_s1 + $0xfa8] sm:$0xff]  ;;  %v9091_v33 = vcombine.low %v517_v62, %v525_v11 }
 0x257   :  { %7247 = vmatprep.subr.bf16.mxu0 %v8914_v25  ;;  %7459 = vmatprep.subr.bf16.mxu1 %v8916_v32  ;;  %v452_v25 = vld [vmem:[%s14279_s1 + $0xd20] sm:$0xff]  ;;  %v541_v52 = vld [vmem:[%s14279_s1 + $0xfe8] sm:$0xff] }
 0x258   :  { %7273 = vmatprep.mubr.bf16.mxu0 %v10202_v43  ;;  %7485 = vmatprep.mubr.bf16.mxu1 %v10202_v43  ;;  %v460_v32 = vld [vmem:[%s14279_s1 + $0xd60] sm:$0xff] }
 0x259   :  { %v9025_v51 = vcombine.low %v452_v25, %v460_v32 }
 0x25a   :  { %7248 = vmatpush1.bf16.msra.mxu0 %v8913_v20  ;;  %7460 = vmatpush1.bf16.msra.mxu1 %v8915_v26  ;;  %v9026_v20 = vcombine.high %v452_v25, %v460_v32  ;;  %v9028_v26 = vcombine.high %v453_v4, %v461_v5  ;;  %v549_v25 = vld [vmem:[%s14279_s1 + $0x1028] sm:$0xff]  ;;  %v9107_v5 = vcombine.low %v533_v35, %v541_v52 }
 0x25b   :  { %7249 = vmatprep.subr.bf16.mxu0 %v8930_v63  ;;  %7461 = vmatprep.subr.bf16.mxu1 %v8932_v59  ;;  %v468_v63 = vld [vmem:[%s14279_s1 + $0xda0] sm:$0xff]  ;;  %v557_v32 = vld [vmem:[%s14279_s1 + $0x1068] sm:$0xff] }
 0x25c   :  { %v476_v59 = vld [vmem:[%s14279_s1 + $0xde0] sm:$0xff] }
 0x25d   :  { %v9041_v19 = vcombine.low %v468_v63, %v476_v59 }
 0x25e   :  { %7250 = vmatpush1.bf16.msra.mxu0 %v8929_v10  ;;  %7462 = vmatpush1.bf16.msra.mxu1 %v8931_v57  ;;  %v9042_v10 = vcombine.high %v468_v63, %v476_v59  ;;  %v9044_v57 = vcombine.high %v469_v40, %v477_v24  ;;  %v565_v63 = vld [vmem:[%s14279_s1 + $0x10a8] sm:$0xff]  ;;  %v9123_v24 = vcombine.low %v549_v25, %v557_v32 }
 0x25f   :  { %7251 = vmatprep.subr.bf16.mxu0 %v8946_v13  ;;  %7463 = vmatprep.subr.bf16.mxu1 %v8948_v45  ;;  %v484_v13 = vld [vmem:[%s14279_s1 + $0xe20] sm:$0xff]  ;;  %v573_v59 = vld [vmem:[%s14279_s1 + $0x10e8] sm:$0xff] }
 0x260   :  { %v492_v45 = vld [vmem:[%s14279_s1 + $0xe60] sm:$0xff] }
 0x261   :  { %v9057_v55 = vcombine.low %v484_v13, %v492_v45 }
 0x262   :  { %7252 = vmatpush1.bf16.msra.mxu0 %v8945_v1  ;;  %7464 = vmatpush1.bf16.msra.mxu1 %v8947_v46  ;;  %v9058_v1 = vcombine.high %v484_v13, %v492_v45  ;;  %v9060_v46 = vcombine.high %v485_v9, %v493_v21  ;;  %v581_v13 = vld [vmem:[%s14279_s1 + $0x1128] sm:$0xff]  ;;  %v9139_v21 = vcombine.low %v565_v63, %v573_v59 }
 0x263   :  { %7253 = vmatprep.subr.bf16.mxu0 %v8962_v50  ;;  %7465 = vmatprep.subr.bf16.mxu1 %v8964_v47  ;;  %v500_v50 = vld [vmem:[%s14279_s1 + $0xea0] sm:$0xff]  ;;  %v589_v45 = vld [vmem:[%s14279_s1 + $0x1168] sm:$0xff] }
 0x264   :  { %v508_v47 = vld [vmem:[%s14279_s1 + $0xee0] sm:$0xff] }
 0x265   :  { %v9073_v27 = vcombine.low %v500_v50, %v508_v47 }
 0x266   :  { %7254 = vmatpush1.bf16.msra.mxu0 %v8961_v0  ;;  %7466 = vmatpush1.bf16.msra.mxu1 %v8963_v17  ;;  %v9074_v0 = vcombine.high %v500_v50, %v508_v47  ;;  %v9076_v17 = vcombine.high %v501_v14, %v509_v16  ;;  %v597_v50 = vld [vmem:[%s14279_s1 + $0x11a8] sm:$0xff]  ;;  %v9155_v16 = vcombine.low %v581_v13, %v589_v45 }
 0x267   :  { %7255 = vmatprep.subr.bf16.mxu0 %v8978_v60  ;;  %7467 = vmatprep.subr.bf16.mxu1 %v8980_v61  ;;  %v516_v60 = vld [vmem:[%s14279_s1 + $0xf20] sm:$0xff]  ;;  %v605_v47 = vld [vmem:[%s14279_s1 + $0x11e8] sm:$0xff] }
 0x268   :  { %v524_v61 = vld [vmem:[%s14279_s1 + $0xf60] sm:$0xff] }
 0x269   :  { %v9089_v39 = vcombine.low %v516_v60, %v524_v61 }
 0x26a   :  { %7256 = vmatpush1.bf16.msra.mxu0 %v8977_v37  ;;  %7468 = vmatpush1.bf16.msra.mxu1 %v8979_v18  ;;  %v9090_v37 = vcombine.high %v516_v60, %v524_v61  ;;  %v9092_v18 = vcombine.high %v517_v62, %v525_v11  ;;  %v613_v60 = vld [vmem:[%s14279_s1 + $0x1228] sm:$0xff]  ;;  %v9171_v11 = vcombine.low %v597_v50, %v605_v47 }
 0x26b   :  { %7257 = vmatprep.subr.bf16.mxu0 %v8994_v12  ;;  %7469 = vmatprep.subr.bf16.mxu1 %v8996_v44  ;;  %v532_v12 = vld [vmem:[%s14279_s1 + $0xfa0] sm:$0xff]  ;;  %v621_v61 = vld [vmem:[%s14279_s1 + $0x1268] sm:$0xff] }
 0x26c   :  { %v540_v44 = vld [vmem:[%s14279_s1 + $0xfe0] sm:$0xff] }
 0x26d   :  { %v9105_v4 = vcombine.low %v532_v12, %v540_v44 }
 0x26e   :  { %7258 = vmatpush1.bf16.msra.mxu0 %v8993_v54  ;;  %7470 = vmatpush1.bf16.msra.mxu1 %v8995_v38  ;;  %v9106_v54 = vcombine.high %v532_v12, %v540_v44  ;;  %v9108_v38 = vcombine.high %v533_v35, %v541_v52  ;;  %v629_v12 = vld [vmem:[%s14279_s1 + $0x12a8] sm:$0xff]  ;;  %v9187_v52 = vcombine.low %v613_v60, %v621_v61 }
 0x26f   :  { %7259 = vmatprep.subr.bf16.mxu0 %v9010_v30  ;;  %7471 = vmatprep.subr.bf16.mxu1 %v9012_v49  ;;  %v548_v30 = vld [vmem:[%s14279_s1 + $0x1020] sm:$0xff]  ;;  %v637_v44 = vld [vmem:[%s14279_s1 + $0x12e8] sm:$0xff] }
 0x270   :  { %v556_v49 = vld [vmem:[%s14279_s1 + $0x1060] sm:$0xff] }
 0x271   :  { %v9121_v40 = vcombine.low %v548_v30, %v556_v49 }
 0x272   :  { %7260 = vmatpush1.bf16.msra.mxu0 %v9009_v6  ;;  %7472 = vmatpush1.bf16.msra.mxu1 %v9011_v41  ;;  %v9122_v6 = vcombine.high %v548_v30, %v556_v49  ;;  %v9124_v41 = vcombine.high %v549_v25, %v557_v32  ;;  %v645_v30 = vld [vmem:[%s14279_s1 + $0x1328] sm:$0xff]  ;;  %v9203_v32 = vcombine.low %v629_v12, %v637_v44 }
 0x273   :  { %7261 = vmatprep.subr.bf16.mxu0 %v9026_v20  ;;  %7473 = vmatprep.subr.bf16.mxu1 %v9028_v26  ;;  %v564_v20 = vld [vmem:[%s14279_s1 + $0x10a0] sm:$0xff]  ;;  %v653_v49 = vld [vmem:[%s14279_s1 + $0x1368] sm:$0xff] }
 0x274   :  { %v572_v26 = vld [vmem:[%s14279_s1 + $0x10e0] sm:$0xff] }
 0x275   :  { %v9137_v9 = vcombine.low %v564_v20, %v572_v26 }
 0x276   :  { %7262 = vmatpush1.bf16.msra.mxu0 %v9025_v51  ;;  %7474 = vmatpush1.bf16.msra.mxu1 %v9027_v53  ;;  %v9138_v51 = vcombine.high %v564_v20, %v572_v26  ;;  %v9140_v53 = vcombine.high %v565_v63, %v573_v59  ;;  %v661_v20 = vld [vmem:[%s14279_s1 + $0x13a8] sm:$0xff]  ;;  %v9219_v59 = vcombine.low %v645_v30, %v653_v49 }
 0x277   :  { %7263 = vmatprep.subr.bf16.mxu0 %v9042_v10  ;;  %7475 = vmatprep.subr.bf16.mxu1 %v9044_v57  ;;  %v580_v10 = vld [vmem:[%s14279_s1 + $0x1120] sm:$0xff]  ;;  %v669_v26 = vld [vmem:[%s14279_s1 + $0x13e8] sm:$0xff] }
 0x278   :  { %v588_v57 = vld [vmem:[%s14279_s1 + $0x1160] sm:$0xff] }
 0x279   :  { %v9153_v14 = vcombine.low %v580_v10, %v588_v57 }
 0x27a   :  { %7264 = vmatpush1.bf16.msra.mxu0 %v9041_v19  ;;  %7476 = vmatpush1.bf16.msra.mxu1 %v9043_v29  ;;  %v9154_v19 = vcombine.high %v580_v10, %v588_v57  ;;  %v9156_v29 = vcombine.high %v581_v13, %v589_v45  ;;  %v677_v10 = vld [vmem:[%s14279_s1 + $0x1428] sm:$0xff]  ;;  %v9235_v45 = vcombine.low %v661_v20, %v669_v26 }
 0x27b   :  { %7265 = vmatprep.subr.bf16.mxu0 %v9058_v1  ;;  %7477 = vmatprep.subr.bf16.mxu1 %v9060_v46  ;;  %v596_v1 = vld [vmem:[%s14279_s1 + $0x11a0] sm:$0xff]  ;;  %v685_v57 = vld [vmem:[%s14279_s1 + $0x1468] sm:$0xff] }
 0x27c   :  { %v604_v46 = vld [vmem:[%s14279_s1 + $0x11e0] sm:$0xff] }
 0x27d   :  { %v9169_v62 = vcombine.low %v596_v1, %v604_v46 }
 0x27e   :  { %7266 = vmatpush1.bf16.msra.mxu0 %v9057_v55  ;;  %7478 = vmatpush1.bf16.msra.mxu1 %v9059_v48  ;;  %v9170_v55 = vcombine.high %v596_v1, %v604_v46  ;;  %v9172_v48 = vcombine.high %v597_v50, %v605_v47  ;;  %v693_v1 = vld [vmem:[%s14279_s1 + $0x14a8] sm:$0xff]  ;;  %v9251_v47 = vcombine.low %v677_v10, %v685_v57 }
 0x27f   :  { %7267 = vmatprep.subr.bf16.mxu0 %v9074_v0  ;;  %7479 = vmatprep.subr.bf16.mxu1 %v9076_v17  ;;  %v612_v0 = vld [vmem:[%s14279_s1 + $0x1220] sm:$0xff]  ;;  %v701_v46 = vld [vmem:[%s14279_s1 + $0x14e8] sm:$0xff] }
 0x280   :  { %v620_v17 = vld [vmem:[%s14279_s1 + $0x1260] sm:$0xff] }
 0x281   :  { %v9185_v35 = vcombine.low %v612_v0, %v620_v17 }
 0x282   :  { %7268 = vmatpush1.bf16.msra.mxu0 %v9073_v27  ;;  %7480 = vmatpush1.bf16.msra.mxu1 %v9075_v28  ;;  %v9186_v27 = vcombine.high %v612_v0, %v620_v17  ;;  %v9188_v28 = vcombine.high %v613_v60, %v621_v61  ;;  %v709_v0 = vld [vmem:[%s14279_s1 + $0x1528] sm:$0xff]  ;;  %v9267_v61 = vcombine.low %v693_v1, %v701_v46 }
 0x283   :  { %7269 = vmatprep.subr.bf16.mxu0 %v9090_v37  ;;  %7481 = vmatprep.subr.bf16.mxu1 %v9092_v18  ;;  %v628_v37 = vld [vmem:[%s14279_s1 + $0x12a0] sm:$0xff]  ;;  %v717_v17 = vld [vmem:[%s14279_s1 + $0x1568] sm:$0xff] }
 0x284   :  { %v636_v18 = vld [vmem:[%s14279_s1 + $0x12e0] sm:$0xff] }
 0x285   :  { %v9201_v25 = vcombine.low %v628_v37, %v636_v18 }
 0x286   :  { %7270 = vmatpush1.bf16.msra.mxu0 %v9089_v39  ;;  %7482 = vmatpush1.bf16.msra.mxu1 %v9091_v33  ;;  %v9202_v39 = vcombine.high %v628_v37, %v636_v18  ;;  %v9204_v33 = vcombine.high %v629_v12, %v637_v44  ;;  %v725_v37 = vld [vmem:[%s14279_s1 + $0x15a8] sm:$0xff]  ;;  %v9283_v44 = vcombine.low %v709_v0, %v717_v17 }
 0x287   :  { %7271 = vmatprep.subr.bf16.mxu0 %v9106_v54  ;;  %7483 = vmatprep.subr.bf16.mxu1 %v9108_v38  ;;  %v644_v54 = vld [vmem:[%s14279_s1 + $0x1320] sm:$0xff]  ;;  %v733_v18 = vld [vmem:[%s14279_s1 + $0x15e8] sm:$0xff] }
 0x288   :  { %v652_v38 = vld [vmem:[%s14279_s1 + $0x1360] sm:$0xff] }
 0x289   :  { %v9217_v63 = vcombine.low %v644_v54, %v652_v38 }
 0x28a   :  { %7272 = vmatpush1.bf16.msra.mxu0 %v9105_v4  ;;  %7484 = vmatpush1.bf16.msra.mxu1 %v9107_v5  ;;  %v9218_v4 = vcombine.high %v644_v54, %v652_v38  ;;  %v9220_v5 = vcombine.high %v645_v30, %v653_v49  ;;  %v741_v54 = vld [vmem:[%s14279_s1 + $0x1628] sm:$0xff]  ;;  %v9299_v49 = vcombine.low %v725_v37, %v733_v18 }
 0x28b   :  { %7294 = vmatprep.subr.bf16.mxu0 %v9122_v6  ;;  %7506 = vmatprep.subr.bf16.mxu1 %v9124_v41  ;;  %v660_v6 = vld [vmem:[%s14279_s1 + $0x13a0] sm:$0xff]  ;;  %v749_v38 = vld [vmem:[%s14279_s1 + $0x1668] sm:$0xff] }
 0x28c   :  { %v668_v41 = vld [vmem:[%s14279_s1 + $0x13e0] sm:$0xff] }
 0x28d   :  { %7274 = vmatmul.mubr.bf16.vlgmr.msra.gmra.mrb[16].mxu0 %v10369_v31  ;;  %7486 = vmatmul.mubr.bf16.vlgmr.msra.gmra.mrb[16].mxu1 %v10369_v31  ;;  %v9233_v13 = vcombine.low %v660_v6, %v668_v41 }
 0x28e   :  { %7295 = vmatpush1.bf16.msra.mxu0 %v9121_v40  ;;  %7507 = vmatpush1.bf16.msra.mxu1 %v9123_v24  ;;  %v9234_v40 = vcombine.high %v660_v6, %v668_v41  ;;  %v9236_v24 = vcombine.high %v661_v20, %v669_v26  ;;  %v757_v6 = vld [vmem:[%s14279_s1 + $0x16a8] sm:$0xff]  ;;  %v9315_v26 = vcombine.low %v741_v54, %v749_v38 }
 0x28f   :  { %7296 = vmatprep.subr.bf16.mxu0 %v9138_v51  ;;  %7508 = vmatprep.subr.bf16.mxu1 %v9140_v53  ;;  %v676_v51 = vld [vmem:[%s14279_s1 + $0x1420] sm:$0xff]  ;;  %v765_v41 = vld [vmem:[%s14279_s1 + $0x16e8] sm:$0xff] }
 0x290   :  { %7283 = vmatprep.mubr.bf16.mxu0 %v10386_v42  ;;  %7495 = vmatprep.mubr.bf16.mxu1 %v10386_v42  ;;  %v684_v53 = vld [vmem:[%s14279_s1 + $0x1460] sm:$0xff] }
 0x291   :  { %v9249_v50 = vcombine.low %v676_v51, %v684_v53 }
 0x292   :  { %7297 = vmatpush1.bf16.msra.mxu0 %v9137_v9  ;;  %7509 = vmatpush1.bf16.msra.mxu1 %v9139_v21  ;;  %v9250_v9 = vcombine.high %v676_v51, %v684_v53  ;;  %v9252_v21 = vcombine.high %v677_v10, %v685_v57  ;;  %v773_v51 = vld [vmem:[%s14279_s1 + $0x1728] sm:$0xff]  ;;  %v9331_v57 = vcombine.low %v757_v6, %v765_v41 }
 0x293   :  { %7298 = vmatprep.subr.bf16.mxu0 %v9154_v19  ;;  %7510 = vmatprep.subr.bf16.mxu1 %v9156_v29  ;;  %v692_v19 = vld [vmem:[%s14279_s1 + $0x14a0] sm:$0xff]  ;;  %v781_v53 = vld [vmem:[%s14279_s1 + $0x1768] sm:$0xff] }
 0x294   :  { %v700_v29 = vld [vmem:[%s14279_s1 + $0x14e0] sm:$0xff] }
 0x295   :  { %7284 = vmatmul.mubr.bf16.gmra.mrb[20].mxu0 %v10410_v56  ;;  %7496 = vmatmul.mubr.bf16.gmra.mrb[20].mxu1 %v10410_v56  ;;  %v9265_v60 = vcombine.low %v692_v19, %v700_v29 }
 0x296   :  { %7299 = vmatpush1.bf16.msra.mxu0 %v9153_v14  ;;  %7511 = vmatpush1.bf16.msra.mxu1 %v9155_v16  ;;  %v9266_v14 = vcombine.high %v692_v19, %v700_v29  ;;  %v9268_v16 = vcombine.high %v693_v1, %v701_v46  ;;  %v789_v19 = vld [vmem:[%s14279_s1 + $0x17a8] sm:$0xff]  ;;  %v9347_v46 = vcombine.low %v773_v51, %v781_v53 }
 0x297   :  { %7300 = vmatprep.subr.bf16.mxu0 %v9170_v55  ;;  %7512 = vmatprep.subr.bf16.mxu1 %v9172_v48  ;;  %v708_v55 = vld [vmem:[%s14279_s1 + $0x1520] sm:$0xff]  ;;  %v797_v29 = vld [vmem:[%s14279_s1 + $0x17e8] sm:$0xff] }
 0x298   :  { %7326 = vmatprep.mubr.bf16.mxu0 %v10430_v2  ;;  %7538 = vmatprep.mubr.bf16.mxu1 %v10430_v2  ;;  %v716_v48 = vld [vmem:[%s14279_s1 + $0x1560] sm:$0xff] }
 0x299   :  { %v9281_v12 = vcombine.low %v708_v55, %v716_v48 }
 0x29a   :  { %7301 = vmatpush1.bf16.msra.mxu0 %v9169_v62  ;;  %7513 = vmatpush1.bf16.msra.mxu1 %v9171_v11  ;;  %v9282_v62 = vcombine.high %v708_v55, %v716_v48  ;;  %v9284_v11 = vcombine.high %v709_v0, %v717_v17  ;;  %v805_v55 = vld [vmem:[%s14279_s1 + $0x1828] sm:$0xff]  ;;  %v9363_v17 = vcombine.low %v789_v19, %v797_v29 }
 0x29b   :  { %7302 = vmatprep.subr.bf16.mxu0 %v9186_v27  ;;  %7514 = vmatprep.subr.bf16.mxu1 %v9188_v28  ;;  %v724_v27 = vld [vmem:[%s14279_s1 + $0x15a0] sm:$0xff]  ;;  %v813_v48 = vld [vmem:[%s14279_s1 + $0x1868] sm:$0xff] }
 0x29c   :  { %v732_v28 = vld [vmem:[%s14279_s1 + $0x15e0] sm:$0xff] }
 0x29d   :  { %v9297_v30 = vcombine.low %v724_v27, %v732_v28 }
 0x29e   :  { %7303 = vmatpush1.bf16.msra.mxu0 %v9185_v35  ;;  %7515 = vmatpush1.bf16.msra.mxu1 %v9187_v52  ;;  %v9298_v35 = vcombine.high %v724_v27, %v732_v28  ;;  %v9300_v52 = vcombine.high %v725_v37, %v733_v18  ;;  %v821_v27 = vld [vmem:[%s14279_s1 + $0x18a8] sm:$0xff]  ;;  %v9379_v18 = vcombine.low %v805_v55, %v813_v48 }
 0x29f   :  { %7304 = vmatprep.subr.bf16.mxu0 %v9202_v39  ;;  %7516 = vmatprep.subr.bf16.mxu1 %v9204_v33  ;;  %v740_v39 = vld [vmem:[%s14279_s1 + $0x1620] sm:$0xff]  ;;  %v829_v28 = vld [vmem:[%s14279_s1 + $0x18e8] sm:$0xff] }
 0x2a0   :  { %v748_v33 = vld [vmem:[%s14279_s1 + $0x1660] sm:$0xff] }
 0x2a1   :  { %v9313_v20 = vcombine.low %v740_v39, %v748_v33 }
 0x2a2   :  { %7305 = vmatpush1.bf16.msra.mxu0 %v9201_v25  ;;  %7517 = vmatpush1.bf16.msra.mxu1 %v9203_v32  ;;  %v9314_v25 = vcombine.high %v740_v39, %v748_v33  ;;  %v9316_v32 = vcombine.high %v741_v54, %v749_v38  ;;  %v14333_v39 = vld [vmem:[#allocation2_spill] sm:$0xff]  ;;  %v837_v33 = vld [vmem:[%s14279_s1 + $0x1928] sm:$0xff] }
 0x2a3   :  { %7306 = vmatprep.subr.bf16.mxu0 %v9218_v4  ;;  %7518 = vmatprep.subr.bf16.mxu1 %v9220_v5  ;;  %v756_v4 = vld [vmem:[%s14279_s1 + $0x16a0] sm:$0xff]  ;;  %v845_v54 = vld [vmem:[%s14279_s1 + $0x1968] sm:$0xff] }
 0x2a4   :  { %v764_v5 = vld [vmem:[%s14279_s1 + $0x16e0] sm:$0xff] }
 0x2a5   :  { %v9329_v10 = vcombine.low %v756_v4, %v764_v5 }
 0x2a6   :  { %7307 = vmatpush1.bf16.msra.mxu0 %v9217_v63  ;;  %7519 = vmatpush1.bf16.msra.mxu1 %v9219_v59  ;;  %v9330_v63 = vcombine.high %v756_v4, %v764_v5  ;;  %v9332_v59 = vcombine.high %v757_v6, %v765_v41  ;;  %v860_v4 = vld [vmem:[%s14279_s1 + $0x19e0] sm:$0xff]  ;;  %v14334_v5 = vld [vmem:[#allocation3_spill] sm:$0xff] }
 0x2a7   :  { %7308 = vmatprep.subr.bf16.mxu0 %v9234_v40  ;;  %7520 = vmatprep.subr.bf16.mxu1 %v9236_v24  ;;  %v772_v40 = vld [vmem:[%s14279_s1 + $0x1720] sm:$0xff]  ;;  %v853_v6 = vld [vmem:[%s14279_s1 + $0x19a8] sm:$0xff] }
 0x2a8   :  { %v780_v24 = vld [vmem:[%s14279_s1 + $0x1760] sm:$0xff]  ;;  %v861_v41 = vld [vmem:[%s14279_s1 + $0x19e8] sm:$0xff] }
 0x2a9   :  { %v9345_v1 = vcombine.low %v772_v40, %v780_v24 }
 0x2aa   :  { %7309 = vmatpush1.bf16.msra.mxu0 %v9233_v13  ;;  %7521 = vmatpush1.bf16.msra.mxu1 %v9235_v45  ;;  %v9346_v13 = vcombine.high %v772_v40, %v780_v24  ;;  %v9348_v45 = vcombine.high %v773_v51, %v781_v53  ;;  %v868_v40 = vld [vmem:[%s14279_s1 + $0x1a20] sm:$0xff]  ;;  %v12613_v51 = vld [vmem:[%s14279_s1 + $0x1a28] sm:$0xff] }
 0x2ab   :  { %7310 = vmatprep.subr.bf16.mxu0 %v9250_v9  ;;  %7522 = vmatprep.subr.bf16.mxu1 %v9252_v21  ;;  %v788_v9 = vld [vmem:[%s14279_s1 + $0x17a0] sm:$0xff]  ;;  %v12618_v53 = vld [vmem:[%s14279_s1 + $0x1a68] sm:$0xff] }
 0x2ac   :  { %v796_v21 = vld [vmem:[%s14279_s1 + $0x17e0] sm:$0xff] }
 0x2ad   :  { %v9361_v0 = vcombine.low %v788_v9, %v796_v21  ;;  %v876_v24 = vld [vmem:[%s14279_s1 + $0x1a60] sm:$0xff] }
 0x2ae   :  { %7311 = vmatpush1.bf16.msra.mxu0 %v9249_v50  ;;  %7523 = vmatpush1.bf16.msra.mxu1 %v9251_v47  ;;  %v9362_v50 = vcombine.high %v788_v9, %v796_v21  ;;  %v9364_v47 = vcombine.high %v789_v19, %v797_v29  ;;  %v9427_v9 = vcombine.low %v853_v6, %v861_v41  ;;  %v14297_v19 = vsub.s32 5, %v11468_v8 }
 0x2af   :  { %7312 = vmatprep.subr.bf16.mxu0 %v9266_v14  ;;  %7524 = vmatprep.subr.bf16.mxu1 %v9268_v16  ;;  %v804_v14 = vld [vmem:[%s14279_s1 + $0x1820] sm:$0xff]  ;;  %v9442_v21 = vcombine.high %v868_v40, %v876_v24  ;;  %v14296_v29 = vsub.s32 7, %v11468_v8 }
 0x2b0   :  { %v812_v16 = vld [vmem:[%s14279_s1 + $0x1860] sm:$0xff] }
 0x2b1   :  { %v9377_v37 = vcombine.low %v804_v14, %v812_v16 }
 0x2b2   :  { %7313 = vmatpush1.bf16.msra.mxu0 %v9265_v60  ;;  %7525 = vmatpush1.bf16.msra.mxu1 %v9267_v61  ;;  %v9378_v60 = vcombine.high %v804_v14, %v812_v16  ;;  %v9380_v61 = vcombine.high %v805_v55, %v813_v48  ;;  %v12646_v14 = vld [vmem:[%s14279_s1 + $0x1ae8] sm:$0xff]  ;;  %v12651_v16 = vld [vmem:[%s14279_s1 + $0x1b20] sm:$0xff]  ;;  %v14336_v48 = vld [vmem:[#allocation5_spill] sm:$0xff] }
 0x2b3   :  { %7314 = vmatprep.subr.bf16.mxu0 %v9282_v62  ;;  %7526 = vmatprep.subr.bf16.mxu1 %v9284_v11  ;;  %v820_v62 = vld [vmem:[%s14279_s1 + $0x18a0] sm:$0xff] }
 0x2b4   :  { %v828_v11 = vld [vmem:[%s14279_s1 + $0x18e0] sm:$0xff] }
 0x2b5   :  { %v9393_v38 = vcombine.low %v820_v62, %v828_v11  ;;  %v12656_v55 = vld [vmem:[%s14279_s1 + $0x1b60] sm:$0xff] }
 0x2b6   :  { %7315 = vmatpush1.bf16.msra.mxu0 %v9281_v12  ;;  %7527 = vmatpush1.bf16.msra.mxu1 %v9283_v44  ;;  %v9394_v12 = vcombine.high %v820_v62, %v828_v11  ;;  %v9396_v44 = vcombine.high %v821_v27, %v829_v28  ;;  %v9443_v62 = vcombine.low %v12613_v51, %v12618_v53  ;;  %v9883_v11 = vld [vmem:[%s14281_s2] sm:$0xff] }
 0x2b7   :  { %7316 = vmatprep.subr.bf16.mxu0 %v9298_v35  ;;  %7528 = vmatprep.subr.bf16.mxu1 %v9300_v52  ;;  %v836_v35 = vld [vmem:[%s14279_s1 + $0x1920] sm:$0xff] }
 0x2b8   :  { %v844_v52 = vld [vmem:[%s14279_s1 + $0x1960] sm:$0xff] }
 0x2ba   :  { %7317 = vmatpush1.bf16.msra.mxu0 %v9297_v30  ;;  %7529 = vmatpush1.bf16.msra.mxu1 %v9299_v49  ;;  %v9395_v30 = vcombine.low %v821_v27, %v829_v28  ;;  %v9410_v49 = vcombine.high %v836_v35, %v844_v52 }
 0x2bb   :  { %7318 = vmatprep.subr.bf16.mxu0 %v9314_v25  ;;  %7530 = vmatprep.subr.bf16.mxu1 %v9316_v32  ;;  %v9412_v25 = vcombine.high %v837_v33, %v845_v54  ;;  %v852_v32 = vld [vmem:[%s14279_s1 + $0x19a0] sm:$0xff] }
 0x2be   :  { %7319 = vmatpush1.bf16.msra.mxu0 %v9313_v20  ;;  %7531 = vmatpush1.bf16.msra.mxu1 %v9315_v26  ;;  %v9409_v20 = vcombine.low %v836_v35, %v844_v52  ;;  %v9411_v26 = vcombine.low %v837_v33, %v845_v54  ;;  %v12709_v35 = vrot.slane %v9883_v11, %v14296_v29  ;;  %v12716_v33 = vld [vmem:[%s14279_s1 + $0x1c20] sm:$0xff] }
 0x2bf   :  { %7320 = vmatprep.subr.bf16.mxu0 %v9330_v63  ;;  %7532 = vmatprep.subr.bf16.mxu1 %v9332_v59  ;;  %v9426_v63 = vcombine.high %v852_v32, %v860_v4  ;;  %v9428_v59 = vcombine.high %v853_v6, %v861_v41  ;;  %v12721_v54 = vld [vmem:[%s14279_s1 + $0x1c60] sm:$0xff] }
 0x2c0   :  { %v12744_v6 = vld [vmem:[%s14279_s1 + $0x1ca0] sm:$0xff] }
 0x2c1   :  { %v12749_v41 = vld [vmem:[%s14279_s1 + $0x1ce0] sm:$0xff] }
 0x2c2   :  { %7321 = vmatpush1.bf16.msra.mxu0 %v9329_v10  ;;  %7533 = vmatpush1.bf16.msra.mxu1 %v9331_v57  ;;  %v14335_v10 = vld [vmem:[#allocation4_spill] sm:$0xff]  ;;  %v9425_v57 = vcombine.low %v852_v32, %v860_v4  ;;  %v9474_v32 = vcombine.high %v12651_v16, %v12656_v55  ;;  %v12739_v4 = vld [vmem:[%s14279_s1 + $0x1c68] sm:$0xff]  ;;  %v12811_v29 = vld [vmem:[%s14279_s1 + $0x1de0] sm:$0xff] }
 0x2c3   :  { %7322 = vmatprep.subr.bf16.mxu0 %v9346_v13  ;;  %7534 = vmatprep.subr.bf16.mxu1 %v9348_v45  ;;  %v14299_v13 = vsub.s32 4, %v11468_v8  ;;  %v14298_v45 = vsub.s32 6, %v11468_v8 }
 0x2c5   :  { %v12682_v27 = vrot.slane %v9883_v11, %v14299_v13  ;;  %v12686_v28 = vrot.slane %v9883_v11, %v14298_v45 }
 0x2c6   :  { %7323 = vmatpush1.bf16.msra.mxu0 %v9345_v1  ;;  %7535 = vmatpush1.bf16.msra.mxu1 %v9347_v46  ;;  %v12629_v1 = vld [vmem:[%s14279_s1 + $0x1aa0] sm:$0xff] }
 0x2c7   :  { %7324 = vmatprep.subr.bf16.mxu0 %v9362_v50  ;;  %7536 = vmatprep.subr.bf16.mxu1 %v9364_v47  ;;  %v12634_v46 = vld [vmem:[%s14279_s1 + $0x1ae0] sm:$0xff]  ;;  %v12639_v50 = vld [vmem:[%s14279_s1 + $0x1aa8] sm:$0xff]  ;;  %v9444_v47 = vcombine.high %v12613_v51, %v12618_v53 }
 0x2c8   :  { %v9458_v52 = vcombine.high %v12629_v1, %v12634_v46  ;;  %v12772_v51 = vld [vmem:[%s14279_s1 + $0x1d20] sm:$0xff] }
 0x2ca   :  { %7325 = vmatpush1.bf16.msra.mxu0 %v9361_v0  ;;  %7537 = vmatpush1.bf16.msra.mxu1 %v9363_v17  ;;  %v12662_v0 = vld [vmem:[%s14279_s1 + $0x1b28] sm:$0xff] }
 0x2cb   :  { %7347 = vmatprep.subr.bf16.mxu0 %v9378_v60  ;;  %7559 = vmatprep.subr.bf16.mxu1 %v9380_v61  ;;  %v12667_v17 = vld [vmem:[%s14279_s1 + $0x1b68] sm:$0xff]  ;;  %v12672_v60 = vld [vmem:[%s14279_s1 + $0x1ba0] sm:$0xff]  ;;  %v9441_v61 = vcombine.low %v868_v40, %v876_v24 }
 0x2cc   :  { %v12762_v40 = vld [vmem:[%s14279_s1 + $0x1ca8] sm:$0xff] }
 0x2cd   :  { %7327 = vmatmul.mubr.bf16.vlgmr.msra.gmra.mrb[16].mxu0 %v14333_v39  ;;  %7539 = vmatmul.mubr.bf16.vlgmr.msra.gmra.mrb[16].mxu1 %v14333_v39  ;;  %v12767_v24 = vld [vmem:[%s14279_s1 + $0x1ce8] sm:$0xff] }
 0x2ce   :  { %7348 = vmatpush1.bf16.msra.mxu0 %v9377_v37  ;;  %7560 = vmatpush1.bf16.msra.mxu1 %v9379_v18  ;;  %v12691_v37 = vld [vmem:[%s14279_s1 + $0x1be0] sm:$0xff]  ;;  %v12696_v18 = vld [vmem:[%s14279_s1 + $0x1ba8] sm:$0xff] }
 0x2cf   :  { %7349 = vmatprep.subr.bf16.mxu0 %v9394_v12  ;;  %7561 = vmatprep.subr.bf16.mxu1 %v9396_v44  ;;  %v12701_v12 = vld [vmem:[%s14279_s1 + $0x1be8] sm:$0xff]  ;;  %v12705_v44 = vrot.slane %v9883_v11, %v14297_v19  ;;  %v12806_v11 = vld [vmem:[%s14279_s1 + $0x1da0] sm:$0xff] }
 0x2d0   :  { %7336 = vmatprep.mubr.bf16.mxu0 %v14334_v5  ;;  %7548 = vmatprep.mubr.bf16.mxu1 %v14334_v5 }
 0x2d2   :  { %7350 = vmatpush1.bf16.msra.mxu0 %v9393_v38  ;;  %7562 = vmatpush1.bf16.msra.mxu1 %v9395_v30  ;;  %v12726_v38 = vld [vmem:[%s14279_s1 + $0x1c28] sm:$0xff]  ;;  %v9457_v30 = vcombine.low %v12629_v1, %v12634_v46  ;;  %v12785_v1 = vld [vmem:[%s14279_s1 + $0x1d60] sm:$0xff] }
 0x2d3   :  { %7351 = vmatprep.subr.bf16.mxu0 %v9410_v49  ;;  %7563 = vmatprep.subr.bf16.mxu1 %v9412_v25  ;;  %v9459_v49 = vcombine.low %v12639_v50, %v12646_v14  ;;  %v9460_v25 = vcombine.high %v12639_v50, %v12646_v14  ;;  %v12790_v46 = vld [vmem:[%s14279_s1 + $0x1d28] sm:$0xff] }
 0x2d4   :  { %v12795_v50 = vld [vmem:[%s14279_s1 + $0x1d68] sm:$0xff] }
 0x2d5   :  { %7337 = vmatmul.mubr.bf16.gmra.mrb[20].mxu0 %v14335_v10  ;;  %7549 = vmatmul.mubr.bf16.gmra.mrb[20].mxu1 %v14335_v10 }
 0x2d6   :  { %7352 = vmatpush1.bf16.msra.mxu0 %v9409_v20  ;;  %7564 = vmatpush1.bf16.msra.mxu1 %v9411_v26  ;;  %v9473_v20 = vcombine.low %v12651_v16, %v12656_v55  ;;  %v14337_v16 = vcombine.low %v12662_v0, %v12667_v17  ;;  %v14338_v55 = vcombine.high %v12672_v60, %v12691_v37 }
 0x2d7   :  { %7353 = vmatprep.subr.bf16.mxu0 %v9426_v63  ;;  %7565 = vmatprep.subr.bf16.mxu1 %v9428_v59  ;;  %v9476_v63 = vcombine.high %v12662_v0, %v12667_v17  ;;  %v14339_v0 = vcombine.high %v12696_v18, %v12701_v12 }
 0x2d8   :  { %7379 = vmatprep.mubr.bf16.mxu0 %v14336_v48  ;;  %7591 = vmatprep.mubr.bf16.mxu1 %v14336_v48 }
 0x2da   :  { %7354 = vmatpush1.bf16.msra.mxu0 %v9425_v57  ;;  %7566 = vmatpush1.bf16.msra.mxu1 %v9427_v9 }
 0x2db   :  { %7355 = vmatprep.subr.bf16.mxu0 %v9442_v21  ;;  %7567 = vmatprep.subr.bf16.mxu1 %v9444_v47 }
 0x2de   :  { %7356 = vmatpush1.bf16.msra.mxu0 %v9441_v61  ;;  %7568 = vmatpush1.bf16.msra.mxu1 %v9443_v62 }
 0x2df   :  { %7357 = vmatprep.subr.bf16.mxu0 %v9458_v52  ;;  %7569 = vmatprep.subr.bf16.mxu1 %v9460_v25 }
 0x2e0   :  { %v6957_v62 = vpop.f32.mrb[8].mxu0  ;;  %v7169_v47 = vpop.f32.mrb[8].mxu1 }
 0x2e1   :  { %v9641_v14 = vadd.f32 %v6957_v62, %v12682_v27  ;;  %v6959_v61 = vpop.f32.mrb[9].mxu0  ;;  %v9649_v19 = vadd.f32 %v7169_v47, %v12686_v28  ;;  %v7171_v57 = vpop.f32.mrb[9].mxu1 }
 0x2e2   :  { %v9642_v45 = vadd.f32 %v6959_v61, %v12705_v44  ;;  %v6961_v53 = vpop.f32.mrb[10].mxu0  ;;  %7358 = vmatpush1.bf16.msra.mxu0 %v9457_v30  ;;  %v9650_v52 = vadd.f32 %v7171_v57, %v12709_v35  ;;  %v7173_v25 = vpop.f32.mrb[10].mxu1  ;;  %7570 = vmatpush1.bf16.msra.mxu1 %v9459_v49 }
 0x2e3   :  { %8040 = vst [vmem:[%s14282_s3 + $0x20] sm:$0xff] %v9641_v14  ;;  %v8260_v21 = vmul.f32 %v9641_v14, %v9641_v14  ;;  %v9643_v47 = vadd.f32 %v6961_v53, %v12682_v27  ;;  %v6963_v61 = vpop.f32.mrb[11].mxu0  ;;  %7359 = vmatprep.subr.bf16.mxu0 %v9474_v32  ;;  %8042 = vst [vmem:[%s14282_s3 + $0x30] sm:$0xff] %v9649_v19  ;;  %v8262_v30 = vmul.f32 %v9649_v19, %v9649_v19  ;;  %v7175_v9 = vpop.f32.mrb[11].mxu1 }
 0x2e4   :  { %8041 = vst [vmem:[%s14282_s3 + $0x28] sm:$0xff] %v9642_v45  ;;  %v8261_v13 = vmul.f32 %v9642_v45, %v9642_v45  ;;  %v9651_v62 = vadd.f32 %v7173_v25, %v12686_v28  ;;  %v9644_v57 = vadd.f32 %v6963_v61, %v12705_v44  ;;  %7571 = vmatprep.subr.bf16.mxu1 %v9476_v63  ;;  %8043 = vst [vmem:[%s14282_s3 + $0x38] sm:$0xff] %v9650_v52  ;;  %v12857_v25 = vld [vmem:[%s14279_s1 + $0x1da8] sm:$0xff] }
 0x2e5   :  { %v8263_v49 = vmul.f32 %v9650_v52, %v9650_v52  ;;  %8056 = vst [vmem:[%s14282_s3 + $0xa0] sm:$0xff] %v9643_v47  ;;  %v8148_v32 = vadd.f32 %v9643_v47, %v9641_v14  ;;  %v8276_v53 = vmul.f32 %v9643_v47, %v9643_v47  ;;  %v9652_v59 = vadd.f32 %v7175_v9, %v12709_v35  ;;  %v12862_v63 = vld [vmem:[%s14279_s1 + $0x1de8] sm:$0xff]  ;;  %v12876_v47 = vld [vmem:[%s14279_s1 + $0x1e20] sm:$0xff] }
 0x2e6   :  { %8058 = vst [vmem:[%s14282_s3 + $0xb0] sm:$0xff] %v9651_v62  ;;  %v8166_v61 = vadd.f32 %v9651_v62, %v9649_v19  ;;  %v8278_v26 = vmul.f32 %v9651_v62, %v9651_v62  ;;  %8057 = vst [vmem:[%s14282_s3 + $0xa8] sm:$0xff] %v9644_v57  ;;  %v8157_v9 = vadd.f32 %v9644_v57, %v9642_v45  ;;  %7360 = vmatpush1.bf16.msra.mxu0 %v9473_v20  ;;  %v12881_v19 = vld [vmem:[%s14279_s1 + $0x1e60] sm:$0xff]  ;;  %v12895_v20 = vld [vmem:[%s14279_s1 + $0x1e28] sm:$0xff] }
 0x2e7   :  { %v8277_v14 = vmul.f32 %v9644_v57, %v9644_v57  ;;  %v8356_v62 = vadd.f32 %v8276_v53, %v8260_v21  ;;  %8059 = vst [vmem:[%s14282_s3 + $0xb8] sm:$0xff] %v9652_v59  ;;  %v8175_v45 = vadd.f32 %v9652_v59, %v9650_v52  ;;  %v8279_v57 = vmul.f32 %v9652_v59, %v9652_v59  ;;  %v12900_v21 = vld [vmem:[%s14279_s1 + $0x1e68] sm:$0xff] }
 0x2e8   :  { %7572 = vmatpush1.bf16.msra.mxu1 %v14337_v16  ;;  %7361 = vmatprep.subr.bf16.mxu0 %v14338_v55  ;;  %v8374_v52 = vadd.f32 %v8278_v26, %v8262_v30  ;;  %v6967_v53 = vpop.f32.mrb[12].mxu0  ;;  %v7179_v48 = vpop.f32.mrb[12].mxu1  ;;  %v14340_v16 = vcombine.low %v12672_v60, %v12691_v37  ;;  %v14341_v60 = vcombine.low %v12696_v18, %v12701_v12 }
 0x2e9   :  { %v8365_v59 = vadd.f32 %v8277_v14, %v8261_v13  ;;  %7573 = vmatprep.subr.bf16.mxu1 %v14339_v0  ;;  %v8383_v55 = vadd.f32 %v8279_v57, %v8263_v49  ;;  %v9645_v8 = vadd.f32 %v6967_v53, %v12682_v27  ;;  %v6969_v10 = vpop.f32.mrb[13].mxu0  ;;  %v9653_v30 = vadd.f32 %v7179_v48, %v12686_v28  ;;  %v7181_v0 = vpop.f32.mrb[13].mxu1 }
 0x2ea   :  { %v9646_v14 = vadd.f32 %v6969_v10, %v12705_v44  ;;  %v6971_v17 = vpop.f32.mrb[14].mxu0  ;;  %7362 = vmatpush1.bf16.msra.mxu0 %v14340_v16  ;;  %v9654_v10 = vadd.f32 %v7181_v0, %v12709_v35  ;;  %v7183_v26 = vpop.f32.mrb[14].mxu1 }
 0x2eb   :  { %8072 = vst [vmem:[%s14282_s3 + $0x120] sm:$0xff] %v9645_v8  ;;  %v8149_v53 = vadd.f32 %v9645_v8, %v8148_v32  ;;  %v8292_v48 = vmul.f32 %v9645_v8, %v9645_v8  ;;  %v9647_v13 = vadd.f32 %v6971_v17, %v12682_v27  ;;  %v6973_v37 = vpop.f32.mrb[15].mxu0  ;;  %8074 = vst [vmem:[%s14282_s3 + $0x130] sm:$0xff] %v9653_v30  ;;  %v7185_v0 = vpop.f32.mrb[15].mxu1 }
 0x2ec   :  { %7574 = vmatpush1.bf16.msra.mxu1 %v14341_v60  ;;  %v8167_v16 = vadd.f32 %v9653_v30, %v8166_v61  ;;  %v8294_v57 = vmul.f32 %v9653_v30, %v9653_v30  ;;  %8073 = vst [vmem:[%s14282_s3 + $0x128] sm:$0xff] %v9646_v14  ;;  %v8158_v8 = vadd.f32 %v9646_v14, %v8157_v9  ;;  %8075 = vst [vmem:[%s14282_s3 + $0x138] sm:$0xff] %v9654_v10 }
 0x2ed   :  { %v8293_v32 = vmul.f32 %v9646_v14, %v9646_v14  ;;  %v14342_v27 = vcombine.high %v12716_v33, %v12721_v54  ;;  %v8357_v18 = vadd.f32 %v8356_v62, %v8292_v48  ;;  %v8176_v12 = vadd.f32 %v9654_v10, %v8175_v45  ;;  %8088 = vst [vmem:[%s14282_s3 + $0x1a0] sm:$0xff] %v9647_v13 }
 0x2ee   :  { %v8295_v17 = vmul.f32 %v9654_v10, %v9654_v10  ;;  %v8150_v61 = vadd.f32 %v9647_v13, %v8149_v53  ;;  %v14343_v9 = vcombine.high %v12726_v38, %v12739_v4  ;;  %v8375_v30 = vadd.f32 %v8374_v52, %v8294_v57 }
 0x2ef   :  { %7363 = vmatprep.subr.bf16.mxu0 %v14342_v27  ;;  %v8366_v14 = vadd.f32 %v8365_v59, %v8293_v32  ;;  %v8308_v60 = vmul.f32 %v9647_v13, %v9647_v13  ;;  %v9655_v62 = vadd.f32 %v7183_v26, %v12686_v28  ;;  %v14344_v48 = vcombine.low %v12716_v33, %v12721_v54 }
 0x2f0   :  { %7575 = vmatprep.subr.bf16.mxu1 %v14343_v9  ;;  %v8384_v45 = vadd.f32 %v8383_v55, %v8295_v17  ;;  %v8151_v10 = vrot.slane %v8150_v61, 4  ;;  %v9648_v27 = vadd.f32 %v6973_v37, %v12705_v44  ;;  %v9656_v49 = vadd.f32 %v7185_v0, %v12709_v35 }
 0x2f1   :  { %7364 = vmatpush1.bf16.msra.mxu0 %v14344_v48  ;;  %v14345_v53 = vcombine.low %v12726_v38, %v12739_v4  ;;  %v14346_v52 = vcombine.high %v12744_v6, %v12749_v41  ;;  %v8358_v59 = vadd.f32 %v8357_v18, %v8308_v60  ;;  %8090 = vst [vmem:[%s14282_s3 + $0x1b0] sm:$0xff] %v9655_v62 }
 0x2f2   :  { %v8168_v28 = vadd.f32 %v9655_v62, %v8167_v16  ;;  %v8310_v33 = vmul.f32 %v9655_v62, %v9655_v62  ;;  %v14347_v44 = vcombine.high %v12762_v40, %v12767_v24  ;;  %v9572_v35 = vcombine.high %v12895_v20, %v12900_v21  ;;  %8089 = vst [vmem:[%s14282_s3 + $0x1a8] sm:$0xff] %v9648_v27 }
 0x2f3   :  { %7576 = vmatpush1.bf16.msra.mxu1 %v14345_v53  ;;  %7365 = vmatprep.subr.bf16.mxu0 %v14346_v52  ;;  %v8152_v54 = vadd.f32 %v8151_v10, %v8150_v61  ;;  %v8159_v38 = vadd.f32 %v9648_v27, %v8158_v8  ;;  %v8309_v4 = vmul.f32 %v9648_v27, %v9648_v27  ;;  %v8359_v26 = vrot.slane %v8358_v59, 4  ;;  %v12998_v53 = vld [vmem:[%s14279_s1 + $0x1ee0] sm:$0xff] }
 0x2f4   :  { %7577 = vmatprep.subr.bf16.mxu1 %v14347_v44  ;;  %8091 = vst [vmem:[%s14282_s3 + $0x1b8] sm:$0xff] %v9656_v49  ;;  %v8177_v55 = vadd.f32 %v9656_v49, %v8176_v12  ;;  %v8169_v13 = vrot.slane %v8168_v28, 4  ;;  %v8376_v57 = vadd.f32 %v8375_v30, %v8310_v33  ;;  %v8311_v37 = vmul.f32 %v9656_v49, %v9656_v49 }
 0x2f5   :  { %v14348_v16 = vcombine.low %v12744_v6, %v12749_v41  ;;  %v8153_v32 = vrot.slane %v8152_v54, 2  ;;  %v8160_v0 = vrot.slane %v8159_v38, 4  ;;  %v8367_v18 = vadd.f32 %v8366_v14, %v8309_v4 }
 0x2f6   :  { %v8178_v17 = vrot.slane %v8177_v55, 4  ;;  %v14349_v8 = vcombine.low %v12762_v40, %v12767_v24  ;;  %v14350_v61 = vcombine.high %v12772_v51, %v12785_v1  ;;  %v8360_v12 = vadd.f32 %v8359_v26, %v8358_v59  ;;  %v1013_v26 = vld [vmem:[%s14279_s1 + $0x1ea8] sm:$0xff] }
 0x2f7   :  { %7366 = vmatpush1.bf16.msra.mxu0 %v14348_v16  ;;  %v8170_v9 = vadd.f32 %v8169_v13, %v8168_v28  ;;  %v8377_v30 = vrot.slane %v8376_v57, 4  ;;  %v8385_v49 = vadd.f32 %v8384_v45, %v8311_v37  ;;  %v14351_v6 = vcombine.high %v12790_v46, %v12795_v50  ;;  %v12993_v45 = vld [vmem:[%s14279_s1 + $0x1ea0] sm:$0xff] }
 0x2f8   :  { %7578 = vmatpush1.bf16.msra.mxu1 %v14349_v8  ;;  %7367 = vmatprep.subr.bf16.mxu0 %v14350_v61  ;;  %v8154_v41 = vadd.f32 %v8153_v32, %v8152_v54  ;;  %v8161_v60 = vadd.f32 %v8160_v0, %v8159_v38  ;;  %v8368_v14 = vrot.slane %v8367_v18, 4  ;;  %v8179_v62 = vadd.f32 %v8178_v17, %v8177_v55 }
 0x2f9   :  { %7579 = vmatprep.subr.bf16.mxu1 %v14351_v6  ;;  %v8361_v48 = vrot.slane %v8360_v12, 2  ;;  %v8171_v10 = vrot.slane %v8170_v9, 2  ;;  %v8378_v40 = vadd.f32 %v8377_v30, %v8376_v57  ;;  %v8386_v24 = vrot.slane %v8385_v49, 4 }
 0x2fa   :  { %v14352_v27 = vcombine.low %v12772_v51, %v12785_v1  ;;  %v8155_v52 = vrot.slane %v8154_v41, 1  ;;  %v8162_v59 = vrot.slane %v8161_v60, 2  ;;  %v8369_v28 = vadd.f32 %v8368_v14, %v8367_v18 }
 0x2fb   :  { %v8180_v33 = vrot.slane %v8179_v62, 2  ;;  %v14353_v44 = vcombine.low %v12790_v46, %v12795_v50  ;;  %v14354_v51 = vcombine.high %v12806_v11, %v12811_v29  ;;  %v8362_v1 = vadd.f32 %v8361_v48, %v8360_v12  ;;  %v1021_v46 = vld [vmem:[%s14279_s1 + $0x1ee8] sm:$0xff] }
 0x2fc   :  { %7368 = vmatpush1.bf16.msra.mxu0 %v14352_v27  ;;  %v8172_v54 = vadd.f32 %v8171_v10, %v8170_v9  ;;  %v8379_v38 = vrot.slane %v8378_v40, 2  ;;  %v8387_v4 = vadd.f32 %v8386_v24, %v8385_v49  ;;  %v14355_v55 = vcombine.high %v12857_v25, %v12862_v63  ;;  %v1029_v48 = vld [vmem:[%s14279_s1 + $0x1f28] sm:$0xff] }
 0x2fd   :  { %7580 = vmatpush1.bf16.msra.mxu1 %v14353_v44  ;;  %7369 = vmatprep.subr.bf16.mxu0 %v14354_v51  ;;  %v8163_v50 = vadd.f32 %v8162_v59, %v8161_v60  ;;  %v8370_v13 = vrot.slane %v8369_v28, 2  ;;  %v8181_v57 = vadd.f32 %v8180_v33, %v8179_v62  ;;  %v9586_v37 = vcombine.high %v12993_v45, %v12998_v53 }
 0x2fe   :  { %7581 = vmatprep.subr.bf16.mxu1 %v14355_v55  ;;  %v8363_v16 = vrot.slane %v8362_v1, 1  ;;  %v8173_v32 = vrot.slane %v8172_v54, 1  ;;  %v8380_v0 = vadd.f32 %v8379_v38, %v8378_v40  ;;  %v8388_v18 = vrot.slane %v8387_v4, 2 }
 0x2ff   :  { %v14356_v17 = vcombine.low %v12806_v11, %v12811_v29  ;;  %v8156_v8 = vadd.f32 %v8155_v52, %v8154_v41  ;;  %v8164_v61 = vrot.slane %v8163_v50, 1  ;;  %v8371_v12 = vadd.f32 %v8370_v13, %v8369_v28  ;;  %v1028_v29 = vld [vmem:[%s14279_s1 + $0x1f20] sm:$0xff] }
 0x300   :  { %v14357_v9 = vcombine.low %v12857_v25, %v12862_v63  ;;  %v14358_v30 = vcombine.high %v12876_v47, %v12881_v19  ;;  %v9588_v49 = vcombine.high %v1013_v26, %v1021_v46  ;;  %v8364_v6 = vadd.f32 %v8363_v16, %v8362_v1  ;;  %v1036_v11 = vld [vmem:[%s14279_s1 + $0x1f60] sm:$0xff]  ;;  %v46_v16 = vld [vmem:[%s14279_s1 + $0x70] sm:$0xff] }
 0x301   :  { %7370 = vmatpush1.bf16.msra.mxu0 %v14356_v17  ;;  %v8381_v60 = vrot.slane %v8380_v0, 1  ;;  %v8182_v14 = vrot.slane %v8181_v57, 1  ;;  %v8389_v62 = vadd.f32 %v8388_v18, %v8387_v4  ;;  %v8372_v25 = vrot.slane %v8371_v12, 1  ;;  %v47_v18 = vld [vmem:[%s14279_s1 + $0x78] sm:$0xff] }
 0x302   :  { %7582 = vmatpush1.bf16.msra.mxu1 %v14357_v9  ;;  %7371 = vmatprep.subr.bf16.mxu0 %v14358_v30  ;;  %v9585_v63 = vcombine.low %v12993_v45, %v12998_v53  ;;  %v9587_v41 = vcombine.low %v1013_v26, %v1021_v46  ;;  %v8469_v10 = vsel %vm8464_vm0, %v8156_v8, %v8364_v6  ;;  %v54_v30 = vld [vmem:[%s14279_s1 + $0xb0] sm:$0xff]  ;;  %v55_v6 = vld [vmem:[%s14279_s1 + $0xb8] sm:$0xff] }
 0x303   :  { %7583 = vmatprep.subr.bf16.mxu1 %v9572_v35  ;;  %v1037_v35 = vld [vmem:[%s14279_s1 + $0x1f68] sm:$0xff]  ;;  %v8174_v40 = vadd.f32 %v8173_v32, %v8172_v54  ;;  %v8382_v24 = vadd.f32 %v8381_v60, %v8380_v0  ;;  %v8390_v27 = vrot.slane %v8389_v62, 1  ;;  %v14359_v52 = vcombine.low %v12876_v47, %v12881_v19  ;;  %v1044_v54 = vld [vmem:[%s14279_s1 + $0x1fa0] sm:$0xff]  ;;  %v39_v0 = vld [vmem:[%s14279_s1 + $0x38] sm:$0xff] }
 0x304   :  { %v8165_v59 = vadd.f32 %v8164_v61, %v8163_v50  ;;  %v8373_v45 = vadd.f32 %v8372_v25, %v8371_v12  ;;  %v14360_v53 = vcombine.low %v12895_v20, %v12900_v21  ;;  %v9602_v28 = vcombine.high %v1028_v29, %v1036_v11  ;;  %v1052_v47 = vld [vmem:[%s14279_s1 + $0x1fe0] sm:$0xff]  ;;  %v1045_v20 = vld [vmem:[%s14279_s1 + $0x1fa8] sm:$0xff]  ;;  %v63_v60 = vld [vmem:[%s14279_s1 + $0xf8] sm:$0xff] }
 0x305   :  { %7372 = vmatpush1.bf16.msra.mxu0 %v14359_v52  ;;  %v8471_v33 = vsel %vm8464_vm0, %v8174_v40, %v8382_v24  ;;  %v8183_v44 = vadd.f32 %v8182_v14, %v8181_v57  ;;  %v8391_v51 = vadd.f32 %v8390_v27, %v8389_v62  ;;  %v9604_v1 = vcombine.high %v1029_v48, %v1037_v35  ;;  %v1053_v21 = vld [vmem:[%s14279_s1 + $0x1fe8] sm:$0xff]  ;;  %v70_v25 = vld [vmem:[%s14279_s1 + $0x130] sm:$0xff] }
 0x306   :  { %7584 = vmatpush1.bf16.msra.mxu1 %v14360_v53  ;;  %7373 = vmatprep.subr.bf16.mxu0 %v9586_v37  ;;  %v8470_v19 = vsel %vm8464_vm0, %v8165_v59, %v8373_v45  ;;  %v9601_v55 = vcombine.low %v1028_v29, %v1036_v11  ;;  %v9603_v46 = vcombine.low %v1029_v48, %v1037_v35  ;;  %v38_v37 = vld [vmem:[%s14279_s1 + $0x30] sm:$0xff]  ;;  %v79_v48 = vld [vmem:[%s14279_s1 + $0x178] sm:$0xff] }
 0x307   :  { %7585 = vmatprep.subr.bf16.mxu1 %v9588_v49  ;;  %v8514_v38 = vcombine.low %v8469_v10, %v8470_v19  ;;  %v8472_v4 = vsel %vm8464_vm0, %v8183_v44, %v8391_v51  ;;  %v9618_v50 = vcombine.high %v1044_v54, %v1052_v47  ;;  %v9620_v57 = vcombine.high %v1045_v20, %v1053_v21  ;;  %v62_v49 = vld [vmem:[%s14279_s1 + $0xf0] sm:$0xff]  ;;  %v87_v59 = vld [vmem:[%s14279_s1 + $0x1b8] sm:$0xff] }
 0x308   :  { %v8515_v26 = vcombine.low %v8471_v33, %v8472_v4  ;;  %v9617_v17 = vcombine.low %v1044_v54, %v1052_v47  ;;  %v9619_v61 = vcombine.low %v1045_v20, %v1053_v21  ;;  %v8614_v12 = vcombine.high %v38_v37, %v46_v16  ;;  %v86_v27 = vld [vmem:[%s14279_s1 + $0x1b0] sm:$0xff]  ;;  %v95_v45 = vld [vmem:[%s14279_s1 + $0x1f8] sm:$0xff] }
 0x309   :  { %7374 = vmatpush1.bf16.msra.mxu0 %v9585_v63  ;;  %v8522_v13 = vrot.slane %v8514_v38, %v11915_v7  ;;  %v8616_v9 = vcombine.high %v39_v0, %v47_v18  ;;  %v8613_v14 = vcombine.low %v38_v37, %v46_v16  ;;  %v8615_v62 = vcombine.low %v39_v0, %v47_v18  ;;  %v78_v63 = vld [vmem:[%s14279_s1 + $0x170] sm:$0xff]  ;;  %v103_v54 = vld [vmem:[%s14279_s1 + $0x238] sm:$0xff] }
 0x30a   :  { %7586 = vmatpush1.bf16.msra.mxu1 %v9587_v41  ;;  %7375 = vmatprep.subr.bf16.mxu0 %v9602_v28  ;;  %v8529_v32 = vrot.slane %v8515_v26, %v11915_v7  ;;  %v8630_v29 = vcombine.high %v54_v30, %v62_v49  ;;  %v8632_v11 = vcombine.high %v55_v6, %v63_v60  ;;  %v71_v41 = vld [vmem:[%s14279_s1 + $0x138] sm:$0xff]  ;;  %v94_v52 = vld [vmem:[%s14279_s1 + $0x1f0] sm:$0xff] }
 0x30b   :  { %7587 = vmatprep.subr.bf16.mxu1 %v9604_v1  ;;  %v8629_v35 = vcombine.low %v54_v30, %v62_v49  ;;  %v8631_v10 = vcombine.low %v55_v6, %v63_v60  ;;  %v8646_v40 = vcombine.high %v70_v25, %v78_v63  ;;  %v8648_v24 = vcombine.high %v71_v41, %v79_v48  ;;  %v102_v51 = vld [vmem:[%s14279_s1 + $0x230] sm:$0xff]  ;;  %v111_v47 = vld [vmem:[%s14279_s1 + $0x278] sm:$0xff] }
 0x30c   :  { %v8530_v8 = vcombine.low %v8522_v13, %v8529_v32  ;;  %v8645_v53 = vcombine.low %v70_v25, %v78_v63  ;;  %v8647_v28 = vcombine.low %v71_v41, %v79_v48  ;;  %v8662_v33 = vcombine.high %v86_v27, %v94_v52  ;;  %v110_v1 = vld [vmem:[%s14279_s1 + $0x270] sm:$0xff]  ;;  %v119_v26 = vld [vmem:[%s14279_s1 + $0x2b8] sm:$0xff] }
 0x30d   :  { %7376 = vmatpush1.bf16.msra.mxu0 %v9601_v55  ;;  %v8664_v44 = vcombine.high %v87_v59, %v95_v45  ;;  %v8661_v19 = vcombine.low %v86_v27, %v94_v52  ;;  %v8663_v20 = vcombine.low %v87_v59, %v95_v45  ;;  %v8678_v21 = vcombine.high %v102_v51, %v110_v1  ;;  %v118_v4 = vld [vmem:[%s14279_s1 + $0x2b0] sm:$0xff]  ;;  %v143_v0 = vld [vmem:[%s14279_s1 + $0x378] sm:$0xff] }
 0x30e   :  { %7588 = vmatpush1.bf16.msra.mxu1 %v9603_v46  ;;  %7377 = vmatprep.subr.bf16.mxu0 %v9618_v50  ;;  %8574 = vst [vmem:[%s14283_s4 + $0x8] sm:$0xff] %v8530_v8  ;;  %v8680_v38 = vcombine.high %v103_v54, %v111_v47  ;;  %v126_v55 = vld [vmem:[%s14279_s1 + $0x2f0] sm:$0xff]  ;;  %v127_v46 = vld [vmem:[%s14279_s1 + $0x2f8] sm:$0xff]  ;;  %v8677_v50 = vcombine.low %v102_v51, %v110_v1 }
 0x30f   :  { %7589 = vmatprep.subr.bf16.mxu1 %v9620_v57  ;;  %v8679_v13 = vcombine.low %v103_v54, %v111_v47  ;;  %v8694_v57 = vcombine.high %v118_v4, %v126_v55  ;;  %v8696_v37 = vcombine.high %v119_v26, %v127_v46  ;;  %v134_v16 = vld [vmem:[%s14279_s1 + $0x330] sm:$0xff]  ;;  %v8693_v18 = vcombine.low %v118_v4, %v126_v55  ;;  %v151_v30 = vld [vmem:[%s14279_s1 + $0x3b8] sm:$0xff] }
 0x310   :  { %v142_v32 = vld [vmem:[%s14279_s1 + $0x370] sm:$0xff]  ;;  %v159_v49 = vld [vmem:[%s14279_s1 + $0x3f8] sm:$0xff] }
 0x311   :  { %7378 = vmatpush1.bf16.msra.mxu0 %v9617_v17  ;;  %v8695_v17 = vcombine.low %v119_v26, %v127_v46  ;;  %v8710_v8 = vcombine.high %v134_v16, %v142_v32  ;;  %v8709_v6 = vcombine.low %v134_v16, %v142_v32  ;;  %v167_v25 = vld [vmem:[%s14279_s1 + $0x438] sm:$0xff]  ;;  %v8727_v48 = vcombine.low %v151_v30, %v159_v49 }
 0x312   :  { %7590 = vmatpush1.bf16.msra.mxu1 %v9619_v61  ;;  %7612 = vmatprep.subr.bf16.mxu0 %v8614_v12  ;;  %v150_v12 = vld [vmem:[%s14279_s1 + $0x3b0] sm:$0xff]  ;;  %v175_v63 = vld [vmem:[%s14279_s1 + $0x478] sm:$0xff] }
 0x313   :  { %7824 = vmatprep.subr.bf16.mxu1 %v8616_v9  ;;  %v158_v9 = vld [vmem:[%s14279_s1 + $0x3f0] sm:$0xff]  ;;  %v183_v27 = vld [vmem:[%s14279_s1 + $0x4b8] sm:$0xff]  ;;  %v8743_v45 = vcombine.low %v167_v25, %v175_v63 }
 0x314   :  { %7380 = vmatmul.mubr.bf16.vlgmr.msra.gmra.mrb[16].mxu0 %v10825_v36  ;;  %v8725_v41 = vcombine.low %v150_v12, %v158_v9  ;;  %v191_v52 = vld [vmem:[%s14279_s1 + $0x4f8] sm:$0xff] }
 0x315   :  { %7592 = vmatmul.mubr.bf16.vlgmr.msra.gmra.mrb[16].mxu1 %v10825_v36  ;;  %7613 = vmatpush1.bf16.msra.mxu0 %v8613_v14  ;;  %v8726_v14 = vcombine.high %v150_v12, %v158_v9  ;;  %v199_v51 = vld [vmem:[%s14279_s1 + $0x538] sm:$0xff]  ;;  %v8759_v47 = vcombine.low %v183_v27, %v191_v52 }
 0x316   :  { %7825 = vmatpush1.bf16.msra.mxu1 %v8615_v62  ;;  %7614 = vmatprep.subr.bf16.mxu0 %v8630_v29  ;;  %v8728_v62 = vcombine.high %v151_v30, %v159_v49  ;;  %v166_v29 = vld [vmem:[%s14279_s1 + $0x430] sm:$0xff]  ;;  %v207_v1 = vld [vmem:[%s14279_s1 + $0x578] sm:$0xff] }
 0x317   :  { %7826 = vmatprep.subr.bf16.mxu1 %v8632_v11  ;;  %7389 = vmatprep.mubr.bf16.mxu0 %v10836_v22  ;;  %v174_v11 = vld [vmem:[%s14279_s1 + $0x470] sm:$0xff]  ;;  %v215_v4 = vld [vmem:[%s14279_s1 + $0x5b8] sm:$0xff]  ;;  %v8775_v46 = vcombine.low %v199_v51, %v207_v1 }
 0x318   :  { %7601 = vmatprep.mubr.bf16.mxu1 %v10836_v22  ;;  %v8741_v59 = vcombine.low %v166_v29, %v174_v11  ;;  %v223_v55 = vld [vmem:[%s14279_s1 + $0x5f8] sm:$0xff] }
 0x319   :  { %7615 = vmatpush1.bf16.msra.mxu0 %v8629_v35  ;;  %v8742_v35 = vcombine.high %v166_v29, %v174_v11  ;;  %v231_v16 = vld [vmem:[%s14279_s1 + $0x638] sm:$0xff] }
 0x31a   :  { %7827 = vmatpush1.bf16.msra.mxu1 %v8631_v10  ;;  %7616 = vmatprep.subr.bf16.mxu0 %v8646_v40  ;;  %v8744_v10 = vcombine.high %v167_v25, %v175_v63  ;;  %v182_v40 = vld [vmem:[%s14279_s1 + $0x4b0] sm:$0xff]  ;;  %v239_v32 = vld [vmem:[%s14279_s1 + $0x678] sm:$0xff] }
 0x31b   :  { %7828 = vmatprep.subr.bf16.mxu1 %v8648_v24  ;;  %v190_v24 = vld [vmem:[%s14279_s1 + $0x4f0] sm:$0xff]  ;;  %v247_v12 = vld [vmem:[%s14279_s1 + $0x6b8] sm:$0xff]  ;;  %v8807_v49 = vcombine.low %v231_v16, %v239_v32 }
 0x31c   :  { %7390 = vmatmul.mubr.bf16.gmra.mrb[20].mxu0 %v10860_v3  ;;  %v8757_v54 = vcombine.low %v182_v40, %v190_v24  ;;  %v255_v9 = vld [vmem:[%s14279_s1 + $0x6f8] sm:$0xff] }
 0x31d   :  { %7602 = vmatmul.mubr.bf16.gmra.mrb[20].mxu1 %v10860_v3  ;;  %7617 = vmatpush1.bf16.msra.mxu0 %v8645_v53  ;;  %v8758_v53 = vcombine.high %v182_v40, %v190_v24  ;;  %v263_v29 = vld [vmem:[%s14279_s1 + $0x738] sm:$0xff]  ;;  %v8823_v63 = vcombine.low %v247_v12, %v255_v9 }
 0x31e   :  { %7829 = vmatpush1.bf16.msra.mxu1 %v8647_v28  ;;  %7618 = vmatprep.subr.bf16.mxu0 %v8662_v33  ;;  %v8760_v28 = vcombine.high %v183_v27, %v191_v52  ;;  %v198_v33 = vld [vmem:[%s14279_s1 + $0x530] sm:$0xff]  ;;  %v271_v11 = vld [vmem:[%s14279_s1 + $0x778] sm:$0xff] }
 0x31f   :  { %7830 = vmatprep.subr.bf16.mxu1 %v8664_v44  ;;  %7644 = vmatprep.mubr.bf16.mxu0 %v10012_v58  ;;  %v206_v44 = vld [vmem:[%s14279_s1 + $0x570] sm:$0xff]  ;;  %v279_v40 = vld [vmem:[%s14279_s1 + $0x7b8] sm:$0xff]  ;;  %v8839_v52 = vcombine.low %v263_v29, %v271_v11 }
 0x320   :  { %7856 = vmatprep.mubr.bf16.mxu1 %v10012_v58  ;;  %v135_v58 = vld [vmem:[%s14279_s1 + $0x338] sm:$0xff]  ;;  %v8773_v26 = vcombine.low %v198_v33, %v206_v44 }
 0x321   :  { %7619 = vmatpush1.bf16.msra.mxu0 %v8661_v19  ;;  %v8712_v61 = vcombine.high %v135_v58, %v143_v0  ;;  %v8711_v60 = vcombine.low %v135_v58, %v143_v0  ;;  %v8774_v19 = vcombine.high %v198_v33, %v206_v44  ;;  %v8791_v0 = vcombine.low %v215_v4, %v223_v55  ;;  %v287_v24 = vld [vmem:[%s14279_s1 + $0x7f8] sm:$0xff] }
 0x322   :  { %7831 = vmatpush1.bf16.msra.mxu1 %v8663_v20  ;;  %7620 = vmatprep.subr.bf16.mxu0 %v8678_v21  ;;  %v8776_v20 = vcombine.high %v199_v51, %v207_v1  ;;  %v214_v21 = vld [vmem:[%s14279_s1 + $0x5b0] sm:$0xff]  ;;  %v295_v33 = vld [vmem:[%s14279_s1 + $0x838] sm:$0xff]  ;;  %v8855_v1 = vcombine.low %v279_v40, %v287_v24 }
 0x323   :  { %7832 = vmatprep.subr.bf16.mxu1 %v8680_v38  ;;  %v222_v38 = vld [vmem:[%s14279_s1 + $0x5f0] sm:$0xff]  ;;  %v303_v44 = vld [vmem:[%s14279_s1 + $0x878] sm:$0xff] }
 0x324   :  { %v8789_v58 = vcombine.low %v214_v21, %v222_v38 }
 0x325   :  { %7621 = vmatpush1.bf16.msra.mxu0 %v8677_v50  ;;  %v8790_v50 = vcombine.high %v214_v21, %v222_v38  ;;  %v311_v21 = vld [vmem:[%s14279_s1 + $0x8b8] sm:$0xff] }
 0x326   :  { %7833 = vmatpush1.bf16.msra.mxu1 %v8679_v13  ;;  %7622 = vmatprep.subr.bf16.mxu0 %v8694_v57  ;;  %v8792_v13 = vcombine.high %v215_v4, %v223_v55  ;;  %v230_v57 = vld [vmem:[%s14279_s1 + $0x630] sm:$0xff]  ;;  %v319_v38 = vld [vmem:[%s14279_s1 + $0x8f8] sm:$0xff]  ;;  %v8871_v55 = vcombine.low %v295_v33, %v303_v44 }
 0x327   :  { %7834 = vmatprep.subr.bf16.mxu1 %v8696_v37  ;;  %v238_v37 = vld [vmem:[%s14279_s1 + $0x670] sm:$0xff] }
 0x328   :  { %v8805_v30 = vcombine.low %v230_v57, %v238_v37 }
 0x329   :  { %7623 = vmatpush1.bf16.msra.mxu0 %v8693_v18  ;;  %v8806_v18 = vcombine.high %v230_v57, %v238_v37  ;;  %v327_v57 = vld [vmem:[%s14279_s1 + $0x938] sm:$0xff] }
 0x32a   :  { %7835 = vmatpush1.bf16.msra.mxu1 %v8695_v17  ;;  %7624 = vmatprep.subr.bf16.mxu0 %v8710_v8  ;;  %v8808_v17 = vcombine.high %v231_v16, %v239_v32  ;;  %v246_v8 = vld [vmem:[%s14279_s1 + $0x6b0] sm:$0xff]  ;;  %v335_v37 = vld [vmem:[%s14279_s1 + $0x978] sm:$0xff]  ;;  %v8887_v32 = vcombine.low %v311_v21, %v319_v38 }
 0x32b   :  { %7836 = vmatprep.subr.bf16.mxu1 %v8712_v61  ;;  %v254_v61 = vld [vmem:[%s14279_s1 + $0x6f0] sm:$0xff] }
 0x32c   :  { %v8821_v25 = vcombine.low %v246_v8, %v254_v61 }
 0x32d   :  { %7625 = vmatpush1.bf16.msra.mxu0 %v8709_v6  ;;  %v8822_v6 = vcombine.high %v246_v8, %v254_v61  ;;  %v351_v8 = vld [vmem:[%s14279_s1 + $0x9f8] sm:$0xff] }
 0x32e   :  { %7837 = vmatpush1.bf16.msra.mxu1 %v8711_v60  ;;  %7626 = vmatprep.subr.bf16.mxu0 %v8726_v14  ;;  %v8824_v60 = vcombine.high %v247_v12, %v255_v9  ;;  %v262_v14 = vld [vmem:[%s14279_s1 + $0x730] sm:$0xff]  ;;  %v8903_v12 = vcombine.low %v327_v57, %v335_v37 }
 0x32f   :  { %7838 = vmatprep.subr.bf16.mxu1 %v8728_v62  ;;  %v270_v62 = vld [vmem:[%s14279_s1 + $0x770] sm:$0xff] }
 0x330   :  { %v8837_v27 = vcombine.low %v262_v14, %v270_v62 }
 0x331   :  { %7627 = vmatpush1.bf16.msra.mxu0 %v8725_v41  ;;  %v8838_v41 = vcombine.high %v262_v14, %v270_v62 }
 0x332   :  { %7839 = vmatpush1.bf16.msra.mxu1 %v8727_v48  ;;  %7628 = vmatprep.subr.bf16.mxu0 %v8742_v35  ;;  %v8840_v48 = vcombine.high %v263_v29, %v271_v11  ;;  %v278_v35 = vld [vmem:[%s14279_s1 + $0x7b0] sm:$0xff] }
 0x333   :  { %7840 = vmatprep.subr.bf16.mxu1 %v8744_v10  ;;  %v286_v10 = vld [vmem:[%s14279_s1 + $0x7f0] sm:$0xff] }
 0x334   :  { %v8853_v51 = vcombine.low %v278_v35, %v286_v10 }
 0x335   :  { %7629 = vmatpush1.bf16.msra.mxu0 %v8741_v59  ;;  %v8854_v59 = vcombine.high %v278_v35, %v286_v10 }
 0x336   :  { %7841 = vmatpush1.bf16.msra.mxu1 %v8743_v45  ;;  %7630 = vmatprep.subr.bf16.mxu0 %v8758_v53  ;;  %v8856_v45 = vcombine.high %v279_v40, %v287_v24  ;;  %v294_v53 = vld [vmem:[%s14279_s1 + $0x830] sm:$0xff] }
 0x337   :  { %7842 = vmatprep.subr.bf16.mxu1 %v8760_v28  ;;  %v302_v28 = vld [vmem:[%s14279_s1 + $0x870] sm:$0xff] }
 0x338   :  { %v8869_v4 = vcombine.low %v294_v53, %v302_v28  ;;  %v390_v24 = vld [vmem:[%s14279_s1 + $0xb30] sm:$0xff] }
 0x339   :  { %7631 = vmatpush1.bf16.msra.mxu0 %v8757_v54  ;;  %v8870_v54 = vcombine.high %v294_v53, %v302_v28 }
 0x33a   :  { %7843 = vmatpush1.bf16.msra.mxu1 %v8759_v47  ;;  %7632 = vmatprep.subr.bf16.mxu0 %v8774_v19  ;;  %v8872_v47 = vcombine.high %v295_v33, %v303_v44  ;;  %v310_v19 = vld [vmem:[%s14279_s1 + $0x8b0] sm:$0xff] }
 0x33b   :  { %7844 = vmatprep.subr.bf16.mxu1 %v8776_v20  ;;  %v318_v20 = vld [vmem:[%s14279_s1 + $0x8f0] sm:$0xff] }
 0x33c   :  { %v8885_v16 = vcombine.low %v310_v19, %v318_v20  ;;  %v406_v33 = vld [vmem:[%s14279_s1 + $0xbb0] sm:$0xff] }
 0x33d   :  { %7633 = vmatpush1.bf16.msra.mxu0 %v8773_v26  ;;  %v8886_v26 = vcombine.high %v310_v19, %v318_v20  ;;  %v414_v44 = vld [vmem:[%s14279_s1 + $0xbf0] sm:$0xff] }
 0x33e   :  { %7845 = vmatpush1.bf16.msra.mxu1 %v8775_v46  ;;  %7634 = vmatprep.subr.bf16.mxu0 %v8790_v50  ;;  %v8888_v46 = vcombine.high %v311_v21, %v319_v38  ;;  %v326_v50 = vld [vmem:[%s14279_s1 + $0x930] sm:$0xff]  ;;  %v8982_v19 = vcombine.high %v406_v33, %v414_v44 }
 0x33f   :  { %7846 = vmatprep.subr.bf16.mxu1 %v8792_v13  ;;  %v334_v13 = vld [vmem:[%s14279_s1 + $0x970] sm:$0xff] }
 0x340   :  { %v8901_v61 = vcombine.low %v326_v50, %v334_v13  ;;  %v422_v21 = vld [vmem:[%s14279_s1 + $0xc30] sm:$0xff] }
 0x341   :  { %7635 = vmatpush1.bf16.msra.mxu0 %v8789_v58  ;;  %v8902_v58 = vcombine.high %v326_v50, %v334_v13  ;;  %v430_v38 = vld [vmem:[%s14279_s1 + $0xc70] sm:$0xff] }
 0x342   :  { %7847 = vmatpush1.bf16.msra.mxu1 %v8791_v0  ;;  %7636 = vmatprep.subr.bf16.mxu0 %v8806_v18  ;;  %v8904_v0 = vcombine.high %v327_v57, %v335_v37  ;;  %v342_v18 = vld [vmem:[%s14279_s1 + $0x9b0] sm:$0xff]  ;;  %v8998_v50 = vcombine.high %v422_v21, %v430_v38 }
 0x343   :  { %7848 = vmatprep.subr.bf16.mxu1 %v8808_v17  ;;  %v350_v17 = vld [vmem:[%s14279_s1 + $0x9f0] sm:$0xff] }
 0x344   :  { %v8918_v9 = vcombine.high %v342_v18, %v350_v17  ;;  %v8917_v14 = vcombine.low %v342_v18, %v350_v17  ;;  %v438_v57 = vld [vmem:[%s14279_s1 + $0xcb0] sm:$0xff] }
 0x345   :  { %7637 = vmatpush1.bf16.msra.mxu0 %v8805_v30  ;;  %v446_v37 = vld [vmem:[%s14279_s1 + $0xcf0] sm:$0xff] }
 0x346   :  { %7849 = vmatpush1.bf16.msra.mxu1 %v8807_v49  ;;  %7638 = vmatprep.subr.bf16.mxu0 %v8822_v6  ;;  %v358_v49 = vld [vmem:[%s14279_s1 + $0xa30] sm:$0xff]  ;;  %v9014_v18 = vcombine.high %v438_v57, %v446_v37 }
 0x347   :  { %7850 = vmatprep.subr.bf16.mxu1 %v8824_v60  ;;  %v366_v6 = vld [vmem:[%s14279_s1 + $0xa70] sm:$0xff]  ;;  %v367_v60 = vld [vmem:[%s14279_s1 + $0xa78] sm:$0xff] }
 0x348   :  { %v8934_v29 = vcombine.high %v358_v49, %v366_v6 }
 0x349   :  { %7639 = vmatpush1.bf16.msra.mxu0 %v8821_v25  ;;  %v374_v25 = vld [vmem:[%s14279_s1 + $0xab0] sm:$0xff] }
 0x34a   :  { %7851 = vmatpush1.bf16.msra.mxu1 %v8823_v63  ;;  %7640 = vmatprep.subr.bf16.mxu0 %v8838_v41  ;;  %v382_v63 = vld [vmem:[%s14279_s1 + $0xaf0] sm:$0xff]  ;;  %v383_v41 = vld [vmem:[%s14279_s1 + $0xaf8] sm:$0xff] }
 0x34b   :  { %7852 = vmatprep.subr.bf16.mxu1 %v8840_v48  ;;  %v8933_v48 = vcombine.low %v358_v49, %v366_v6  ;;  %v8950_v10 = vcombine.high %v374_v25, %v382_v63 }
 0x34d   :  { %7641 = vmatpush1.bf16.msra.mxu0 %v8837_v27  ;;  %v398_v27 = vld [vmem:[%s14279_s1 + $0xb70] sm:$0xff] }
 0x34e   :  { %7853 = vmatpush1.bf16.msra.mxu1 %v8839_v52  ;;  %7642 = vmatprep.subr.bf16.mxu0 %v8854_v59  ;;  %v399_v52 = vld [vmem:[%s14279_s1 + $0xb78] sm:$0xff]  ;;  %v8949_v59 = vcombine.low %v374_v25, %v382_v63  ;;  %v8966_v53 = vcombine.high %v390_v24, %v398_v27 }
 0x34f   :  { %7854 = vmatprep.subr.bf16.mxu1 %v8856_v45 }
 0x351   :  { %7643 = vmatpush1.bf16.msra.mxu0 %v8853_v51  ;;  %v407_v51 = vld [vmem:[%s14279_s1 + $0xbb8] sm:$0xff] }
 0x352   :  { %7855 = vmatpush1.bf16.msra.mxu1 %v8855_v1  ;;  %7665 = vmatprep.subr.bf16.mxu0 %v8870_v54  ;;  %v415_v1 = vld [vmem:[%s14279_s1 + $0xbf8] sm:$0xff]  ;;  %v8965_v54 = vcombine.low %v390_v24, %v398_v27 }
 0x353   :  { %7877 = vmatprep.subr.bf16.mxu1 %v8872_v47  ;;  %v8984_v20 = vcombine.high %v407_v51, %v415_v1 }
 0x354   :  { %7645 = vmatmul.mubr.bf16.vlgmr.msra.gmra.mrb[24].mxu0 %v10141_v15 }
 0x355   :  { %7666 = vmatpush1.bf16.msra.mxu0 %v8869_v4  ;;  %7857 = vmatmul.mubr.bf16.vlgmr.msra.gmra.mrb[24].mxu1 %v10141_v15  ;;  %v343_v15 = vld [vmem:[%s14279_s1 + $0x9b8] sm:$0xff] }
 0x356   :  { %7878 = vmatpush1.bf16.msra.mxu1 %v8871_v55  ;;  %7667 = vmatprep.subr.bf16.mxu0 %v8886_v26  ;;  %v8920_v30 = vcombine.high %v343_v15, %v351_v8  ;;  %v8919_v62 = vcombine.low %v343_v15, %v351_v8  ;;  %v423_v4 = vld [vmem:[%s14279_s1 + $0xc38] sm:$0xff]  ;;  %v8981_v26 = vcombine.low %v406_v33, %v414_v44  ;;  %v454_v15 = vld [vmem:[%s14279_s1 + $0xd30] sm:$0xff] }
 0x357   :  { %7879 = vmatprep.subr.bf16.mxu1 %v8888_v46  ;;  %7654 = vmatprep.mubr.bf16.mxu0 %v10158_v23  ;;  %v431_v55 = vld [vmem:[%s14279_s1 + $0xc78] sm:$0xff]  ;;  %v8983_v46 = vcombine.low %v407_v51, %v415_v1  ;;  %v462_v8 = vld [vmem:[%s14279_s1 + $0xd70] sm:$0xff] }
 0x358   :  { %7866 = vmatprep.mubr.bf16.mxu1 %v10158_v23  ;;  %v359_v23 = vld [vmem:[%s14279_s1 + $0xa38] sm:$0xff]  ;;  %v9000_v13 = vcombine.high %v423_v4, %v431_v55  ;;  %v9030_v49 = vcombine.high %v454_v15, %v462_v8  ;;  %v518_v51 = vld [vmem:[%s14279_s1 + $0xf30] sm:$0xff] }
 0x359   :  { %7668 = vmatpush1.bf16.msra.mxu0 %v8885_v16  ;;  %v8936_v11 = vcombine.high %v359_v23, %v367_v60  ;;  %v8935_v35 = vcombine.low %v359_v23, %v367_v60  ;;  %v439_v16 = vld [vmem:[%s14279_s1 + $0xcb8] sm:$0xff]  ;;  %v470_v23 = vld [vmem:[%s14279_s1 + $0xdb0] sm:$0xff] }
 0x35a   :  { %7880 = vmatpush1.bf16.msra.mxu1 %v8887_v32  ;;  %7669 = vmatprep.subr.bf16.mxu0 %v8902_v58  ;;  %v447_v32 = vld [vmem:[%s14279_s1 + $0xcf8] sm:$0xff]  ;;  %v8997_v58 = vcombine.low %v422_v21, %v430_v38  ;;  %v478_v60 = vld [vmem:[%s14279_s1 + $0xdf0] sm:$0xff] }
 0x35b   :  { %7881 = vmatprep.subr.bf16.mxu1 %v8904_v0  ;;  %v8999_v0 = vcombine.low %v423_v4, %v431_v55  ;;  %v9016_v17 = vcombine.high %v439_v16, %v447_v32  ;;  %v9046_v25 = vcombine.high %v470_v23, %v478_v60  ;;  %v526_v1 = vld [vmem:[%s14279_s1 + $0xf70] sm:$0xff] }
 0x35c   :  { %7655 = vmatmul.mubr.bf16.gmra.mrb[28].mxu0 %v10182_v34  ;;  %v9094_v21 = vcombine.high %v518_v51, %v526_v1  ;;  %v534_v4 = vld [vmem:[%s14279_s1 + $0xfb0] sm:$0xff] }
 0x35d   :  { %7670 = vmatpush1.bf16.msra.mxu0 %v8901_v61  ;;  %7867 = vmatmul.mubr.bf16.gmra.mrb[28].mxu1 %v10182_v34  ;;  %v375_v34 = vld [vmem:[%s14279_s1 + $0xab8] sm:$0xff]  ;;  %v542_v55 = vld [vmem:[%s14279_s1 + $0xff0] sm:$0xff] }
 0x35e   :  { %7882 = vmatpush1.bf16.msra.mxu1 %v8903_v12  ;;  %7671 = vmatprep.subr.bf16.mxu0 %v8918_v9  ;;  %v8952_v40 = vcombine.high %v375_v34, %v383_v41  ;;  %v8951_v45 = vcombine.low %v375_v34, %v383_v41  ;;  %v455_v61 = vld [vmem:[%s14279_s1 + $0xd38] sm:$0xff]  ;;  %v9013_v9 = vcombine.low %v438_v57, %v446_v37  ;;  %v486_v34 = vld [vmem:[%s14279_s1 + $0xe30] sm:$0xff] }
 0x35f   :  { %7883 = vmatprep.subr.bf16.mxu1 %v8920_v30  ;;  %7697 = vmatprep.mubr.bf16.mxu0 %v10202_v43  ;;  %v463_v12 = vld [vmem:[%s14279_s1 + $0xd78] sm:$0xff]  ;;  %v9015_v30 = vcombine.low %v439_v16, %v447_v32  ;;  %v494_v41 = vld [vmem:[%s14279_s1 + $0xe70] sm:$0xff]  ;;  %v9110_v57 = vcombine.high %v534_v4, %v542_v55 }
 0x360   :  { %7909 = vmatprep.mubr.bf16.mxu1 %v10202_v43  ;;  %v391_v43 = vld [vmem:[%s14279_s1 + $0xb38] sm:$0xff]  ;;  %v9032_v6 = vcombine.high %v455_v61, %v463_v12  ;;  %v9062_v24 = vcombine.high %v486_v34, %v494_v41  ;;  %v550_v16 = vld [vmem:[%s14279_s1 + $0x1030] sm:$0xff] }
 0x361   :  { %7672 = vmatpush1.bf16.msra.mxu0 %v8917_v14  ;;  %v8968_v28 = vcombine.high %v391_v43, %v399_v52  ;;  %v8967_v47 = vcombine.low %v391_v43, %v399_v52  ;;  %v471_v14 = vld [vmem:[%s14279_s1 + $0xdb8] sm:$0xff]  ;;  %v502_v43 = vld [vmem:[%s14279_s1 + $0xeb0] sm:$0xff] }
 0x362   :  { %7884 = vmatpush1.bf16.msra.mxu1 %v8919_v62  ;;  %7673 = vmatprep.subr.bf16.mxu0 %v8934_v29  ;;  %v479_v62 = vld [vmem:[%s14279_s1 + $0xdf8] sm:$0xff]  ;;  %v9029_v29 = vcombine.low %v454_v15, %v462_v8  ;;  %v510_v52 = vld [vmem:[%s14279_s1 + $0xef0] sm:$0xff] }
 0x363   :  { %7885 = vmatprep.subr.bf16.mxu1 %v8936_v11  ;;  %v9031_v11 = vcombine.low %v455_v61, %v463_v12  ;;  %v9048_v63 = vcombine.high %v471_v14, %v479_v62  ;;  %v9078_v33 = vcombine.high %v502_v43, %v510_v52  ;;  %v558_v32 = vld [vmem:[%s14279_s1 + $0x1070] sm:$0xff] }
 0x364   :  { %v9126_v15 = vcombine.high %v550_v16, %v558_v32  ;;  %v566_v61 = vld [vmem:[%s14279_s1 + $0x10b0] sm:$0xff] }
 0x365   :  { %7674 = vmatpush1.bf16.msra.mxu0 %v8933_v48  ;;  %v487_v48 = vld [vmem:[%s14279_s1 + $0xe38] sm:$0xff]  ;;  %v574_v12 = vld [vmem:[%s14279_s1 + $0x10f0] sm:$0xff] }
 0x366   :  { %7886 = vmatpush1.bf16.msra.mxu1 %v8935_v35  ;;  %7675 = vmatprep.subr.bf16.mxu0 %v8950_v10  ;;  %v495_v35 = vld [vmem:[%s14279_s1 + $0xe78] sm:$0xff]  ;;  %v9045_v10 = vcombine.low %v470_v23, %v478_v60  ;;  %v9142_v23 = vcombine.high %v566_v61, %v574_v12 }
 0x367   :  { %7887 = vmatprep.subr.bf16.mxu1 %v8952_v40  ;;  %v9047_v40 = vcombine.low %v471_v14, %v479_v62  ;;  %v9064_v27 = vcombine.high %v487_v48, %v495_v35  ;;  %v582_v14 = vld [vmem:[%s14279_s1 + $0x1130] sm:$0xff] }
 0x368   :  { %v590_v62 = vld [vmem:[%s14279_s1 + $0x1170] sm:$0xff] }
 0x369   :  { %7676 = vmatpush1.bf16.msra.mxu0 %v8949_v59  ;;  %v503_v59 = vld [vmem:[%s14279_s1 + $0xeb8] sm:$0xff] }
 0x36a   :  { %7888 = vmatpush1.bf16.msra.mxu1 %v8951_v45  ;;  %7677 = vmatprep.subr.bf16.mxu0 %v8966_v53  ;;  %v511_v45 = vld [vmem:[%s14279_s1 + $0xef8] sm:$0xff]  ;;  %v9061_v53 = vcombine.low %v486_v34, %v494_v41  ;;  %v9158_v34 = vcombine.high %v582_v14, %v590_v62 }
 0x36b   :  { %7889 = vmatprep.subr.bf16.mxu1 %v8968_v28  ;;  %v9063_v28 = vcombine.low %v487_v48, %v495_v35  ;;  %v9080_v44 = vcombine.high %v503_v59, %v511_v45  ;;  %v598_v48 = vld [vmem:[%s14279_s1 + $0x11b0] sm:$0xff] }
 0x36c   :  { %v606_v35 = vld [vmem:[%s14279_s1 + $0x11f0] sm:$0xff] }
 0x36d   :  { %7678 = vmatpush1.bf16.msra.mxu0 %v8965_v54  ;;  %v519_v54 = vld [vmem:[%s14279_s1 + $0xf38] sm:$0xff] }
 0x36e   :  { %7890 = vmatpush1.bf16.msra.mxu1 %v8967_v47  ;;  %7679 = vmatprep.subr.bf16.mxu0 %v8982_v19  ;;  %v527_v47 = vld [vmem:[%s14279_s1 + $0xf78] sm:$0xff]  ;;  %v9077_v19 = vcombine.low %v502_v43, %v510_v52  ;;  %v614_v52 = vld [vmem:[%s14279_s1 + $0x1230] sm:$0xff] }
 0x36f   :  { %7891 = vmatprep.subr.bf16.mxu1 %v8984_v20  ;;  %v9079_v20 = vcombine.low %v503_v59, %v511_v45  ;;  %v9096_v38 = vcombine.high %v519_v54, %v527_v47  ;;  %v622_v59 = vld [vmem:[%s14279_s1 + $0x1270] sm:$0xff]  ;;  %v623_v45 = vld [vmem:[%s14279_s1 + $0x1278] sm:$0xff] }
 0x371   :  { %7680 = vmatpush1.bf16.msra.mxu0 %v8981_v26  ;;  %v535_v26 = vld [vmem:[%s14279_s1 + $0xfb8] sm:$0xff] }
 0x372   :  { %7892 = vmatpush1.bf16.msra.mxu1 %v8983_v46  ;;  %7681 = vmatprep.subr.bf16.mxu0 %v8998_v50  ;;  %v543_v46 = vld [vmem:[%s14279_s1 + $0xff8] sm:$0xff]  ;;  %v9093_v50 = vcombine.low %v518_v51, %v526_v1  ;;  %v630_v51 = vld [vmem:[%s14279_s1 + $0x12b0] sm:$0xff] }
 0x373   :  { %7893 = vmatprep.subr.bf16.mxu1 %v9000_v13  ;;  %v9095_v13 = vcombine.low %v519_v54, %v527_v47  ;;  %v9112_v37 = vcombine.high %v535_v26, %v543_v46  ;;  %v638_v1 = vld [vmem:[%s14279_s1 + $0x12f0] sm:$0xff]  ;;  %v639_v54 = vld [vmem:[%s14279_s1 + $0x12f8] sm:$0xff]  ;;  %v9189_v47 = vcombine.low %v614_v52, %v622_v59 }
 0x375   :  { %7682 = vmatpush1.bf16.msra.mxu0 %v8997_v58  ;;  %v551_v58 = vld [vmem:[%s14279_s1 + $0x1038] sm:$0xff] }
 0x376   :  { %7894 = vmatpush1.bf16.msra.mxu1 %v8999_v0  ;;  %7683 = vmatprep.subr.bf16.mxu0 %v9014_v18  ;;  %v559_v0 = vld [vmem:[%s14279_s1 + $0x1078] sm:$0xff]  ;;  %v9109_v18 = vcombine.low %v534_v4, %v542_v55  ;;  %v654_v4 = vld [vmem:[%s14279_s1 + $0x1370] sm:$0xff] }
 0x377   :  { %7895 = vmatprep.subr.bf16.mxu1 %v9016_v17  ;;  %v9111_v17 = vcombine.low %v535_v26, %v543_v46  ;;  %v9128_v8 = vcombine.high %v551_v58, %v559_v0  ;;  %v655_v55 = vld [vmem:[%s14279_s1 + $0x1378] sm:$0xff]  ;;  %v9205_v26 = vcombine.low %v630_v51, %v638_v1 }
 0x379   :  { %7684 = vmatpush1.bf16.msra.mxu0 %v9013_v9  ;;  %v567_v9 = vld [vmem:[%s14279_s1 + $0x10b8] sm:$0xff] }
 0x37a   :  { %7896 = vmatpush1.bf16.msra.mxu1 %v9015_v30  ;;  %7685 = vmatprep.subr.bf16.mxu0 %v9030_v49  ;;  %v575_v30 = vld [vmem:[%s14279_s1 + $0x10f8] sm:$0xff]  ;;  %v9125_v49 = vcombine.low %v550_v16, %v558_v32 }
 0x37b   :  { %7897 = vmatprep.subr.bf16.mxu1 %v9032_v6  ;;  %v9127_v6 = vcombine.low %v551_v58, %v559_v0  ;;  %v9144_v60 = vcombine.high %v567_v9, %v575_v30  ;;  %v663_v16 = vld [vmem:[%s14279_s1 + $0x13b8] sm:$0xff] }
 0x37c   :  { %v671_v32 = vld [vmem:[%s14279_s1 + $0x13f8] sm:$0xff] }
 0x37d   :  { %7686 = vmatpush1.bf16.msra.mxu0 %v9029_v29  ;;  %v583_v29 = vld [vmem:[%s14279_s1 + $0x1138] sm:$0xff] }
 0x37e   :  { %7898 = vmatpush1.bf16.msra.mxu1 %v9031_v11  ;;  %7687 = vmatprep.subr.bf16.mxu0 %v9046_v25  ;;  %v591_v11 = vld [vmem:[%s14279_s1 + $0x1178] sm:$0xff]  ;;  %v9141_v25 = vcombine.low %v566_v61, %v574_v12 }
 0x37f   :  { %7899 = vmatprep.subr.bf16.mxu1 %v9048_v63  ;;  %v9143_v63 = vcombine.low %v567_v9, %v575_v30  ;;  %v9160_v41 = vcombine.high %v583_v29, %v591_v11  ;;  %v679_v61 = vld [vmem:[%s14279_s1 + $0x1438] sm:$0xff]  ;;  %v9239_v30 = vcombine.low %v663_v16, %v671_v32 }
 0x380   :  { %v687_v12 = vld [vmem:[%s14279_s1 + $0x1478] sm:$0xff] }
 0x381   :  { %7688 = vmatpush1.bf16.msra.mxu0 %v9045_v10  ;;  %v607_v10 = vld [vmem:[%s14279_s1 + $0x11f8] sm:$0xff] }
 0x382   :  { %7900 = vmatpush1.bf16.msra.mxu1 %v9047_v40  ;;  %7689 = vmatprep.subr.bf16.mxu0 %v9062_v24  ;;  %v9157_v40 = vcombine.low %v582_v14, %v590_v62  ;;  %v9159_v24 = vcombine.low %v583_v29, %v591_v11  ;;  %v695_v14 = vld [vmem:[%s14279_s1 + $0x14b8] sm:$0xff]  ;;  %v9255_v11 = vcombine.low %v679_v61, %v687_v12 }
 0x383   :  { %7901 = vmatprep.subr.bf16.mxu1 %v9064_v27  ;;  %v9174_v27 = vcombine.high %v598_v48, %v606_v35  ;;  %v703_v62 = vld [vmem:[%s14279_s1 + $0x14f8] sm:$0xff] }
 0x385   :  { %7690 = vmatpush1.bf16.msra.mxu0 %v9061_v53  ;;  %v9173_v53 = vcombine.low %v598_v48, %v606_v35  ;;  %v711_v48 = vld [vmem:[%s14279_s1 + $0x1538] sm:$0xff] }
 0x386   :  { %7902 = vmatpush1.bf16.msra.mxu1 %v9063_v28  ;;  %7691 = vmatprep.subr.bf16.mxu0 %v9078_v33  ;;  %v9190_v33 = vcombine.high %v614_v52, %v622_v59  ;;  %v719_v35 = vld [vmem:[%s14279_s1 + $0x1578] sm:$0xff] }
 0x387   :  { %7903 = vmatprep.subr.bf16.mxu1 %v9080_v44  ;;  %v727_v52 = vld [vmem:[%s14279_s1 + $0x15b8] sm:$0xff] }
 0x388   :  { %v735_v59 = vld [vmem:[%s14279_s1 + $0x15f8] sm:$0xff] }
 0x389   :  { %7692 = vmatpush1.bf16.msra.mxu0 %v9077_v19 }
 0x38a   :  { %7904 = vmatpush1.bf16.msra.mxu1 %v9079_v20  ;;  %7693 = vmatprep.subr.bf16.mxu0 %v9094_v21  ;;  %v9206_v20 = vcombine.high %v630_v51, %v638_v1  ;;  %v743_v51 = vld [vmem:[%s14279_s1 + $0x1638] sm:$0xff] }
 0x38b   :  { %7905 = vmatprep.subr.bf16.mxu1 %v9096_v38  ;;  %v646_v38 = vld [vmem:[%s14279_s1 + $0x1330] sm:$0xff]  ;;  %v751_v1 = vld [vmem:[%s14279_s1 + $0x1678] sm:$0xff] }
 0x38c   :  { %v9221_v58 = vcombine.low %v646_v38, %v654_v4 }
 0x38d   :  { %7694 = vmatpush1.bf16.msra.mxu0 %v9093_v50  ;;  %v9222_v50 = vcombine.high %v646_v38, %v654_v4  ;;  %v759_v38 = vld [vmem:[%s14279_s1 + $0x16b8] sm:$0xff] }
 0x38e   :  { %7906 = vmatpush1.bf16.msra.mxu1 %v9095_v13  ;;  %7695 = vmatprep.subr.bf16.mxu0 %v9110_v57  ;;  %v662_v57 = vld [vmem:[%s14279_s1 + $0x13b0] sm:$0xff]  ;;  %v767_v4 = vld [vmem:[%s14279_s1 + $0x16f8] sm:$0xff] }
 0x38f   :  { %7907 = vmatprep.subr.bf16.mxu1 %v9112_v37  ;;  %v670_v37 = vld [vmem:[%s14279_s1 + $0x13f0] sm:$0xff] }
 0x390   :  { %v9237_v9 = vcombine.low %v662_v57, %v670_v37 }
 0x391   :  { %7696 = vmatpush1.bf16.msra.mxu0 %v9109_v18  ;;  %v9238_v18 = vcombine.high %v662_v57, %v670_v37  ;;  %v775_v57 = vld [vmem:[%s14279_s1 + $0x1738] sm:$0xff] }
 0x392   :  { %7908 = vmatpush1.bf16.msra.mxu1 %v9111_v17  ;;  %7718 = vmatprep.subr.bf16.mxu0 %v9126_v15  ;;  %v9240_v17 = vcombine.high %v663_v16, %v671_v32  ;;  %v678_v15 = vld [vmem:[%s14279_s1 + $0x1430] sm:$0xff]  ;;  %v783_v37 = vld [vmem:[%s14279_s1 + $0x1778] sm:$0xff]  ;;  %v9335_v32 = vcombine.low %v759_v38, %v767_v4 }
 0x393   :  { %7930 = vmatprep.subr.bf16.mxu1 %v9128_v8  ;;  %v686_v8 = vld [vmem:[%s14279_s1 + $0x1470] sm:$0xff] }
 0x394   :  { %7698 = vmatmul.mubr.bf16.vlgmr.msra.gmra.mrb[24].mxu0 %v10369_v31  ;;  %v9253_v29 = vcombine.low %v678_v15, %v686_v8 }
 0x395   :  { %7719 = vmatpush1.bf16.msra.mxu0 %v9125_v49  ;;  %7910 = vmatmul.mubr.bf16.vlgmr.msra.gmra.mrb[24].mxu1 %v10369_v31  ;;  %v599_v31 = vld [vmem:[%s14279_s1 + $0x11b8] sm:$0xff]  ;;  %v9254_v49 = vcombine.high %v678_v15, %v686_v8 }
 0x396   :  { %7931 = vmatpush1.bf16.msra.mxu1 %v9127_v6  ;;  %7720 = vmatprep.subr.bf16.mxu0 %v9142_v23  ;;  %v9176_v43 = vcombine.high %v599_v31, %v607_v10  ;;  %v9175_v28 = vcombine.low %v599_v31, %v607_v10  ;;  %v9256_v6 = vcombine.high %v679_v61, %v687_v12  ;;  %v694_v23 = vld [vmem:[%s14279_s1 + $0x14b0] sm:$0xff]  ;;  %v791_v15 = vld [vmem:[%s14279_s1 + $0x17b8] sm:$0xff] }
 0x397   :  { %7932 = vmatprep.subr.bf16.mxu1 %v9144_v60  ;;  %7707 = vmatprep.mubr.bf16.mxu0 %v10386_v42  ;;  %v702_v60 = vld [vmem:[%s14279_s1 + $0x14f0] sm:$0xff]  ;;  %v9271_v10 = vcombine.low %v695_v14, %v703_v62  ;;  %v799_v8 = vld [vmem:[%s14279_s1 + $0x17f8] sm:$0xff]  ;;  %v9351_v12 = vcombine.low %v775_v57, %v783_v37 }
 0x398   :  { %7919 = vmatprep.mubr.bf16.mxu1 %v10386_v42  ;;  %v615_v42 = vld [vmem:[%s14279_s1 + $0x1238] sm:$0xff]  ;;  %v9269_v31 = vcombine.low %v694_v23, %v702_v60 }
 0x399   :  { %7721 = vmatpush1.bf16.msra.mxu0 %v9141_v25  ;;  %v9192_v44 = vcombine.high %v615_v42, %v623_v45  ;;  %v9191_v19 = vcombine.low %v615_v42, %v623_v45  ;;  %v9270_v25 = vcombine.high %v694_v23, %v702_v60  ;;  %v9287_v45 = vcombine.low %v711_v48, %v719_v35  ;;  %v807_v23 = vld [vmem:[%s14279_s1 + $0x1838] sm:$0xff] }
 0x39a   :  { %7933 = vmatpush1.bf16.msra.mxu1 %v9143_v63  ;;  %7722 = vmatprep.subr.bf16.mxu0 %v9158_v34  ;;  %v9272_v63 = vcombine.high %v695_v14, %v703_v62  ;;  %v710_v34 = vld [vmem:[%s14279_s1 + $0x1530] sm:$0xff]  ;;  %v815_v60 = vld [vmem:[%s14279_s1 + $0x1878] sm:$0xff]  ;;  %v9367_v62 = vcombine.low %v791_v15, %v799_v8 }
 0x39b   :  { %7934 = vmatprep.subr.bf16.mxu1 %v9160_v41  ;;  %v718_v41 = vld [vmem:[%s14279_s1 + $0x1570] sm:$0xff] }
 0x39c   :  { %7708 = vmatmul.mubr.bf16.gmra.mrb[28].mxu0 %v10410_v56  ;;  %v9285_v42 = vcombine.low %v710_v34, %v718_v41 }
 0x39d   :  { %7723 = vmatpush1.bf16.msra.mxu0 %v9157_v40  ;;  %7920 = vmatmul.mubr.bf16.gmra.mrb[28].mxu1 %v10410_v56  ;;  %v631_v56 = vld [vmem:[%s14279_s1 + $0x12b8] sm:$0xff]  ;;  %v9286_v40 = vcombine.high %v710_v34, %v718_v41 }
 0x39e   :  { %7935 = vmatpush1.bf16.msra.mxu1 %v9159_v24  ;;  %7724 = vmatprep.subr.bf16.mxu0 %v9174_v27  ;;  %v9208_v21 = vcombine.high %v631_v56, %v639_v54  ;;  %v9207_v46 = vcombine.low %v631_v56, %v639_v54  ;;  %v9288_v24 = vcombine.high %v711_v48, %v719_v35  ;;  %v726_v27 = vld [vmem:[%s14279_s1 + $0x15b0] sm:$0xff]  ;;  %v823_v34 = vld [vmem:[%s14279_s1 + $0x18b8] sm:$0xff] }
 0x39f   :  { %7936 = vmatprep.subr.bf16.mxu1 %v9176_v43  ;;  %7750 = vmatprep.mubr.bf16.mxu0 %v10430_v2  ;;  %v734_v43 = vld [vmem:[%s14279_s1 + $0x15f0] sm:$0xff]  ;;  %v9303_v54 = vcombine.low %v727_v52, %v735_v59  ;;  %v831_v41 = vld [vmem:[%s14279_s1 + $0x18f8] sm:$0xff]  ;;  %v9383_v35 = vcombine.low %v807_v23, %v815_v60 }
 0x3a0   :  { %7962 = vmatprep.mubr.bf16.mxu1 %v10430_v2  ;;  %v647_v2 = vld [vmem:[%s14279_s1 + $0x1338] sm:$0xff]  ;;  %v9301_v56 = vcombine.low %v726_v27, %v734_v43 }
 0x3a1   :  { %7725 = vmatpush1.bf16.msra.mxu0 %v9173_v53  ;;  %v9224_v13 = vcombine.high %v647_v2, %v655_v55  ;;  %v9223_v0 = vcombine.low %v647_v2, %v655_v55  ;;  %v9302_v53 = vcombine.high %v726_v27, %v734_v43  ;;  %v9319_v55 = vcombine.low %v743_v51, %v751_v1  ;;  %v839_v27 = vld [vmem:[%s14279_s1 + $0x1938] sm:$0xff] }
 0x3a2   :  { %7937 = vmatpush1.bf16.msra.mxu1 %v9175_v28  ;;  %7726 = vmatprep.subr.bf16.mxu0 %v9190_v33  ;;  %v9304_v28 = vcombine.high %v727_v52, %v735_v59  ;;  %v742_v33 = vld [vmem:[%s14279_s1 + $0x1630] sm:$0xff]  ;;  %v847_v43 = vld [vmem:[%s14279_s1 + $0x1978] sm:$0xff]  ;;  %v9399_v59 = vcombine.low %v823_v34, %v831_v41 }
 0x3a3   :  { %7938 = vmatprep.subr.bf16.mxu1 %v9192_v44  ;;  %v750_v44 = vld [vmem:[%s14279_s1 + $0x1670] sm:$0xff] }
 0x3a4   :  { %v9317_v2 = vcombine.low %v742_v33, %v750_v44 }
 0x3a5   :  { %7727 = vmatpush1.bf16.msra.mxu0 %v9189_v47  ;;  %v9318_v47 = vcombine.high %v742_v33, %v750_v44  ;;  %v863_v33 = vld [vmem:[%s14279_s1 + $0x19f8] sm:$0xff] }
 0x3a6   :  { %7939 = vmatpush1.bf16.msra.mxu1 %v9191_v19  ;;  %7728 = vmatprep.subr.bf16.mxu0 %v9206_v20  ;;  %v9320_v19 = vcombine.high %v743_v51, %v751_v1  ;;  %v758_v20 = vld [vmem:[%s14279_s1 + $0x16b0] sm:$0xff]  ;;  %v9415_v51 = vcombine.low %v839_v27, %v847_v43 }
 0x3a7   :  { %7940 = vmatprep.subr.bf16.mxu1 %v9208_v21  ;;  %v766_v21 = vld [vmem:[%s14279_s1 + $0x16f0] sm:$0xff] }
 0x3a8   :  { %v9333_v16 = vcombine.low %v758_v20, %v766_v21 }
 0x3a9   :  { %7729 = vmatpush1.bf16.msra.mxu0 %v9205_v26  ;;  %v9334_v26 = vcombine.high %v758_v20, %v766_v21  ;;  %v14361_v20 = vld [vmem:[#allocation4_spill] sm:$0xff] }
 0x3aa   :  { %7941 = vmatpush1.bf16.msra.mxu1 %v9207_v46  ;;  %7730 = vmatprep.subr.bf16.mxu0 %v9222_v50  ;;  %v9336_v46 = vcombine.high %v759_v38, %v767_v4  ;;  %v774_v50 = vld [vmem:[%s14279_s1 + $0x1730] sm:$0xff]  ;;  %v13740_v38 = vld [vmem:[%s14281_s2 + $0x8] sm:$0xff] }
 0x3ab   :  { %7942 = vmatprep.subr.bf16.mxu1 %v9224_v13  ;;  %v782_v13 = vld [vmem:[%s14279_s1 + $0x1770] sm:$0xff] }
 0x3ac   :  { %v9349_v61 = vcombine.low %v774_v50, %v782_v13 }
 0x3ad   :  { %7731 = vmatpush1.bf16.msra.mxu0 %v9221_v58  ;;  %v9350_v58 = vcombine.high %v774_v50, %v782_v13  ;;  %v13762_v13 = vld [vmem:[%s14279_s1 + $0x1af8] sm:$0xff] }
 0x3ae   :  { %7943 = vmatpush1.bf16.msra.mxu1 %v9223_v0  ;;  %7732 = vmatprep.subr.bf16.mxu0 %v9238_v18  ;;  %v9352_v0 = vcombine.high %v775_v57, %v783_v37  ;;  %v790_v18 = vld [vmem:[%s14279_s1 + $0x17b0] sm:$0xff] }
 0x3af   :  { %7944 = vmatprep.subr.bf16.mxu1 %v9240_v17  ;;  %v798_v17 = vld [vmem:[%s14279_s1 + $0x17f0] sm:$0xff] }
 0x3b0   :  { %v9365_v14 = vcombine.low %v790_v18, %v798_v17  ;;  %v13767_v57 = vld [vmem:[%s14279_s1 + $0x1b30] sm:$0xff] }
 0x3b1   :  { %7733 = vmatpush1.bf16.msra.mxu0 %v9237_v9  ;;  %v9366_v9 = vcombine.high %v790_v18, %v798_v17  ;;  %v13772_v37 = vld [vmem:[%s14279_s1 + $0x1b70] sm:$0xff] }
 0x3b2   :  { %7945 = vmatpush1.bf16.msra.mxu1 %v9239_v30  ;;  %7734 = vmatprep.subr.bf16.mxu0 %v9254_v49  ;;  %v9368_v30 = vcombine.high %v791_v15, %v799_v8  ;;  %v806_v49 = vld [vmem:[%s14279_s1 + $0x1830] sm:$0xff]  ;;  %v14363_v15 = vld [vmem:[#allocation6_spill] sm:$0xff] }
 0x3b3   :  { %7946 = vmatprep.subr.bf16.mxu1 %v9256_v6  ;;  %v814_v6 = vld [vmem:[%s14279_s1 + $0x1870] sm:$0xff]  ;;  %v14364_v8 = vsub.s32 0, %v14363_v15 }
 0x3b4   :  { %v9381_v48 = vcombine.low %v806_v49, %v814_v6 }
 0x3b5   :  { %7735 = vmatpush1.bf16.msra.mxu0 %v9253_v29  ;;  %v9382_v29 = vcombine.high %v806_v49, %v814_v6  ;;  %v13810_v49 = vld [vmem:[%s14279_s1 + $0x1bb8] sm:$0xff] }
 0x3b6   :  { %7947 = vmatpush1.bf16.msra.mxu1 %v9255_v11  ;;  %7736 = vmatprep.subr.bf16.mxu0 %v9270_v25  ;;  %v9384_v11 = vcombine.high %v807_v23, %v815_v60  ;;  %v822_v25 = vld [vmem:[%s14279_s1 + $0x18b0] sm:$0xff]  ;;  %v13815_v6 = vld [vmem:[%s14279_s1 + $0x1bf8] sm:$0xff]  ;;  %v14366_v23 = vsub.s32 1, %v14363_v15 }
 0x3b7   :  { %7948 = vmatprep.subr.bf16.mxu1 %v9272_v63  ;;  %v830_v63 = vld [vmem:[%s14279_s1 + $0x18f0] sm:$0xff] }
 0x3b8   :  { %v9397_v52 = vcombine.low %v822_v25, %v830_v63  ;;  %v13820_v60 = vrot.slane %v13740_v38, %v14366_v23 }
 0x3b9   :  { %7737 = vmatpush1.bf16.msra.mxu0 %v9269_v31  ;;  %v9398_v31 = vcombine.high %v822_v25, %v830_v63  ;;  %v13837_v25 = vld [vmem:[%s14279_s1 + $0x1c70] sm:$0xff]  ;;  %v13842_v63 = vld [vmem:[%s14279_s1 + $0x1c38] sm:$0xff] }
 0x3ba   :  { %7949 = vmatpush1.bf16.msra.mxu1 %v9271_v10  ;;  %7738 = vmatprep.subr.bf16.mxu0 %v9286_v40  ;;  %v9400_v10 = vcombine.high %v823_v34, %v831_v41  ;;  %v838_v40 = vld [vmem:[%s14279_s1 + $0x1930] sm:$0xff] }
 0x3bb   :  { %7950 = vmatprep.subr.bf16.mxu1 %v9288_v24  ;;  %v846_v24 = vld [vmem:[%s14279_s1 + $0x1970] sm:$0xff] }
 0x3bc   :  { %v9413_v44 = vcombine.low %v838_v40, %v846_v24 }
 0x3bd   :  { %7739 = vmatpush1.bf16.msra.mxu0 %v9285_v42  ;;  %v9414_v42 = vcombine.high %v838_v40, %v846_v24  ;;  %v13865_v40 = vld [vmem:[%s14279_s1 + $0x1cf0] sm:$0xff]  ;;  %v9477_v24 = vcombine.low %v13767_v57, %v13772_v37 }
 0x3be   :  { %7951 = vmatpush1.bf16.msra.mxu1 %v9287_v45  ;;  %7740 = vmatprep.subr.bf16.mxu0 %v9302_v53  ;;  %v9416_v45 = vcombine.high %v839_v27, %v847_v43  ;;  %v854_v53 = vld [vmem:[%s14279_s1 + $0x19b0] sm:$0xff] }
 0x3bf   :  { %7952 = vmatprep.subr.bf16.mxu1 %v9304_v28  ;;  %v862_v28 = vld [vmem:[%s14279_s1 + $0x19f0] sm:$0xff] }
 0x3c0   :  { %v9430_v1 = vcombine.high %v854_v53, %v862_v28  ;;  %v9429_v21 = vcombine.low %v854_v53, %v862_v28  ;;  %v9495_v28 = vcombine.low %v13810_v49, %v13815_v6 }
 0x3c1   :  { %7741 = vmatpush1.bf16.msra.mxu0 %v9301_v56 }
 0x3c2   :  { %7953 = vmatpush1.bf16.msra.mxu1 %v9303_v54  ;;  %7742 = vmatprep.subr.bf16.mxu0 %v9318_v47  ;;  %v870_v54 = vld [vmem:[%s14279_s1 + $0x1a30] sm:$0xff] }
 0x3c3   :  { %7954 = vmatprep.subr.bf16.mxu1 %v9320_v19  ;;  %v878_v47 = vld [vmem:[%s14279_s1 + $0x1a70] sm:$0xff]  ;;  %v879_v19 = vld [vmem:[%s14279_s1 + $0x1a78] sm:$0xff] }
 0x3c4   :  { %v9445_v18 = vcombine.low %v870_v54, %v878_v47 }
 0x3c5   :  { %7743 = vmatpush1.bf16.msra.mxu0 %v9317_v2  ;;  %v9446_v2 = vcombine.high %v870_v54, %v878_v47 }
 0x3c6   :  { %7955 = vmatpush1.bf16.msra.mxu1 %v9319_v55  ;;  %7744 = vmatprep.subr.bf16.mxu0 %v9334_v26  ;;  %v13746_v55 = vld [vmem:[%s14279_s1 + $0x1ab0] sm:$0xff] }
 0x3c7   :  { %7956 = vmatprep.subr.bf16.mxu1 %v9336_v46  ;;  %v13751_v26 = vld [vmem:[%s14279_s1 + $0x1af0] sm:$0xff]  ;;  %v13756_v46 = vld [vmem:[%s14279_s1 + $0x1ab8] sm:$0xff] }
 0x3c8   :  { %v9461_v34 = vcombine.low %v13746_v55, %v13751_v26  ;;  %v9463_v41 = vcombine.low %v13756_v46, %v13762_v13 }
 0x3c9   :  { %7745 = vmatpush1.bf16.msra.mxu0 %v9333_v16  ;;  %v14362_v16 = vld [vmem:[#allocation5_spill] sm:$0xff] }
 0x3ca   :  { %7957 = vmatpush1.bf16.msra.mxu1 %v9335_v32  ;;  %7746 = vmatprep.subr.bf16.mxu0 %v9350_v58  ;;  %v13778_v32 = vld [vmem:[%s14279_s1 + $0x1b38] sm:$0xff] }
 0x3cb   :  { %7958 = vmatprep.subr.bf16.mxu1 %v9352_v0  ;;  %v13783_v58 = vld [vmem:[%s14279_s1 + $0x1b78] sm:$0xff]  ;;  %v13788_v0 = vld [vmem:[%s14279_s1 + $0x1bb0] sm:$0xff] }
 0x3cc   :  { %v9479_v27 = vcombine.low %v13778_v32, %v13783_v58  ;;  %v9480_v43 = vcombine.high %v13778_v32, %v13783_v58 }
 0x3cd   :  { %7747 = vmatpush1.bf16.msra.mxu0 %v9349_v61  ;;  %v13795_v61 = vrot.slane %v13740_v38, %v14364_v8 }
 0x3ce   :  { %7959 = vmatpush1.bf16.msra.mxu1 %v9351_v12  ;;  %7748 = vmatprep.subr.bf16.mxu0 %v9366_v9  ;;  %v14365_v12 = vsub.s32 2, %v14363_v15 }
 0x3cf   :  { %7960 = vmatprep.subr.bf16.mxu1 %v9368_v30  ;;  %v13805_v30 = vld [vmem:[%s14279_s1 + $0x1bf0] sm:$0xff] }
 0x3d0   :  { %v13800_v9 = vrot.slane %v13740_v38, %v14365_v12  ;;  %v9493_v53 = vcombine.low %v13788_v0, %v13805_v30 }
 0x3d1   :  { %7749 = vmatpush1.bf16.msra.mxu0 %v9365_v14  ;;  %v14367_v14 = vsub.s32 3, %v14363_v15 }
 0x3d2   :  { %7961 = vmatpush1.bf16.msra.mxu1 %v9367_v62  ;;  %7771 = vmatprep.subr.bf16.mxu0 %v9382_v29  ;;  %v9462_v29 = vcombine.high %v13746_v55, %v13751_v26 }
 0x3d3   :  { %7983 = vmatprep.subr.bf16.mxu1 %v9384_v11  ;;  %v13825_v62 = vrot.slane %v13740_v38, %v14367_v14  ;;  %v13832_v11 = vld [vmem:[%s14279_s1 + $0x1c30] sm:$0xff] }
 0x3d4   :  { %7751 = vmatmul.mubr.bf16.vlgmr.msra.gmra.mrb[24].mxu0 %v14333_v39 }
 0x3d5   :  { %7772 = vmatpush1.bf16.msra.mxu0 %v9381_v48  ;;  %7963 = vmatmul.mubr.bf16.vlgmr.msra.gmra.mrb[24].mxu1 %v14333_v39  ;;  %v855_v39 = vld [vmem:[%s14279_s1 + $0x19b8] sm:$0xff]  ;;  %v9464_v48 = vcombine.high %v13756_v46, %v13762_v13 }
 0x3d6   :  { %7984 = vmatpush1.bf16.msra.mxu1 %v9383_v35  ;;  %7773 = vmatprep.subr.bf16.mxu0 %v9398_v31  ;;  %v9432_v56 = vcombine.high %v855_v39, %v863_v33  ;;  %v9431_v4 = vcombine.low %v855_v39, %v863_v33  ;;  %v9478_v35 = vcombine.high %v13767_v57, %v13772_v37  ;;  %v13855_v31 = vld [vmem:[%s14279_s1 + $0x1c78] sm:$0xff] }
 0x3d7   :  { %7985 = vmatprep.subr.bf16.mxu1 %v9400_v10  ;;  %7760 = vmatprep.mubr.bf16.mxu0 %v14334_v5  ;;  %v13860_v10 = vld [vmem:[%s14279_s1 + $0x1cb0] sm:$0xff]  ;;  %v9496_v39 = vcombine.high %v13810_v49, %v13815_v6  ;;  %v9510_v33 = vcombine.high %v13832_v11, %v13837_v25  ;;  %v9511_v54 = vcombine.low %v13842_v63, %v13855_v31  ;;  %v14011_v57 = vld [vmem:[%s14279_s1 + $0x1e38] sm:$0xff] }
 0x3d8   :  { %7972 = vmatprep.mubr.bf16.mxu1 %v14334_v5  ;;  %v13731_v5 = vld [vmem:[%s14279_s1 + $0x1a38] sm:$0xff]  ;;  %v9512_v47 = vcombine.high %v13842_v63, %v13855_v31 }
 0x3d9   :  { %7774 = vmatpush1.bf16.msra.mxu0 %v9397_v52  ;;  %v9448_v50 = vcombine.high %v13731_v5, %v879_v19  ;;  %v9447_v17 = vcombine.low %v13731_v5, %v879_v19  ;;  %v9494_v52 = vcombine.high %v13788_v0, %v13805_v30  ;;  %v13922_v5 = vld [vmem:[%s14279_s1 + $0x1db0] sm:$0xff]  ;;  %v14016_v37 = vld [vmem:[%s14279_s1 + $0x1e78] sm:$0xff] }
 0x3da   :  { %7986 = vmatpush1.bf16.msra.mxu1 %v9399_v59  ;;  %7775 = vmatprep.subr.bf16.mxu0 %v9414_v42  ;;  %v13878_v59 = vld [vmem:[%s14279_s1 + $0x1cb8] sm:$0xff]  ;;  %v13927_v19 = vld [vmem:[%s14279_s1 + $0x1df0] sm:$0xff] }
 0x3db   :  { %7987 = vmatprep.subr.bf16.mxu1 %v9416_v45  ;;  %v13883_v42 = vld [vmem:[%s14279_s1 + $0x1cf8] sm:$0xff]  ;;  %v13888_v45 = vld [vmem:[%s14279_s1 + $0x1d30] sm:$0xff] }
 0x3dc   :  { %7761 = vmatmul.mubr.bf16.gmra.mrb[28].mxu0 %v14361_v20  ;;  %v9528_v55 = vcombine.high %v13878_v59, %v13883_v42 }
 0x3dd   :  { %7776 = vmatpush1.bf16.msra.mxu0 %v9413_v44  ;;  %7973 = vmatmul.mubr.bf16.gmra.mrb[28].mxu1 %v14361_v20  ;;  %v13901_v44 = vld [vmem:[%s14279_s1 + $0x1d70] sm:$0xff] }
 0x3de   :  { %7988 = vmatpush1.bf16.msra.mxu1 %v9415_v51  ;;  %7777 = vmatprep.subr.bf16.mxu0 %v9430_v1  ;;  %v13906_v51 = vld [vmem:[%s14279_s1 + $0x1d38] sm:$0xff] }
 0x3df   :  { %7989 = vmatprep.subr.bf16.mxu1 %v9432_v56  ;;  %7803 = vmatprep.mubr.bf16.mxu0 %v14362_v16  ;;  %v13911_v1 = vld [vmem:[%s14279_s1 + $0x1d78] sm:$0xff]  ;;  %v9509_v56 = vcombine.low %v13832_v11, %v13837_v25 }
 0x3e0   :  { %8015 = vmatprep.mubr.bf16.mxu1 %v14362_v16 }
 0x3e1   :  { %7778 = vmatpush1.bf16.msra.mxu0 %v9429_v21  ;;  %v9525_v21 = vcombine.low %v13860_v10, %v13865_v40 }
 0x3e2   :  { %7990 = vmatpush1.bf16.msra.mxu1 %v9431_v4  ;;  %7779 = vmatprep.subr.bf16.mxu0 %v9446_v2  ;;  %v9526_v4 = vcombine.high %v13860_v10, %v13865_v40  ;;  %v14370_v10 = vcombine.high %v13906_v51, %v13911_v1 }
 0x3e3   :  { %7991 = vmatprep.subr.bf16.mxu1 %v9448_v50 }
 0x3e5   :  { %7780 = vmatpush1.bf16.msra.mxu0 %v9445_v18 }
 0x3e6   :  { %7992 = vmatpush1.bf16.msra.mxu1 %v9447_v17  ;;  %7781 = vmatprep.subr.bf16.mxu0 %v9462_v29 }
 0x3e7   :  { %v7381_v20 = vpop.f32.mrb[16].mxu0  ;;  %7993 = vmatprep.subr.bf16.mxu1 %v9464_v48 }
 0x3e8   :  { %v9657_v26 = vadd.f32 %v7381_v20, %v13795_v61  ;;  %v7593_v46 = vpop.f32.mrb[16].mxu1  ;;  %v7383_v50 = vpop.f32.mrb[17].mxu0 }
 0x3e9   :  { %v9665_v17 = vadd.f32 %v7593_v46, %v13800_v9  ;;  %v9658_v8 = vadd.f32 %v7383_v50, %v13820_v60  ;;  %v7595_v12 = vpop.f32.mrb[17].mxu1  ;;  %v7385_v23 = vpop.f32.mrb[18].mxu0  ;;  %7782 = vmatpush1.bf16.msra.mxu0 %v9461_v34 }
 0x3ea   :  { %8044 = vst [vmem:[%s14282_s3 + $0x40] sm:$0xff] %v9657_v26  ;;  %v8264_v48 = vmul.f32 %v9657_v26, %v9657_v26  ;;  %v9666_v20 = vadd.f32 %v7595_v12, %v13825_v62  ;;  %v9659_v46 = vadd.f32 %v7385_v23, %v13795_v61  ;;  %v7597_v18 = vpop.f32.mrb[18].mxu1  ;;  %7994 = vmatpush1.bf16.msra.mxu1 %v9463_v41  ;;  %v7387_v50 = vpop.f32.mrb[19].mxu0 }
 0x3eb   :  { %7783 = vmatprep.subr.bf16.mxu0 %v9478_v35  ;;  %8046 = vst [vmem:[%s14282_s3 + $0x50] sm:$0xff] %v9665_v17  ;;  %v8266_v34 = vmul.f32 %v9665_v17, %v9665_v17  ;;  %8045 = vst [vmem:[%s14282_s3 + $0x48] sm:$0xff] %v9658_v8  ;;  %v8265_v29 = vmul.f32 %v9658_v8, %v9658_v8  ;;  %v9667_v13 = vadd.f32 %v7597_v18, %v13800_v9  ;;  %v7599_v14 = vpop.f32.mrb[19].mxu1  ;;  %v13973_v18 = vld [vmem:[%s14279_s1 + $0x1db8] sm:$0xff] }
 0x3ec   :  { %v9660_v12 = vadd.f32 %v7387_v50, %v13820_v60  ;;  %7995 = vmatprep.subr.bf16.mxu1 %v9480_v43  ;;  %8047 = vst [vmem:[%s14282_s3 + $0x58] sm:$0xff] %v9666_v20  ;;  %v8267_v41 = vmul.f32 %v9666_v20, %v9666_v20  ;;  %8060 = vst [vmem:[%s14282_s3 + $0xc0] sm:$0xff] %v9659_v46  ;;  %v8184_v35 = vadd.f32 %v9659_v46, %v9657_v26  ;;  %v13978_v43 = vld [vmem:[%s14279_s1 + $0x1df8] sm:$0xff] }
 0x3ed   :  { %v8280_v23 = vmul.f32 %v9659_v46, %v9659_v46  ;;  %v9668_v16 = vadd.f32 %v7599_v14, %v13825_v62  ;;  %8062 = vst [vmem:[%s14282_s3 + $0xd0] sm:$0xff] %v9667_v13  ;;  %v8202_v50 = vadd.f32 %v9667_v13, %v9665_v17  ;;  %v8282_v2 = vmul.f32 %v9667_v13, %v9667_v13  ;;  %v13992_v46 = vld [vmem:[%s14279_s1 + $0x1e30] sm:$0xff] }
 0x3ee   :  { %8061 = vst [vmem:[%s14282_s3 + $0xc8] sm:$0xff] %v9660_v12  ;;  %v8193_v26 = vadd.f32 %v9660_v12, %v9658_v8  ;;  %v8281_v14 = vmul.f32 %v9660_v12, %v9660_v12  ;;  %7784 = vmatpush1.bf16.msra.mxu0 %v9477_v24  ;;  %v13997_v17 = vld [vmem:[%s14279_s1 + $0x1e70] sm:$0xff]  ;;  %7996 = vmatpush1.bf16.msra.mxu1 %v9479_v27 }
 0x3ef   :  { %v8392_v13 = vadd.f32 %v8280_v23, %v8264_v48  ;;  %8063 = vst [vmem:[%s14282_s3 + $0xd8] sm:$0xff] %v9668_v16  ;;  %v8211_v8 = vadd.f32 %v9668_v16, %v9666_v20  ;;  %v8283_v12 = vmul.f32 %v9668_v16, %v9668_v16  ;;  %7785 = vmatprep.subr.bf16.mxu0 %v9494_v52  ;;  %v7391_v48 = vpop.f32.mrb[20].mxu0 }
 0x3f0   :  { %v8410_v24 = vadd.f32 %v8282_v2, %v8266_v34  ;;  %v8401_v16 = vadd.f32 %v8281_v14, %v8265_v29  ;;  %7997 = vmatprep.subr.bf16.mxu1 %v9496_v39  ;;  %v9661_v52 = vadd.f32 %v7391_v48, %v13795_v61  ;;  %v7603_v20 = vpop.f32.mrb[20].mxu1  ;;  %v7393_v23 = vpop.f32.mrb[21].mxu0  ;;  %v9560_v2 = vcombine.high %v13973_v18, %v13978_v43 }
 0x3f1   :  { %v8419_v27 = vadd.f32 %v8283_v12, %v8267_v41  ;;  %v9669_v34 = vadd.f32 %v7603_v20, %v13800_v9  ;;  %v9662_v39 = vadd.f32 %v7393_v23, %v13820_v60  ;;  %v7605_v14 = vpop.f32.mrb[21].mxu1  ;;  %v7395_v32 = vpop.f32.mrb[22].mxu0  ;;  %v9573_v41 = vcombine.low %v13992_v46, %v13997_v17 }
 0x3f2   :  { %7786 = vmatpush1.bf16.msra.mxu0 %v9493_v53  ;;  %v9575_v12 = vcombine.low %v14011_v57, %v14016_v37  ;;  %8076 = vst [vmem:[%s14282_s3 + $0x140] sm:$0xff] %v9661_v52  ;;  %v8185_v48 = vadd.f32 %v9661_v52, %v8184_v35  ;;  %v8296_v20 = vmul.f32 %v9661_v52, %v9661_v52  ;;  %v7607_v58 = vpop.f32.mrb[22].mxu1  ;;  %v7397_v0 = vpop.f32.mrb[23].mxu0 }
 0x3f3   :  { %v9670_v23 = vadd.f32 %v7605_v14, %v13825_v62  ;;  %v9663_v29 = vadd.f32 %v7395_v32, %v13795_v61  ;;  %7998 = vmatpush1.bf16.msra.mxu1 %v9495_v28  ;;  %8078 = vst [vmem:[%s14282_s3 + $0x150] sm:$0xff] %v9669_v34  ;;  %v8203_v30 = vadd.f32 %v9669_v34, %v8202_v50  ;;  %8077 = vst [vmem:[%s14282_s3 + $0x148] sm:$0xff] %v9662_v39  ;;  %v7609_v14 = vpop.f32.mrb[23].mxu1 }
 0x3f4   :  { %v8298_v53 = vmul.f32 %v9669_v34, %v9669_v34  ;;  %v8194_v35 = vadd.f32 %v9662_v39, %v8193_v26  ;;  %v8297_v52 = vmul.f32 %v9662_v39, %v9662_v39  ;;  %7787 = vmatprep.subr.bf16.mxu0 %v9510_v33  ;;  %v8393_v61 = vadd.f32 %v8392_v13, %v8296_v20 }
 0x3f5   :  { %8079 = vst [vmem:[%s14282_s3 + $0x158] sm:$0xff] %v9670_v23  ;;  %v8212_v49 = vadd.f32 %v9670_v23, %v8211_v8  ;;  %v8299_v6 = vmul.f32 %v9670_v23, %v9670_v23  ;;  %8092 = vst [vmem:[%s14282_s3 + $0x1c0] sm:$0xff] %v9663_v29  ;;  %v8186_v28 = vadd.f32 %v9663_v29, %v8185_v48  ;;  %7999 = vmatprep.subr.bf16.mxu1 %v9512_v47 }
 0x3f6   :  { %v8411_v50 = vadd.f32 %v8410_v24, %v8298_v53  ;;  %v8402_v26 = vadd.f32 %v8401_v16, %v8297_v52  ;;  %v8312_v32 = vmul.f32 %v9663_v29, %v9663_v29  ;;  %v9671_v33 = vadd.f32 %v7607_v58, %v13800_v9  ;;  %7788 = vmatpush1.bf16.msra.mxu0 %v9509_v56 }
 0x3f7   :  { %v8420_v13 = vadd.f32 %v8419_v27, %v8299_v6  ;;  %v8187_v8 = vrot.slane %v8186_v28, 4  ;;  %v9664_v34 = vadd.f32 %v7397_v0, %v13820_v60  ;;  %v9672_v39 = vadd.f32 %v7609_v14, %v13825_v62  ;;  %8000 = vmatpush1.bf16.msra.mxu1 %v9511_v54  ;;  %7789 = vmatprep.subr.bf16.mxu0 %v9526_v4  ;;  %v14114_v6 = vld [vmem:[%s14279_s1 + $0x1ef0] sm:$0xff] }
 0x3f8   :  { %v8394_v47 = vadd.f32 %v8393_v61, %v8312_v32  ;;  %8094 = vst [vmem:[%s14282_s3 + $0x1d0] sm:$0xff] %v9671_v33  ;;  %v8204_v9 = vadd.f32 %v9671_v33, %v8203_v30  ;;  %v8314_v11 = vmul.f32 %v9671_v33, %v9671_v33  ;;  %8001 = vmatprep.subr.bf16.mxu1 %v9528_v55 }
 0x3f9   :  { %v9576_v60 = vcombine.high %v14011_v57, %v14016_v37  ;;  %v8188_v62 = vadd.f32 %v8187_v8, %v8186_v28  ;;  %8093 = vst [vmem:[%s14282_s3 + $0x1c8] sm:$0xff] %v9664_v34  ;;  %v8195_v25 = vadd.f32 %v9664_v34, %v8194_v35  ;;  %v8313_v63 = vmul.f32 %v9664_v34, %v9664_v34  ;;  %v1047_v57 = vld [vmem:[%s14279_s1 + $0x1fb8] sm:$0xff] }
 0x3fa   :  { %8095 = vst [vmem:[%s14282_s3 + $0x1d8] sm:$0xff] %v9672_v39  ;;  %v8213_v31 = vadd.f32 %v9672_v39, %v8212_v49  ;;  %v8395_v56 = vrot.slane %v8394_v47, 4  ;;  %v8205_v54 = vrot.slane %v8204_v9, 4  ;;  %v8412_v4 = vadd.f32 %v8411_v50, %v8314_v11  ;;  %7790 = vmatpush1.bf16.msra.mxu0 %v9525_v21  ;;  %v14109_v49 = vld [vmem:[%s14279_s1 + $0x1eb0] sm:$0xff]  ;;  %v1055_v37 = vld [vmem:[%s14279_s1 + $0x1ff8] sm:$0xff] }
 0x3fb   :  { %v8315_v24 = vmul.f32 %v9672_v39, %v9672_v39  ;;  %v8189_v55 = vrot.slane %v8188_v62, 2  ;;  %v8196_v16 = vrot.slane %v8195_v25, 4  ;;  %v8403_v58 = vadd.f32 %v8402_v26, %v8313_v63  ;;  %v1015_v39 = vld [vmem:[%s14279_s1 + $0x1eb8] sm:$0xff] }
 0x3fc   :  { %v8214_v27 = vrot.slane %v8213_v31, 4  ;;  %v14368_v29 = vcombine.low %v13878_v59, %v13883_v42  ;;  %v14369_v48 = vcombine.high %v13888_v45, %v13901_v44  ;;  %v8396_v20 = vadd.f32 %v8395_v56, %v8394_v47 }
 0x3fd   :  { %v8206_v23 = vadd.f32 %v8205_v54, %v8204_v9  ;;  %v8413_v0 = vrot.slane %v8412_v4, 4  ;;  %v8421_v30 = vadd.f32 %v8420_v13, %v8315_v24  ;;  %v8190_v40 = vadd.f32 %v8189_v55, %v8188_v62 }
 0x3fe   :  { %8002 = vmatpush1.bf16.msra.mxu1 %v14368_v29  ;;  %7791 = vmatprep.subr.bf16.mxu0 %v14369_v48  ;;  %v8197_v21 = vadd.f32 %v8196_v16, %v8195_v25  ;;  %v8404_v53 = vrot.slane %v8403_v58, 4  ;;  %v8215_v35 = vadd.f32 %v8214_v27, %v8213_v31  ;;  %v8397_v52 = vrot.slane %v8396_v20, 2 }
 0x3ff   :  { %8003 = vmatprep.subr.bf16.mxu1 %v14370_v10  ;;  %v8207_v14 = vrot.slane %v8206_v23, 2  ;;  %v8414_v59 = vadd.f32 %v8413_v0, %v8412_v4  ;;  %v8422_v42 = vrot.slane %v8421_v30, 4  ;;  %v14371_v61 = vcombine.low %v13888_v45, %v13901_v44 }
 0x400   :  { %v8191_v28 = vrot.slane %v8190_v40, 1  ;;  %v8198_v50 = vrot.slane %v8197_v21, 2  ;;  %v8405_v26 = vadd.f32 %v8404_v53, %v8403_v58  ;;  %v8216_v32 = vrot.slane %v8215_v35, 2 }
 0x401   :  { %7792 = vmatpush1.bf16.msra.mxu0 %v14371_v61  ;;  %v14372_v33 = vcombine.low %v13906_v51, %v13911_v1  ;;  %v14373_v45 = vcombine.high %v13922_v5, %v13927_v19  ;;  %v8398_v44 = vadd.f32 %v8397_v52, %v8396_v20  ;;  %v8208_v13 = vadd.f32 %v8207_v14, %v8206_v23  ;;  %v1023_v51 = vld [vmem:[%s14279_s1 + $0x1ef8] sm:$0xff]  ;;  %v1046_v61 = vld [vmem:[%s14279_s1 + $0x1fb0] sm:$0xff] }
 0x402   :  { %v8415_v8 = vrot.slane %v8414_v59, 2  ;;  %v8423_v34 = vadd.f32 %v8422_v42, %v8421_v30  ;;  %v8199_v1 = vadd.f32 %v8198_v50, %v8197_v21  ;;  %v8406_v47 = vrot.slane %v8405_v26, 2  ;;  %v1031_v23 = vld [vmem:[%s14279_s1 + $0x1f38] sm:$0xff] }
 0x403   :  { %8004 = vmatpush1.bf16.msra.mxu1 %v14372_v33  ;;  %7793 = vmatprep.subr.bf16.mxu0 %v14373_v45  ;;  %v8217_v9 = vadd.f32 %v8216_v32, %v8215_v35  ;;  %v9590_v11 = vcombine.high %v14109_v49, %v14114_v6  ;;  %v8399_v62 = vrot.slane %v8398_v44, 1  ;;  %v8209_v25 = vrot.slane %v8208_v13, 1 }
 0x404   :  { %8005 = vmatprep.subr.bf16.mxu1 %v9560_v2  ;;  %v8416_v63 = vadd.f32 %v8415_v8, %v8414_v59  ;;  %v8424_v31 = vrot.slane %v8423_v34, 2  ;;  %v14374_v2 = vcombine.low %v13922_v5, %v13927_v19  ;;  %v8192_v56 = vadd.f32 %v8191_v28, %v8190_v40  ;;  %v1030_v5 = vld [vmem:[%s14279_s1 + $0x1f30] sm:$0xff] }
 0x405   :  { %v8200_v54 = vrot.slane %v8199_v1, 1  ;;  %v8407_v4 = vadd.f32 %v8406_v47, %v8405_v26  ;;  %v14375_v24 = vcombine.low %v13973_v18, %v13978_v43  ;;  %v14376_v55 = vcombine.high %v13992_v46, %v13997_v17  ;;  %v1038_v19 = vld [vmem:[%s14279_s1 + $0x1f70] sm:$0xff] }
 0x406   :  { %7794 = vmatpush1.bf16.msra.mxu0 %v14374_v2  ;;  %v9592_v16 = vcombine.high %v1015_v39, %v1023_v51  ;;  %v8400_v58 = vadd.f32 %v8399_v62, %v8398_v44  ;;  %v8417_v27 = vrot.slane %v8416_v63, 1  ;;  %v8218_v29 = vrot.slane %v8217_v9, 1  ;;  %v1054_v46 = vld [vmem:[%s14279_s1 + $0x1ff0] sm:$0xff] }
 0x407   :  { %8006 = vmatpush1.bf16.msra.mxu1 %v14375_v24  ;;  %7795 = vmatprep.subr.bf16.mxu0 %v14376_v55  ;;  %v8425_v48 = vadd.f32 %v8424_v31, %v8423_v34  ;;  %v8408_v18 = vrot.slane %v8407_v4, 1  ;;  %v9589_v43 = vcombine.low %v14109_v49, %v14114_v6  ;;  %v9591_v20 = vcombine.low %v1015_v39, %v1023_v51 }
 0x408   :  { %8007 = vmatprep.subr.bf16.mxu1 %v9576_v60  ;;  %v1039_v60 = vld [vmem:[%s14279_s1 + $0x1f78] sm:$0xff]  ;;  %v8473_v0 = vsel %vm8464_vm0, %v8192_v56, %v8400_v58  ;;  %v8210_v30 = vadd.f32 %v8209_v25, %v8208_v13  ;;  %v8418_v10 = vadd.f32 %v8417_v27, %v8416_v63  ;;  %v8201_v21 = vadd.f32 %v8200_v54, %v8199_v1 }
 0x409   :  { %v8426_v40 = vrot.slane %v8425_v48, 1  ;;  %v8409_v53 = vadd.f32 %v8408_v18, %v8407_v4  ;;  %v9606_v35 = vcombine.high %v1030_v5, %v1038_v19  ;;  %v8219_v14 = vadd.f32 %v8218_v29, %v8217_v9 }
 0x40a   :  { %7796 = vmatpush1.bf16.msra.mxu0 %v9573_v41  ;;  %v8475_v52 = vsel %vm8464_vm0, %v8210_v30, %v8418_v10  ;;  %v9608_v42 = vcombine.high %v1031_v23, %v1039_v60  ;;  %v9605_v49 = vcombine.low %v1030_v5, %v1038_v19  ;;  %v9607_v28 = vcombine.low %v1031_v23, %v1039_v60 }
 0x40b   :  { %8008 = vmatpush1.bf16.msra.mxu1 %v9575_v12  ;;  %7797 = vmatprep.subr.bf16.mxu0 %v9590_v11  ;;  %v8427_v59 = vadd.f32 %v8426_v40, %v8425_v48  ;;  %v8474_v17 = vsel %vm8464_vm0, %v8201_v21, %v8409_v53  ;;  %v9622_v50 = vcombine.high %v1046_v61, %v1054_v46  ;;  %v14377_v8 = vsub.s32 4, %v14363_v15 }
 0x40c   :  { %8009 = vmatprep.subr.bf16.mxu1 %v9592_v16  ;;  %v8531_v41 = vcombine.low %v8473_v0, %v8474_v17  ;;  %v9624_v32 = vcombine.high %v1047_v57, %v1055_v37  ;;  %v9621_v45 = vcombine.low %v1046_v61, %v1054_v46  ;;  %v9623_v13 = vcombine.low %v1047_v57, %v1055_v37 }
 0x40d   :  { %v8476_v12 = vsel %vm8464_vm0, %v8219_v14, %v8427_v59  ;;  %v1111_v34 = vrot.slane %v13740_v38, %v14377_v8  ;;  %v14378_v39 = vsub.s32 6, %v14363_v15  ;;  %v14379_v1 = vsub.s32 5, %v14363_v15 }
 0x40e   :  { %7798 = vmatpush1.bf16.msra.mxu0 %v9589_v43  ;;  %v8532_v6 = vcombine.low %v8475_v52, %v8476_v12  ;;  %v8539_v26 = vrot.slane %v8531_v41, %v11915_v7 }
 0x40f   :  { %8010 = vmatpush1.bf16.msra.mxu1 %v9591_v20  ;;  %7799 = vmatprep.subr.bf16.mxu0 %v9606_v35  ;;  %v14198_v51 = vrot.slane %v13740_v38, %v14378_v39 }
 0x410   :  { %8011 = vmatprep.subr.bf16.mxu1 %v9608_v42  ;;  %v8546_v33 = vrot.slane %v8532_v6, %v11915_v7 }
 0x412   :  { %7800 = vmatpush1.bf16.msra.mxu0 %v9605_v49  ;;  %v8547_v44 = vcombine.low %v8539_v26, %v8546_v33 }
 0x413   :  { %8012 = vmatpush1.bf16.msra.mxu1 %v9607_v28  ;;  %7801 = vmatprep.subr.bf16.mxu0 %v9622_v50 }
 0x414   :  { %8013 = vmatprep.subr.bf16.mxu1 %v9624_v32  ;;  %8575 = vst [vmem:[%s14283_s4 + $0x10] sm:$0xff] %v8547_v44 }
 0x416   :  { %7802 = vmatpush1.bf16.msra.mxu0 %v9621_v45 }
 0x417   :  { %8014 = vmatpush1.bf16.msra.mxu1 %v9623_v13 }
 0x419   :  { %7804 = vmatmul.mubr.bf16.vlgmr.msra.gmra.mrb[24].mxu0 %v10825_v36 }
 0x41a   :  { %8016 = vmatmul.mubr.bf16.vlgmr.msra.gmra.mrb[24].mxu1 %v10825_v36  ;;  %7813 = vmatprep.mubr.bf16.mxu0 %v10836_v22  ;;  %v14203_v36 = vrot.slane %v13740_v38, %v14379_v1 }
 0x41b   :  { %8025 = vmatprep.mubr.bf16.mxu1 %v10836_v22  ;;  %v14380_v22 = vsub.s32 7, %v14363_v15 }
 0x41d   :  { %v14208_v47 = vrot.slane %v13740_v38, %v14380_v22 }
 0x421   :  { %7814 = vmatmul.mubr.bf16.gmra.mrb[28].mxu0 %v10860_v3 }
 0x422   :  { %8026 = vmatmul.mubr.bf16.gmra.mrb[28].mxu1 %v10860_v3 }
 0x4ec   :  { %v7805_v3 = vpop.f32.mrb[24].mxu0 }
 0x4ed   :  { %v9673_v9 = vadd.f32 %v7805_v3, %v1111_v34  ;;  %v8017_v11 = vpop.f32.mrb[24].mxu1  ;;  %v7807_v62 = vpop.f32.mrb[25].mxu0 }
 0x4ee   :  { %v9681_v25 = vadd.f32 %v8017_v11, %v14198_v51  ;;  %v9674_v63 = vadd.f32 %v7807_v62, %v14203_v36  ;;  %v8019_v31 = vpop.f32.mrb[25].mxu1  ;;  %v7809_v2 = vpop.f32.mrb[26].mxu0 }
 0x4ef   :  { %8048 = vst [vmem:[%s14282_s3 + $0x60] sm:$0xff] %v9673_v9  ;;  %v9682_v56 = vadd.f32 %v8019_v31, %v14208_v47  ;;  %v9675_v15 = vadd.f32 %v7809_v2, %v1111_v34  ;;  %v8021_v54 = vpop.f32.mrb[26].mxu1  ;;  %v7811_v38 = vpop.f32.mrb[27].mxu0  ;;  %v8268_v4 = vmul.f32 %v9673_v9, %v9673_v9 }
 0x4f0   :  { %8050 = vst [vmem:[%s14282_s3 + $0x70] sm:$0xff] %v9681_v25  ;;  %v8270_v24 = vmul.f32 %v9681_v25, %v9681_v25  ;;  %8049 = vst [vmem:[%s14282_s3 + $0x68] sm:$0xff] %v9674_v63  ;;  %v9683_v55 = vadd.f32 %v8021_v54, %v14198_v51  ;;  %v9676_v16 = vadd.f32 %v7811_v38, %v14203_v36  ;;  %v8023_v58 = vpop.f32.mrb[27].mxu1 }
 0x4f1   :  { %v8269_v27 = vmul.f32 %v9674_v63, %v9674_v63  ;;  %8051 = vst [vmem:[%s14282_s3 + $0x78] sm:$0xff] %v9682_v56  ;;  %8064 = vst [vmem:[%s14282_s3 + $0xe0] sm:$0xff] %v9675_v15  ;;  %v8220_v29 = vadd.f32 %v9675_v15, %v9673_v9  ;;  %v8284_v48 = vmul.f32 %v9675_v15, %v9675_v15 }
 0x4f2   :  { %v9684_v5 = vadd.f32 %v8023_v58, %v14208_v47  ;;  %8066 = vst [vmem:[%s14282_s3 + $0xf0] sm:$0xff] %v9683_v55  ;;  %v8238_v19 = vadd.f32 %v9683_v55, %v9681_v25  ;;  %v8286_v18 = vmul.f32 %v9683_v55, %v9683_v55  ;;  %8065 = vst [vmem:[%s14282_s3 + $0xe8] sm:$0xff] %v9676_v16 }
 0x4f3   :  { %v8229_v43 = vadd.f32 %v9676_v16, %v9674_v63  ;;  %v8285_v20 = vmul.f32 %v9676_v16, %v9676_v16  ;;  %v8271_v23 = vmul.f32 %v9682_v56, %v9682_v56  ;;  %v8428_v60 = vadd.f32 %v8284_v48, %v8268_v4 }
 0x4f4   :  { %8067 = vst [vmem:[%s14282_s3 + $0xf8] sm:$0xff] %v9684_v5  ;;  %v8247_v0 = vadd.f32 %v9684_v5, %v9682_v56  ;;  %v8287_v30 = vmul.f32 %v9684_v5, %v9684_v5  ;;  %v8446_v10 = vadd.f32 %v8286_v18, %v8270_v24  ;;  %v7815_v21 = vpop.f32.mrb[28].mxu0 }
 0x4f5   :  { %v8437_v40 = vadd.f32 %v8285_v20, %v8269_v27  ;;  %v9677_v35 = vadd.f32 %v7815_v21, %v1111_v34  ;;  %v8027_v52 = vpop.f32.mrb[28].mxu1  ;;  %v7817_v14 = vpop.f32.mrb[29].mxu0 }
 0x4f6   :  { %v8455_v53 = vadd.f32 %v8287_v30, %v8271_v23  ;;  %v9685_v59 = vadd.f32 %v8027_v52, %v14198_v51  ;;  %v9678_v42 = vadd.f32 %v7817_v14, %v14203_v36  ;;  %v8029_v61 = vpop.f32.mrb[29].mxu1  ;;  %v7819_v46 = vpop.f32.mrb[30].mxu0 }
 0x4f7   :  { %8080 = vst [vmem:[%s14282_s3 + $0x160] sm:$0xff] %v9677_v35  ;;  %v8221_v17 = vadd.f32 %v9677_v35, %v8220_v29  ;;  %v8300_v57 = vmul.f32 %v9677_v35, %v9677_v35  ;;  %v9686_v37 = vadd.f32 %v8029_v61, %v14208_v47  ;;  %v9679_v41 = vadd.f32 %v7819_v46, %v1111_v34  ;;  %v8031_v12 = vpop.f32.mrb[30].mxu1  ;;  %v7821_v49 = vpop.f32.mrb[31].mxu0 }
 0x4f8   :  { %8082 = vst [vmem:[%s14282_s3 + $0x170] sm:$0xff] %v9685_v59  ;;  %v8239_v6 = vadd.f32 %v9685_v59, %v8238_v19  ;;  %v8302_v28 = vmul.f32 %v9685_v59, %v9685_v59  ;;  %8081 = vst [vmem:[%s14282_s3 + $0x168] sm:$0xff] %v9678_v42  ;;  %v8230_v50 = vadd.f32 %v9678_v42, %v8229_v43  ;;  %v8033_v32 = vpop.f32.mrb[31].mxu1 }
 0x4f9   :  { %v8301_v26 = vmul.f32 %v9678_v42, %v9678_v42  ;;  %v8429_v33 = vadd.f32 %v8428_v60, %v8300_v57  ;;  %8083 = vst [vmem:[%s14282_s3 + $0x178] sm:$0xff] %v9686_v37  ;;  %v8248_v45 = vadd.f32 %v9686_v37, %v8247_v0  ;;  %v8303_v44 = vmul.f32 %v9686_v37, %v9686_v37 }
 0x4fa   :  { %8096 = vst [vmem:[%s14282_s3 + $0x1e0] sm:$0xff] %v9679_v41  ;;  %v8222_v13 = vadd.f32 %v9679_v41, %v8221_v17  ;;  %v8447_v8 = vadd.f32 %v8446_v10, %v8302_v28  ;;  %v8316_v39 = vmul.f32 %v9679_v41, %v9679_v41  ;;  %v9687_v1 = vadd.f32 %v8031_v12, %v14198_v51 }
 0x4fb   :  { %v8438_v34 = vadd.f32 %v8437_v40, %v8301_v26  ;;  %v8456_v22 = vadd.f32 %v8455_v53, %v8303_v44  ;;  %v9680_v9 = vadd.f32 %v7821_v49, %v14203_v36  ;;  %v9688_v11 = vadd.f32 %v8033_v32, %v14208_v47 }
 0x4fc   :  { %v8223_v3 = vrot.slane %v8222_v13, 4  ;;  %v8430_v62 = vadd.f32 %v8429_v33, %v8316_v39  ;;  %8098 = vst [vmem:[%s14282_s3 + $0x1f0] sm:$0xff] %v9687_v1  ;;  %v8240_v25 = vadd.f32 %v9687_v1, %v8239_v6  ;;  %v8318_v63 = vmul.f32 %v9687_v1, %v9687_v1 }
 0x4fd   :  { %8097 = vst [vmem:[%s14282_s3 + $0x1e8] sm:$0xff] %v9680_v9  ;;  %v8231_v2 = vadd.f32 %v9680_v9, %v8230_v50  ;;  %v8317_v51 = vmul.f32 %v9680_v9, %v9680_v9  ;;  %8099 = vst [vmem:[%s14282_s3 + $0x1f8] sm:$0xff] %v9688_v11  ;;  %v8249_v36 = vadd.f32 %v9688_v11, %v8248_v45 }
 0x4fe   :  { %v8224_v31 = vadd.f32 %v8223_v3, %v8222_v13  ;;  %v8431_v47 = vrot.slane %v8430_v62, 4  ;;  %v8241_v56 = vrot.slane %v8240_v25, 4  ;;  %v8448_v15 = vadd.f32 %v8447_v8, %v8318_v63 }
 0x4ff   :  { %v8319_v54 = vmul.f32 %v9688_v11, %v9688_v11  ;;  %v8232_v4 = vrot.slane %v8231_v2, 4  ;;  %v8439_v24 = vadd.f32 %v8438_v34, %v8317_v51  ;;  %v8250_v55 = vrot.slane %v8249_v36, 4 }
 0x500   :  { %v8225_v38 = vrot.slane %v8224_v31, 2  ;;  %v8432_v16 = vadd.f32 %v8431_v47, %v8430_v62  ;;  %v8242_v58 = vadd.f32 %v8241_v56, %v8240_v25  ;;  %v8449_v27 = vrot.slane %v8448_v15, 4 }
 0x501   :  { %v8457_v29 = vadd.f32 %v8456_v22, %v8319_v54  ;;  %v8233_v5 = vadd.f32 %v8232_v4, %v8231_v2  ;;  %v8440_v19 = vrot.slane %v8439_v24, 4  ;;  %v8251_v18 = vadd.f32 %v8250_v55, %v8249_v36 }
 0x502   :  { %v8226_v48 = vadd.f32 %v8225_v38, %v8224_v31  ;;  %v8433_v43 = vrot.slane %v8432_v16, 2  ;;  %v8243_v20 = vrot.slane %v8242_v58, 2  ;;  %v8450_v23 = vadd.f32 %v8449_v27, %v8448_v15 }
 0x503   :  { %v8458_v60 = vrot.slane %v8457_v29, 4  ;;  %v8234_v30 = vrot.slane %v8233_v5, 2  ;;  %v8441_v10 = vadd.f32 %v8440_v19, %v8439_v24  ;;  %v8252_v40 = vrot.slane %v8251_v18, 2 }
 0x504   :  { %v8227_v0 = vrot.slane %v8226_v48, 1  ;;  %v8434_v21 = vadd.f32 %v8433_v43, %v8432_v16  ;;  %v8244_v53 = vadd.f32 %v8243_v20, %v8242_v58  ;;  %v8451_v35 = vrot.slane %v8450_v23, 2 }
 0x505   :  { %v8459_v52 = vadd.f32 %v8458_v60, %v8457_v29  ;;  %v8235_v14 = vadd.f32 %v8234_v30, %v8233_v5  ;;  %v8442_v59 = vrot.slane %v8441_v10, 2  ;;  %v8253_v42 = vadd.f32 %v8252_v40, %v8251_v18 }
 0x506   :  { %v8435_v61 = vrot.slane %v8434_v21, 1  ;;  %v8245_v46 = vrot.slane %v8244_v53, 1  ;;  %v8452_v17 = vadd.f32 %v8451_v35, %v8450_v23  ;;  %v8228_v37 = vadd.f32 %v8227_v0, %v8226_v48 }
 0x507   :  { %v8460_v57 = vrot.slane %v8459_v52, 2  ;;  %v8236_v41 = vrot.slane %v8235_v14, 1  ;;  %v8443_v12 = vadd.f32 %v8442_v59, %v8441_v10  ;;  %v8254_v28 = vrot.slane %v8253_v42, 1 }
 0x508   :  { %v8436_v49 = vadd.f32 %v8435_v61, %v8434_v21  ;;  %v8453_v6 = vrot.slane %v8452_v17, 1  ;;  %v8246_v33 = vadd.f32 %v8245_v46, %v8244_v53 }
 0x509   :  { %v8461_v50 = vadd.f32 %v8460_v57, %v8459_v52  ;;  %v8444_v26 = vrot.slane %v8443_v12, 1  ;;  %v8237_v13 = vadd.f32 %v8236_v41, %v8235_v14  ;;  %v8255_v39 = vadd.f32 %v8254_v28, %v8253_v42 }
 0x50a   :  { %v8477_v32 = vsel %vm8464_vm0, %v8228_v37, %v8436_v49  ;;  %v8454_v45 = vadd.f32 %v8453_v6, %v8452_v17 }
 0x50b   :  { %v8462_v44 = vrot.slane %v8461_v50, 1  ;;  %v8445_v8 = vadd.f32 %v8444_v26, %v8443_v12 }
 0x50c   :  { %v8479_v34 = vsel %vm8464_vm0, %v8246_v33, %v8454_v45 }
 0x50d   :  { %v8463_v1 = vadd.f32 %v8462_v44, %v8461_v50  ;;  %v8478_v22 = vsel %vm8464_vm0, %v8237_v13, %v8445_v8 }
 0x50e   :  { %v8548_v3 = vcombine.low %v8477_v32, %v8478_v22 }
 0x50f   :  { %v8480_v9 = vsel %vm8464_vm0, %v8255_v39, %v8463_v1 }
 0x510   :  { %v8549_v11 = vcombine.low %v8479_v34, %v8480_v9  ;;  %v8556_v62 = vrot.slane %v8548_v3, %v11915_v7 }
 0x512   :  { %v8563_v25 = vrot.slane %v8549_v11, %v11915_v7 }
 0x514   :  { %v8564_v63 = vcombine.low %v8556_v62, %v8563_v25 }
 0x516   :  { %8576 = vst [vmem:[%s14283_s4 + $0x18] sm:$0xff] %v8564_v63 }

// kernel: generator_forward.14
= control target key start
LH: loop header
LB: loop body
LE: loop exit
PB: predicated region body
PF: predicated region fallthrough
CT: control target
= control target key end

     0   :  { %s507_s6 = smov 0   ;;  %s866_s0 = inlined_call_operand.vmem [shape: f32[256,512], index: 0, kind: input, shape index: {}]   ;;  %s867_s1 = inlined_call_operand.vmem [shape: f32[2,512], index: 1, kind: output, shape index: {}]  }
   0x1 LB: > { %s466_s7 = sadd.s32 4294967295, %s493_s6   ;;  %p469_p0 = scmp.ge.s32.totalorder %s493_s6, 1  ;;  %s493_s6 = sphi %s507_s6, %s11_s6  }
   0x2   : > { %p84_p1 = scmp.lt.s32.totalorder %s493_s6, 3 }
   0x4   : > { %p85_p2 = pnand %p469_p0, %p84_p1 }
   0x6   : > { %88 = sbr.rel (%p85_p2) target bundleno = 100 (0x64), region = 24 }
   0xd   : > { %s470_s8 = sshll.u32 %s466_s7, 4  ;;  %p473_p4 = scmp.ne.s32.totalorder %s466_s7, 0 }
   0xe   : > { %p101_p3 = scmp.lt.s32.totalorder %s470_s8, 31  ;;  %v495_v0 = vmov (!%p473_p4), 0.0  }
   0xf   : > { %110 = sbr.rel (%p473_p4) target bundleno = 22 (0x16), region = 28  ;;  %111 = vst [vmem:[%s867_s1] sm:$0xff] (!%p473_p4), %v495_v0 }
  0x10   : > { %s871_s8 = smov (!%p101_p3, %s470_s8), 31 }
  0x11   : > { %s476_s9 = sshll.u32 %s871_s8, 5 }
  0x12   : > { %s518_s12 = scalar_lea.vmem %s866_s0, %s476_s9 }
  0x16 PF: > { %v524_v1 = vld [vmem:[%s518_s12] sm:$0xff]  ;;  %v527_v2 = vld [vmem:[%s518_s12 + $0x8] sm:$0xff]  ;;  %v530_v3 = vld [vmem:[%s518_s12 + $0x10] sm:$0xff]  ;;  %vm409_vm0 = vcmask 1040384  }
  0x17   : > { %v533_v4 = vld [vmem:[%s518_s12 + $0x20] sm:$0xff]  ;;  %v536_v5 = vld [vmem:[%s518_s12 + $0x28] sm:$0xff]  ;;  %v539_v6 = vld [vmem:[%s518_s12 + $0x18] sm:$0xff] }
  0x18   : > { %v542_v7 = vld [vmem:[%s518_s12 + $0x30] sm:$0xff]  ;;  %v545_v8 = vld [vmem:[%s518_s12 + $0x38] sm:$0xff]  ;;  %v177_v9 = vadd.f32 %v533_v4, %v524_v1  ;;  %v198_v10 = vadd.f32 %v536_v5, %v527_v2  ;;  %v552_v11 = vld [vmem:[%s518_s12 + $0x40] sm:$0xff] }
  0x19   : > { %v555_v12 = vld [vmem:[%s518_s12 + $0x48] sm:$0xff]  ;;  %v219_v13 = vadd.f32 %v542_v7, %v530_v3  ;;  %v240_v14 = vadd.f32 %v545_v8, %v539_v6  ;;  %v562_v15 = vld [vmem:[%s518_s12 + $0x50] sm:$0xff]  ;;  %v565_v16 = vld [vmem:[%s518_s12 + $0x58] sm:$0xff] }
  0x1a   : > { %v178_v17 = vadd.f32 %v177_v9, %v552_v11  ;;  %v199_v18 = vadd.f32 %v198_v10, %v555_v12  ;;  %v570_v19 = vld [vmem:[%s518_s12 + $0x60] sm:$0xff]  ;;  %v573_v20 = vld [vmem:[%s518_s12 + $0x68] sm:$0xff]  ;;  %v578_v23 = vld [vmem:[%s518_s12 + $0x70] sm:$0xff] }
  0x1b   : > { %v220_v21 = vadd.f32 %v219_v13, %v562_v15  ;;  %v241_v22 = vadd.f32 %v240_v14, %v565_v16  ;;  %v581_v24 = vld [vmem:[%s518_s12 + $0x78] sm:$0xff]  ;;  %v586_v27 = vld [vmem:[%s518_s12 + $0x80] sm:$0xff]  ;;  %v589_v28 = vld [vmem:[%s518_s12 + $0x88] sm:$0xff] }
  0x1c   : > { %v179_v25 = vadd.f32 %v178_v17, %v570_v19  ;;  %v200_v26 = vadd.f32 %v199_v18, %v573_v20  ;;  %v594_v31 = vld [vmem:[%s518_s12 + $0x90] sm:$0xff]  ;;  %v597_v32 = vld [vmem:[%s518_s12 + $0x98] sm:$0xff]  ;;  %v602_v35 = vld [vmem:[%s518_s12 + $0xa0] sm:$0xff]  ;;  %v261_v18 = vmul.f32 %v524_v1, %v524_v1  ;;  %v266_v1 = vmul.f32 %v536_v5, %v536_v5 }
  0x1d   : > { %v221_v29 = vadd.f32 %v220_v21, %v578_v23  ;;  %v242_v30 = vadd.f32 %v241_v22, %v581_v24  ;;  %v605_v36 = vld [vmem:[%s518_s12 + $0xa8] sm:$0xff]  ;;  %v610_v39 = vld [vmem:[%s518_s12 + $0xb0] sm:$0xff]  ;;  %v613_v40 = vld [vmem:[%s518_s12 + $0xb8] sm:$0xff]  ;;  %v657_v21 = vmul.f32 %v527_v2, %v527_v2  ;;  %v661_v22 = vmul.f32 %v530_v3, %v530_v3 }
  0x1e   : > { %v180_v33 = vadd.f32 %v179_v25, %v586_v27  ;;  %v201_v34 = vadd.f32 %v200_v26, %v589_v28  ;;  %v618_v43 = vld [vmem:[%s518_s12 + $0xc0] sm:$0xff]  ;;  %v621_v44 = vld [vmem:[%s518_s12 + $0xc8] sm:$0xff]  ;;  %v626_v47 = vld [vmem:[%s518_s12 + $0xd0] sm:$0xff]  ;;  %v665_v26 = vmul.f32 %v539_v6, %v539_v6  ;;  %v267_v2 = vmul.f32 %v542_v7, %v542_v7 }
  0x1f   : > { %v222_v37 = vadd.f32 %v221_v29, %v594_v31  ;;  %v243_v38 = vadd.f32 %v242_v30, %v597_v32  ;;  %v629_v48 = vld [vmem:[%s518_s12 + $0xd8] sm:$0xff]  ;;  %v634_v51 = vld [vmem:[%s518_s12 + $0xe0] sm:$0xff]  ;;  %v141_v54 = vld [vmem:[%s518_s12 + $0xe8] sm:$0xff]  ;;  %v265_v29 = vmul.f32 %v533_v4, %v533_v4  ;;  %v268_v3 = vmul.f32 %v545_v8, %v545_v8 }
  0x20   : > { %v181_v41 = vadd.f32 %v180_v33, %v602_v35  ;;  %v202_v42 = vadd.f32 %v201_v34, %v605_v36  ;;  %v640_v55 = vld [vmem:[%s518_s12 + $0xf0] sm:$0xff]  ;;  %v644_v57 = vld [vmem:[%s518_s12 + $0xf8] sm:$0xff]  ;;  %v144_v60 = vld [vmem:[%s518_s12 + $0x100] sm:$0xff]  ;;  %v269_v34 = vmul.f32 %v552_v11, %v552_v11  ;;  %v681_v6 = vmul.f32 %v555_v12, %v555_v12 }
  0x21   : > { %v223_v45 = vadd.f32 %v222_v37, %v610_v39  ;;  %v244_v46 = vadd.f32 %v243_v38, %v613_v40  ;;  %v145_v63 = vld [vmem:[%s518_s12 + $0x108] sm:$0xff]  ;;  %v146_v0 = vld [vmem:[%s518_s12 + $0x110] sm:$0xff]  ;;  %v147_v9 = vld [vmem:[%s518_s12 + $0x118] sm:$0xff]  ;;  %v271_v38 = vmul.f32 %v562_v15, %v562_v15  ;;  %v688_v7 = vmul.f32 %v565_v16, %v565_v16 }
  0x22   : > { %v182_v49 = vadd.f32 %v181_v41, %v618_v43  ;;  %v203_v50 = vadd.f32 %v202_v42, %v621_v44  ;;  %v148_v14 = vld [vmem:[%s518_s12 + $0x120] sm:$0xff]  ;;  %v149_v30 = vld [vmem:[%s518_s12 + $0x128] sm:$0xff]  ;;  %v150_v33 = vld [vmem:[%s518_s12 + $0x130] sm:$0xff]  ;;  %v273_v11 = vmul.f32 %v570_v19, %v570_v19  ;;  %v695_v12 = vmul.f32 %v573_v20, %v573_v20 }
  0x23   : > { %v224_v52 = vadd.f32 %v223_v45, %v626_v47  ;;  %v245_v53 = vadd.f32 %v244_v46, %v629_v48  ;;  %v151_v4 = vld [vmem:[%s518_s12 + $0x138] sm:$0xff]  ;;  %v152_v8 = vld [vmem:[%s518_s12 + $0x140] sm:$0xff]  ;;  %v699_v42 = vmul.f32 %v578_v23, %v578_v23  ;;  %v703_v16 = vmul.f32 %v581_v24, %v581_v24  ;;  %v153_v20 = vld [vmem:[%s518_s12 + $0x148] sm:$0xff] }
  0x24   : > { %v183_v56 = vadd.f32 %v182_v49, %v634_v51  ;;  %v204_v58 = vadd.f32 %v203_v50, %v141_v54  ;;  %v707_v45 = vmul.f32 %v586_v27, %v586_v27  ;;  %v711_v19 = vmul.f32 %v589_v28, %v589_v28  ;;  %v154_v46 = vld [vmem:[%s518_s12 + $0x150] sm:$0xff]  ;;  %v155_v28 = vld [vmem:[%s518_s12 + $0x158] sm:$0xff] }
  0x25   : > { %v225_v59 = vadd.f32 %v224_v52, %v640_v55  ;;  %v246_v61 = vadd.f32 %v245_v53, %v644_v57  ;;  %v717_v23 = vmul.f32 %v594_v31, %v594_v31  ;;  %v721_v49 = vmul.f32 %v597_v32, %v597_v32 }
  0x26   : > { %v184_v62 = vadd.f32 %v183_v56, %v144_v60  ;;  %v205_v10 = vadd.f32 %v204_v58, %v145_v63  ;;  %v725_v24 = vmul.f32 %v602_v35, %v602_v35  ;;  %v729_v27 = vmul.f32 %v605_v36, %v605_v36  ;;  %v156_v35 = vld [vmem:[%s518_s12 + $0x160] sm:$0xff] }
  0x27   : > { %v226_v13 = vadd.f32 %v225_v59, %v146_v0  ;;  %v247_v17 = vadd.f32 %v246_v61, %v147_v9  ;;  %v734_v31 = vmul.f32 %v610_v39, %v610_v39  ;;  %v738_v32 = vmul.f32 %v613_v40, %v613_v40  ;;  %v157_v61 = vld [vmem:[%s518_s12 + $0x168] sm:$0xff] }
  0x28   : > { %v185_v25 = vadd.f32 %v184_v62, %v148_v14  ;;  %v206_v37 = vadd.f32 %v205_v10, %v149_v30  ;;  %v743_v56 = vmul.f32 %v618_v43, %v618_v43  ;;  %v747_v36 = vmul.f32 %v621_v44, %v621_v44  ;;  %v158_v62 = vld [vmem:[%s518_s12 + $0x170] sm:$0xff] }
  0x29   : > { %v227_v5 = vadd.f32 %v226_v13, %v150_v33  ;;  %v248_v41 = vadd.f32 %v247_v17, %v151_v4  ;;  %v751_v58 = vmul.f32 %v626_v47, %v626_v47  ;;  %v755_v40 = vmul.f32 %v629_v48, %v629_v48 }
  0x2a   : > { %v186_v15 = vadd.f32 %v185_v25, %v152_v8  ;;  %v207_v50 = vadd.f32 %v206_v37, %v153_v20  ;;  %v759_v59 = vmul.f32 %v634_v51, %v634_v51  ;;  %v761_v43 = vmul.f32 %v141_v54, %v141_v54  ;;  %v159_v51 = vld [vmem:[%s518_s12 + $0x178] sm:$0xff] }
  0x2b   : > { %v228_v52 = vadd.f32 %v227_v5, %v154_v46  ;;  %v249_v53 = vadd.f32 %v248_v41, %v155_v28  ;;  %v767_v44 = vmul.f32 %v640_v55, %v640_v55  ;;  %v771_v47 = vmul.f32 %v644_v57, %v644_v57  ;;  %v160_v55 = vld [vmem:[%s518_s12 + $0x180] sm:$0xff] }
  0x2c   : > { %v187_v39 = vadd.f32 %v186_v15, %v156_v35  ;;  %v773_v10 = vmul.f32 %v144_v60, %v144_v60  ;;  %v775_v48 = vmul.f32 %v145_v63, %v145_v63  ;;  %v208_v13 = vadd.f32 %v207_v50, %v157_v61 }
  0x2d   : > { %v229_v54 = vadd.f32 %v228_v52, %v158_v62  ;;  %v778_v17 = vmul.f32 %v146_v0, %v146_v0  ;;  %v780_v25 = vmul.f32 %v147_v9, %v147_v9  ;;  %v250_v37 = vadd.f32 %v249_v53, %v159_v51  ;;  %v161_v0 = vld [vmem:[%s518_s12 + $0x188] sm:$0xff]  ;;  %v162_v52 = vld [vmem:[%s518_s12 + $0x190] sm:$0xff] }
  0x2e   : > { %v783_v5 = vmul.f32 %v148_v14, %v148_v14  ;;  %v785_v57 = vmul.f32 %v149_v30, %v149_v30  ;;  %v325_v60 = vadd.f32 %v265_v29, %v261_v18  ;;  %v188_v41 = vadd.f32 %v187_v39, %v160_v55  ;;  %v163_v18 = vld [vmem:[%s518_s12 + $0x198] sm:$0xff] }
  0x2f   : > { %868 = vst [vmem:[#allocation2_spill] sm:$0xff] %v780_v25  ;;  %v787_v63 = vmul.f32 %v150_v33, %v150_v33  ;;  %v346_v15 = vadd.f32 %v266_v1, %v657_v21  ;;  %v367_v50 = vadd.f32 %v267_v2, %v661_v22  ;;  %v793_v9 = vmul.f32 %v151_v4, %v151_v4  ;;  %v164_v21 = vld [vmem:[%s518_s12 + $0x1a0] sm:$0xff] }
  0x30   : > { %v795_v25 = vmul.f32 %v152_v8, %v152_v8  ;;  %v326_v53 = vadd.f32 %v325_v60, %v269_v34  ;;  %v388_v14 = vadd.f32 %v268_v3, %v665_v26  ;;  %v209_v29 = vadd.f32 %v208_v13, %v161_v0  ;;  %v165_v13 = vld [vmem:[%s518_s12 + $0x1a8] sm:$0xff] }
  0x31   : > { %v230_v30 = vadd.f32 %v229_v54, %v162_v52  ;;  %v347_v33 = vadd.f32 %v346_v15, %v681_v6  ;;  %v368_v39 = vadd.f32 %v367_v50, %v271_v38  ;;  %v251_v22 = vadd.f32 %v250_v37, %v163_v18  ;;  %v166_v54 = vld [vmem:[%s518_s12 + $0x1b0] sm:$0xff] }
  0x32   : > { %v801_v1 = vmul.f32 %v153_v20, %v153_v20  ;;  %v327_v2 = vadd.f32 %v326_v53, %v273_v11  ;;  %v389_v4 = vadd.f32 %v388_v14, %v688_v7  ;;  %v189_v34 = vadd.f32 %v188_v41, %v164_v21  ;;  %v167_v7 = vld [vmem:[%s518_s12 + $0x1b8] sm:$0xff]  ;;  %v169_v14 = vld [vmem:[%s518_s12 + $0x1c8] sm:$0xff] }
  0x33   : > { %v804_v8 = vmul.f32 %v154_v46, %v154_v46  ;;  %v348_v26 = vadd.f32 %v347_v33, %v695_v12  ;;  %v369_v3 = vadd.f32 %v368_v39, %v699_v42  ;;  %v810_v6 = vmul.f32 %v155_v28, %v155_v28  ;;  %v168_v42 = vld [vmem:[%s518_s12 + $0x1c0] sm:$0xff] }
  0x34   : > { %v812_v38 = vmul.f32 %v156_v35, %v156_v35  ;;  %v328_v20 = vadd.f32 %v327_v2, %v707_v45  ;;  %v390_v11 = vadd.f32 %v389_v4, %v703_v16  ;;  %v210_v37 = vadd.f32 %v209_v29, %v165_v13  ;;  %v170_v29 = vld [vmem:[%s518_s12 + $0x1d0] sm:$0xff] }
  0x35   : > { %v231_v46 = vadd.f32 %v230_v30, %v166_v54  ;;  %v349_v60 = vadd.f32 %v348_v26, %v711_v19  ;;  %v370_v12 = vadd.f32 %v369_v3, %v717_v23  ;;  %v252_v41 = vadd.f32 %v251_v22, %v167_v7  ;;  %v174_v26 = vld [vmem:[%s518_s12 + $0x1f0] sm:$0xff] }
  0x36   : > { %v306_v28 = vmul.f32 %v157_v61, %v157_v61  ;;  %v329_v35 = vadd.f32 %v328_v20, %v725_v24  ;;  %v391_v15 = vadd.f32 %v390_v11, %v721_v49  ;;  %v190_v45 = vadd.f32 %v189_v34, %v168_v42  ;;  %v171_v24 = vld [vmem:[%s518_s12 + $0x1d8] sm:$0xff]  ;;  %v173_v34 = vld [vmem:[%s518_s12 + $0x1e8] sm:$0xff] }
  0x37   : > { %v307_v50 = vmul.f32 %v158_v62, %v158_v62  ;;  %v350_v16 = vadd.f32 %v349_v60, %v729_v27  ;;  %v371_v53 = vadd.f32 %v370_v12, %v734_v31  ;;  %v308_v19 = vmul.f32 %v159_v51, %v159_v51  ;;  %v172_v27 = vld [vmem:[%s518_s12 + $0x1e0] sm:$0xff]  ;;  %v175_v11 = vld [vmem:[%s518_s12 + $0x1f8] sm:$0xff] }
  0x38   : > { %v309_v30 = vmul.f32 %v160_v55, %v160_v55  ;;  %v330_v23 = vadd.f32 %v329_v35, %v743_v56  ;;  %v392_v61 = vadd.f32 %v391_v15, %v738_v32  ;;  %v211_v33 = vadd.f32 %v210_v37, %v169_v14 }
  0x39   : > { %v232_v49 = vadd.f32 %v231_v46, %v170_v29  ;;  %v351_v39 = vadd.f32 %v350_v16, %v747_v36  ;;  %v372_v62 = vadd.f32 %v371_v53, %v751_v58  ;;  %v253_v31 = vadd.f32 %v252_v41, %v171_v24 }
  0x3a   : > { %v310_v22 = vmul.f32 %v161_v0, %v161_v0  ;;  %v331_v51 = vadd.f32 %v330_v23, %v759_v59  ;;  %v393_v55 = vadd.f32 %v392_v61, %v755_v40  ;;  %v191_v56 = vadd.f32 %v190_v45, %v172_v27 }
  0x3b   : > { %v311_v2 = vmul.f32 %v162_v52, %v162_v52  ;;  %v352_v32 = vadd.f32 %v351_v39, %v761_v43  ;;  %v373_v4 = vadd.f32 %v372_v62, %v767_v44  ;;  %v312_v3 = vmul.f32 %v163_v18, %v163_v18  ;;  %v869_v44 = vld [vmem:[#allocation2_spill] sm:$0xff] }
  0x3c   : > { %v313_v36 = vmul.f32 %v164_v21, %v164_v21  ;;  %v332_v58 = vadd.f32 %v331_v51, %v773_v10  ;;  %v394_v20 = vadd.f32 %v393_v55, %v771_v47  ;;  %v212_v0 = vadd.f32 %v211_v33, %v173_v34 }
  0x3d   : > { %v233_v37 = vadd.f32 %v232_v49, %v174_v26  ;;  %v353_v59 = vadd.f32 %v352_v32, %v775_v48  ;;  %v374_v40 = vadd.f32 %v373_v4, %v778_v17  ;;  %v254_v52 = vadd.f32 %v253_v31, %v175_v11 }
  0x3e   : > { %v314_v46 = vmul.f32 %v165_v13, %v165_v13  ;;  %v333_v43 = vadd.f32 %v332_v58, %v783_v5  ;;  %v395_v60 = vadd.f32 %v394_v20, %v869_v44  ;;  %v192_v12 = vrot.slane %v191_v56, 4 }
  0x3f   : > { %v315_v18 = vmul.f32 %v166_v54, %v166_v54  ;;  %v354_v21 = vadd.f32 %v353_v59, %v785_v57  ;;  %v375_v10 = vadd.f32 %v374_v40, %v787_v63  ;;  %v316_v47 = vmul.f32 %v167_v7, %v167_v7 }
  0x40   : > { %v317_v41 = vmul.f32 %v168_v42, %v168_v42  ;;  %v334_v35 = vadd.f32 %v333_v43, %v795_v25  ;;  %v396_v48 = vadd.f32 %v395_v60, %v793_v9  ;;  %v213_v15 = vrot.slane %v212_v0, 4 }
  0x41   : > { %v234_v17 = vrot.slane %v233_v37, 4  ;;  %v355_v13 = vadd.f32 %v354_v21, %v801_v1  ;;  %v376_v5 = vadd.f32 %v375_v10, %v804_v8  ;;  %v255_v45 = vrot.slane %v254_v52, 4 }
  0x42   : > { %v318_v16 = vmul.f32 %v169_v14, %v169_v14  ;;  %v335_v54 = vadd.f32 %v334_v35, %v812_v38  ;;  %v397_v57 = vadd.f32 %v396_v48, %v810_v6  ;;  %v193_v53 = vadd.f32 %v192_v12, %v191_v56 }
  0x43   : > { %v319_v63 = vmul.f32 %v170_v29, %v170_v29  ;;  %v356_v7 = vadd.f32 %v355_v13, %v306_v28  ;;  %v377_v42 = vadd.f32 %v376_v5, %v307_v50  ;;  %v320_v23 = vmul.f32 %v171_v24, %v171_v24 }
  0x44   : > { %v321_v25 = vmul.f32 %v172_v27, %v172_v27  ;;  %v336_v61 = vadd.f32 %v335_v54, %v309_v30  ;;  %v398_v9 = vadd.f32 %v397_v57, %v308_v19  ;;  %v214_v33 = vadd.f32 %v213_v15, %v212_v0 }
  0x45   : > { %v235_v49 = vadd.f32 %v234_v17, %v233_v37  ;;  %v357_v39 = vadd.f32 %v356_v7, %v310_v22  ;;  %v378_v1 = vadd.f32 %v377_v42, %v311_v2  ;;  %v256_v62 = vadd.f32 %v255_v45, %v254_v52 }
  0x46   : > { %v322_v8 = vmul.f32 %v173_v34, %v173_v34  ;;  %v337_v31 = vadd.f32 %v336_v61, %v313_v36  ;;  %v399_v14 = vadd.f32 %v398_v9, %v312_v3  ;;  %v194_v51 = vrot.slane %v193_v53, 2 }
  0x47   : > { %v323_v38 = vmul.f32 %v174_v26, %v174_v26  ;;  %v358_v55 = vadd.f32 %v357_v39, %v314_v46  ;;  %v379_v6 = vadd.f32 %v378_v1, %v315_v18  ;;  %v324_v56 = vmul.f32 %v175_v11, %v175_v11 }
  0x48   : > { %v338_v29 = vadd.f32 %v337_v31, %v317_v41  ;;  %v400_v28 = vadd.f32 %v399_v14, %v316_v47  ;;  %v215_v50 = vrot.slane %v214_v33, 2  ;;  %v236_v24 = vrot.slane %v235_v49, 2 }
  0x49   : > { %v359_v27 = vadd.f32 %v358_v55, %v318_v16  ;;  %v380_v30 = vadd.f32 %v379_v6, %v319_v63  ;;  %v257_v19 = vrot.slane %v256_v62, 2  ;;  %v195_v22 = vadd.f32 %v194_v51, %v193_v53  ;;  %v176_v6 = vld [vmem:[%s867_s1] sm:$0xff] }
  0x4a   : > { %v339_v32 = vadd.f32 %v338_v29, %v321_v25  ;;  %v401_v4 = vadd.f32 %v400_v28, %v320_v23  ;;  %v216_v3 = vadd.f32 %v215_v50, %v214_v33  ;;  %v237_v20 = vadd.f32 %v236_v24, %v235_v49 }
  0x4b   : > { %v360_v2 = vadd.f32 %v359_v27, %v322_v8  ;;  %v381_v58 = vadd.f32 %v380_v30, %v323_v38  ;;  %v258_v37 = vadd.f32 %v257_v19, %v256_v62  ;;  %v196_v40 = vrot.slane %v195_v22, 1 }
  0x4c   : > { %v340_v34 = vrot.slane %v339_v32, 4  ;;  %v402_v36 = vadd.f32 %v401_v4, %v324_v56  ;;  %v496_v60 = vmov 1983009808   ;;  %v423_v18 = vlaneseq }
  0x4d   : > { %v361_v26 = vrot.slane %v360_v2, 4  ;;  %v382_v0 = vrot.slane %v381_v58, 4  ;;  %v421_v12 = vunpack.c.l.s4 %v496_v60  ;;  %v217_v21 = vrot.slane %v216_v3, 1 }
  0x4e   : > { %v341_v11 = vadd.f32 %v340_v34, %v339_v32  ;;  %v403_v59 = vrot.slane %v402_v36, 4  ;;  %v238_v10 = vrot.slane %v237_v20, 1  ;;  %v259_v35 = vrot.slane %v258_v37, 1 }
  0x4f   : > { %v362_v52 = vadd.f32 %v361_v26, %v360_v2  ;;  %v383_v46 = vadd.f32 %v382_v0, %v381_v58  ;;  %v197_v17 = vadd.f32 %v196_v40, %v195_v22  ;;  %v422_v54 = vunpack.c.0.s8 %v421_v12 }
  0x50   : > { %v342_v43 = vrot.slane %v341_v11, 2  ;;  %v404_v44 = vadd.f32 %v403_v59, %v402_v36  ;;  %v424_v57 = vshrl.u32 %v423_v18, 7  ;;  %v218_v53 = vadd.f32 %v217_v21, %v216_v3 }
  0x51   : > { %v363_v47 = vrot.slane %v362_v52, 2  ;;  %v384_v41 = vrot.slane %v383_v46, 2  ;;  %v239_v63 = vadd.f32 %v238_v10, %v237_v20  ;;  %v260_v23 = vadd.f32 %v259_v35, %v258_v37 }
  0x52   : > { %v343_v48 = vadd.f32 %v342_v43, %v341_v11  ;;  %v405_v15 = vrot.slane %v404_v44, 2  ;;  %v425_v1 = vsub.s32 %v422_v54, %v424_v57 }
  0x53   : > { %v364_v13 = vadd.f32 %v363_v47, %v362_v52  ;;  %v385_v5 = vadd.f32 %v384_v41, %v383_v46 }
  0x54   : > { %v344_v45 = vrot.slane %v343_v48, 1  ;;  %v406_v16 = vadd.f32 %v405_v15, %v404_v44 }
  0x55   : > { %v365_v7 = vrot.slane %v364_v13, 1  ;;  %v386_v42 = vrot.slane %v385_v5, 1 }
  0x56   : > { %v345_v25 = vadd.f32 %v344_v45, %v343_v48  ;;  %v407_v61 = vrot.slane %v406_v16, 1 }
  0x57   : > { %v366_v9 = vadd.f32 %v365_v7, %v364_v13  ;;  %v387_v33 = vadd.f32 %v386_v42, %v385_v5 }
  0x58   : > { %v408_v49 = vadd.f32 %v407_v61, %v406_v16  ;;  %v410_v39 = vsel %vm409_vm0, %v197_v17, %v345_v25 }
  0x59   : > { %v411_v62 = vsel %vm409_vm0, %v218_v53, %v366_v9  ;;  %v412_v8 = vsel %vm409_vm0, %v239_v63, %v387_v33 }
  0x5a   : > { %v413_v31 = vsel %vm409_vm0, %v260_v23, %v408_v49  ;;  %v418_v14 = vcombine.low %v410_v39, %v411_v62 }
  0x5b   : > { %v419_v51 = vcombine.low %v412_v8, %v413_v31 }
  0x5c   : > { %v426_v38 = vrot.slane %v418_v14, %v425_v1 }
  0x5d   : > { %v433_v55 = vrot.slane %v419_v51, %v425_v1 }
  0x5f   : > { %v434_v56 = vcombine.low %v426_v38, %v433_v55 }
  0x61   : > { %v436_v29 = vadd.f32 %v434_v56, %v176_v6 }
  0x63   : > { %437 = vst [vmem:[%s867_s1] sm:$0xff] %v436_v29 }
  0x64 PF: > { %s11_s6 = sadd.s32 1, %s493_s6  }
  0x65   : > { %p8_p5 = scmp.ge.s32.totalorder %s11_s6, 4  }
  0x67   :  { %10 = sbr.rel (!%p8_p5) target bundleno = 1 (0x1), region = 54 }

// kernel: tile.18
= control target key start
LH: loop header
LB: loop body
LE: loop exit
PB: predicated region body
PF: predicated region fallthrough
CT: control target
= control target key end

     0   :  { %s22_s0 = inlined_call_operand.vmem [shape: f32[64], index: 0, kind: input, shape index: {}]   ;;  %s23_s1 = inlined_call_operand.vmem [shape: f32[8,64], index: 1, kind: output, shape index: {}]  }
   0x1   :  { %v4_v0 = vld [vmem:[%s22_s0] ss:$0 sm:$0xff] }
   0x2   :  { %5 = vst [vmem:[%s23_s1] sm:$0xff] %v4_v0 }

// kernel: tile.23
= control target key start
LH: loop header
LB: loop body
LE: loop exit
PB: predicated region body
PF: predicated region fallthrough
CT: control target
= control target key end

     0   :  { %vm3_vm0 = vcmask 523264   ;;  %s41_s8 = smov 64   ;;  %vm9_vm1 = vcmask 1048064   ;;  %s70_s0 = inlined_call_operand.vmem [shape: f32[8,64], index: 0, kind: input, shape index: {}]   ;;  %s71_s1 = inlined_call_operand.vmem [shape: f32[1,512], index: 1, kind: output, shape index: {}]  }
   0x1   :  { %v36_v0 = vld [vmem:[%s70_s0 + $0x1] ss:$2 sm:$0xf]   ;;  %v2_v1 = vld [vmem:[%s70_s0] ss:$2 sm:$0xf]  }
   0x2   :  { %7 = vrot.lane.b32.xlu0 %v36_v0, %s41_s8  ;;  %4 = vst.msk [vmem:[#allocation0] ss:$8 sm:$0xf] %vm3_vm0, %v2_v1  }
  0x74   :  { %v8_v2 = vpop.permute.xlu0 %7  }
  0x75   :  { %10 = vst.msk [vmem:[#allocation0] ss:$8 sm:$0xf] %vm9_vm1, %v8_v2  }
  0x7c   :  { %v14_v3 = vld [vmem:[#allocation0] sm:$0x1]  ;;  %v18_v4 = vld [vmem:[#allocation0 + $0x8] sm:$0x1]  ;;  %v23_v5 = vld [vmem:[#allocation0 + $0x10] sm:$0x1] }
  0x7d   :  { %16 = vst [vmem:[%s71_s1] sm:$0x1] %v14_v3  ;;  %37 = vst [vmem:[%s71_s1 + $0x1] sm:$0x1] %v18_v4  ;;  %v29_v6 = vld [vmem:[#allocation0 + $0x18] sm:$0x1] }
  0x7e   :  { %38 = vst [vmem:[%s71_s1 + $0x2] sm:$0x1] %v23_v5  ;;  %39 = vst [vmem:[%s71_s1 + $0x3] sm:$0x1] %v29_v6 }

// kernel: generator_forward.15
= control target key start
LH: loop header
LB: loop body
LE: loop exit
PB: predicated region body
PF: predicated region fallthrough
CT: control target
= control target key end

     0   :  { %s652_s12 = smov 0   ;;  %s954_s0 = inlined_call_operand.vmem [shape: f32[256,512], index: 0, kind: input, shape index: {}]   ;;  %s955_s1 = inlined_call_operand.vmem [shape: f32[1,512], index: 1, kind: input, shape index: {}]   ;;  %s956_s2 = inlined_call_operand.vmem [shape: f32[1,512], index: 2, kind: input, shape index: {}]   ;;  %s957_s3 = inlined_call_operand.vmem [shape: f32[256,512], index: 3, kind: output, shape index: {}]  }
   0x1 LB: > { %s601_s13 = sadd.s32 4294967295, %s630_s12   ;;  %p605_p0 = scmp.ge.s32.totalorder %s630_s12, 1  ;;  %s630_s12 = sphi %s652_s12, %s13_s12  }
   0x2   : > { %p139_p1 = scmp.lt.s32.totalorder %s630_s12, 3 }
   0x4   : > { %p140_p2 = pnand %p605_p0, %p139_p1 }
   0x5   : > { %s606_s14 = sshll.u32 (!%p140_p2), %s601_s13, 4  ;;  %v245_v0 = vlaneseq (!%p140_p2)  ;;  %v243_v2 = vld [vmem:[%s955_s1] sm:$0xf] (!%p140_p2) }
   0x6   : > { %143 = sbr.rel (%p140_p2) target bundleno = 73 (0x49), region = 32  ;;  %p166_p3 = scmp.lt.s32.totalorder (!%p140_p2), %s606_s14, 31  ;;  %v329_v3 = vld [vmem:[%s956_s2] sm:$0xf] (!%p140_p2) }
   0x7   : > { %v246_v1 = vshrl.u32 (!%p140_p2), %v245_v0, 7 }
   0x9   : > { %v247_v4 = vsub.s32 (!%p140_p2), 0, %v246_v1  ;;  %v251_v5 = vsub.s32 (!%p140_p2), 1, %v246_v1  ;;  %v255_v6 = vsub.s32 (!%p140_p2), 2, %v246_v1  ;;  %v259_v7 = vsub.s32 (!%p140_p2), 3, %v246_v1 }
   0xb   : > { %v674_v8 = vrot.slane (!%p140_p2), %v243_v2, %v247_v4  ;;  %v676_v9 = vrot.slane (!%p140_p2), %v329_v3, %v247_v4  ;;  %v678_v10 = vrot.slane (!%p140_p2), %v243_v2, %v251_v5  ;;  %v680_v11 = vrot.slane (!%p140_p2), %v329_v3, %v251_v5 }
   0xc   : > { %v685_v15 = vrot.slane (!%p140_p2), %v243_v2, %v255_v6  ;;  %v687_v16 = vrot.slane (!%p140_p2), %v329_v3, %v255_v6  ;;  %v689_v17 = vrot.slane (!%p140_p2), %v243_v2, %v259_v7  ;;  %v691_v18 = vrot.slane (!%p140_p2), %v329_v3, %v259_v7 }
   0xd   : > { %s959_s14 = smov (!%p166_p3, %s606_s14), 31 }
   0xe   : > { %s614_s19 = sshll.u32 %s959_s14, 5 }
   0xf   : > { %s672_s22 = scalar_lea.vmem %s954_s0, %s614_s19  ;;  %s711_s25 = scalar_lea.vmem %s957_s3, %s614_s19 }
  0x10   : > { %v179_v12 = vld [vmem:[%s672_s22] sm:$0xff]  ;;  %v180_v13 = vld [vmem:[%s672_s22 + $0x8] sm:$0xff]  ;;  %v181_v14 = vld [vmem:[%s672_s22 + $0x10] sm:$0xff] }
  0x11   : > { %v265_v19 = vmul.f32 %v674_v8, %v179_v12  ;;  %v266_v20 = vmul.f32 %v678_v10, %v180_v13  ;;  %v182_v21 = vld [vmem:[%s672_s22 + $0x18] sm:$0xff]  ;;  %v183_v22 = vld [vmem:[%s672_s22 + $0x20] sm:$0xff]  ;;  %v184_v23 = vld [vmem:[%s672_s22 + $0x28] sm:$0xff]  ;;  %v267_v24 = vmul.f32 %v685_v15, %v181_v14 }
  0x12   : > { %v268_v25 = vmul.f32 %v689_v17, %v182_v21  ;;  %v269_v26 = vmul.f32 %v674_v8, %v183_v22  ;;  %v270_v27 = vmul.f32 %v678_v10, %v184_v23  ;;  %v185_v28 = vld [vmem:[%s672_s22 + $0x30] sm:$0xff]  ;;  %v186_v29 = vld [vmem:[%s672_s22 + $0x38] sm:$0xff]  ;;  %v187_v38 = vld [vmem:[%s672_s22 + $0x40] sm:$0xff] }
  0x13   : > { %v351_v30 = vadd.f32 %v676_v9, %v265_v19  ;;  %v352_v31 = vadd.f32 %v680_v11, %v266_v20  ;;  %v271_v32 = vmul.f32 %v685_v15, %v185_v28  ;;  %v272_v33 = vmul.f32 %v689_v17, %v186_v29  ;;  %v188_v39 = vld [vmem:[%s672_s22 + $0x48] sm:$0xff]  ;;  %v189_v40 = vld [vmem:[%s672_s22 + $0x50] sm:$0xff]  ;;  %v190_v45 = vld [vmem:[%s672_s22 + $0x58] sm:$0xff] }
  0x14   : > { %v353_v34 = vadd.f32 %v687_v16, %v267_v24  ;;  %v354_v35 = vadd.f32 %v691_v18, %v268_v25  ;;  %v355_v36 = vadd.f32 %v676_v9, %v269_v26  ;;  %v356_v37 = vadd.f32 %v680_v11, %v270_v27  ;;  %v191_v46 = vld [vmem:[%s672_s22 + $0x60] sm:$0xff]  ;;  %v192_v47 = vld [vmem:[%s672_s22 + $0x68] sm:$0xff]  ;;  %v193_v52 = vld [vmem:[%s672_s22 + $0x70] sm:$0xff] }
  0x15   : > { %v415_v41 = vmax.f32 %v351_v30, 0.0  ;;  %v416_v42 = vmax.f32 %v352_v31, 0.0  ;;  %v357_v43 = vadd.f32 %v687_v16, %v271_v32  ;;  %v358_v44 = vadd.f32 %v691_v18, %v272_v33  ;;  %v194_v53 = vld [vmem:[%s672_s22 + $0x78] sm:$0xff]  ;;  %v195_v6 = vld [vmem:[%s672_s22 + $0x80] sm:$0xff]  ;;  %v196_v7 = vld [vmem:[%s672_s22 + $0x88] sm:$0xff] }
  0x16   : > { %v417_v48 = vmax.f32 %v353_v34, 0.0  ;;  %v418_v49 = vmax.f32 %v354_v35, 0.0  ;;  %v419_v50 = vmax.f32 %v355_v36, 0.0  ;;  %v420_v51 = vmax.f32 %v356_v37, 0.0  ;;  %v197_v12 = vld [vmem:[%s672_s22 + $0x90] sm:$0xff]  ;;  %v198_v21 = vld [vmem:[%s672_s22 + $0x98] sm:$0xff] }
  0x17   : > { %479 = vst [vmem:[%s711_s25] sm:$0xff] %v415_v41  ;;  %480 = vst [vmem:[%s711_s25 + $0x8] sm:$0xff] %v416_v42  ;;  %v421_v54 = vmax.f32 %v357_v43, 0.0  ;;  %v422_v55 = vmax.f32 %v358_v44, 0.0  ;;  %v273_v56 = vmul.f32 %v674_v8, %v187_v38  ;;  %v274_v57 = vmul.f32 %v678_v10, %v188_v39  ;;  %v199_v22 = vld [vmem:[%s672_s22 + $0xa0] sm:$0xff]  ;;  %v200_v23 = vld [vmem:[%s672_s22 + $0xa8] sm:$0xff] }
  0x18   : > { %481 = vst [vmem:[%s711_s25 + $0x10] sm:$0xff] %v417_v48  ;;  %482 = vst [vmem:[%s711_s25 + $0x18] sm:$0xff] %v418_v49  ;;  %v275_v58 = vmul.f32 %v685_v15, %v189_v40  ;;  %v276_v59 = vmul.f32 %v689_v17, %v190_v45  ;;  %v277_v60 = vmul.f32 %v674_v8, %v191_v46  ;;  %v201_v28 = vld [vmem:[%s672_s22 + $0xb0] sm:$0xff]  ;;  %v202_v29 = vld [vmem:[%s672_s22 + $0xb8] sm:$0xff] }
  0x19   : > { %483 = vst [vmem:[%s711_s25 + $0x20] sm:$0xff] %v419_v50  ;;  %484 = vst [vmem:[%s711_s25 + $0x28] sm:$0xff] %v420_v51  ;;  %v278_v61 = vmul.f32 %v678_v10, %v192_v47  ;;  %v359_v62 = vadd.f32 %v676_v9, %v273_v56  ;;  %v360_v63 = vadd.f32 %v680_v11, %v274_v57  ;;  %v203_v46 = vld [vmem:[%s672_s22 + $0xc0] sm:$0xff]  ;;  %v204_v47 = vld [vmem:[%s672_s22 + $0xc8] sm:$0xff] }
  0x1a   : > { %485 = vst [vmem:[%s711_s25 + $0x30] sm:$0xff] %v421_v54  ;;  %486 = vst [vmem:[%s711_s25 + $0x38] sm:$0xff] %v422_v55  ;;  %v279_v0 = vmul.f32 %v685_v15, %v193_v52  ;;  %v280_v1 = vmul.f32 %v689_v17, %v194_v53  ;;  %v361_v2 = vadd.f32 %v687_v16, %v275_v58  ;;  %v205_v48 = vld [vmem:[%s672_s22 + $0xd0] sm:$0xff]  ;;  %v206_v53 = vld [vmem:[%s672_s22 + $0xd8] sm:$0xff] }
  0x1b   : > { %v362_v3 = vadd.f32 %v691_v18, %v276_v59  ;;  %v363_v4 = vadd.f32 %v676_v9, %v277_v60  ;;  %v364_v5 = vadd.f32 %v680_v11, %v278_v61  ;;  %v423_v13 = vmax.f32 %v359_v62, 0.0  ;;  %v207_v54 = vld [vmem:[%s672_s22 + $0xe0] sm:$0xff]  ;;  %v208_v55 = vld [vmem:[%s672_s22 + $0xe8] sm:$0xff]  ;;  %v209_v60 = vld [vmem:[%s672_s22 + $0xf0] sm:$0xff] }
  0x1c   : > { %v424_v14 = vmax.f32 %v360_v63, 0.0  ;;  %v365_v19 = vadd.f32 %v687_v16, %v279_v0  ;;  %v366_v20 = vadd.f32 %v691_v18, %v280_v1  ;;  %v425_v24 = vmax.f32 %v361_v2, 0.0  ;;  %v210_v61 = vld [vmem:[%s672_s22 + $0xf8] sm:$0xff] }
  0x1d   : > { %v426_v25 = vmax.f32 %v362_v3, 0.0  ;;  %v427_v26 = vmax.f32 %v363_v4, 0.0  ;;  %v428_v27 = vmax.f32 %v364_v5, 0.0  ;;  %487 = vst [vmem:[%s711_s25 + $0x40] sm:$0xff] %v423_v13  ;;  %v281_v32 = vmul.f32 %v674_v8, %v195_v6 }
  0x1e   : > { %488 = vst [vmem:[%s711_s25 + $0x48] sm:$0xff] %v424_v14  ;;  %v429_v30 = vmax.f32 %v365_v19, 0.0  ;;  %v430_v31 = vmax.f32 %v366_v20, 0.0  ;;  %v282_v33 = vmul.f32 %v678_v10, %v196_v7  ;;  %489 = vst [vmem:[%s711_s25 + $0x50] sm:$0xff] %v425_v24  ;;  %v283_v34 = vmul.f32 %v685_v15, %v197_v12  ;;  %v213_v24 = vld [vmem:[%s672_s22 + $0x110] sm:$0xff] }
  0x1f   : > { %490 = vst [vmem:[%s711_s25 + $0x58] sm:$0xff] %v426_v25  ;;  %491 = vst [vmem:[%s711_s25 + $0x60] sm:$0xff] %v427_v26  ;;  %v284_v35 = vmul.f32 %v689_v17, %v198_v21  ;;  %v285_v36 = vmul.f32 %v674_v8, %v199_v22  ;;  %v286_v37 = vmul.f32 %v678_v10, %v200_v23  ;;  %v211_v22 = vld [vmem:[%s672_s22 + $0x100] sm:$0xff]  ;;  %v212_v23 = vld [vmem:[%s672_s22 + $0x108] sm:$0xff] }
  0x20   : > { %492 = vst [vmem:[%s711_s25 + $0x68] sm:$0xff] %v428_v27  ;;  %493 = vst [vmem:[%s711_s25 + $0x70] sm:$0xff] %v429_v30  ;;  %v367_v38 = vadd.f32 %v676_v9, %v281_v32  ;;  %v368_v39 = vadd.f32 %v680_v11, %v282_v33  ;;  %v287_v40 = vmul.f32 %v685_v15, %v201_v28  ;;  %v215_v30 = vld [vmem:[%s672_s22 + $0x120] sm:$0xff] }
  0x21   : > { %494 = vst [vmem:[%s711_s25 + $0x78] sm:$0xff] %v430_v31  ;;  %v288_v41 = vmul.f32 %v689_v17, %v202_v29  ;;  %v369_v42 = vadd.f32 %v687_v16, %v283_v34  ;;  %v370_v43 = vadd.f32 %v691_v18, %v284_v35  ;;  %v371_v44 = vadd.f32 %v676_v9, %v285_v36  ;;  %v214_v29 = vld [vmem:[%s672_s22 + $0x118] sm:$0xff]  ;;  %v216_v31 = vld [vmem:[%s672_s22 + $0x128] sm:$0xff]  ;;  %v217_v36 = vld [vmem:[%s672_s22 + $0x130] sm:$0xff] }
  0x22   : > { %v372_v45 = vadd.f32 %v680_v11, %v286_v37  ;;  %v431_v49 = vmax.f32 %v367_v38, 0.0  ;;  %v432_v50 = vmax.f32 %v368_v39, 0.0  ;;  %v373_v51 = vadd.f32 %v687_v16, %v287_v40  ;;  %v218_v37 = vld [vmem:[%s672_s22 + $0x138] sm:$0xff] }
  0x23   : > { %v374_v52 = vadd.f32 %v691_v18, %v288_v41  ;;  %v433_v56 = vmax.f32 %v369_v42, 0.0  ;;  %v434_v57 = vmax.f32 %v370_v43, 0.0  ;;  %v435_v58 = vmax.f32 %v371_v44, 0.0 }
  0x24   : > { %v436_v59 = vmax.f32 %v372_v45, 0.0  ;;  %495 = vst [vmem:[%s711_s25 + $0x80] sm:$0xff] %v431_v49  ;;  %496 = vst [vmem:[%s711_s25 + $0x88] sm:$0xff] %v432_v50  ;;  %v437_v62 = vmax.f32 %v373_v51, 0.0  ;;  %v289_v0 = vmul.f32 %v674_v8, %v203_v46  ;;  %v290_v1 = vmul.f32 %v678_v10, %v204_v47 }
  0x25   : > { %v438_v63 = vmax.f32 %v374_v52, 0.0  ;;  %497 = vst [vmem:[%s711_s25 + $0x90] sm:$0xff] %v433_v56  ;;  %498 = vst [vmem:[%s711_s25 + $0x98] sm:$0xff] %v434_v57  ;;  %v291_v2 = vmul.f32 %v685_v15, %v205_v48  ;;  %v292_v3 = vmul.f32 %v689_v17, %v206_v53  ;;  %v293_v4 = vmul.f32 %v674_v8, %v207_v54  ;;  %v219_v54 = vld [vmem:[%s672_s22 + $0x140] sm:$0xff]  ;;  %v221_v56 = vld [vmem:[%s672_s22 + $0x150] sm:$0xff] }
  0x26   : > { %499 = vst [vmem:[%s711_s25 + $0xa0] sm:$0xff] %v435_v58  ;;  %500 = vst [vmem:[%s711_s25 + $0xa8] sm:$0xff] %v436_v59  ;;  %v294_v5 = vmul.f32 %v678_v10, %v208_v55  ;;  %v375_v6 = vadd.f32 %v676_v9, %v289_v0  ;;  %v376_v7 = vadd.f32 %v680_v11, %v290_v1  ;;  %v220_v55 = vld [vmem:[%s672_s22 + $0x148] sm:$0xff] }
  0x27   : > { %501 = vst [vmem:[%s711_s25 + $0xb0] sm:$0xff] %v437_v62  ;;  %502 = vst [vmem:[%s711_s25 + $0xb8] sm:$0xff] %v438_v63  ;;  %v295_v12 = vmul.f32 %v685_v15, %v209_v60  ;;  %v296_v13 = vmul.f32 %v689_v17, %v210_v61  ;;  %v377_v14 = vadd.f32 %v687_v16, %v291_v2  ;;  %v222_v61 = vld [vmem:[%s672_s22 + $0x158] sm:$0xff]  ;;  %v223_v62 = vld [vmem:[%s672_s22 + $0x160] sm:$0xff] }
  0x28   : > { %v378_v19 = vadd.f32 %v691_v18, %v292_v3  ;;  %v379_v20 = vadd.f32 %v676_v9, %v293_v4  ;;  %v380_v21 = vadd.f32 %v680_v11, %v294_v5  ;;  %v439_v25 = vmax.f32 %v375_v6, 0.0  ;;  %v224_v63 = vld [vmem:[%s672_s22 + $0x168] sm:$0xff]  ;;  %v225_v4 = vld [vmem:[%s672_s22 + $0x170] sm:$0xff]  ;;  %v226_v5 = vld [vmem:[%s672_s22 + $0x178] sm:$0xff] }
  0x29   : > { %v440_v26 = vmax.f32 %v376_v7, 0.0  ;;  %v381_v27 = vadd.f32 %v687_v16, %v295_v12  ;;  %v382_v28 = vadd.f32 %v691_v18, %v296_v13  ;;  %v441_v32 = vmax.f32 %v377_v14, 0.0 }
  0x2a   : > { %v442_v33 = vmax.f32 %v378_v19, 0.0  ;;  %v443_v34 = vmax.f32 %v379_v20, 0.0  ;;  %v444_v35 = vmax.f32 %v380_v21, 0.0  ;;  %503 = vst [vmem:[%s711_s25 + $0xc0] sm:$0xff] %v439_v25  ;;  %v297_v40 = vmul.f32 %v674_v8, %v211_v22 }
  0x2b   : > { %504 = vst [vmem:[%s711_s25 + $0xc8] sm:$0xff] %v440_v26  ;;  %v445_v38 = vmax.f32 %v381_v27, 0.0  ;;  %v446_v39 = vmax.f32 %v382_v28, 0.0  ;;  %v298_v41 = vmul.f32 %v678_v10, %v212_v23  ;;  %505 = vst [vmem:[%s711_s25 + $0xd0] sm:$0xff] %v441_v32  ;;  %v299_v42 = vmul.f32 %v685_v15, %v213_v24  ;;  %v229_v32 = vld [vmem:[%s672_s22 + $0x190] sm:$0xff] }
  0x2c   : > { %506 = vst [vmem:[%s711_s25 + $0xd8] sm:$0xff] %v442_v33  ;;  %507 = vst [vmem:[%s711_s25 + $0xe0] sm:$0xff] %v443_v34  ;;  %v300_v43 = vmul.f32 %v689_v17, %v214_v29  ;;  %v301_v44 = vmul.f32 %v674_v8, %v215_v30  ;;  %v302_v45 = vmul.f32 %v678_v10, %v216_v31  ;;  %v227_v30 = vld [vmem:[%s672_s22 + $0x180] sm:$0xff]  ;;  %v228_v31 = vld [vmem:[%s672_s22 + $0x188] sm:$0xff] }
  0x2d   : > { %508 = vst [vmem:[%s711_s25 + $0xe8] sm:$0xff] %v444_v35  ;;  %509 = vst [vmem:[%s711_s25 + $0xf0] sm:$0xff] %v445_v38  ;;  %v383_v46 = vadd.f32 %v676_v9, %v297_v40  ;;  %v384_v47 = vadd.f32 %v680_v11, %v298_v41  ;;  %v303_v48 = vmul.f32 %v685_v15, %v217_v36  ;;  %v231_v38 = vld [vmem:[%s672_s22 + $0x1a0] sm:$0xff] }
  0x2e   : > { %510 = vst [vmem:[%s711_s25 + $0xf8] sm:$0xff] %v446_v39  ;;  %v304_v49 = vmul.f32 %v689_v17, %v218_v37  ;;  %v385_v50 = vadd.f32 %v687_v16, %v299_v42  ;;  %v386_v51 = vadd.f32 %v691_v18, %v300_v43  ;;  %v387_v52 = vadd.f32 %v676_v9, %v301_v44  ;;  %v230_v37 = vld [vmem:[%s672_s22 + $0x198] sm:$0xff]  ;;  %v232_v39 = vld [vmem:[%s672_s22 + $0x1a8] sm:$0xff]  ;;  %v233_v44 = vld [vmem:[%s672_s22 + $0x1b0] sm:$0xff] }
  0x2f   : > { %v388_v53 = vadd.f32 %v680_v11, %v302_v45  ;;  %v447_v57 = vmax.f32 %v383_v46, 0.0  ;;  %v448_v58 = vmax.f32 %v384_v47, 0.0  ;;  %v389_v59 = vadd.f32 %v687_v16, %v303_v48  ;;  %v234_v45 = vld [vmem:[%s672_s22 + $0x1b8] sm:$0xff] }
  0x30   : > { %v390_v60 = vadd.f32 %v691_v18, %v304_v49  ;;  %v449_v0 = vmax.f32 %v385_v50, 0.0  ;;  %v450_v1 = vmax.f32 %v386_v51, 0.0  ;;  %v451_v2 = vmax.f32 %v387_v52, 0.0 }
  0x31   : > { %v452_v3 = vmax.f32 %v388_v53, 0.0  ;;  %511 = vst [vmem:[%s711_s25 + $0x100] sm:$0xff] %v447_v57  ;;  %512 = vst [vmem:[%s711_s25 + $0x108] sm:$0xff] %v448_v58  ;;  %v453_v6 = vmax.f32 %v389_v59, 0.0  ;;  %v305_v12 = vmul.f32 %v674_v8, %v219_v54  ;;  %v306_v13 = vmul.f32 %v678_v10, %v220_v55 }
  0x32   : > { %v454_v7 = vmax.f32 %v390_v60, 0.0  ;;  %513 = vst [vmem:[%s711_s25 + $0x110] sm:$0xff] %v449_v0  ;;  %514 = vst [vmem:[%s711_s25 + $0x118] sm:$0xff] %v450_v1  ;;  %v307_v14 = vmul.f32 %v685_v15, %v221_v56  ;;  %v308_v19 = vmul.f32 %v689_v17, %v222_v61  ;;  %v309_v20 = vmul.f32 %v674_v8, %v223_v62  ;;  %v235_v62 = vld [vmem:[%s672_s22 + $0x1c0] sm:$0xff]  ;;  %v237_v0 = vld [vmem:[%s672_s22 + $0x1d0] sm:$0xff] }
  0x33   : > { %515 = vst [vmem:[%s711_s25 + $0x120] sm:$0xff] %v451_v2  ;;  %516 = vst [vmem:[%s711_s25 + $0x128] sm:$0xff] %v452_v3  ;;  %v310_v21 = vmul.f32 %v678_v10, %v224_v63  ;;  %v391_v22 = vadd.f32 %v676_v9, %v305_v12  ;;  %v392_v23 = vadd.f32 %v680_v11, %v306_v13  ;;  %v236_v63 = vld [vmem:[%s672_s22 + $0x1c8] sm:$0xff] }
  0x34   : > { %517 = vst [vmem:[%s711_s25 + $0x130] sm:$0xff] %v453_v6  ;;  %518 = vst [vmem:[%s711_s25 + $0x138] sm:$0xff] %v454_v7  ;;  %v311_v24 = vmul.f32 %v685_v15, %v225_v4  ;;  %v312_v25 = vmul.f32 %v689_v17, %v226_v5  ;;  %v393_v26 = vadd.f32 %v687_v16, %v307_v14  ;;  %v238_v5 = vld [vmem:[%s672_s22 + $0x1d8] sm:$0xff]  ;;  %v239_v6 = vld [vmem:[%s672_s22 + $0x1e0] sm:$0xff] }
  0x35   : > { %v394_v27 = vadd.f32 %v691_v18, %v308_v19  ;;  %v395_v28 = vadd.f32 %v676_v9, %v309_v20  ;;  %v396_v29 = vadd.f32 %v680_v11, %v310_v21  ;;  %v455_v33 = vmax.f32 %v391_v22, 0.0  ;;  %v240_v7 = vld [vmem:[%s672_s22 + $0x1e8] sm:$0xff]  ;;  %v241_v20 = vld [vmem:[%s672_s22 + $0x1f0] sm:$0xff]  ;;  %v242_v21 = vld [vmem:[%s672_s22 + $0x1f8] sm:$0xff] }
  0x36   : > { %v456_v34 = vmax.f32 %v392_v23, 0.0  ;;  %v397_v35 = vadd.f32 %v687_v16, %v311_v24  ;;  %v398_v36 = vadd.f32 %v691_v18, %v312_v25  ;;  %v457_v40 = vmax.f32 %v393_v26, 0.0 }
  0x37   : > { %v458_v41 = vmax.f32 %v394_v27, 0.0  ;;  %v459_v42 = vmax.f32 %v395_v28, 0.0  ;;  %v460_v43 = vmax.f32 %v396_v29, 0.0  ;;  %519 = vst [vmem:[%s711_s25 + $0x140] sm:$0xff] %v455_v33  ;;  %v313_v48 = vmul.f32 %v674_v8, %v227_v30 }
  0x38   : > { %520 = vst [vmem:[%s711_s25 + $0x148] sm:$0xff] %v456_v34  ;;  %v461_v46 = vmax.f32 %v397_v35, 0.0  ;;  %v462_v47 = vmax.f32 %v398_v36, 0.0  ;;  %v314_v49 = vmul.f32 %v678_v10, %v228_v31  ;;  %521 = vst [vmem:[%s711_s25 + $0x150] sm:$0xff] %v457_v40  ;;  %v315_v50 = vmul.f32 %v685_v15, %v229_v32 }
  0x39   : > { %522 = vst [vmem:[%s711_s25 + $0x158] sm:$0xff] %v458_v41  ;;  %523 = vst [vmem:[%s711_s25 + $0x160] sm:$0xff] %v459_v42  ;;  %v316_v51 = vmul.f32 %v689_v17, %v230_v37  ;;  %v317_v52 = vmul.f32 %v674_v8, %v231_v38  ;;  %v318_v53 = vmul.f32 %v678_v10, %v232_v39 }
  0x3a   : > { %524 = vst [vmem:[%s711_s25 + $0x168] sm:$0xff] %v460_v43  ;;  %525 = vst [vmem:[%s711_s25 + $0x170] sm:$0xff] %v461_v46  ;;  %v399_v54 = vadd.f32 %v676_v9, %v313_v48  ;;  %v400_v55 = vadd.f32 %v680_v11, %v314_v49  ;;  %v319_v56 = vmul.f32 %v685_v15, %v233_v44 }
  0x3b   : > { %526 = vst [vmem:[%s711_s25 + $0x178] sm:$0xff] %v462_v47  ;;  %v320_v57 = vmul.f32 %v689_v17, %v234_v45  ;;  %v401_v58 = vadd.f32 %v687_v16, %v315_v50  ;;  %v402_v59 = vadd.f32 %v691_v18, %v316_v51  ;;  %v403_v60 = vadd.f32 %v676_v9, %v317_v52 }
  0x3c   : > { %v404_v61 = vadd.f32 %v680_v11, %v318_v53  ;;  %v463_v1 = vmax.f32 %v399_v54, 0.0  ;;  %v464_v2 = vmax.f32 %v400_v55, 0.0  ;;  %v405_v3 = vadd.f32 %v687_v16, %v319_v56 }
  0x3d   : > { %v406_v4 = vadd.f32 %v691_v18, %v320_v57  ;;  %v465_v12 = vmax.f32 %v401_v58, 0.0  ;;  %v466_v13 = vmax.f32 %v402_v59, 0.0  ;;  %v467_v14 = vmax.f32 %v403_v60, 0.0 }
  0x3e   : > { %v468_v19 = vmax.f32 %v404_v61, 0.0  ;;  %527 = vst [vmem:[%s711_s25 + $0x180] sm:$0xff] %v463_v1  ;;  %528 = vst [vmem:[%s711_s25 + $0x188] sm:$0xff] %v464_v2  ;;  %v469_v22 = vmax.f32 %v405_v3, 0.0  ;;  %v321_v24 = vmul.f32 %v674_v8, %v235_v62  ;;  %v322_v25 = vmul.f32 %v678_v10, %v236_v63 }
  0x3f   : > { %v470_v23 = vmax.f32 %v406_v4, 0.0  ;;  %529 = vst [vmem:[%s711_s25 + $0x190] sm:$0xff] %v465_v12  ;;  %530 = vst [vmem:[%s711_s25 + $0x198] sm:$0xff] %v466_v13  ;;  %v323_v26 = vmul.f32 %v685_v15, %v237_v0  ;;  %v324_v27 = vmul.f32 %v689_v17, %v238_v5  ;;  %v325_v28 = vmul.f32 %v674_v8, %v239_v6 }
  0x40   : > { %531 = vst [vmem:[%s711_s25 + $0x1a0] sm:$0xff] %v467_v14  ;;  %532 = vst [vmem:[%s711_s25 + $0x1a8] sm:$0xff] %v468_v19  ;;  %v326_v29 = vmul.f32 %v678_v10, %v240_v7  ;;  %v407_v30 = vadd.f32 %v676_v9, %v321_v24  ;;  %v408_v31 = vadd.f32 %v680_v11, %v322_v25 }
  0x41   : > { %533 = vst [vmem:[%s711_s25 + $0x1b0] sm:$0xff] %v469_v22  ;;  %534 = vst [vmem:[%s711_s25 + $0x1b8] sm:$0xff] %v470_v23  ;;  %v327_v32 = vmul.f32 %v685_v15, %v241_v20  ;;  %v328_v33 = vmul.f32 %v689_v17, %v242_v21  ;;  %v409_v34 = vadd.f32 %v687_v16, %v323_v26 }
  0x42   : > { %v410_v35 = vadd.f32 %v691_v18, %v324_v27  ;;  %v411_v8 = vadd.f32 %v676_v9, %v325_v28  ;;  %v412_v10 = vadd.f32 %v680_v11, %v326_v29  ;;  %v471_v36 = vmax.f32 %v407_v30, 0.0 }
  0x43   : > { %v472_v37 = vmax.f32 %v408_v31, 0.0  ;;  %v413_v15 = vadd.f32 %v687_v16, %v327_v32  ;;  %v414_v17 = vadd.f32 %v691_v18, %v328_v33  ;;  %v473_v38 = vmax.f32 %v409_v34, 0.0 }
  0x44   : > { %v474_v39 = vmax.f32 %v410_v35, 0.0  ;;  %v475_v40 = vmax.f32 %v411_v8, 0.0  ;;  %v476_v41 = vmax.f32 %v412_v10, 0.0  ;;  %535 = vst [vmem:[%s711_s25 + $0x1c0] sm:$0xff] %v471_v36 }
  0x45   : > { %536 = vst [vmem:[%s711_s25 + $0x1c8] sm:$0xff] %v472_v37  ;;  %v477_v42 = vmax.f32 %v413_v15, 0.0  ;;  %v478_v9 = vmax.f32 %v414_v17, 0.0  ;;  %537 = vst [vmem:[%s711_s25 + $0x1d0] sm:$0xff] %v473_v38 }
  0x46   : > { %538 = vst [vmem:[%s711_s25 + $0x1d8] sm:$0xff] %v474_v39  ;;  %539 = vst [vmem:[%s711_s25 + $0x1e0] sm:$0xff] %v475_v40 }
  0x47   : > { %540 = vst [vmem:[%s711_s25 + $0x1e8] sm:$0xff] %v476_v41  ;;  %541 = vst [vmem:[%s711_s25 + $0x1f0] sm:$0xff] %v477_v42 }
  0x48   : > { %542 = vst [vmem:[%s711_s25 + $0x1f8] sm:$0xff] %v478_v9 }
  0x49 PF: > { %s13_s12 = sadd.s32 1, %s630_s12  }
  0x4a   : > { %p10_p4 = scmp.ge.s32.totalorder %s13_s12, 4  }
  0x4c   :  { %12 = sbr.rel (!%p10_p4) target bundleno = 1 (0x1), region = 62 }

// kernel: generator_forward.16
= control target key start
LH: loop header
LB: loop body
LE: loop exit
PB: predicated region body
PF: predicated region fallthrough
CT: control target
= control target key end

     0   :  { %s589_s12 = smov 0   ;;  %s667_s0 = inlined_call_operand.vmem [shape: bf16[2048,64], index: 0, kind: input, shape index: {}]   ;;  %s668_s1 = inlined_call_operand.vmem [shape: bf16[64,16], index: 1, kind: input, shape index: {}]   ;;  %s669_s2 = inlined_call_operand.vmem [shape: f32[1,16], index: 2, kind: input, shape index: {}]   ;;  %s670_s3 = inlined_call_operand.vmem [shape: f32[2048,16], index: 3, kind: output, shape index: {}]  }
   0x1 LB: > { %s465_s13 = sadd.s32 4294967295, %s567_s12   ;;  %p469_p0 = scmp.ge.s32.totalorder %s567_s12, 1  ;;  %s567_s12 = sphi %s589_s12, %s13_s12  }
   0x2   : > { %p138_p1 = scmp.lt.s32.totalorder %s567_s12, 17 }
   0x4   : > { %p139_p2 = pnand %p469_p0, %p138_p1 }
   0x5   : > { %v549_v0 = vld [vmem:[%s668_s1] sm:$0xff] (!%p139_p2)   ;;  %s470_s16 = sshll.u32 (!%p139_p2), %s465_s13, 4  ;;  %v550_v1 = vld [vmem:[%s668_s1 + $0x8] sm:$0xff] (!%p139_p2)   ;;  %v551_v2 = vld [vmem:[%s668_s1 + $0x10] sm:$0xff] (!%p139_p2)   ;;  %vm270_vm0 = vcmask (!%p139_p2), 523264   ;;  %vm392_vm1 = vcmask (!%p139_p2), 130048  }
   0x6   : > { %142 = sbr.rel (%p139_p2) target bundleno = 248 (0xf8), region = 32  ;;  %p163_p3 = scmp.lt.s32.totalorder (!%p139_p2), %s470_s16, 255  ;;  %509 = vmatprep.subr.bf16.mxu0 (!%p139_p2), %v549_v0  ;;  %533 = vmatprep.subr.bf16.mxu1 (!%p139_p2), %v549_v0  ;;  %v552_v3 = vld [vmem:[%s668_s1 + $0x18] sm:$0xff] (!%p139_p2)   ;;  %v474_v12 = vld [vmem:[%s669_s2] ss:$0 sm:$0xff] (!%p139_p2) }
   0x7   : > { %510 = vmatpush3.bf16.msra.mxu0 (!%p139_p2), %v549_v0  ;;  %537 = vmatpush3.bf16.msra.mxu1 (!%p139_p2), %v549_v0 }
   0x8   : > { %511 = vmatprep.subr.bf16.mxu0 (!%p139_p2), %v550_v1  ;;  %534 = vmatprep.subr.bf16.mxu1 (!%p139_p2), %v550_v1 }
   0xb   : > { %512 = vmatpush3.bf16.msra.mxu0 (!%p139_p2), %v550_v1  ;;  %538 = vmatpush3.bf16.msra.mxu1 (!%p139_p2), %v550_v1 }
   0xc   : > { %513 = vmatprep.subr.bf16.mxu0 (!%p139_p2), %v551_v2  ;;  %535 = vmatprep.subr.bf16.mxu1 (!%p139_p2), %v551_v2 }
   0xd   : > { %s672_s16 = smov (!%p163_p3, %s470_s16), 255 }
   0xe   : > { %s471_s21 = sshll.u32 %s672_s16, 2  ;;  %s473_s27 = sshll.u32 %s672_s16, 3 }
   0xf   : > { %s166_s26 = scalar_lea.vmem %s667_s0, %s471_s21  ;;  %514 = vmatpush3.bf16.msra.mxu0 %v551_v2  ;;  %539 = vmatpush3.bf16.msra.mxu1 %v551_v2  ;;  %s630_s5 = scalar_lea.vmem %s670_s3, %s473_s27 }
  0x10   : > { %v553_v4 = vld [vmem:[%s166_s26] sm:$0xff]   ;;  %515 = vmatprep.subr.bf16.mxu0 %v552_v3  ;;  %536 = vmatprep.subr.bf16.mxu1 %v552_v3  ;;  %v555_v6 = vld [vmem:[%s166_s26 + $0x8] sm:$0xff]   ;;  %v557_v8 = vld [vmem:[%s166_s26 + $0x10] sm:$0xff]  }
  0x11   : > { %v554_v5 = vld [vmem:[%s166_s26 + $0x20] sm:$0xff]   ;;  %517 = vmatprep.mubr.msk.bf16.mxu0 %vm270_vm0, %v553_v4  ;;  %v556_v7 = vld [vmem:[%s166_s26 + $0x28] sm:$0xff]   ;;  %v558_v9 = vld [vmem:[%s166_s26 + $0x30] sm:$0xff]  }
  0x12   : > { %525 = vmatprep.mubr.msk.bf16.mxu1 %vm270_vm0, %v554_v5  ;;  %v559_v10 = vld [vmem:[%s166_s26 + $0x18] sm:$0xff]  }
  0x13   : > { %516 = vmatpush3.bf16.msra.mxu0 %v552_v3  ;;  %540 = vmatpush3.bf16.msra.mxu1 %v552_v3  ;;  %v560_v11 = vld [vmem:[%s166_s26 + $0x38] sm:$0xff]  }
  0x16   : > { %518 = vmatmul.mubr.msk.bf16.vlgmr.msra.gmra.mrb[0].mxu0 %vm270_vm0, %v555_v6  ;;  %526 = vmatmul.mubr.msk.bf16.vlgmr.msra.gmra.mrb[0].mxu1 %vm270_vm0, %v556_v7 }
  0x17   : > { %521 = vmatprep.mubr.msk.bf16.mxu0 %vm270_vm0, %v557_v8  ;;  %529 = vmatprep.mubr.msk.bf16.mxu1 %vm270_vm0, %v558_v9 }
  0x1e   : > { %522 = vmatmul.mubr.msk.bf16.gmra.mrb[4].mxu0 %vm270_vm0, %v559_v10  ;;  %530 = vmatmul.mubr.msk.bf16.gmra.mrb[4].mxu1 %vm270_vm0, %v560_v11 }
  0xe9   : > { %v519_v13 = vpop.f32.mrb[0].mxu0  ;;  %v527_v14 = vpop.f32.mrb[0].mxu1 }
  0xea   : > { %v338_v15 = vadd.f32 %v519_v13, %v474_v12  ;;  %v370_v16 = vadd.f32 %v527_v14, %v474_v12  ;;  %v329_v17 = vpop.f32.mrb[1].mxu0  ;;  %v361_v18 = vpop.f32.mrb[1].mxu1 }
  0xeb   : > { %v330_v19 = vadd.f32 %v474_v12, %v329_v17  ;;  %v362_v20 = vadd.f32 %v474_v12, %v361_v18  ;;  %v520_v21 = vpop.f32.mrb[2].mxu0  ;;  %v528_v22 = vpop.f32.mrb[2].mxu1 }
  0xec   : > { %395 = vst.msk [vmem:[%s630_s5 + $0x10] sm:$0xff] %vm392_vm1, %v338_v15  ;;  %403 = vst.msk [vmem:[%s630_s5 + $0x50] sm:$0xff] %vm392_vm1, %v370_v16  ;;  %v341_v23 = vadd.f32 %v520_v21, %v474_v12  ;;  %v373_v24 = vadd.f32 %v528_v22, %v474_v12  ;;  %v332_v25 = vpop.f32.mrb[3].mxu0  ;;  %v364_v26 = vpop.f32.mrb[3].mxu1 }
  0xed   : > { %393 = vst.msk [vmem:[%s630_s5] sm:$0xff] %vm392_vm1, %v330_v19  ;;  %401 = vst.msk [vmem:[%s630_s5 + $0x40] sm:$0xff] %vm392_vm1, %v362_v20  ;;  %v333_v27 = vadd.f32 %v474_v12, %v332_v25  ;;  %v365_v28 = vadd.f32 %v474_v12, %v364_v26 }
  0xee   : > { %396 = vst.msk [vmem:[%s630_s5 + $0x18] sm:$0xff] %vm392_vm1, %v341_v23  ;;  %404 = vst.msk [vmem:[%s630_s5 + $0x58] sm:$0xff] %vm392_vm1, %v373_v24 }
  0xef   : > { %394 = vst.msk [vmem:[%s630_s5 + $0x8] sm:$0xff] %vm392_vm1, %v333_v27  ;;  %402 = vst.msk [vmem:[%s630_s5 + $0x48] sm:$0xff] %vm392_vm1, %v365_v28 }
  0xf1   : > { %v523_v29 = vpop.f32.mrb[4].mxu0  ;;  %v531_v30 = vpop.f32.mrb[4].mxu1 }
  0xf2   : > { %v354_v31 = vadd.f32 %v523_v29, %v474_v12  ;;  %v386_v32 = vadd.f32 %v531_v30, %v474_v12  ;;  %v345_v33 = vpop.f32.mrb[5].mxu0  ;;  %v377_v34 = vpop.f32.mrb[5].mxu1 }
  0xf3   : > { %v346_v35 = vadd.f32 %v474_v12, %v345_v33  ;;  %v378_v36 = vadd.f32 %v474_v12, %v377_v34  ;;  %v524_v37 = vpop.f32.mrb[6].mxu0  ;;  %v532_v38 = vpop.f32.mrb[6].mxu1 }
  0xf4   : > { %399 = vst.msk [vmem:[%s630_s5 + $0x30] sm:$0xff] %vm392_vm1, %v354_v31  ;;  %407 = vst.msk [vmem:[%s630_s5 + $0x70] sm:$0xff] %vm392_vm1, %v386_v32  ;;  %v357_v39 = vadd.f32 %v524_v37, %v474_v12  ;;  %v389_v40 = vadd.f32 %v532_v38, %v474_v12  ;;  %v348_v41 = vpop.f32.mrb[7].mxu0  ;;  %v380_v42 = vpop.f32.mrb[7].mxu1 }
  0xf5   : > { %397 = vst.msk [vmem:[%s630_s5 + $0x20] sm:$0xff] %vm392_vm1, %v346_v35  ;;  %405 = vst.msk [vmem:[%s630_s5 + $0x60] sm:$0xff] %vm392_vm1, %v378_v36  ;;  %v349_v43 = vadd.f32 %v474_v12, %v348_v41  ;;  %v381_v44 = vadd.f32 %v474_v12, %v380_v42 }
  0xf6   : > { %400 = vst.msk [vmem:[%s630_s5 + $0x38] sm:$0xff] %vm392_vm1, %v357_v39  ;;  %408 = vst.msk [vmem:[%s630_s5 + $0x78] sm:$0xff] %vm392_vm1, %v389_v40 }
  0xf7   : > { %398 = vst.msk [vmem:[%s630_s5 + $0x28] sm:$0xff] %vm392_vm1, %v349_v43  ;;  %406 = vst.msk [vmem:[%s630_s5 + $0x68] sm:$0xff] %vm392_vm1, %v381_v44 }
  0xf8 PF: > { %s13_s12 = sadd.s32 1, %s567_s12  }
  0xf9   : > { %p10_p4 = scmp.ge.s32.totalorder %s13_s12, 18  }
  0xfb   :  { %12 = sbr.rel (!%p10_p4) target bundleno = 1 (0x1), region = 62 }

// kernel: generator_forward.17
= control target key start
LH: loop header
LB: loop body
LE: loop exit
PB: predicated region body
PF: predicated region fallthrough
CT: control target
= control target key end

     0   :  { %v24_v0 = vlaneseq  ;;  %s228_s1 = inlined_call_operand.vmem [shape: f32[1,256], index: 1, kind: input, shape index: {}]   ;;  %s229_s2 = inlined_call_operand.vmem [shape: f32[1,256], index: 2, kind: input, shape index: {}]   ;;  %s230_s0 = inlined_call_operand.vmem [shape: f32[32,256], index: 0, kind: input, shape index: {}]   ;;  %s231_s3 = inlined_call_operand.vmem [shape: f32[32,256], index: 3, kind: output, shape index: {}]  }
   0x1   :  { %v22_v2 = vld [vmem:[%s228_s1] sm:$0x3]  ;;  %v15_v6 = vld [vmem:[%s230_s0 + $0x8] sm:$0xff]  ;;  %v16_v8 = vld [vmem:[%s230_s0 + $0x10] sm:$0xff] }
   0x2   :  { %v25_v1 = vshrl.u32 %v24_v0, 7  ;;  %v42_v3 = vld [vmem:[%s229_s2] sm:$0x3]  ;;  %v17_v9 = vld [vmem:[%s230_s0 + $0x18] sm:$0xff]  ;;  %v19_v15 = vld [vmem:[%s230_s0 + $0x28] sm:$0xff] }
   0x3   :  { %v14_v4 = vld [vmem:[%s230_s0] sm:$0xff]  ;;  %v20_v16 = vld [vmem:[%s230_s0 + $0x30] sm:$0xff]  ;;  %v21_v17 = vld [vmem:[%s230_s0 + $0x38] sm:$0xff] }
   0x4   :  { %v26_v5 = vsub.s32 0, %v25_v1  ;;  %v30_v7 = vsub.s32 1, %v25_v1  ;;  %v18_v10 = vld [vmem:[%s230_s0 + $0x20] sm:$0xff] }
   0x6   :  { %v27_v11 = vrot.slane %v22_v2, %v26_v5  ;;  %v47_v12 = vrot.slane %v42_v3, %v26_v5  ;;  %v31_v13 = vrot.slane %v22_v2, %v30_v7  ;;  %v51_v14 = vrot.slane %v42_v3, %v30_v7 }
   0x8   :  { %v34_v18 = vmul.f32 %v27_v11, %v14_v4  ;;  %v35_v19 = vmul.f32 %v31_v13, %v15_v6  ;;  %v36_v20 = vmul.f32 %v27_v11, %v16_v8  ;;  %v37_v21 = vmul.f32 %v31_v13, %v17_v9 }
   0x9   :  { %v38_v22 = vmul.f32 %v27_v11, %v18_v10  ;;  %v39_v23 = vmul.f32 %v31_v13, %v19_v15  ;;  %v40_v24 = vmul.f32 %v27_v11, %v20_v16  ;;  %v41_v25 = vmul.f32 %v31_v13, %v21_v17 }
   0xa   :  { %v54_v26 = vadd.f32 %v47_v12, %v34_v18  ;;  %v55_v27 = vadd.f32 %v51_v14, %v35_v19  ;;  %v56_v28 = vadd.f32 %v47_v12, %v36_v20  ;;  %v57_v29 = vadd.f32 %v51_v14, %v37_v21 }
   0xb   :  { %v58_v30 = vadd.f32 %v47_v12, %v38_v22  ;;  %v59_v31 = vadd.f32 %v51_v14, %v39_v23  ;;  %v60_v32 = vadd.f32 %v47_v12, %v40_v24  ;;  %v61_v33 = vadd.f32 %v51_v14, %v41_v25 }
   0xc   :  { %v62_v34 = vsub.f32 0.0, %v54_v26  ;;  %v63_v35 = vsub.f32 0.0, %v55_v27  ;;  %v64_v36 = vsub.f32 0.0, %v56_v28  ;;  %v65_v37 = vsub.f32 0.0, %v57_v29 }
   0xd   :  { %v66_v38 = vsub.f32 0.0, %v58_v30  ;;  %v67_v39 = vsub.f32 0.0, %v59_v31  ;;  %v68_v40 = vsub.f32 0.0, %v60_v32  ;;  %v69_v45 = vsub.f32 0.0, %v61_v33 }
   0xe   :  { %v70_v41 = vmul.f32 1.442695, %v62_v34  ;;  %v72_v42 = vmul.f32 1.442695, %v63_v35  ;;  %v74_v43 = vmul.f32 1.442695, %v64_v36 }
   0xf   :  { %v76_v44 = vmul.f32 1.442695, %v65_v37  ;;  %v78_v46 = vmul.f32 1.442695, %v66_v38  ;;  %v80_v47 = vmul.f32 1.442695, %v67_v39 }
  0x10   :  { %122 = vpow2.f32 %v70_v41  ;;  %v82_v48 = vmul.f32 1.442695, %v68_v40  ;;  %v84_v49 = vmul.f32 1.442695, %v69_v45 }
  0x11   :  { %124 = vpow2.f32 %v72_v42 }
  0x12   :  { %126 = vpow2.f32 %v74_v43 }
  0x13   :  { %128 = vpow2.f32 %v76_v44 }
  0x14   :  { %130 = vpow2.f32 %v78_v46 }
  0x15   :  { %132 = vpow2.f32 %v80_v47 }
  0x16   :  { %134 = vpow2.f32 %v82_v48 }
  0x17   :  { %136 = vpow2.f32 %v84_v49 }
  0x1a   :  { %v123_v50 = vpop.eup %122 }
  0x1b   :  { %v125_v51 = vpop.eup %124  ;;  %v86_v52 = vadd.f32 1.0, %v123_v50 }
  0x1c   :  { %v127_v53 = vpop.eup %126  ;;  %v87_v54 = vadd.f32 1.0, %v125_v51 }
  0x1d   :  { %v129_v55 = vpop.eup %128  ;;  %138 = vrcp.f32 %v86_v52  ;;  %v88_v56 = vadd.f32 1.0, %v127_v53 }
  0x1e   :  { %v131_v57 = vpop.eup %130  ;;  %140 = vrcp.f32 %v87_v54  ;;  %v89_v58 = vadd.f32 1.0, %v129_v55 }
  0x1f   :  { %v133_v59 = vpop.eup %132  ;;  %142 = vrcp.f32 %v88_v56  ;;  %v90_v60 = vadd.f32 1.0, %v131_v57 }
  0x20   :  { %v135_v61 = vpop.eup %134  ;;  %144 = vrcp.f32 %v89_v58  ;;  %v91_v62 = vadd.f32 1.0, %v133_v59 }
  0x21   :  { %v137_v63 = vpop.eup %136  ;;  %146 = vrcp.f32 %v90_v60  ;;  %v92_v0 = vadd.f32 1.0, %v135_v61 }
  0x22   :  { %148 = vrcp.f32 %v91_v62  ;;  %v93_v1 = vadd.f32 1.0, %v137_v63 }
  0x23   :  { %150 = vrcp.f32 %v92_v0 }
  0x24   :  { %152 = vrcp.f32 %v93_v1 }
  0x27   :  { %v139_v2 = vpop.eup %138 }
  0x28   :  { %v141_v3 = vpop.eup %140  ;;  %110 = vst [vmem:[%s231_s3] sm:$0xff] %v139_v2 }
  0x29   :  { %v143_v4 = vpop.eup %142  ;;  %111 = vst [vmem:[%s231_s3 + $0x8] sm:$0xff] %v141_v3 }
  0x2a   :  { %v145_v5 = vpop.eup %144  ;;  %112 = vst [vmem:[%s231_s3 + $0x10] sm:$0xff] %v143_v4 }
  0x2b   :  { %v147_v6 = vpop.eup %146  ;;  %113 = vst [vmem:[%s231_s3 + $0x18] sm:$0xff] %v145_v5 }
  0x2c   :  { %v149_v7 = vpop.eup %148  ;;  %114 = vst [vmem:[%s231_s3 + $0x20] sm:$0xff] %v147_v6 }
  0x2d   :  { %v151_v8 = vpop.eup %150  ;;  %115 = vst [vmem:[%s231_s3 + $0x28] sm:$0xff] %v149_v7 }
  0x2e   :  { %v153_v9 = vpop.eup %152  ;;  %116 = vst [vmem:[%s231_s3 + $0x30] sm:$0xff] %v151_v8 }
  0x2f   :  { %117 = vst [vmem:[%s231_s3 + $0x38] sm:$0xff] %v153_v9 }

</bundles_post_ra>
